<compile_context>
chip_gen: v5e
topology: v5e:2x2
jax: 0.10.0
libtpu: 0.0.40
codegen_flags: <defaults>
</compile_context>

<pallas_src>
import jax
import jax.numpy as jnp
from jax import lax
from jax.experimental import pallas as pl
from jax.experimental.pallas import tpu as pltpu

INPUT = 512
HIDDEN = 64
FC1 = 32
NUM_CLASSES = 14
NUM_LAYERS = 2
BN_EPS = 1e-5

H = HIDDEN
H2, H4, H6, H8 = 2 * H, 4 * H, 6 * H, 8 * H


# --------------------------------------------------------------------------
# In-kernel helpers (run inside the single fused kernel, fully unrolled)
# --------------------------------------------------------------------------
def _merge_directions(gx, fwd_mask, gx_ref, T):
    """Hoist the fwd/bwd gate merge out of the recurrence.

    gx is the raw time-major hoisted projection (T, B, 8H).  gx_ref[s] gets
    [fwd gate cols of time s | bwd gate cols of time T-1-s], so the serial
    loop below reads one contiguous (B, 8H) slab per step with no select and
    no strided gather on its critical path.
    """
    for s in range(T):
        gx_ref[s] = jnp.where(fwd_mask, gx[s], gx[T - 1 - s])


def _bilstm_layer(gx_ref, whh, T, B, seq_ref=None):
    """One bidirectional LSTM layer with both directions fused.

    gx_ref: (T, B, 8H) merged gate projections in VMEM scratch.
    whh:    (2H, 8H) block recurrent weights (bf16); rows = [h_fwd | h_bwd].
    seq_ref: optional (T, B, 2H) scratch collecting the output sequence
             (fwd half at [s, :, :H], bwd half at [T-1-s, :, H:]).
    Returns final hc = [h_fwd | h_bwd]  (B, 2H) f32.
    """
    hc = jnp.zeros((B, H2), jnp.float32)          # [h_fwd | h_bwd]
    cc = jnp.zeros((B, H2), jnp.float32)          # [c_fwd | c_bwd]
    for s in range(T):                            # static unroll (T small)
        gates = gx_ref[s] + jnp.dot(hc.astype(whh.dtype), whh,
                                    preferred_element_type=jnp.float32)
        sig = jax.nn.sigmoid(gates[:, :H6])       # [i | f | o], both dirs
        g = jnp.tanh(gates[:, H6:])               # [g], both dirs
        cc = sig[:, H2:H4] * cc + sig[:, :H2] * g
        hc = sig[:, H4:H6] * jnp.tanh(cc)
        if seq_ref is not None:
            seq_ref[s, :, :H] = hc[:, :H]         # fwd output at time s
            seq_ref[T - 1 - s, :, H:] = hc[:, H:] # bwd output at time T-1-s
    return hc


# --------------------------------------------------------------------------
# The single fused kernel: 2-layer bi-LSTM + folded (BN,fc1,fc2) head
# --------------------------------------------------------------------------
def _clip_lstm_kernel(feat_ref, wih0_ref, whh0_ref, b0_ref, b1_ref,
                      hw_ref, hb_ref,
                      wih1_hbm, whh1_hbm,
                      out_ref,
                      gx_ref, seq1_ref, wih1_v, whh1_v, dma_sems):
    T, B, D = feat_ref.shape

    # Kick off the layer-1 weight DMA now; it is hidden behind all of layer 0.
    cp_wih1 = pltpu.make_async_copy(wih1_hbm, wih1_v, dma_sems.at[0])
    cp_whh1 = pltpu.make_async_copy(whh1_hbm, whh1_v, dma_sems.at[1])
    cp_wih1.start()
    cp_whh1.start()

    # Mask selecting fwd-direction gate columns (H=64 => bit 6 of lane index).
    col = lax.broadcasted_iota(jnp.int32, (B, H8), 1)
    fwd_mask = (col & H) == 0

    # ---- Layer 0: hoisted input projection (bf16 MXU, f32 accumulate,
    #      bias folded in), then the unrolled fused recurrence.
    x0 = feat_ref[...].reshape(T * B, D).astype(jnp.bfloat16)
    gx0 = (jnp.dot(x0, wih0_ref[...], preferred_element_type=jnp.float32)
           + b0_ref[...]).reshape(T, B, H8)
    _merge_directions(gx0, fwd_mask, gx_ref, T)
    hc0 = _bilstm_layer(gx_ref, whh0_ref[...], T, B, seq_ref=seq1_ref)
    # TODO(synk): nn.LSTM inter-layer dropout (p=0.3) is identity (eval mode).

    # ---- Layer 1: single K=2H hoisted projection of the layer-0 sequence
    #      (built in VMEM scratch during the layer-0 loop).
    cp_wih1.wait()
    x1 = seq1_ref[...].reshape(T * B, H2).astype(jnp.bfloat16)
    gx1 = (jnp.dot(x1, wih1_v[...], preferred_element_type=jnp.float32)
           + b1_ref[...]).reshape(T, B, H8)
    _merge_directions(gx1, fwd_mask, gx_ref, T)
    cp_whh1.wait()
    hc1 = _bilstm_layer(gx_ref, whh1_v[...], T, B, seq_ref=None)

    # ---- Head: BN(eval) + fc1 + fc2 folded into one (2H, C) affine map;
    #      0.25 mean over h_n = [l0_f, l0_b, l1_f, l1_b] folded into hw.
    # TODO(synk): F.dropout(p=0.3) after fc1 is identity (eval mode).
    z = jnp.dot(hc0 + hc1, hw_ref[...],
                preferred_element_type=jnp.float32) + hb_ref[...]
    z = z - jnp.max(z, axis=1, keepdims=True)
    e = jnp.exp(z)
    out_ref[...] = e / jnp.sum(e, axis=1, keepdims=True)   # exact softmax


def clip_lstm_forward(feat, kp):
    """feat: (B, T, 512) batch-first, like the PyTorch module."""
    B, T, D = feat.shape
    # Fill f32 sublanes / MXU rows: pad the batch up to a multiple of 8.
    B_pad = ((B + 7) // 8) * 8
    feat_tm = jnp.transpose(feat.astype(jnp.float32), (1, 0, 2))   # (T, B, D)
    if B_pad != B:
        feat_tm = jnp.pad(feat_tm, ((0, 0), (0, B_pad - B), (0, 0)))

    vmem = pltpu.MemorySpace.VMEM
    out = pl.pallas_call(
        _clip_lstm_kernel,
        out_shape=jax.ShapeDtypeStruct((B_pad, NUM_CLASSES), jnp.float32),
        in_specs=[pl.BlockSpec(memory_space=vmem)] * 7
                 + [pl.BlockSpec(memory_space=pl.ANY)] * 2,
        out_specs=pl.BlockSpec(memory_space=vmem),
        scratch_shapes=[
            pltpu.VMEM((T, B_pad, H8), jnp.float32),   # merged gate slabs
            pltpu.VMEM((T, B_pad, H2), jnp.float32),   # layer-0 output seq
            pltpu.VMEM((H2, H8), jnp.bfloat16),        # wih1 landing buffer
            pltpu.VMEM((H2, H8), jnp.bfloat16),        # whh1 landing buffer
            pltpu.SemaphoreType.DMA((2,)),
        ],
    )(feat_tm,
      kp["wih0"], kp["whh0"], kp["b0"], kp["b1"],
      kp["head_w"], kp["head_b"],
      kp["wih1"], kp["whh1"])
    return out[:B]


# --------------------------------------------------------------------------
# Synthetic parameters in PyTorch layout + packing into the kernel layout
# --------------------------------------------------------------------------
def init_torch_params(key):
    """Parameters with nn.LSTM / nn.Linear shapes & gate order (i,f,g,o)."""
    k = 1.0 / jnp.sqrt(jnp.float32(HIDDEN))
    keys = iter(jax.random.split(key, 64))
    p = {"lstm": []}
    for layer in range(NUM_LAYERS):
        d_in = INPUT if layer == 0 else 2 * HIDDEN
        dirs = []
        for _ in range(2):                       # 0 = fwd, 1 = bwd
            dirs.append(dict(
                w_ih=jax.random.uniform(next(keys), (4 * H, d_in),
                                        jnp.float32, -k, k),
                w_hh=jax.random.uniform(next(keys), (4 * H, H),
                                        jnp.float32, -k, k),
                b_ih=jax.random.uniform(next(keys), (4 * H,),
                                        jnp.float32, -k, k),
                b_hh=jax.random.uniform(next(keys), (4 * H,),
                                        jnp.float32, -k, k)))
        p["lstm"].append(dirs)
    p["bn_gamma"] = jnp.ones((H,), jnp.float32)
    p["bn_beta"] = jnp.zeros((H,), jnp.float32)
    p["bn_rmean"] = jnp.zeros((H,), jnp.float32)
    p["bn_rvar"] = jnp.ones((H,), jnp.float32)
    k1 = 1.0 / jnp.sqrt(jnp.float32(HIDDEN))
    p["fc1_w"] = jax.random.uniform(next(keys), (FC1, HIDDEN),
                                    jnp.float32, -k1, k1)
    p["fc1_b"] = jax.random.uniform(next(keys), (FC1,), jnp.float32, -k1, k1)
    k2 = 1.0 / jnp.sqrt(jnp.float32(FC1))
    p["fc2_w"] = jax.random.uniform(next(keys), (NUM_CLASSES, FC1),
                                    jnp.float32, -k2, k2)
    p["fc2_b"] = jax.random.uniform(next(keys), (NUM_CLASSES,),
                                    jnp.float32, -k2, k2)
    return p


def _reorder_ifog(w_t):
    """(rows, 4H) PyTorch gate-column order [i,f,g,o] -> [i,f,o,g]."""
    return jnp.concatenate(
        [w_t[:, :H], w_t[:, H:2 * H], w_t[:, 3 * H:], w_t[:, 2 * H:3 * H]],
        axis=1)


def _interleave_dirs(a_f, a_b):
    """(R,4H) fwd + (R,4H) bwd -> (R,8H) cols [i_f,i_b,f_f,f_b,o_f,o_b,g_f,g_b]."""
    r = a_f.shape[0]
    return jnp.stack([a_f.reshape(r, 4, H), a_b.reshape(r, 4, H)],
                     axis=2).reshape(r, 8 * H)


def pack_params(p):
    """Pack PyTorch-layout params into the kernel's fused/interleaved layout."""
    hi = lax.Precision.HIGHEST
    kp = {}
    zeros_h = jnp.zeros((H, 4 * H), jnp.float32)
    for layer in range(NUM_LAYERS):
        pf, pb = p["lstm"][layer]
        wih_f = _reorder_ifog(pf["w_ih"].T)                      # (d_in, 4H)
        wih_b = _reorder_ifog(pb["w_ih"].T)
        whh_f = _reorder_ifog(pf["w_hh"].T)                      # (H, 4H)
        whh_b = _reorder_ifog(pb["w_hh"].T)
        bias_f = _reorder_ifog((pf["b_ih"] + pf["b_hh"])[None, :])
        bias_b = _reorder_ifog((pb["b_ih"] + pb["b_hh"])[None, :])
        # bf16 matmul weights (f32 accumulation inside the kernel).
        kp[f"wih{layer}"] = _interleave_dirs(wih_f, wih_b).astype(jnp.bfloat16)
        kp[f"whh{layer}"] = jnp.concatenate(                     # (2H, 8H)
            [_interleave_dirs(whh_f, zeros_h),
             _interleave_dirs(zeros_h, whh_b)], axis=0).astype(jnp.bfloat16)
        kp[f"b{layer}"] = _interleave_dirs(bias_f, bias_b)       # (1, 8H) f32
    # Fold eval-mode BN (affine) + fc1 + fc2 (no nonlinearity between them)
    # into one affine map on h_mean; also fold the 0.25 mean and the
    # [h_fwd | h_bwd] sum structure into a (2H, C) weight.
    bn_s = p["bn_gamma"] / jnp.sqrt(p["bn_rvar"] + BN_EPS)           # (H,)
    bn_t = p["bn_beta"] - p["bn_rmean"] * bn_s                       # (H,)
    w_fold = jnp.dot(bn_s[:, None] * p["fc1_w"].T, p["fc2_w"].T,
                     precision=hi)                                   # (H, C)
    b_fold = (jnp.dot(bn_t @ p["fc1_w"].T + p["fc1_b"], p["fc2_w"].T,
                      precision=hi) + p["fc2_b"])                    # (C,)
    kp["head_w"] = 0.25 * jnp.concatenate([w_fold, w_fold], axis=0)  # (2H, C)
    kp["head_b"] = b_fold[None, :]                                   # (1, C)
    return kp


# --------------------------------------------------------------------------
# Pure-JAX reference (PyTorch semantics, eval mode) for correctness checking
# --------------------------------------------------------------------------
def reference_forward(feat, p):
    hi = lax.Precision.HIGHEST

    def dir_pass(x_tm, d):
        t_len, b_sz, _ = x_tm.shape
        h = jnp.zeros((b_sz, H), jnp.float32)
        c = jnp.zeros((b_sz, H), jnp.float32)
        outs = []
        for t in range(t_len):
            g = (jnp.dot(x_tm[t], d["w_ih"].T, precision=hi)
                 + jnp.dot(h, d["w_hh"].T, precision=hi)
                 + d["b_ih"] + d["b_hh"])
            i = jax.nn.sigmoid(g[:, :H])
            f = jax.nn.sigmoid(g[:, H:2 * H])
            gg = jnp.tanh(g[:, 2 * H:3 * H])
            o = jax.nn.sigmoid(g[:, 3 * H:])
            c = f * c + i * gg
            h = o * jnp.tanh(c)
            outs.append(h)
        return jnp.stack(outs, 0), h

    x_tm = jnp.transpose(feat.astype(jnp.float32), (1, 0, 2))
    h_finals = []
    layer_in = x_tm
    for layer in range(NUM_LAYERS):
        pf, pb = p["lstm"][layer]
        seq_f, h_f = dir_pass(layer_in, pf)
        seq_b_rev, h_b = dir_pass(layer_in[::-1], pb)
        h_finals += [h_f, h_b]
        layer_in = jnp.concatenate([seq_f, seq_b_rev[::-1]], axis=-1)
    h_mean = jnp.mean(jnp.stack(h_finals, 0), axis=0)
    xb = (h_mean - p["bn_rmean"]) / jnp.sqrt(p["bn_rvar"] + BN_EPS)
    xb = xb * p["bn_gamma"] + p["bn_beta"]
    z1 = jnp.dot(xb, p["fc1_w"].T, precision=hi) + p["fc1_b"]
    z2 = jnp.dot(z1, p["fc2_w"].T, precision=hi) + p["fc2_b"]
    return jax.nn.softmax(z2, axis=1)


if __name__ == "__main__":
    B, T = 2, 8
    key = jax.random.PRNGKey(0)
    k_feat, k_par = jax.random.split(key)

    feat = jax.random.normal(k_feat, (B, T, INPUT), jnp.float32)
    tparams = init_torch_params(k_par)
    kparams = pack_params(tparams)

    fwd = jax.jit(clip_lstm_forward)
    out = fwd(feat, kparams)
    jax.block_until_ready(out)

    assert out.shape == (B, NUM_CLASSES)
    assert bool(jnp.all(jnp.isfinite(out)))
    assert bool(jnp.allclose(jnp.sum(out, axis=1), 1.0, atol=1e-5))

    ref = jax.jit(reference_forward)(feat, tparams)
    assert bool(jnp.allclose(out, ref, atol=1e-2))

    print("KERNEL_OK")
</pallas_src>

<mosaic_0001>
module attributes {stable_mosaic.version = 11 : i64} {
  func.func @_clip_lstm_kernel(%arg0: memref<8x8x512xf32, #tpu.memory_space<vmem>>, %arg1: memref<512x512xbf16, #tpu.memory_space<vmem>>, %arg2: memref<128x512xbf16, #tpu.memory_space<vmem>>, %arg3: memref<1x512xf32, #tpu.memory_space<vmem>>, %arg4: memref<1x512xf32, #tpu.memory_space<vmem>>, %arg5: memref<128x14xf32, #tpu.memory_space<vmem>>, %arg6: memref<1x14xf32, #tpu.memory_space<vmem>>, %arg7: memref<128x512xbf16, #tpu.memory_space<any>>, %arg8: memref<128x512xbf16, #tpu.memory_space<any>>, %arg9: memref<8x14xf32, #tpu.memory_space<vmem>>, %arg10: memref<8x8x512xf32, #tpu.memory_space<vmem>>, %arg11: memref<8x8x128xf32, #tpu.memory_space<vmem>>, %arg12: memref<128x512xbf16, #tpu.memory_space<vmem>>, %arg13: memref<128x512xbf16, #tpu.memory_space<vmem>>, %arg14: memref<2x!tpu.dma_semaphore, #tpu.memory_space<semaphore_mem>>) attributes {dimension_semantics = [], scalar_prefetch = 0 : i64, scratch_operands = 5 : i64, tpu.core_type = #tpu.core_type<tc>} {
    %c0_i32 = arith.constant 0 : i32
    %0 = tpu.memref_slice %arg14[%c0_i32] : memref<2x!tpu.dma_semaphore, #tpu.memory_space<semaphore_mem>> -> memref<1x!tpu.dma_semaphore, #tpu.memory_space<semaphore_mem>>
    %1 = tpu.memref_squeeze %0 : memref<1x!tpu.dma_semaphore, #tpu.memory_space<semaphore_mem>> -> memref<!tpu.dma_semaphore, #tpu.memory_space<semaphore_mem>>
    tpu.enqueue_dma source(%arg7 : memref<128x512xbf16, #tpu.memory_space<any>>) target(%arg12 : memref<128x512xbf16, #tpu.memory_space<vmem>>) target_semaphore(%1 : memref<!tpu.dma_semaphore, #tpu.memory_space<semaphore_mem>>)
    %c1_i32 = arith.constant 1 : i32
    %2 = tpu.memref_slice %arg14[%c1_i32] : memref<2x!tpu.dma_semaphore, #tpu.memory_space<semaphore_mem>> -> memref<1x!tpu.dma_semaphore, #tpu.memory_space<semaphore_mem>>
    %3 = tpu.memref_squeeze %2 : memref<1x!tpu.dma_semaphore, #tpu.memory_space<semaphore_mem>> -> memref<!tpu.dma_semaphore, #tpu.memory_space<semaphore_mem>>
    tpu.enqueue_dma source(%arg8 : memref<128x512xbf16, #tpu.memory_space<any>>) target(%arg13 : memref<128x512xbf16, #tpu.memory_space<vmem>>) target_semaphore(%3 : memref<!tpu.dma_semaphore, #tpu.memory_space<semaphore_mem>>)
    %4 = tpu.iota {dimensions = array<i32: 1>} : vector<8x512xi32>
    %c64_i32 = arith.constant 64 : i32
    %5 = vector.broadcast %c64_i32 : i32 to vector<8x512xi32>
    %6 = arith.andi %4, %5 : vector<8x512xi32>
    %c0_i32_0 = arith.constant 0 : i32
    %7 = vector.broadcast %c0_i32_0 : i32 to vector<8x512xi32>
    %8 = arith.cmpi eq, %6, %7 : vector<8x512xi32>
    %c0 = arith.constant 0 : index
    %c0_1 = arith.constant 0 : index
    %c0_2 = arith.constant 0 : index
    %9 = vector.load %arg0[%c0, %c0_1, %c0_2] : memref<8x8x512xf32, #tpu.memory_space<vmem>>, vector<8x8x512xf32>
    %10 = vector.shape_cast %9 : vector<8x8x512xf32> to vector<64x512xf32>
    %11 = arith.truncf %10 : vector<64x512xf32> to vector<64x512xbf16>
    %c0_3 = arith.constant 0 : index
    %c0_4 = arith.constant 0 : index
    %12 = vector.load %arg1[%c0_3, %c0_4] : memref<512x512xbf16, #tpu.memory_space<vmem>>, vector<512x512xbf16>
    %cst = arith.constant dense<0.000000e+00> : vector<64x512xf32>
    %13 = tpu.matmul %11, %12, %cst {dimension_numbers = #tpu.dot_dimension_numbers<[1], [0], [0], [1], [0, 0, 1, 1], [], []>} : vector<64x512xbf16>, vector<512x512xbf16>, vector<64x512xf32> -> vector<64x512xf32>
    %c0_5 = arith.constant 0 : index
    %c0_6 = arith.constant 0 : index
    %14 = vector.load %arg3[%c0_5, %c0_6] : memref<1x512xf32, #tpu.memory_space<vmem>>, vector<1x512xf32>
    %15 = vector.broadcast %14 : vector<1x512xf32> to vector<64x512xf32>
    %16 = arith.addf %13, %15 : vector<64x512xf32>
    %17 = vector.shape_cast %16 : vector<64x512xf32> to vector<8x8x512xf32>
    %18 = vector.extract_strided_slice %17 {offsets = [0, 0, 0], sizes = [1, 8, 512], strides = [1, 1, 1]} : vector<8x8x512xf32> to vector<1x8x512xf32>
    %19 = vector.shape_cast %18 : vector<1x8x512xf32> to vector<8x512xf32>
    %20 = vector.extract_strided_slice %17 {offsets = [7, 0, 0], sizes = [1, 8, 512], strides = [1, 1, 1]} : vector<8x8x512xf32> to vector<1x8x512xf32>
    %21 = vector.shape_cast %20 : vector<1x8x512xf32> to vector<8x512xf32>
    %22 = arith.select %8, %19, %21 : vector<8x512xi1>, vector<8x512xf32>
    %c0_7 = arith.constant 0 : index
    %c0_8 = arith.constant 0 : index
    %c0_9 = arith.constant 0 : index
    %23 = vector.load %arg10[%c0_7, %c0_8, %c0_9] : memref<8x8x512xf32, #tpu.memory_space<vmem>>, vector<1x8x512xf32>
    %24 = vector.shape_cast %23 : vector<1x8x512xf32> to vector<8x512xf32>
    %25 = vector.shape_cast %22 : vector<8x512xf32> to vector<1x8x512xf32>
    tpu.vector_store %arg10[%c0_7, %c0_8, %c0_9], %25 {strides = array<i32>} : memref<8x8x512xf32, #tpu.memory_space<vmem>>, vector<1x8x512xf32>,
    %26 = vector.extract_strided_slice %17 {offsets = [1, 0, 0], sizes = [1, 8, 512], strides = [1, 1, 1]} : vector<8x8x512xf32> to vector<1x8x512xf32>
    %27 = vector.shape_cast %26 : vector<1x8x512xf32> to vector<8x512xf32>
    %28 = vector.extract_strided_slice %17 {offsets = [6, 0, 0], sizes = [1, 8, 512], strides = [1, 1, 1]} : vector<8x8x512xf32> to vector<1x8x512xf32>
    %29 = vector.shape_cast %28 : vector<1x8x512xf32> to vector<8x512xf32>
    %30 = arith.select %8, %27, %29 : vector<8x512xi1>, vector<8x512xf32>
    %c1 = arith.constant 1 : index
    %c0_10 = arith.constant 0 : index
    %c0_11 = arith.constant 0 : index
    %31 = vector.load %arg10[%c1, %c0_10, %c0_11] : memref<8x8x512xf32, #tpu.memory_space<vmem>>, vector<1x8x512xf32>
    %32 = vector.shape_cast %31 : vector<1x8x512xf32> to vector<8x512xf32>
    %33 = vector.shape_cast %30 : vector<8x512xf32> to vector<1x8x512xf32>
    tpu.vector_store %arg10[%c1, %c0_10, %c0_11], %33 {strides = array<i32>} : memref<8x8x512xf32, #tpu.memory_space<vmem>>, vector<1x8x512xf32>,
    %34 = vector.extract_strided_slice %17 {offsets = [2, 0, 0], sizes = [1, 8, 512], strides = [1, 1, 1]} : vector<8x8x512xf32> to vector<1x8x512xf32>
    %35 = vector.shape_cast %34 : vector<1x8x512xf32> to vector<8x512xf32>
    %36 = vector.extract_strided_slice %17 {offsets = [5, 0, 0], sizes = [1, 8, 512], strides = [1, 1, 1]} : vector<8x8x512xf32> to vector<1x8x512xf32>
    %37 = vector.shape_cast %36 : vector<1x8x512xf32> to vector<8x512xf32>
    %38 = arith.select %8, %35, %37 : vector<8x512xi1>, vector<8x512xf32>
    %c2 = arith.constant 2 : index
    %c0_12 = arith.constant 0 : index
    %c0_13 = arith.constant 0 : index
    %39 = vector.load %arg10[%c2, %c0_12, %c0_13] : memref<8x8x512xf32, #tpu.memory_space<vmem>>, vector<1x8x512xf32>
    %40 = vector.shape_cast %39 : vector<1x8x512xf32> to vector<8x512xf32>
    %41 = vector.shape_cast %38 : vector<8x512xf32> to vector<1x8x512xf32>
    tpu.vector_store %arg10[%c2, %c0_12, %c0_13], %41 {strides = array<i32>} : memref<8x8x512xf32, #tpu.memory_space<vmem>>, vector<1x8x512xf32>,
    %42 = vector.extract_strided_slice %17 {offsets = [3, 0, 0], sizes = [1, 8, 512], strides = [1, 1, 1]} : vector<8x8x512xf32> to vector<1x8x512xf32>
    %43 = vector.shape_cast %42 : vector<1x8x512xf32> to vector<8x512xf32>
    %44 = vector.extract_strided_slice %17 {offsets = [4, 0, 0], sizes = [1, 8, 512], strides = [1, 1, 1]} : vector<8x8x512xf32> to vector<1x8x512xf32>
    %45 = vector.shape_cast %44 : vector<1x8x512xf32> to vector<8x512xf32>
    %46 = arith.select %8, %43, %45 : vector<8x512xi1>, vector<8x512xf32>
    %c3 = arith.constant 3 : index
    %c0_14 = arith.constant 0 : index
    %c0_15 = arith.constant 0 : index
    %47 = vector.load %arg10[%c3, %c0_14, %c0_15] : memref<8x8x512xf32, #tpu.memory_space<vmem>>, vector<1x8x512xf32>
    %48 = vector.shape_cast %47 : vector<1x8x512xf32> to vector<8x512xf32>
    %49 = vector.shape_cast %46 : vector<8x512xf32> to vector<1x8x512xf32>
    tpu.vector_store %arg10[%c3, %c0_14, %c0_15], %49 {strides = array<i32>} : memref<8x8x512xf32, #tpu.memory_space<vmem>>, vector<1x8x512xf32>,
    %50 = vector.extract_strided_slice %17 {offsets = [4, 0, 0], sizes = [1, 8, 512], strides = [1, 1, 1]} : vector<8x8x512xf32> to vector<1x8x512xf32>
    %51 = vector.shape_cast %50 : vector<1x8x512xf32> to vector<8x512xf32>
    %52 = vector.extract_strided_slice %17 {offsets = [3, 0, 0], sizes = [1, 8, 512], strides = [1, 1, 1]} : vector<8x8x512xf32> to vector<1x8x512xf32>
    %53 = vector.shape_cast %52 : vector<1x8x512xf32> to vector<8x512xf32>
    %54 = arith.select %8, %51, %53 : vector<8x512xi1>, vector<8x512xf32>
    %c4 = arith.constant 4 : index
    %c0_16 = arith.constant 0 : index
    %c0_17 = arith.constant 0 : index
    %55 = vector.load %arg10[%c4, %c0_16, %c0_17] : memref<8x8x512xf32, #tpu.memory_space<vmem>>, vector<1x8x512xf32>
    %56 = vector.shape_cast %55 : vector<1x8x512xf32> to vector<8x512xf32>
    %57 = vector.shape_cast %54 : vector<8x512xf32> to vector<1x8x512xf32>
    tpu.vector_store %arg10[%c4, %c0_16, %c0_17], %57 {strides = array<i32>} : memref<8x8x512xf32, #tpu.memory_space<vmem>>, vector<1x8x512xf32>,
    %58 = vector.extract_strided_slice %17 {offsets = [5, 0, 0], sizes = [1, 8, 512], strides = [1, 1, 1]} : vector<8x8x512xf32> to vector<1x8x512xf32>
    %59 = vector.shape_cast %58 : vector<1x8x512xf32> to vector<8x512xf32>
    %60 = vector.extract_strided_slice %17 {offsets = [2, 0, 0], sizes = [1, 8, 512], strides = [1, 1, 1]} : vector<8x8x512xf32> to vector<1x8x512xf32>
    %61 = vector.shape_cast %60 : vector<1x8x512xf32> to vector<8x512xf32>
    %62 = arith.select %8, %59, %61 : vector<8x512xi1>, vector<8x512xf32>
    %c5 = arith.constant 5 : index
    %c0_18 = arith.constant 0 : index
    %c0_19 = arith.constant 0 : index
    %63 = vector.load %arg10[%c5, %c0_18, %c0_19] : memref<8x8x512xf32, #tpu.memory_space<vmem>>, vector<1x8x512xf32>
    %64 = vector.shape_cast %63 : vector<1x8x512xf32> to vector<8x512xf32>
    %65 = vector.shape_cast %62 : vector<8x512xf32> to vector<1x8x512xf32>
    tpu.vector_store %arg10[%c5, %c0_18, %c0_19], %65 {strides = array<i32>} : memref<8x8x512xf32, #tpu.memory_space<vmem>>, vector<1x8x512xf32>,
    %66 = vector.extract_strided_slice %17 {offsets = [6, 0, 0], sizes = [1, 8, 512], strides = [1, 1, 1]} : vector<8x8x512xf32> to vector<1x8x512xf32>
    %67 = vector.shape_cast %66 : vector<1x8x512xf32> to vector<8x512xf32>
    %68 = vector.extract_strided_slice %17 {offsets = [1, 0, 0], sizes = [1, 8, 512], strides = [1, 1, 1]} : vector<8x8x512xf32> to vector<1x8x512xf32>
    %69 = vector.shape_cast %68 : vector<1x8x512xf32> to vector<8x512xf32>
    %70 = arith.select %8, %67, %69 : vector<8x512xi1>, vector<8x512xf32>
    %c6 = arith.constant 6 : index
    %c0_20 = arith.constant 0 : index
    %c0_21 = arith.constant 0 : index
    %71 = vector.load %arg10[%c6, %c0_20, %c0_21] : memref<8x8x512xf32, #tpu.memory_space<vmem>>, vector<1x8x512xf32>
    %72 = vector.shape_cast %71 : vector<1x8x512xf32> to vector<8x512xf32>
    %73 = vector.shape_cast %70 : vector<8x512xf32> to vector<1x8x512xf32>
    tpu.vector_store %arg10[%c6, %c0_20, %c0_21], %73 {strides = array<i32>} : memref<8x8x512xf32, #tpu.memory_space<vmem>>, vector<1x8x512xf32>,
    %74 = vector.extract_strided_slice %17 {offsets = [7, 0, 0], sizes = [1, 8, 512], strides = [1, 1, 1]} : vector<8x8x512xf32> to vector<1x8x512xf32>
    %75 = vector.shape_cast %74 : vector<1x8x512xf32> to vector<8x512xf32>
    %76 = vector.extract_strided_slice %17 {offsets = [0, 0, 0], sizes = [1, 8, 512], strides = [1, 1, 1]} : vector<8x8x512xf32> to vector<1x8x512xf32>
    %77 = vector.shape_cast %76 : vector<1x8x512xf32> to vector<8x512xf32>
    %78 = arith.select %8, %75, %77 : vector<8x512xi1>, vector<8x512xf32>
    %c7 = arith.constant 7 : index
    %c0_22 = arith.constant 0 : index
    %c0_23 = arith.constant 0 : index
    %79 = vector.load %arg10[%c7, %c0_22, %c0_23] : memref<8x8x512xf32, #tpu.memory_space<vmem>>, vector<1x8x512xf32>
    %80 = vector.shape_cast %79 : vector<1x8x512xf32> to vector<8x512xf32>
    %81 = vector.shape_cast %78 : vector<8x512xf32> to vector<1x8x512xf32>
    tpu.vector_store %arg10[%c7, %c0_22, %c0_23], %81 {strides = array<i32>} : memref<8x8x512xf32, #tpu.memory_space<vmem>>, vector<1x8x512xf32>,
    %c0_24 = arith.constant 0 : index
    %c0_25 = arith.constant 0 : index
    %82 = vector.load %arg2[%c0_24, %c0_25] : memref<128x512xbf16, #tpu.memory_space<vmem>>, vector<128x512xbf16>
    %cst_26 = arith.constant 0.000000e+00 : f32
    %83 = vector.broadcast %cst_26 : f32 to vector<8x128xf32>
    %cst_27 = arith.constant 0.000000e+00 : f32
    %84 = vector.broadcast %cst_27 : f32 to vector<8x128xf32>
    %c0_28 = arith.constant 0 : index
    %c0_29 = arith.constant 0 : index
    %c0_30 = arith.constant 0 : index
    %85 = vector.load %arg10[%c0_28, %c0_29, %c0_30] : memref<8x8x512xf32, #tpu.memory_space<vmem>>, vector<1x8x512xf32>
    %86 = vector.shape_cast %85 : vector<1x8x512xf32> to vector<8x512xf32>
    %87 = arith.truncf %83 : vector<8x128xf32> to vector<8x128xbf16>
    %cst_31 = arith.constant dense<0.000000e+00> : vector<8x512xf32>
    %88 = tpu.matmul %87, %82, %cst_31 {dimension_numbers = #tpu.dot_dimension_numbers<[1], [0], [0], [1], [0, 0, 1, 1], [], []>} : vector<8x128xbf16>, vector<128x512xbf16>, vector<8x512xf32> -> vector<8x512xf32>
    %89 = arith.addf %86, %88 : vector<8x512xf32>
    %90 = vector.extract_strided_slice %89 {offsets = [0, 0], sizes = [8, 384], strides = [1, 1]} : vector<8x512xf32> to vector<8x384xf32>
    %91 = arith.negf %90 : vector<8x384xf32>
    %92 = math.exp %91 : vector<8x384xf32>
    %cst_32 = arith.constant 1.000000e+00 : f32
    %93 = vector.broadcast %cst_32 : f32 to vector<8x384xf32>
    %94 = arith.addf %93, %92 : vector<8x384xf32>
    %95 = arith.divf %93, %94 : vector<8x384xf32>
    %96 = vector.extract_strided_slice %89 {offsets = [0, 384], sizes = [8, 128], strides = [1, 1]} : vector<8x512xf32> to vector<8x128xf32>
    %97 = math.tanh %96 : vector<8x128xf32>
    %98 = vector.extract_strided_slice %95 {offsets = [0, 128], sizes = [8, 128], strides = [1, 1]} : vector<8x384xf32> to vector<8x128xf32>
    %99 = arith.mulf %98, %84 : vector<8x128xf32>
    %100 = vector.extract_strided_slice %95 {offsets = [0, 0], sizes = [8, 128], strides = [1, 1]} : vector<8x384xf32> to vector<8x128xf32>
    %101 = arith.mulf %100, %97 : vector<8x128xf32>
    %102 = arith.addf %99, %101 : vector<8x128xf32>
    %103 = vector.extract_strided_slice %95 {offsets = [0, 256], sizes = [8, 128], strides = [1, 1]} : vector<8x384xf32> to vector<8x128xf32>
    %104 = math.tanh %102 : vector<8x128xf32>
    %105 = arith.mulf %103, %104 : vector<8x128xf32>
    %106 = vector.extract_strided_slice %105 {offsets = [0, 0], sizes = [8, 64], strides = [1, 1]} : vector<8x128xf32> to vector<8x64xf32>
    %c0_33 = arith.constant 0 : index
    %c0_34 = arith.constant 0 : index
    %c0_35 = arith.constant 0 : index
    %107 = vector.load %arg11[%c0_33, %c0_34, %c0_35] : memref<8x8x128xf32, #tpu.memory_space<vmem>>, vector<1x8x64xf32>
    %108 = vector.shape_cast %107 : vector<1x8x64xf32> to vector<8x64xf32>
    %109 = vector.shape_cast %106 : vector<8x64xf32> to vector<1x8x64xf32>
    tpu.vector_store %arg11[%c0_33, %c0_34, %c0_35], %109 {strides = array<i32>} : memref<8x8x128xf32, #tpu.memory_space<vmem>>, vector<1x8x64xf32>,
    %110 = vector.extract_strided_slice %105 {offsets = [0, 64], sizes = [8, 64], strides = [1, 1]} : vector<8x128xf32> to vector<8x64xf32>
    %c7_36 = arith.constant 7 : index
    %c0_37 = arith.constant 0 : index
    %c64 = arith.constant 64 : index
    %111 = vector.load %arg11[%c7_36, %c0_37, %c64] : memref<8x8x128xf32, #tpu.memory_space<vmem>>, vector<1x8x64xf32>
    %112 = vector.shape_cast %111 : vector<1x8x64xf32> to vector<8x64xf32>
    %113 = vector.shape_cast %110 : vector<8x64xf32> to vector<1x8x64xf32>
    tpu.vector_store %arg11[%c7_36, %c0_37, %c64], %113 {strides = array<i32>} : memref<8x8x128xf32, #tpu.memory_space<vmem>>, vector<1x8x64xf32>,
    %c1_38 = arith.constant 1 : index
    %c0_39 = arith.constant 0 : index
    %c0_40 = arith.constant 0 : index
    %114 = vector.load %arg10[%c1_38, %c0_39, %c0_40] : memref<8x8x512xf32, #tpu.memory_space<vmem>>, vector<1x8x512xf32>
    %115 = vector.shape_cast %114 : vector<1x8x512xf32> to vector<8x512xf32>
    %116 = arith.truncf %105 : vector<8x128xf32> to vector<8x128xbf16>
    %cst_41 = arith.constant dense<0.000000e+00> : vector<8x512xf32>
    %117 = tpu.matmul %116, %82, %cst_41 {dimension_numbers = #tpu.dot_dimension_numbers<[1], [0], [0], [1], [0, 0, 1, 1], [], []>} : vector<8x128xbf16>, vector<128x512xbf16>, vector<8x512xf32> -> vector<8x512xf32>
    %118 = arith.addf %115, %117 : vector<8x512xf32>
    %119 = vector.extract_strided_slice %118 {offsets = [0, 0], sizes = [8, 384], strides = [1, 1]} : vector<8x512xf32> to vector<8x384xf32>
    %120 = arith.negf %119 : vector<8x384xf32>
    %121 = math.exp %120 : vector<8x384xf32>
    %cst_42 = arith.constant 1.000000e+00 : f32
    %122 = vector.broadcast %cst_42 : f32 to vector<8x384xf32>
    %123 = arith.addf %122, %121 : vector<8x384xf32>
    %124 = arith.divf %122, %123 : vector<8x384xf32>
    %125 = vector.extract_strided_slice %118 {offsets = [0, 384], sizes = [8, 128], strides = [1, 1]} : vector<8x512xf32> to vector<8x128xf32>
    %126 = math.tanh %125 : vector<8x128xf32>
    %127 = vector.extract_strided_slice %124 {offsets = [0, 128], sizes = [8, 128], strides = [1, 1]} : vector<8x384xf32> to vector<8x128xf32>
    %128 = arith.mulf %127, %102 : vector<8x128xf32>
    %129 = vector.extract_strided_slice %124 {offsets = [0, 0], sizes = [8, 128], strides = [1, 1]} : vector<8x384xf32> to vector<8x128xf32>
    %130 = arith.mulf %129, %126 : vector<8x128xf32>
    %131 = arith.addf %128, %130 : vector<8x128xf32>
    %132 = vector.extract_strided_slice %124 {offsets = [0, 256], sizes = [8, 128], strides = [1, 1]} : vector<8x384xf32> to vector<8x128xf32>
    %133 = math.tanh %131 : vector<8x128xf32>
    %134 = arith.mulf %132, %133 : vector<8x128xf32>
    %135 = vector.extract_strided_slice %134 {offsets = [0, 0], sizes = [8, 64], strides = [1, 1]} : vector<8x128xf32> to vector<8x64xf32>
    %c1_43 = arith.constant 1 : index
    %c0_44 = arith.constant 0 : index
    %c0_45 = arith.constant 0 : index
    %136 = vector.load %arg11[%c1_43, %c0_44, %c0_45] : memref<8x8x128xf32, #tpu.memory_space<vmem>>, vector<1x8x64xf32>
    %137 = vector.shape_cast %136 : vector<1x8x64xf32> to vector<8x64xf32>
    %138 = vector.shape_cast %135 : vector<8x64xf32> to vector<1x8x64xf32>
    tpu.vector_store %arg11[%c1_43, %c0_44, %c0_45], %138 {strides = array<i32>} : memref<8x8x128xf32, #tpu.memory_space<vmem>>, vector<1x8x64xf32>,
    %139 = vector.extract_strided_slice %134 {offsets = [0, 64], sizes = [8, 64], strides = [1, 1]} : vector<8x128xf32> to vector<8x64xf32>
    %c6_46 = arith.constant 6 : index
    %c0_47 = arith.constant 0 : index
    %c64_48 = arith.constant 64 : index
    %140 = vector.load %arg11[%c6_46, %c0_47, %c64_48] : memref<8x8x128xf32, #tpu.memory_space<vmem>>, vector<1x8x64xf32>
    %141 = vector.shape_cast %140 : vector<1x8x64xf32> to vector<8x64xf32>
    %142 = vector.shape_cast %139 : vector<8x64xf32> to vector<1x8x64xf32>
    tpu.vector_store %arg11[%c6_46, %c0_47, %c64_48], %142 {strides = array<i32>} : memref<8x8x128xf32, #tpu.memory_space<vmem>>, vector<1x8x64xf32>,
    %c2_49 = arith.constant 2 : index
    %c0_50 = arith.constant 0 : index
    %c0_51 = arith.constant 0 : index
    %143 = vector.load %arg10[%c2_49, %c0_50, %c0_51] : memref<8x8x512xf32, #tpu.memory_space<vmem>>, vector<1x8x512xf32>
    %144 = vector.shape_cast %143 : vector<1x8x512xf32> to vector<8x512xf32>
    %145 = arith.truncf %134 : vector<8x128xf32> to vector<8x128xbf16>
    %cst_52 = arith.constant dense<0.000000e+00> : vector<8x512xf32>
    %146 = tpu.matmul %145, %82, %cst_52 {dimension_numbers = #tpu.dot_dimension_numbers<[1], [0], [0], [1], [0, 0, 1, 1], [], []>} : vector<8x128xbf16>, vector<128x512xbf16>, vector<8x512xf32> -> vector<8x512xf32>
    %147 = arith.addf %144, %146 : vector<8x512xf32>
    %148 = vector.extract_strided_slice %147 {offsets = [0, 0], sizes = [8, 384], strides = [1, 1]} : vector<8x512xf32> to vector<8x384xf32>
    %149 = arith.negf %148 : vector<8x384xf32>
    %150 = math.exp %149 : vector<8x384xf32>
    %cst_53 = arith.constant 1.000000e+00 : f32
    %151 = vector.broadcast %cst_53 : f32 to vector<8x384xf32>
    %152 = arith.addf %151, %150 : vector<8x384xf32>
    %153 = arith.divf %151, %152 : vector<8x384xf32>
    %154 = vector.extract_strided_slice %147 {offsets = [0, 384], sizes = [8, 128], strides = [1, 1]} : vector<8x512xf32> to vector<8x128xf32>
    %155 = math.tanh %154 : vector<8x128xf32>
    %156 = vector.extract_strided_slice %153 {offsets = [0, 128], sizes = [8, 128], strides = [1, 1]} : vector<8x384xf32> to vector<8x128xf32>
    %157 = arith.mulf %156, %131 : vector<8x128xf32>
    %158 = vector.extract_strided_slice %153 {offsets = [0, 0], sizes = [8, 128], strides = [1, 1]} : vector<8x384xf32> to vector<8x128xf32>
    %159 = arith.mulf %158, %155 : vector<8x128xf32>
    %160 = arith.addf %157, %159 : vector<8x128xf32>
    %161 = vector.extract_strided_slice %153 {offsets = [0, 256], sizes = [8, 128], strides = [1, 1]} : vector<8x384xf32> to vector<8x128xf32>
    %162 = math.tanh %160 : vector<8x128xf32>
    %163 = arith.mulf %161, %162 : vector<8x128xf32>
    %164 = vector.extract_strided_slice %163 {offsets = [0, 0], sizes = [8, 64], strides = [1, 1]} : vector<8x128xf32> to vector<8x64xf32>
    %c2_54 = arith.constant 2 : index
    %c0_55 = arith.constant 0 : index
    %c0_56 = arith.constant 0 : index
    %165 = vector.load %arg11[%c2_54, %c0_55, %c0_56] : memref<8x8x128xf32, #tpu.memory_space<vmem>>, vector<1x8x64xf32>
    %166 = vector.shape_cast %165 : vector<1x8x64xf32> to vector<8x64xf32>
    %167 = vector.shape_cast %164 : vector<8x64xf32> to vector<1x8x64xf32>
    tpu.vector_store %arg11[%c2_54, %c0_55, %c0_56], %167 {strides = array<i32>} : memref<8x8x128xf32, #tpu.memory_space<vmem>>, vector<1x8x64xf32>,
    %168 = vector.extract_strided_slice %163 {offsets = [0, 64], sizes = [8, 64], strides = [1, 1]} : vector<8x128xf32> to vector<8x64xf32>
    %c5_57 = arith.constant 5 : index
    %c0_58 = arith.constant 0 : index
    %c64_59 = arith.constant 64 : index
    %169 = vector.load %arg11[%c5_57, %c0_58, %c64_59] : memref<8x8x128xf32, #tpu.memory_space<vmem>>, vector<1x8x64xf32>
    %170 = vector.shape_cast %169 : vector<1x8x64xf32> to vector<8x64xf32>
    %171 = vector.shape_cast %168 : vector<8x64xf32> to vector<1x8x64xf32>
    tpu.vector_store %arg11[%c5_57, %c0_58, %c64_59], %171 {strides = array<i32>} : memref<8x8x128xf32, #tpu.memory_space<vmem>>, vector<1x8x64xf32>,
    %c3_60 = arith.constant 3 : index
    %c0_61 = arith.constant 0 : index
    %c0_62 = arith.constant 0 : index
    %172 = vector.load %arg10[%c3_60, %c0_61, %c0_62] : memref<8x8x512xf32, #tpu.memory_space<vmem>>, vector<1x8x512xf32>
    %173 = vector.shape_cast %172 : vector<1x8x512xf32> to vector<8x512xf32>
    %174 = arith.truncf %163 : vector<8x128xf32> to vector<8x128xbf16>
    %cst_63 = arith.constant dense<0.000000e+00> : vector<8x512xf32>
    %175 = tpu.matmul %174, %82, %cst_63 {dimension_numbers = #tpu.dot_dimension_numbers<[1], [0], [0], [1], [0, 0, 1, 1], [], []>} : vector<8x128xbf16>, vector<128x512xbf16>, vector<8x512xf32> -> vector<8x512xf32>
    %176 = arith.addf %173, %175 : vector<8x512xf32>
    %177 = vector.extract_strided_slice %176 {offsets = [0, 0], sizes = [8, 384], strides = [1, 1]} : vector<8x512xf32> to vector<8x384xf32>
    %178 = arith.negf %177 : vector<8x384xf32>
    %179 = math.exp %178 : vector<8x384xf32>
    %cst_64 = arith.constant 1.000000e+00 : f32
    %180 = vector.broadcast %cst_64 : f32 to vector<8x384xf32>
    %181 = arith.addf %180, %179 : vector<8x384xf32>
    %182 = arith.divf %180, %181 : vector<8x384xf32>
    %183 = vector.extract_strided_slice %176 {offsets = [0, 384], sizes = [8, 128], strides = [1, 1]} : vector<8x512xf32> to vector<8x128xf32>
    %184 = math.tanh %183 : vector<8x128xf32>
    %185 = vector.extract_strided_slice %182 {offsets = [0, 128], sizes = [8, 128], strides = [1, 1]} : vector<8x384xf32> to vector<8x128xf32>
    %186 = arith.mulf %185, %160 : vector<8x128xf32>
    %187 = vector.extract_strided_slice %182 {offsets = [0, 0], sizes = [8, 128], strides = [1, 1]} : vector<8x384xf32> to vector<8x128xf32>
    %188 = arith.mulf %187, %184 : vector<8x128xf32>
    %189 = arith.addf %186, %188 : vector<8x128xf32>
    %190 = vector.extract_strided_slice %182 {offsets = [0, 256], sizes = [8, 128], strides = [1, 1]} : vector<8x384xf32> to vector<8x128xf32>
    %191 = math.tanh %189 : vector<8x128xf32>
    %192 = arith.mulf %190, %191 : vector<8x128xf32>
    %193 = vector.extract_strided_slice %192 {offsets = [0, 0], sizes = [8, 64], strides = [1, 1]} : vector<8x128xf32> to vector<8x64xf32>
    %c3_65 = arith.constant 3 : index
    %c0_66 = arith.constant 0 : index
    %c0_67 = arith.constant 0 : index
    %194 = vector.load %arg11[%c3_65, %c0_66, %c0_67] : memref<8x8x128xf32, #tpu.memory_space<vmem>>, vector<1x8x64xf32>
    %195 = vector.shape_cast %194 : vector<1x8x64xf32> to vector<8x64xf32>
    %196 = vector.shape_cast %193 : vector<8x64xf32> to vector<1x8x64xf32>
    tpu.vector_store %arg11[%c3_65, %c0_66, %c0_67], %196 {strides = array<i32>} : memref<8x8x128xf32, #tpu.memory_space<vmem>>, vector<1x8x64xf32>,
    %197 = vector.extract_strided_slice %192 {offsets = [0, 64], sizes = [8, 64], strides = [1, 1]} : vector<8x128xf32> to vector<8x64xf32>
    %c4_68 = arith.constant 4 : index
    %c0_69 = arith.constant 0 : index
    %c64_70 = arith.constant 64 : index
    %198 = vector.load %arg11[%c4_68, %c0_69, %c64_70] : memref<8x8x128xf32, #tpu.memory_space<vmem>>, vector<1x8x64xf32>
    %199 = vector.shape_cast %198 : vector<1x8x64xf32> to vector<8x64xf32>
    %200 = vector.shape_cast %197 : vector<8x64xf32> to vector<1x8x64xf32>
    tpu.vector_store %arg11[%c4_68, %c0_69, %c64_70], %200 {strides = array<i32>} : memref<8x8x128xf32, #tpu.memory_space<vmem>>, vector<1x8x64xf32>,
    %c4_71 = arith.constant 4 : index
    %c0_72 = arith.constant 0 : index
    %c0_73 = arith.constant 0 : index
    %201 = vector.load %arg10[%c4_71, %c0_72, %c0_73] : memref<8x8x512xf32, #tpu.memory_space<vmem>>, vector<1x8x512xf32>
    %202 = vector.shape_cast %201 : vector<1x8x512xf32> to vector<8x512xf32>
    %203 = arith.truncf %192 : vector<8x128xf32> to vector<8x128xbf16>
    %cst_74 = arith.constant dense<0.000000e+00> : vector<8x512xf32>
    %204 = tpu.matmul %203, %82, %cst_74 {dimension_numbers = #tpu.dot_dimension_numbers<[1], [0], [0], [1], [0, 0, 1, 1], [], []>} : vector<8x128xbf16>, vector<128x512xbf16>, vector<8x512xf32> -> vector<8x512xf32>
    %205 = arith.addf %202, %204 : vector<8x512xf32>
    %206 = vector.extract_strided_slice %205 {offsets = [0, 0], sizes = [8, 384], strides = [1, 1]} : vector<8x512xf32> to vector<8x384xf32>
    %207 = arith.negf %206 : vector<8x384xf32>
    %208 = math.exp %207 : vector<8x384xf32>
    %cst_75 = arith.constant 1.000000e+00 : f32
    %209 = vector.broadcast %cst_75 : f32 to vector<8x384xf32>
    %210 = arith.addf %209, %208 : vector<8x384xf32>
    %211 = arith.divf %209, %210 : vector<8x384xf32>
    %212 = vector.extract_strided_slice %205 {offsets = [0, 384], sizes = [8, 128], strides = [1, 1]} : vector<8x512xf32> to vector<8x128xf32>
    %213 = math.tanh %212 : vector<8x128xf32>
    %214 = vector.extract_strided_slice %211 {offsets = [0, 128], sizes = [8, 128], strides = [1, 1]} : vector<8x384xf32> to vector<8x128xf32>
    %215 = arith.mulf %214, %189 : vector<8x128xf32>
    %216 = vector.extract_strided_slice %211 {offsets = [0, 0], sizes = [8, 128], strides = [1, 1]} : vector<8x384xf32> to vector<8x128xf32>
    %217 = arith.mulf %216, %213 : vector<8x128xf32>
    %218 = arith.addf %215, %217 : vector<8x128xf32>
    %219 = vector.extract_strided_slice %211 {offsets = [0, 256], sizes = [8, 128], strides = [1, 1]} : vector<8x384xf32> to vector<8x128xf32>
    %220 = math.tanh %218 : vector<8x128xf32>
    %221 = arith.mulf %219, %220 : vector<8x128xf32>
    %222 = vector.extract_strided_slice %221 {offsets = [0, 0], sizes = [8, 64], strides = [1, 1]} : vector<8x128xf32> to vector<8x64xf32>
    %c4_76 = arith.constant 4 : index
    %c0_77 = arith.constant 0 : index
    %c0_78 = arith.constant 0 : index
    %223 = vector.load %arg11[%c4_76, %c0_77, %c0_78] : memref<8x8x128xf32, #tpu.memory_space<vmem>>, vector<1x8x64xf32>
    %224 = vector.shape_cast %223 : vector<1x8x64xf32> to vector<8x64xf32>
    %225 = vector.shape_cast %222 : vector<8x64xf32> to vector<1x8x64xf32>
    tpu.vector_store %arg11[%c4_76, %c0_77, %c0_78], %225 {strides = array<i32>} : memref<8x8x128xf32, #tpu.memory_space<vmem>>, vector<1x8x64xf32>,
    %226 = vector.extract_strided_slice %221 {offsets = [0, 64], sizes = [8, 64], strides = [1, 1]} : vector<8x128xf32> to vector<8x64xf32>
    %c3_79 = arith.constant 3 : index
    %c0_80 = arith.constant 0 : index
    %c64_81 = arith.constant 64 : index
    %227 = vector.load %arg11[%c3_79, %c0_80, %c64_81] : memref<8x8x128xf32, #tpu.memory_space<vmem>>, vector<1x8x64xf32>
    %228 = vector.shape_cast %227 : vector<1x8x64xf32> to vector<8x64xf32>
    %229 = vector.shape_cast %226 : vector<8x64xf32> to vector<1x8x64xf32>
    tpu.vector_store %arg11[%c3_79, %c0_80, %c64_81], %229 {strides = array<i32>} : memref<8x8x128xf32, #tpu.memory_space<vmem>>, vector<1x8x64xf32>,
    %c5_82 = arith.constant 5 : index
    %c0_83 = arith.constant 0 : index
    %c0_84 = arith.constant 0 : index
    %230 = vector.load %arg10[%c5_82, %c0_83, %c0_84] : memref<8x8x512xf32, #tpu.memory_space<vmem>>, vector<1x8x512xf32>
    %231 = vector.shape_cast %230 : vector<1x8x512xf32> to vector<8x512xf32>
    %232 = arith.truncf %221 : vector<8x128xf32> to vector<8x128xbf16>
    %cst_85 = arith.constant dense<0.000000e+00> : vector<8x512xf32>
    %233 = tpu.matmul %232, %82, %cst_85 {dimension_numbers = #tpu.dot_dimension_numbers<[1], [0], [0], [1], [0, 0, 1, 1], [], []>} : vector<8x128xbf16>, vector<128x512xbf16>, vector<8x512xf32> -> vector<8x512xf32>
    %234 = arith.addf %231, %233 : vector<8x512xf32>
    %235 = vector.extract_strided_slice %234 {offsets = [0, 0], sizes = [8, 384], strides = [1, 1]} : vector<8x512xf32> to vector<8x384xf32>
    %236 = arith.negf %235 : vector<8x384xf32>
    %237 = math.exp %236 : vector<8x384xf32>
    %cst_86 = arith.constant 1.000000e+00 : f32
    %238 = vector.broadcast %cst_86 : f32 to vector<8x384xf32>
    %239 = arith.addf %238, %237 : vector<8x384xf32>
    %240 = arith.divf %238, %239 : vector<8x384xf32>
    %241 = vector.extract_strided_slice %234 {offsets = [0, 384], sizes = [8, 128], strides = [1, 1]} : vector<8x512xf32> to vector<8x128xf32>
    %242 = math.tanh %241 : vector<8x128xf32>
    %243 = vector.extract_strided_slice %240 {offsets = [0, 128], sizes = [8, 128], strides = [1, 1]} : vector<8x384xf32> to vector<8x128xf32>
    %244 = arith.mulf %243, %218 : vector<8x128xf32>
    %245 = vector.extract_strided_slice %240 {offsets = [0, 0], sizes = [8, 128], strides = [1, 1]} : vector<8x384xf32> to vector<8x128xf32>
    %246 = arith.mulf %245, %242 : vector<8x128xf32>
    %247 = arith.addf %244, %246 : vector<8x128xf32>
    %248 = vector.extract_strided_slice %240 {offsets = [0, 256], sizes = [8, 128], strides = [1, 1]} : vector<8x384xf32> to vector<8x128xf32>
    %249 = math.tanh %247 : vector<8x128xf32>
    %250 = arith.mulf %248, %249 : vector<8x128xf32>
    %251 = vector.extract_strided_slice %250 {offsets = [0, 0], sizes = [8, 64], strides = [1, 1]} : vector<8x128xf32> to vector<8x64xf32>
    %c5_87 = arith.constant 5 : index
    %c0_88 = arith.constant 0 : index
    %c0_89 = arith.constant 0 : index
    %252 = vector.load %arg11[%c5_87, %c0_88, %c0_89] : memref<8x8x128xf32, #tpu.memory_space<vmem>>, vector<1x8x64xf32>
    %253 = vector.shape_cast %252 : vector<1x8x64xf32> to vector<8x64xf32>
    %254 = vector.shape_cast %251 : vector<8x64xf32> to vector<1x8x64xf32>
    tpu.vector_store %arg11[%c5_87, %c0_88, %c0_89], %254 {strides = array<i32>} : memref<8x8x128xf32, #tpu.memory_space<vmem>>, vector<1x8x64xf32>,
    %255 = vector.extract_strided_slice %250 {offsets = [0, 64], sizes = [8, 64], strides = [1, 1]} : vector<8x128xf32> to vector<8x64xf32>
    %c2_90 = arith.constant 2 : index
    %c0_91 = arith.constant 0 : index
    %c64_92 = arith.constant 64 : index
    %256 = vector.load %arg11[%c2_90, %c0_91, %c64_92] : memref<8x8x128xf32, #tpu.memory_space<vmem>>, vector<1x8x64xf32>
    %257 = vector.shape_cast %256 : vector<1x8x64xf32> to vector<8x64xf32>
    %258 = vector.shape_cast %255 : vector<8x64xf32> to vector<1x8x64xf32>
    tpu.vector_store %arg11[%c2_90, %c0_91, %c64_92], %258 {strides = array<i32>} : memref<8x8x128xf32, #tpu.memory_space<vmem>>, vector<1x8x64xf32>,
    %c6_93 = arith.constant 6 : index
    %c0_94 = arith.constant 0 : index
    %c0_95 = arith.constant 0 : index
    %259 = vector.load %arg10[%c6_93, %c0_94, %c0_95] : memref<8x8x512xf32, #tpu.memory_space<vmem>>, vector<1x8x512xf32>
    %260 = vector.shape_cast %259 : vector<1x8x512xf32> to vector<8x512xf32>
    %261 = arith.truncf %250 : vector<8x128xf32> to vector<8x128xbf16>
    %cst_96 = arith.constant dense<0.000000e+00> : vector<8x512xf32>
    %262 = tpu.matmul %261, %82, %cst_96 {dimension_numbers = #tpu.dot_dimension_numbers<[1], [0], [0], [1], [0, 0, 1, 1], [], []>} : vector<8x128xbf16>, vector<128x512xbf16>, vector<8x512xf32> -> vector<8x512xf32>
    %263 = arith.addf %260, %262 : vector<8x512xf32>
    %264 = vector.extract_strided_slice %263 {offsets = [0, 0], sizes = [8, 384], strides = [1, 1]} : vector<8x512xf32> to vector<8x384xf32>
    %265 = arith.negf %264 : vector<8x384xf32>
    %266 = math.exp %265 : vector<8x384xf32>
    %cst_97 = arith.constant 1.000000e+00 : f32
    %267 = vector.broadcast %cst_97 : f32 to vector<8x384xf32>
    %268 = arith.addf %267, %266 : vector<8x384xf32>
    %269 = arith.divf %267, %268 : vector<8x384xf32>
    %270 = vector.extract_strided_slice %263 {offsets = [0, 384], sizes = [8, 128], strides = [1, 1]} : vector<8x512xf32> to vector<8x128xf32>
    %271 = math.tanh %270 : vector<8x128xf32>
    %272 = vector.extract_strided_slice %269 {offsets = [0, 128], sizes = [8, 128], strides = [1, 1]} : vector<8x384xf32> to vector<8x128xf32>
    %273 = arith.mulf %272, %247 : vector<8x128xf32>
    %274 = vector.extract_strided_slice %269 {offsets = [0, 0], sizes = [8, 128], strides = [1, 1]} : vector<8x384xf32> to vector<8x128xf32>
    %275 = arith.mulf %274, %271 : vector<8x128xf32>
    %276 = arith.addf %273, %275 : vector<8x128xf32>
    %277 = vector.extract_strided_slice %269 {offsets = [0, 256], sizes = [8, 128], strides = [1, 1]} : vector<8x384xf32> to vector<8x128xf32>
    %278 = math.tanh %276 : vector<8x128xf32>
    %279 = arith.mulf %277, %278 : vector<8x128xf32>
    %280 = vector.extract_strided_slice %279 {offsets = [0, 0], sizes = [8, 64], strides = [1, 1]} : vector<8x128xf32> to vector<8x64xf32>
    %c6_98 = arith.constant 6 : index
    %c0_99 = arith.constant 0 : index
    %c0_100 = arith.constant 0 : index
    %281 = vector.load %arg11[%c6_98, %c0_99, %c0_100] : memref<8x8x128xf32, #tpu.memory_space<vmem>>, vector<1x8x64xf32>
    %282 = vector.shape_cast %281 : vector<1x8x64xf32> to vector<8x64xf32>
    %283 = vector.shape_cast %280 : vector<8x64xf32> to vector<1x8x64xf32>
    tpu.vector_store %arg11[%c6_98, %c0_99, %c0_100], %283 {strides = array<i32>} : memref<8x8x128xf32, #tpu.memory_space<vmem>>, vector<1x8x64xf32>,
    %284 = vector.extract_strided_slice %279 {offsets = [0, 64], sizes = [8, 64], strides = [1, 1]} : vector<8x128xf32> to vector<8x64xf32>
    %c1_101 = arith.constant 1 : index
    %c0_102 = arith.constant 0 : index
    %c64_103 = arith.constant 64 : index
    %285 = vector.load %arg11[%c1_101, %c0_102, %c64_103] : memref<8x8x128xf32, #tpu.memory_space<vmem>>, vector<1x8x64xf32>
    %286 = vector.shape_cast %285 : vector<1x8x64xf32> to vector<8x64xf32>
    %287 = vector.shape_cast %284 : vector<8x64xf32> to vector<1x8x64xf32>
    tpu.vector_store %arg11[%c1_101, %c0_102, %c64_103], %287 {strides = array<i32>} : memref<8x8x128xf32, #tpu.memory_space<vmem>>, vector<1x8x64xf32>,
    %c7_104 = arith.constant 7 : index
    %c0_105 = arith.constant 0 : index
    %c0_106 = arith.constant 0 : index
    %288 = vector.load %arg10[%c7_104, %c0_105, %c0_106] : memref<8x8x512xf32, #tpu.memory_space<vmem>>, vector<1x8x512xf32>
    %289 = vector.shape_cast %288 : vector<1x8x512xf32> to vector<8x512xf32>
    %290 = arith.truncf %279 : vector<8x128xf32> to vector<8x128xbf16>
    %cst_107 = arith.constant dense<0.000000e+00> : vector<8x512xf32>
    %291 = tpu.matmul %290, %82, %cst_107 {dimension_numbers = #tpu.dot_dimension_numbers<[1], [0], [0], [1], [0, 0, 1, 1], [], []>} : vector<8x128xbf16>, vector<128x512xbf16>, vector<8x512xf32> -> vector<8x512xf32>
    %292 = arith.addf %289, %291 : vector<8x512xf32>
    %293 = vector.extract_strided_slice %292 {offsets = [0, 0], sizes = [8, 384], strides = [1, 1]} : vector<8x512xf32> to vector<8x384xf32>
    %294 = arith.negf %293 : vector<8x384xf32>
    %295 = math.exp %294 : vector<8x384xf32>
    %cst_108 = arith.constant 1.000000e+00 : f32
    %296 = vector.broadcast %cst_108 : f32 to vector<8x384xf32>
    %297 = arith.addf %296, %295 : vector<8x384xf32>
    %298 = arith.divf %296, %297 : vector<8x384xf32>
    %299 = vector.extract_strided_slice %292 {offsets = [0, 384], sizes = [8, 128], strides = [1, 1]} : vector<8x512xf32> to vector<8x128xf32>
    %300 = math.tanh %299 : vector<8x128xf32>
    %301 = vector.extract_strided_slice %298 {offsets = [0, 128], sizes = [8, 128], strides = [1, 1]} : vector<8x384xf32> to vector<8x128xf32>
    %302 = arith.mulf %301, %276 : vector<8x128xf32>
    %303 = vector.extract_strided_slice %298 {offsets = [0, 0], sizes = [8, 128], strides = [1, 1]} : vector<8x384xf32> to vector<8x128xf32>
    %304 = arith.mulf %303, %300 : vector<8x128xf32>
    %305 = arith.addf %302, %304 : vector<8x128xf32>
    %306 = vector.extract_strided_slice %298 {offsets = [0, 256], sizes = [8, 128], strides = [1, 1]} : vector<8x384xf32> to vector<8x128xf32>
    %307 = math.tanh %305 : vector<8x128xf32>
    %308 = arith.mulf %306, %307 : vector<8x128xf32>
    %309 = vector.extract_strided_slice %308 {offsets = [0, 0], sizes = [8, 64], strides = [1, 1]} : vector<8x128xf32> to vector<8x64xf32>
    %c7_109 = arith.constant 7 : index
    %c0_110 = arith.constant 0 : index
    %c0_111 = arith.constant 0 : index
    %310 = vector.load %arg11[%c7_109, %c0_110, %c0_111] : memref<8x8x128xf32, #tpu.memory_space<vmem>>, vector<1x8x64xf32>
    %311 = vector.shape_cast %310 : vector<1x8x64xf32> to vector<8x64xf32>
    %312 = vector.shape_cast %309 : vector<8x64xf32> to vector<1x8x64xf32>
    tpu.vector_store %arg11[%c7_109, %c0_110, %c0_111], %312 {strides = array<i32>} : memref<8x8x128xf32, #tpu.memory_space<vmem>>, vector<1x8x64xf32>,
    %313 = vector.extract_strided_slice %308 {offsets = [0, 64], sizes = [8, 64], strides = [1, 1]} : vector<8x128xf32> to vector<8x64xf32>
    %c0_112 = arith.constant 0 : index
    %c0_113 = arith.constant 0 : index
    %c64_114 = arith.constant 64 : index
    %314 = vector.load %arg11[%c0_112, %c0_113, %c64_114] : memref<8x8x128xf32, #tpu.memory_space<vmem>>, vector<1x8x64xf32>
    %315 = vector.shape_cast %314 : vector<1x8x64xf32> to vector<8x64xf32>
    %316 = vector.shape_cast %313 : vector<8x64xf32> to vector<1x8x64xf32>
    tpu.vector_store %arg11[%c0_112, %c0_113, %c64_114], %316 {strides = array<i32>} : memref<8x8x128xf32, #tpu.memory_space<vmem>>, vector<1x8x64xf32>,
    %c0_i32_115 = arith.constant 0 : i32
    %317 = tpu.memref_slice %arg14[%c0_i32_115] : memref<2x!tpu.dma_semaphore, #tpu.memory_space<semaphore_mem>> -> memref<1x!tpu.dma_semaphore, #tpu.memory_space<semaphore_mem>>
    %318 = tpu.memref_squeeze %317 : memref<1x!tpu.dma_semaphore, #tpu.memory_space<semaphore_mem>> -> memref<!tpu.dma_semaphore, #tpu.memory_space<semaphore_mem>>
    tpu.wait_dma2 semaphore(%318 : memref<!tpu.dma_semaphore, #tpu.memory_space<semaphore_mem>>) src(%arg7 : memref<128x512xbf16, #tpu.memory_space<any>>) dst(%arg12 : memref<128x512xbf16, #tpu.memory_space<vmem>>)
    %c0_116 = arith.constant 0 : index
    %c0_117 = arith.constant 0 : index
    %c0_118 = arith.constant 0 : index
    %319 = vector.load %arg11[%c0_116, %c0_117, %c0_118] : memref<8x8x128xf32, #tpu.memory_space<vmem>>, vector<8x8x128xf32>
    %320 = vector.shape_cast %319 : vector<8x8x128xf32> to vector<64x128xf32>
    %321 = arith.truncf %320 : vector<64x128xf32> to vector<64x128xbf16>
    %c0_119 = arith.constant 0 : index
    %c0_120 = arith.constant 0 : index
    %322 = vector.load %arg12[%c0_119, %c0_120] : memref<128x512xbf16, #tpu.memory_space<vmem>>, vector<128x512xbf16>
    %cst_121 = arith.constant dense<0.000000e+00> : vector<64x512xf32>
    %323 = tpu.matmul %321, %322, %cst_121 {dimension_numbers = #tpu.dot_dimension_numbers<[1], [0], [0], [1], [0, 0, 1, 1], [], []>} : vector<64x128xbf16>, vector<128x512xbf16>, vector<64x512xf32> -> vector<64x512xf32>
    %c0_122 = arith.constant 0 : index
    %c0_123 = arith.constant 0 : index
    %324 = vector.load %arg4[%c0_122, %c0_123] : memref<1x512xf32, #tpu.memory_space<vmem>>, vector<1x512xf32>
    %325 = vector.broadcast %324 : vector<1x512xf32> to vector<64x512xf32>
    %326 = arith.addf %323, %325 : vector<64x512xf32>
    %327 = vector.shape_cast %326 : vector<64x512xf32> to vector<8x8x512xf32>
    %328 = vector.extract_strided_slice %327 {offsets = [0, 0, 0], sizes = [1, 8, 512], strides = [1, 1, 1]} : vector<8x8x512xf32> to vector<1x8x512xf32>
    %329 = vector.shape_cast %328 : vector<1x8x512xf32> to vector<8x512xf32>
    %330 = vector.extract_strided_slice %327 {offsets = [7, 0, 0], sizes = [1, 8, 512], strides = [1, 1, 1]} : vector<8x8x512xf32> to vector<1x8x512xf32>
    %331 = vector.shape_cast %330 : vector<1x8x512xf32> to vector<8x512xf32>
    %332 = arith.select %8, %329, %331 : vector<8x512xi1>, vector<8x512xf32>
    %c0_124 = arith.constant 0 : index
    %c0_125 = arith.constant 0 : index
    %c0_126 = arith.constant 0 : index
    %333 = vector.load %arg10[%c0_124, %c0_125, %c0_126] : memref<8x8x512xf32, #tpu.memory_space<vmem>>, vector<1x8x512xf32>
    %334 = vector.shape_cast %333 : vector<1x8x512xf32> to vector<8x512xf32>
    %335 = vector.shape_cast %332 : vector<8x512xf32> to vector<1x8x512xf32>
    tpu.vector_store %arg10[%c0_124, %c0_125, %c0_126], %335 {strides = array<i32>} : memref<8x8x512xf32, #tpu.memory_space<vmem>>, vector<1x8x512xf32>,
    %336 = vector.extract_strided_slice %327 {offsets = [1, 0, 0], sizes = [1, 8, 512], strides = [1, 1, 1]} : vector<8x8x512xf32> to vector<1x8x512xf32>
    %337 = vector.shape_cast %336 : vector<1x8x512xf32> to vector<8x512xf32>
    %338 = vector.extract_strided_slice %327 {offsets = [6, 0, 0], sizes = [1, 8, 512], strides = [1, 1, 1]} : vector<8x8x512xf32> to vector<1x8x512xf32>
    %339 = vector.shape_cast %338 : vector<1x8x512xf32> to vector<8x512xf32>
    %340 = arith.select %8, %337, %339 : vector<8x512xi1>, vector<8x512xf32>
    %c1_127 = arith.constant 1 : index
    %c0_128 = arith.constant 0 : index
    %c0_129 = arith.constant 0 : index
    %341 = vector.load %arg10[%c1_127, %c0_128, %c0_129] : memref<8x8x512xf32, #tpu.memory_space<vmem>>, vector<1x8x512xf32>
    %342 = vector.shape_cast %341 : vector<1x8x512xf32> to vector<8x512xf32>
    %343 = vector.shape_cast %340 : vector<8x512xf32> to vector<1x8x512xf32>
    tpu.vector_store %arg10[%c1_127, %c0_128, %c0_129], %343 {strides = array<i32>} : memref<8x8x512xf32, #tpu.memory_space<vmem>>, vector<1x8x512xf32>,
    %344 = vector.extract_strided_slice %327 {offsets = [2, 0, 0], sizes = [1, 8, 512], strides = [1, 1, 1]} : vector<8x8x512xf32> to vector<1x8x512xf32>
    %345 = vector.shape_cast %344 : vector<1x8x512xf32> to vector<8x512xf32>
    %346 = vector.extract_strided_slice %327 {offsets = [5, 0, 0], sizes = [1, 8, 512], strides = [1, 1, 1]} : vector<8x8x512xf32> to vector<1x8x512xf32>
    %347 = vector.shape_cast %346 : vector<1x8x512xf32> to vector<8x512xf32>
    %348 = arith.select %8, %345, %347 : vector<8x512xi1>, vector<8x512xf32>
    %c2_130 = arith.constant 2 : index
    %c0_131 = arith.constant 0 : index
    %c0_132 = arith.constant 0 : index
    %349 = vector.load %arg10[%c2_130, %c0_131, %c0_132] : memref<8x8x512xf32, #tpu.memory_space<vmem>>, vector<1x8x512xf32>
    %350 = vector.shape_cast %349 : vector<1x8x512xf32> to vector<8x512xf32>
    %351 = vector.shape_cast %348 : vector<8x512xf32> to vector<1x8x512xf32>
    tpu.vector_store %arg10[%c2_130, %c0_131, %c0_132], %351 {strides = array<i32>} : memref<8x8x512xf32, #tpu.memory_space<vmem>>, vector<1x8x512xf32>,
    %352 = vector.extract_strided_slice %327 {offsets = [3, 0, 0], sizes = [1, 8, 512], strides = [1, 1, 1]} : vector<8x8x512xf32> to vector<1x8x512xf32>
    %353 = vector.shape_cast %352 : vector<1x8x512xf32> to vector<8x512xf32>
    %354 = vector.extract_strided_slice %327 {offsets = [4, 0, 0], sizes = [1, 8, 512], strides = [1, 1, 1]} : vector<8x8x512xf32> to vector<1x8x512xf32>
    %355 = vector.shape_cast %354 : vector<1x8x512xf32> to vector<8x512xf32>
    %356 = arith.select %8, %353, %355 : vector<8x512xi1>, vector<8x512xf32>
    %c3_133 = arith.constant 3 : index
    %c0_134 = arith.constant 0 : index
    %c0_135 = arith.constant 0 : index
    %357 = vector.load %arg10[%c3_133, %c0_134, %c0_135] : memref<8x8x512xf32, #tpu.memory_space<vmem>>, vector<1x8x512xf32>
    %358 = vector.shape_cast %357 : vector<1x8x512xf32> to vector<8x512xf32>
    %359 = vector.shape_cast %356 : vector<8x512xf32> to vector<1x8x512xf32>
    tpu.vector_store %arg10[%c3_133, %c0_134, %c0_135], %359 {strides = array<i32>} : memref<8x8x512xf32, #tpu.memory_space<vmem>>, vector<1x8x512xf32>,
    %360 = vector.extract_strided_slice %327 {offsets = [4, 0, 0], sizes = [1, 8, 512], strides = [1, 1, 1]} : vector<8x8x512xf32> to vector<1x8x512xf32>
    %361 = vector.shape_cast %360 : vector<1x8x512xf32> to vector<8x512xf32>
    %362 = vector.extract_strided_slice %327 {offsets = [3, 0, 0], sizes = [1, 8, 512], strides = [1, 1, 1]} : vector<8x8x512xf32> to vector<1x8x512xf32>
    %363 = vector.shape_cast %362 : vector<1x8x512xf32> to vector<8x512xf32>
    %364 = arith.select %8, %361, %363 : vector<8x512xi1>, vector<8x512xf32>
    %c4_136 = arith.constant 4 : index
    %c0_137 = arith.constant 0 : index
    %c0_138 = arith.constant 0 : index
    %365 = vector.load %arg10[%c4_136, %c0_137, %c0_138] : memref<8x8x512xf32, #tpu.memory_space<vmem>>, vector<1x8x512xf32>
    %366 = vector.shape_cast %365 : vector<1x8x512xf32> to vector<8x512xf32>
    %367 = vector.shape_cast %364 : vector<8x512xf32> to vector<1x8x512xf32>
    tpu.vector_store %arg10[%c4_136, %c0_137, %c0_138], %367 {strides = array<i32>} : memref<8x8x512xf32, #tpu.memory_space<vmem>>, vector<1x8x512xf32>,
    %368 = vector.extract_strided_slice %327 {offsets = [5, 0, 0], sizes = [1, 8, 512], strides = [1, 1, 1]} : vector<8x8x512xf32> to vector<1x8x512xf32>
    %369 = vector.shape_cast %368 : vector<1x8x512xf32> to vector<8x512xf32>
    %370 = vector.extract_strided_slice %327 {offsets = [2, 0, 0], sizes = [1, 8, 512], strides = [1, 1, 1]} : vector<8x8x512xf32> to vector<1x8x512xf32>
    %371 = vector.shape_cast %370 : vector<1x8x512xf32> to vector<8x512xf32>
    %372 = arith.select %8, %369, %371 : vector<8x512xi1>, vector<8x512xf32>
    %c5_139 = arith.constant 5 : index
    %c0_140 = arith.constant 0 : index
    %c0_141 = arith.constant 0 : index
    %373 = vector.load %arg10[%c5_139, %c0_140, %c0_141] : memref<8x8x512xf32, #tpu.memory_space<vmem>>, vector<1x8x512xf32>
    %374 = vector.shape_cast %373 : vector<1x8x512xf32> to vector<8x512xf32>
    %375 = vector.shape_cast %372 : vector<8x512xf32> to vector<1x8x512xf32>
    tpu.vector_store %arg10[%c5_139, %c0_140, %c0_141], %375 {strides = array<i32>} : memref<8x8x512xf32, #tpu.memory_space<vmem>>, vector<1x8x512xf32>,
    %376 = vector.extract_strided_slice %327 {offsets = [6, 0, 0], sizes = [1, 8, 512], strides = [1, 1, 1]} : vector<8x8x512xf32> to vector<1x8x512xf32>
    %377 = vector.shape_cast %376 : vector<1x8x512xf32> to vector<8x512xf32>
    %378 = vector.extract_strided_slice %327 {offsets = [1, 0, 0], sizes = [1, 8, 512], strides = [1, 1, 1]} : vector<8x8x512xf32> to vector<1x8x512xf32>
    %379 = vector.shape_cast %378 : vector<1x8x512xf32> to vector<8x512xf32>
    %380 = arith.select %8, %377, %379 : vector<8x512xi1>, vector<8x512xf32>
    %c6_142 = arith.constant 6 : index
    %c0_143 = arith.constant 0 : index
    %c0_144 = arith.constant 0 : index
    %381 = vector.load %arg10[%c6_142, %c0_143, %c0_144] : memref<8x8x512xf32, #tpu.memory_space<vmem>>, vector<1x8x512xf32>
    %382 = vector.shape_cast %381 : vector<1x8x512xf32> to vector<8x512xf32>
    %383 = vector.shape_cast %380 : vector<8x512xf32> to vector<1x8x512xf32>
    tpu.vector_store %arg10[%c6_142, %c0_143, %c0_144], %383 {strides = array<i32>} : memref<8x8x512xf32, #tpu.memory_space<vmem>>, vector<1x8x512xf32>,
    %384 = vector.extract_strided_slice %327 {offsets = [7, 0, 0], sizes = [1, 8, 512], strides = [1, 1, 1]} : vector<8x8x512xf32> to vector<1x8x512xf32>
    %385 = vector.shape_cast %384 : vector<1x8x512xf32> to vector<8x512xf32>
    %386 = vector.extract_strided_slice %327 {offsets = [0, 0, 0], sizes = [1, 8, 512], strides = [1, 1, 1]} : vector<8x8x512xf32> to vector<1x8x512xf32>
    %387 = vector.shape_cast %386 : vector<1x8x512xf32> to vector<8x512xf32>
    %388 = arith.select %8, %385, %387 : vector<8x512xi1>, vector<8x512xf32>
    %c7_145 = arith.constant 7 : index
    %c0_146 = arith.constant 0 : index
    %c0_147 = arith.constant 0 : index
    %389 = vector.load %arg10[%c7_145, %c0_146, %c0_147] : memref<8x8x512xf32, #tpu.memory_space<vmem>>, vector<1x8x512xf32>
    %390 = vector.shape_cast %389 : vector<1x8x512xf32> to vector<8x512xf32>
    %391 = vector.shape_cast %388 : vector<8x512xf32> to vector<1x8x512xf32>
    tpu.vector_store %arg10[%c7_145, %c0_146, %c0_147], %391 {strides = array<i32>} : memref<8x8x512xf32, #tpu.memory_space<vmem>>, vector<1x8x512xf32>,
    %c1_i32_148 = arith.constant 1 : i32
    %392 = tpu.memref_slice %arg14[%c1_i32_148] : memref<2x!tpu.dma_semaphore, #tpu.memory_space<semaphore_mem>> -> memref<1x!tpu.dma_semaphore, #tpu.memory_space<semaphore_mem>>
    %393 = tpu.memref_squeeze %392 : memref<1x!tpu.dma_semaphore, #tpu.memory_space<semaphore_mem>> -> memref<!tpu.dma_semaphore, #tpu.memory_space<semaphore_mem>>
    tpu.wait_dma2 semaphore(%393 : memref<!tpu.dma_semaphore, #tpu.memory_space<semaphore_mem>>) src(%arg8 : memref<128x512xbf16, #tpu.memory_space<any>>) dst(%arg13 : memref<128x512xbf16, #tpu.memory_space<vmem>>)
    %c0_149 = arith.constant 0 : index
    %c0_150 = arith.constant 0 : index
    %394 = vector.load %arg13[%c0_149, %c0_150] : memref<128x512xbf16, #tpu.memory_space<vmem>>, vector<128x512xbf16>
    %cst_151 = arith.constant 0.000000e+00 : f32
    %395 = vector.broadcast %cst_151 : f32 to vector<8x128xf32>
    %cst_152 = arith.constant 0.000000e+00 : f32
    %396 = vector.broadcast %cst_152 : f32 to vector<8x128xf32>
    %c0_153 = arith.constant 0 : index
    %c0_154 = arith.constant 0 : index
    %c0_155 = arith.constant 0 : index
    %397 = vector.load %arg10[%c0_153, %c0_154, %c0_155] : memref<8x8x512xf32, #tpu.memory_space<vmem>>, vector<1x8x512xf32>
    %398 = vector.shape_cast %397 : vector<1x8x512xf32> to vector<8x512xf32>
    %399 = arith.truncf %395 : vector<8x128xf32> to vector<8x128xbf16>
    %cst_156 = arith.constant dense<0.000000e+00> : vector<8x512xf32>
    %400 = tpu.matmul %399, %394, %cst_156 {dimension_numbers = #tpu.dot_dimension_numbers<[1], [0], [0], [1], [0, 0, 1, 1], [], []>} : vector<8x128xbf16>, vector<128x512xbf16>, vector<8x512xf32> -> vector<8x512xf32>
    %401 = arith.addf %398, %400 : vector<8x512xf32>
    %402 = vector.extract_strided_slice %401 {offsets = [0, 0], sizes = [8, 384], strides = [1, 1]} : vector<8x512xf32> to vector<8x384xf32>
    %403 = arith.negf %402 : vector<8x384xf32>
    %404 = math.exp %403 : vector<8x384xf32>
    %cst_157 = arith.constant 1.000000e+00 : f32
    %405 = vector.broadcast %cst_157 : f32 to vector<8x384xf32>
    %406 = arith.addf %405, %404 : vector<8x384xf32>
    %407 = arith.divf %405, %406 : vector<8x384xf32>
    %408 = vector.extract_strided_slice %401 {offsets = [0, 384], sizes = [8, 128], strides = [1, 1]} : vector<8x512xf32> to vector<8x128xf32>
    %409 = math.tanh %408 : vector<8x128xf32>
    %410 = vector.extract_strided_slice %407 {offsets = [0, 128], sizes = [8, 128], strides = [1, 1]} : vector<8x384xf32> to vector<8x128xf32>
    %411 = arith.mulf %410, %396 : vector<8x128xf32>
    %412 = vector.extract_strided_slice %407 {offsets = [0, 0], sizes = [8, 128], strides = [1, 1]} : vector<8x384xf32> to vector<8x128xf32>
    %413 = arith.mulf %412, %409 : vector<8x128xf32>
    %414 = arith.addf %411, %413 : vector<8x128xf32>
    %415 = vector.extract_strided_slice %407 {offsets = [0, 256], sizes = [8, 128], strides = [1, 1]} : vector<8x384xf32> to vector<8x128xf32>
    %416 = math.tanh %414 : vector<8x128xf32>
    %417 = arith.mulf %415, %416 : vector<8x128xf32>
    %c1_158 = arith.constant 1 : index
    %c0_159 = arith.constant 0 : index
    %c0_160 = arith.constant 0 : index
    %418 = vector.load %arg10[%c1_158, %c0_159, %c0_160] : memref<8x8x512xf32, #tpu.memory_space<vmem>>, vector<1x8x512xf32>
    %419 = vector.shape_cast %418 : vector<1x8x512xf32> to vector<8x512xf32>
    %420 = arith.truncf %417 : vector<8x128xf32> to vector<8x128xbf16>
    %cst_161 = arith.constant dense<0.000000e+00> : vector<8x512xf32>
    %421 = tpu.matmul %420, %394, %cst_161 {dimension_numbers = #tpu.dot_dimension_numbers<[1], [0], [0], [1], [0, 0, 1, 1], [], []>} : vector<8x128xbf16>, vector<128x512xbf16>, vector<8x512xf32> -> vector<8x512xf32>
    %422 = arith.addf %419, %421 : vector<8x512xf32>
    %423 = vector.extract_strided_slice %422 {offsets = [0, 0], sizes = [8, 384], strides = [1, 1]} : vector<8x512xf32> to vector<8x384xf32>
    %424 = arith.negf %423 : vector<8x384xf32>
    %425 = math.exp %424 : vector<8x384xf32>
    %cst_162 = arith.constant 1.000000e+00 : f32
    %426 = vector.broadcast %cst_162 : f32 to vector<8x384xf32>
    %427 = arith.addf %426, %425 : vector<8x384xf32>
    %428 = arith.divf %426, %427 : vector<8x384xf32>
    %429 = vector.extract_strided_slice %422 {offsets = [0, 384], sizes = [8, 128], strides = [1, 1]} : vector<8x512xf32> to vector<8x128xf32>
    %430 = math.tanh %429 : vector<8x128xf32>
    %431 = vector.extract_strided_slice %428 {offsets = [0, 128], sizes = [8, 128], strides = [1, 1]} : vector<8x384xf32> to vector<8x128xf32>
    %432 = arith.mulf %431, %414 : vector<8x128xf32>
    %433 = vector.extract_strided_slice %428 {offsets = [0, 0], sizes = [8, 128], strides = [1, 1]} : vector<8x384xf32> to vector<8x128xf32>
    %434 = arith.mulf %433, %430 : vector<8x128xf32>
    %435 = arith.addf %432, %434 : vector<8x128xf32>
    %436 = vector.extract_strided_slice %428 {offsets = [0, 256], sizes = [8, 128], strides = [1, 1]} : vector<8x384xf32> to vector<8x128xf32>
    %437 = math.tanh %435 : vector<8x128xf32>
    %438 = arith.mulf %436, %437 : vector<8x128xf32>
    %c2_163 = arith.constant 2 : index
    %c0_164 = arith.constant 0 : index
    %c0_165 = arith.constant 0 : index
    %439 = vector.load %arg10[%c2_163, %c0_164, %c0_165] : memref<8x8x512xf32, #tpu.memory_space<vmem>>, vector<1x8x512xf32>
    %440 = vector.shape_cast %439 : vector<1x8x512xf32> to vector<8x512xf32>
    %441 = arith.truncf %438 : vector<8x128xf32> to vector<8x128xbf16>
    %cst_166 = arith.constant dense<0.000000e+00> : vector<8x512xf32>
    %442 = tpu.matmul %441, %394, %cst_166 {dimension_numbers = #tpu.dot_dimension_numbers<[1], [0], [0], [1], [0, 0, 1, 1], [], []>} : vector<8x128xbf16>, vector<128x512xbf16>, vector<8x512xf32> -> vector<8x512xf32>
    %443 = arith.addf %440, %442 : vector<8x512xf32>
    %444 = vector.extract_strided_slice %443 {offsets = [0, 0], sizes = [8, 384], strides = [1, 1]} : vector<8x512xf32> to vector<8x384xf32>
    %445 = arith.negf %444 : vector<8x384xf32>
    %446 = math.exp %445 : vector<8x384xf32>
    %cst_167 = arith.constant 1.000000e+00 : f32
    %447 = vector.broadcast %cst_167 : f32 to vector<8x384xf32>
    %448 = arith.addf %447, %446 : vector<8x384xf32>
    %449 = arith.divf %447, %448 : vector<8x384xf32>
    %450 = vector.extract_strided_slice %443 {offsets = [0, 384], sizes = [8, 128], strides = [1, 1]} : vector<8x512xf32> to vector<8x128xf32>
    %451 = math.tanh %450 : vector<8x128xf32>
    %452 = vector.extract_strided_slice %449 {offsets = [0, 128], sizes = [8, 128], strides = [1, 1]} : vector<8x384xf32> to vector<8x128xf32>
    %453 = arith.mulf %452, %435 : vector<8x128xf32>
    %454 = vector.extract_strided_slice %449 {offsets = [0, 0], sizes = [8, 128], strides = [1, 1]} : vector<8x384xf32> to vector<8x128xf32>
    %455 = arith.mulf %454, %451 : vector<8x128xf32>
    %456 = arith.addf %453, %455 : vector<8x128xf32>
    %457 = vector.extract_strided_slice %449 {offsets = [0, 256], sizes = [8, 128], strides = [1, 1]} : vector<8x384xf32> to vector<8x128xf32>
    %458 = math.tanh %456 : vector<8x128xf32>
    %459 = arith.mulf %457, %458 : vector<8x128xf32>
    %c3_168 = arith.constant 3 : index
    %c0_169 = arith.constant 0 : index
    %c0_170 = arith.constant 0 : index
    %460 = vector.load %arg10[%c3_168, %c0_169, %c0_170] : memref<8x8x512xf32, #tpu.memory_space<vmem>>, vector<1x8x512xf32>
    %461 = vector.shape_cast %460 : vector<1x8x512xf32> to vector<8x512xf32>
    %462 = arith.truncf %459 : vector<8x128xf32> to vector<8x128xbf16>
    %cst_171 = arith.constant dense<0.000000e+00> : vector<8x512xf32>
    %463 = tpu.matmul %462, %394, %cst_171 {dimension_numbers = #tpu.dot_dimension_numbers<[1], [0], [0], [1], [0, 0, 1, 1], [], []>} : vector<8x128xbf16>, vector<128x512xbf16>, vector<8x512xf32> -> vector<8x512xf32>
    %464 = arith.addf %461, %463 : vector<8x512xf32>
    %465 = vector.extract_strided_slice %464 {offsets = [0, 0], sizes = [8, 384], strides = [1, 1]} : vector<8x512xf32> to vector<8x384xf32>
    %466 = arith.negf %465 : vector<8x384xf32>
    %467 = math.exp %466 : vector<8x384xf32>
    %cst_172 = arith.constant 1.000000e+00 : f32
    %468 = vector.broadcast %cst_172 : f32 to vector<8x384xf32>
    %469 = arith.addf %468, %467 : vector<8x384xf32>
    %470 = arith.divf %468, %469 : vector<8x384xf32>
    %471 = vector.extract_strided_slice %464 {offsets = [0, 384], sizes = [8, 128], strides = [1, 1]} : vector<8x512xf32> to vector<8x128xf32>
    %472 = math.tanh %471 : vector<8x128xf32>
    %473 = vector.extract_strided_slice %470 {offsets = [0, 128], sizes = [8, 128], strides = [1, 1]} : vector<8x384xf32> to vector<8x128xf32>
    %474 = arith.mulf %473, %456 : vector<8x128xf32>
    %475 = vector.extract_strided_slice %470 {offsets = [0, 0], sizes = [8, 128], strides = [1, 1]} : vector<8x384xf32> to vector<8x128xf32>
    %476 = arith.mulf %475, %472 : vector<8x128xf32>
    %477 = arith.addf %474, %476 : vector<8x128xf32>
    %478 = vector.extract_strided_slice %470 {offsets = [0, 256], sizes = [8, 128], strides = [1, 1]} : vector<8x384xf32> to vector<8x128xf32>
    %479 = math.tanh %477 : vector<8x128xf32>
    %480 = arith.mulf %478, %479 : vector<8x128xf32>
    %c4_173 = arith.constant 4 : index
    %c0_174 = arith.constant 0 : index
    %c0_175 = arith.constant 0 : index
    %481 = vector.load %arg10[%c4_173, %c0_174, %c0_175] : memref<8x8x512xf32, #tpu.memory_space<vmem>>, vector<1x8x512xf32>
    %482 = vector.shape_cast %481 : vector<1x8x512xf32> to vector<8x512xf32>
    %483 = arith.truncf %480 : vector<8x128xf32> to vector<8x128xbf16>
    %cst_176 = arith.constant dense<0.000000e+00> : vector<8x512xf32>
    %484 = tpu.matmul %483, %394, %cst_176 {dimension_numbers = #tpu.dot_dimension_numbers<[1], [0], [0], [1], [0, 0, 1, 1], [], []>} : vector<8x128xbf16>, vector<128x512xbf16>, vector<8x512xf32> -> vector<8x512xf32>
    %485 = arith.addf %482, %484 : vector<8x512xf32>
    %486 = vector.extract_strided_slice %485 {offsets = [0, 0], sizes = [8, 384], strides = [1, 1]} : vector<8x512xf32> to vector<8x384xf32>
    %487 = arith.negf %486 : vector<8x384xf32>
    %488 = math.exp %487 : vector<8x384xf32>
    %cst_177 = arith.constant 1.000000e+00 : f32
    %489 = vector.broadcast %cst_177 : f32 to vector<8x384xf32>
    %490 = arith.addf %489, %488 : vector<8x384xf32>
    %491 = arith.divf %489, %490 : vector<8x384xf32>
    %492 = vector.extract_strided_slice %485 {offsets = [0, 384], sizes = [8, 128], strides = [1, 1]} : vector<8x512xf32> to vector<8x128xf32>
    %493 = math.tanh %492 : vector<8x128xf32>
    %494 = vector.extract_strided_slice %491 {offsets = [0, 128], sizes = [8, 128], strides = [1, 1]} : vector<8x384xf32> to vector<8x128xf32>
    %495 = arith.mulf %494, %477 : vector<8x128xf32>
    %496 = vector.extract_strided_slice %491 {offsets = [0, 0], sizes = [8, 128], strides = [1, 1]} : vector<8x384xf32> to vector<8x128xf32>
    %497 = arith.mulf %496, %493 : vector<8x128xf32>
    %498 = arith.addf %495, %497 : vector<8x128xf32>
    %499 = vector.extract_strided_slice %491 {offsets = [0, 256], sizes = [8, 128], strides = [1, 1]} : vector<8x384xf32> to vector<8x128xf32>
    %500 = math.tanh %498 : vector<8x128xf32>
    %501 = arith.mulf %499, %500 : vector<8x128xf32>
    %c5_178 = arith.constant 5 : index
    %c0_179 = arith.constant 0 : index
    %c0_180 = arith.constant 0 : index
    %502 = vector.load %arg10[%c5_178, %c0_179, %c0_180] : memref<8x8x512xf32, #tpu.memory_space<vmem>>, vector<1x8x512xf32>
    %503 = vector.shape_cast %502 : vector<1x8x512xf32> to vector<8x512xf32>
    %504 = arith.truncf %501 : vector<8x128xf32> to vector<8x128xbf16>
    %cst_181 = arith.constant dense<0.000000e+00> : vector<8x512xf32>
    %505 = tpu.matmul %504, %394, %cst_181 {dimension_numbers = #tpu.dot_dimension_numbers<[1], [0], [0], [1], [0, 0, 1, 1], [], []>} : vector<8x128xbf16>, vector<128x512xbf16>, vector<8x512xf32> -> vector<8x512xf32>
    %506 = arith.addf %503, %505 : vector<8x512xf32>
    %507 = vector.extract_strided_slice %506 {offsets = [0, 0], sizes = [8, 384], strides = [1, 1]} : vector<8x512xf32> to vector<8x384xf32>
    %508 = arith.negf %507 : vector<8x384xf32>
    %509 = math.exp %508 : vector<8x384xf32>
    %cst_182 = arith.constant 1.000000e+00 : f32
    %510 = vector.broadcast %cst_182 : f32 to vector<8x384xf32>
    %511 = arith.addf %510, %509 : vector<8x384xf32>
    %512 = arith.divf %510, %511 : vector<8x384xf32>
    %513 = vector.extract_strided_slice %506 {offsets = [0, 384], sizes = [8, 128], strides = [1, 1]} : vector<8x512xf32> to vector<8x128xf32>
    %514 = math.tanh %513 : vector<8x128xf32>
    %515 = vector.extract_strided_slice %512 {offsets = [0, 128], sizes = [8, 128], strides = [1, 1]} : vector<8x384xf32> to vector<8x128xf32>
    %516 = arith.mulf %515, %498 : vector<8x128xf32>
    %517 = vector.extract_strided_slice %512 {offsets = [0, 0], sizes = [8, 128], strides = [1, 1]} : vector<8x384xf32> to vector<8x128xf32>
    %518 = arith.mulf %517, %514 : vector<8x128xf32>
    %519 = arith.addf %516, %518 : vector<8x128xf32>
    %520 = vector.extract_strided_slice %512 {offsets = [0, 256], sizes = [8, 128], strides = [1, 1]} : vector<8x384xf32> to vector<8x128xf32>
    %521 = math.tanh %519 : vector<8x128xf32>
    %522 = arith.mulf %520, %521 : vector<8x128xf32>
    %c6_183 = arith.constant 6 : index
    %c0_184 = arith.constant 0 : index
    %c0_185 = arith.constant 0 : index
    %523 = vector.load %arg10[%c6_183, %c0_184, %c0_185] : memref<8x8x512xf32, #tpu.memory_space<vmem>>, vector<1x8x512xf32>
    %524 = vector.shape_cast %523 : vector<1x8x512xf32> to vector<8x512xf32>
    %525 = arith.truncf %522 : vector<8x128xf32> to vector<8x128xbf16>
    %cst_186 = arith.constant dense<0.000000e+00> : vector<8x512xf32>
    %526 = tpu.matmul %525, %394, %cst_186 {dimension_numbers = #tpu.dot_dimension_numbers<[1], [0], [0], [1], [0, 0, 1, 1], [], []>} : vector<8x128xbf16>, vector<128x512xbf16>, vector<8x512xf32> -> vector<8x512xf32>
    %527 = arith.addf %524, %526 : vector<8x512xf32>
    %528 = vector.extract_strided_slice %527 {offsets = [0, 0], sizes = [8, 384], strides = [1, 1]} : vector<8x512xf32> to vector<8x384xf32>
    %529 = arith.negf %528 : vector<8x384xf32>
    %530 = math.exp %529 : vector<8x384xf32>
    %cst_187 = arith.constant 1.000000e+00 : f32
    %531 = vector.broadcast %cst_187 : f32 to vector<8x384xf32>
    %532 = arith.addf %531, %530 : vector<8x384xf32>
    %533 = arith.divf %531, %532 : vector<8x384xf32>
    %534 = vector.extract_strided_slice %527 {offsets = [0, 384], sizes = [8, 128], strides = [1, 1]} : vector<8x512xf32> to vector<8x128xf32>
    %535 = math.tanh %534 : vector<8x128xf32>
    %536 = vector.extract_strided_slice %533 {offsets = [0, 128], sizes = [8, 128], strides = [1, 1]} : vector<8x384xf32> to vector<8x128xf32>
    %537 = arith.mulf %536, %519 : vector<8x128xf32>
    %538 = vector.extract_strided_slice %533 {offsets = [0, 0], sizes = [8, 128], strides = [1, 1]} : vector<8x384xf32> to vector<8x128xf32>
    %539 = arith.mulf %538, %535 : vector<8x128xf32>
    %540 = arith.addf %537, %539 : vector<8x128xf32>
    %541 = vector.extract_strided_slice %533 {offsets = [0, 256], sizes = [8, 128], strides = [1, 1]} : vector<8x384xf32> to vector<8x128xf32>
    %542 = math.tanh %540 : vector<8x128xf32>
    %543 = arith.mulf %541, %542 : vector<8x128xf32>
    %c7_188 = arith.constant 7 : index
    %c0_189 = arith.constant 0 : index
    %c0_190 = arith.constant 0 : index
    %544 = vector.load %arg10[%c7_188, %c0_189, %c0_190] : memref<8x8x512xf32, #tpu.memory_space<vmem>>, vector<1x8x512xf32>
    %545 = vector.shape_cast %544 : vector<1x8x512xf32> to vector<8x512xf32>
    %546 = arith.truncf %543 : vector<8x128xf32> to vector<8x128xbf16>
    %cst_191 = arith.constant dense<0.000000e+00> : vector<8x512xf32>
    %547 = tpu.matmul %546, %394, %cst_191 {dimension_numbers = #tpu.dot_dimension_numbers<[1], [0], [0], [1], [0, 0, 1, 1], [], []>} : vector<8x128xbf16>, vector<128x512xbf16>, vector<8x512xf32> -> vector<8x512xf32>
    %548 = arith.addf %545, %547 : vector<8x512xf32>
    %549 = vector.extract_strided_slice %548 {offsets = [0, 0], sizes = [8, 384], strides = [1, 1]} : vector<8x512xf32> to vector<8x384xf32>
    %550 = arith.negf %549 : vector<8x384xf32>
    %551 = math.exp %550 : vector<8x384xf32>
    %cst_192 = arith.constant 1.000000e+00 : f32
    %552 = vector.broadcast %cst_192 : f32 to vector<8x384xf32>
    %553 = arith.addf %552, %551 : vector<8x384xf32>
    %554 = arith.divf %552, %553 : vector<8x384xf32>
    %555 = vector.extract_strided_slice %548 {offsets = [0, 384], sizes = [8, 128], strides = [1, 1]} : vector<8x512xf32> to vector<8x128xf32>
    %556 = math.tanh %555 : vector<8x128xf32>
    %557 = vector.extract_strided_slice %554 {offsets = [0, 128], sizes = [8, 128], strides = [1, 1]} : vector<8x384xf32> to vector<8x128xf32>
    %558 = arith.mulf %557, %540 : vector<8x128xf32>
    %559 = vector.extract_strided_slice %554 {offsets = [0, 0], sizes = [8, 128], strides = [1, 1]} : vector<8x384xf32> to vector<8x128xf32>
    %560 = arith.mulf %559, %556 : vector<8x128xf32>
    %561 = arith.addf %558, %560 : vector<8x128xf32>
    %562 = vector.extract_strided_slice %554 {offsets = [0, 256], sizes = [8, 128], strides = [1, 1]} : vector<8x384xf32> to vector<8x128xf32>
    %563 = math.tanh %561 : vector<8x128xf32>
    %564 = arith.mulf %562, %563 : vector<8x128xf32>
    %565 = arith.addf %308, %564 : vector<8x128xf32>
    %c0_193 = arith.constant 0 : index
    %c0_194 = arith.constant 0 : index
    %566 = vector.load %arg5[%c0_193, %c0_194] : memref<128x14xf32, #tpu.memory_space<vmem>>, vector<128x14xf32>
    %cst_195 = arith.constant dense<0.000000e+00> : vector<8x14xf32>
    %567 = tpu.matmul %565, %566, %cst_195 {dimension_numbers = #tpu.dot_dimension_numbers<[1], [0], [0], [1], [0, 0, 1, 1], [], []>} : vector<8x128xf32>, vector<128x14xf32>, vector<8x14xf32> -> vector<8x14xf32>
    %c0_196 = arith.constant 0 : index
    %c0_197 = arith.constant 0 : index
    %568 = vector.load %arg6[%c0_196, %c0_197] : memref<1x14xf32, #tpu.memory_space<vmem>>, vector<1x14xf32>
    %569 = vector.broadcast %568 : vector<1x14xf32> to vector<8x14xf32>
    %570 = arith.addf %567, %569 : vector<8x14xf32>
    %cst_198 = arith.constant dense<0xFF800000> : vector<8xf32>
    %571 = vector.multi_reduction <maximumf>, %570, %cst_198 [1] : vector<8x14xf32> to vector<8xf32>
    %572 = vector.shape_cast %571 : vector<8xf32> to vector<8x1xf32>
    %573 = vector.broadcast %572 : vector<8x1xf32> to vector<8x14xf32>
    %574 = arith.subf %570, %573 : vector<8x14xf32>
    %575 = math.exp %574 : vector<8x14xf32>
    %cst_199 = arith.constant dense<0.000000e+00> : vector<8xf32>
    %576 = vector.multi_reduction <add>, %575, %cst_199 [1] : vector<8x14xf32> to vector<8xf32>
    %577 = vector.shape_cast %576 : vector<8xf32> to vector<8x1xf32>
    %578 = vector.broadcast %577 : vector<8x1xf32> to vector<8x14xf32>
    %579 = arith.divf %575, %578 : vector<8x14xf32>
    %c0_200 = arith.constant 0 : index
    %c0_201 = arith.constant 0 : index
    %580 = vector.load %arg9[%c0_200, %c0_201] : memref<8x14xf32, #tpu.memory_space<vmem>>, vector<8x14xf32>
    tpu.vector_store %arg9[%c0_200, %c0_201], %579 {strides = array<i32>} : memref<8x14xf32, #tpu.memory_space<vmem>>, vector<8x14xf32>,
    return
  }
}

</mosaic_0001>

<bundles_post_ra>
// kernel: clip_lstm_forward.1
= control target key start
LH: loop header
LB: loop body
LE: loop exit
PB: predicated region body
PF: predicated region fallthrough
CT: control target
= control target key end

     0   :  { %14 = vsyncpa [#allocation8], 0  ;;  %s5884_s12 = smov [#allocation7]   ;;  %s5885_s14 = smov 256   ;;  %s8042_s0 = inlined_call_operand.vmem [shape: f32[8,8,512], index: 0, kind: input, shape index: {}]   ;;  %s8043_s1 = inlined_call_operand.hbm [shape: bf16[512,512], index: 1, kind: input, shape index: {}]   ;;  %s8044_s2 = inlined_call_operand.vmem [shape: bf16[128,512], index: 2, kind: input, shape index: {}]   ;;  %s8045_s3 = inlined_call_operand.vmem [shape: f32[1,512], index: 3, kind: input, shape index: {}]   ;;  %s8046_s4 = inlined_call_operand.vmem [shape: f32[1,512], index: 4, kind: input, shape index: {}]   ;;  %s8047_s5 = inlined_call_operand.vmem [shape: f32[128,14], index: 5, kind: input, shape index: {}]   ;;  %s8048_s6 = inlined_call_operand.vmem [shape: f32[1,14], index: 6, kind: input, shape index: {}]   ;;  %s8049_s7 = inlined_call_operand.vmem [shape: bf16[128,512], index: 7, kind: input, shape index: {}]   ;;  %s8050_s8 = inlined_call_operand.hbm [shape: bf16[128,512], index: 8, kind: input, shape index: {}]   ;;  %s8051_s9 = inlined_call_operand.vmem [shape: f32[8,14], index: 9, kind: output, shape index: {}]  }
   0x1   :  { %s21_s11 = sshll.u32 %s8043_s1, 4  ;;  %s23_s13 = sshll.u32 %s5884_s12, 4  ;;  %s22_s11 = int_to_ptr.hbm [resolvable:$true] %s21_s11  ;;  %s24_s13 = int_to_ptr.vmem [resolvable:$true] %s23_s13 }
   0x2   :  { %s5886_s15 = smov 16  }
   0x3   :  { %29 = dma.hbm_to_vmem [thread:$0]  %s22_s11, 16384, %s24_s13, [#allocation8], %s5885_s14, %s5885_s14, %s5886_s15  }
   0x4   :  { %5878 = dma.done.wait [#allocation8], 16384  }
   0x5   :  { %5879 = vsyncadd [#allocation8], 4294950912  ;;  %v55_v0 = vld [vmem:[%s8049_s7] sm:$0xff]  ;;  %v57_v1 = vld [vmem:[%s8049_s7 + $0x8] sm:$0xff] }
   0x6   :  { %v59_v2 = vld [vmem:[%s8049_s7 + $0x10] sm:$0xff]  ;;  %56 = vst [vmem:[#allocation4] sm:$0xff] %v55_v0  ;;  %v61_v3 = vld [vmem:[%s8049_s7 + $0x18] sm:$0xff]  ;;  %v63_v4 = vld [vmem:[%s8049_s7 + $0x20] sm:$0xff] }
   0x7   :  { %58 = vst [vmem:[#allocation4 + $0x8] sm:$0xff] %v57_v1  ;;  %v65_v5 = vld [vmem:[%s8049_s7 + $0x28] sm:$0xff]  ;;  %v67_v6 = vld [vmem:[%s8049_s7 + $0x30] sm:$0xff]  ;;  %v69_v7 = vld [vmem:[%s8049_s7 + $0x38] sm:$0xff] }
   0x8   :  { %60 = vst [vmem:[#allocation4 + $0x10] sm:$0xff] %v59_v2  ;;  %v71_v8 = vld [vmem:[%s8049_s7 + $0x40] sm:$0xff]  ;;  %v73_v9 = vld [vmem:[%s8049_s7 + $0x48] sm:$0xff]  ;;  %v75_v10 = vld [vmem:[%s8049_s7 + $0x50] sm:$0xff] }
   0x9   :  { %62 = vst [vmem:[#allocation4 + $0x18] sm:$0xff] %v61_v3  ;;  %v77_v11 = vld [vmem:[%s8049_s7 + $0x58] sm:$0xff]  ;;  %v79_v12 = vld [vmem:[%s8049_s7 + $0x60] sm:$0xff]  ;;  %v81_v13 = vld [vmem:[%s8049_s7 + $0x68] sm:$0xff] }
   0xa   :  { %64 = vst [vmem:[#allocation4 + $0x20] sm:$0xff] %v63_v4  ;;  %v83_v14 = vld [vmem:[%s8049_s7 + $0x70] sm:$0xff]  ;;  %v85_v15 = vld [vmem:[%s8049_s7 + $0x78] sm:$0xff]  ;;  %v87_v16 = vld [vmem:[%s8049_s7 + $0x80] sm:$0xff] }
   0xb   :  { %66 = vst [vmem:[#allocation4 + $0x28] sm:$0xff] %v65_v5  ;;  %v89_v17 = vld [vmem:[%s8049_s7 + $0x88] sm:$0xff]  ;;  %v91_v18 = vld [vmem:[%s8049_s7 + $0x90] sm:$0xff]  ;;  %v93_v19 = vld [vmem:[%s8049_s7 + $0x98] sm:$0xff] }
   0xc   :  { %68 = vst [vmem:[#allocation4 + $0x30] sm:$0xff] %v67_v6  ;;  %v95_v20 = vld [vmem:[%s8049_s7 + $0xa0] sm:$0xff]  ;;  %v97_v21 = vld [vmem:[%s8049_s7 + $0xa8] sm:$0xff]  ;;  %v99_v22 = vld [vmem:[%s8049_s7 + $0xb0] sm:$0xff] }
   0xd   :  { %70 = vst [vmem:[#allocation4 + $0x38] sm:$0xff] %v69_v7  ;;  %v101_v23 = vld [vmem:[%s8049_s7 + $0xb8] sm:$0xff]  ;;  %v103_v24 = vld [vmem:[%s8049_s7 + $0xc0] sm:$0xff]  ;;  %v105_v25 = vld [vmem:[%s8049_s7 + $0xc8] sm:$0xff] }
   0xe   :  { %72 = vst [vmem:[#allocation4 + $0x40] sm:$0xff] %v71_v8  ;;  %v107_v26 = vld [vmem:[%s8049_s7 + $0xd0] sm:$0xff]  ;;  %v109_v27 = vld [vmem:[%s8049_s7 + $0xd8] sm:$0xff]  ;;  %v111_v28 = vld [vmem:[%s8049_s7 + $0xe0] sm:$0xff] }
   0xf   :  { %74 = vst [vmem:[#allocation4 + $0x48] sm:$0xff] %v73_v9  ;;  %v113_v29 = vld [vmem:[%s8049_s7 + $0xe8] sm:$0xff]  ;;  %v115_v30 = vld [vmem:[%s8049_s7 + $0xf0] sm:$0xff]  ;;  %v117_v31 = vld [vmem:[%s8049_s7 + $0xf8] sm:$0xff] }
  0x10   :  { %76 = vst [vmem:[#allocation4 + $0x50] sm:$0xff] %v75_v10  ;;  %v4507_v32 = vld [vmem:[#allocation7 + $0xe0] sm:$0xf]  ;;  %v5369_v33 = vld [vmem:[#allocation7 + $0xec] sm:$0xf0] }
  0x11   :  { %78 = vst [vmem:[#allocation4 + $0x58] sm:$0xff] %v77_v11  ;;  %v4635_v34 = vld [vmem:[#allocation7 + $0x1e0] sm:$0xf]  ;;  %v4508_v35 = vor.u32 %v5369_v33, %v4507_v32  ;;  %v5401_v36 = vld [vmem:[#allocation7 + $0x1ec] sm:$0xf0] }
  0x12   :  { %80 = vst [vmem:[#allocation4 + $0x60] sm:$0xff] %v79_v12  ;;  %v4763_v37 = vld [vmem:[#allocation7 + $0x2e0] sm:$0xf]  ;;  %v5433_v38 = vld [vmem:[#allocation7 + $0x2ec] sm:$0xf0]  ;;  %v4636_v39 = vor.u32 %v5401_v36, %v4635_v34 }
  0x13   :  { %82 = vst [vmem:[#allocation4 + $0x68] sm:$0xff] %v81_v13  ;;  %v4764_v40 = vor.u32 %v5433_v38, %v4763_v37  ;;  %v4891_v41 = vld [vmem:[#allocation7 + $0x3e0] sm:$0xf]  ;;  %v5465_v42 = vld [vmem:[#allocation7 + $0x3ec] sm:$0xf0]  ;;  %978 = vmatpush.bf16.msra.mxu0 %v4508_v35 }
  0x14   :  { %84 = vst [vmem:[#allocation4 + $0x70] sm:$0xff] %v83_v14  ;;  %v4491_v43 = vld [vmem:[#allocation7 + $0xc0] sm:$0xf]  ;;  %v4892_v44 = vor.u32 %v5465_v42, %v4891_v41  ;;  %v5365_v45 = vld [vmem:[#allocation7 + $0xcc] sm:$0xf0]  ;;  %1007 = vmatpush.bf16.msra.mxu1 %v4636_v39 }
  0x15   :  { %86 = vst [vmem:[#allocation4 + $0x78] sm:$0xff] %v85_v15  ;;  %v4619_v46 = vld [vmem:[#allocation7 + $0x1c0] sm:$0xf]  ;;  %v5397_v47 = vld [vmem:[#allocation7 + $0x1cc] sm:$0xf0]  ;;  %1036 = vmatpush.bf16.msra.mxu2 %v4764_v40  ;;  %v4492_v48 = vor.u32 %v5365_v45, %v4491_v43 }
  0x16   :  { %88 = vst [vmem:[#allocation4 + $0x80] sm:$0xff] %v87_v16  ;;  %v4620_v49 = vor.u32 %v5397_v47, %v4619_v46  ;;  %v4747_v50 = vld [vmem:[#allocation7 + $0x2c0] sm:$0xf]  ;;  %v5429_v51 = vld [vmem:[#allocation7 + $0x2cc] sm:$0xf0]  ;;  %1065 = vmatpush.bf16.msra.mxu3 %v4892_v44 }
  0x17   :  { %90 = vst [vmem:[#allocation4 + $0x88] sm:$0xff] %v89_v17  ;;  %v4875_v52 = vld [vmem:[#allocation7 + $0x3c0] sm:$0xf]  ;;  %v4748_v53 = vor.u32 %v5429_v51, %v4747_v50  ;;  %v5461_v54 = vld [vmem:[#allocation7 + $0x3cc] sm:$0xf0]  ;;  %979 = vmatpush.bf16.msra.mxu0 %v4492_v48 }
  0x18   :  { %92 = vst [vmem:[#allocation4 + $0x90] sm:$0xff] %v91_v18  ;;  %v4475_v55 = vld [vmem:[#allocation7 + $0xa0] sm:$0xf]  ;;  %v5361_v56 = vld [vmem:[#allocation7 + $0xac] sm:$0xf0]  ;;  %v4876_v57 = vor.u32 %v5461_v54, %v4875_v52  ;;  %1008 = vmatpush.bf16.msra.mxu1 %v4620_v49 }
  0x19   :  { %94 = vst [vmem:[#allocation4 + $0x98] sm:$0xff] %v93_v19  ;;  %v4603_v58 = vld [vmem:[#allocation7 + $0x1a0] sm:$0xf]  ;;  %v5393_v59 = vld [vmem:[#allocation7 + $0x1ac] sm:$0xf0]  ;;  %v4476_v61 = vor.u32 %v5361_v56, %v4475_v55  ;;  %1037 = vmatpush.bf16.msra.mxu2 %v4748_v53 }
  0x1a   :  { %96 = vst [vmem:[#allocation4 + $0xa0] sm:$0xff] %v95_v20  ;;  %v4731_v60 = vld [vmem:[#allocation7 + $0x2a0] sm:$0xf]  ;;  %v5425_v62 = vld [vmem:[#allocation7 + $0x2ac] sm:$0xf0]  ;;  %v4604_v1 = vor.u32 %v5393_v59, %v4603_v58  ;;  %1066 = vmatpush.bf16.msra.mxu3 %v4876_v57 }
  0x1b   :  { %98 = vst [vmem:[#allocation4 + $0xa8] sm:$0xff] %v97_v21  ;;  %v4859_v63 = vld [vmem:[#allocation7 + $0x3a0] sm:$0xf]  ;;  %v5457_v0 = vld [vmem:[#allocation7 + $0x3ac] sm:$0xf0]  ;;  %v4732_v2 = vor.u32 %v5425_v62, %v4731_v60  ;;  %980 = vmatpush.bf16.msra.mxu0 %v4476_v61  ;;  %v153_v62 = vld [vmem:[%s8042_s0 + $0x8] sm:$0xff] }
  0x1c   :  { %100 = vst [vmem:[#allocation4 + $0xb0] sm:$0xff] %v99_v22  ;;  %v4459_v3 = vld [vmem:[#allocation7 + $0x80] sm:$0xf]  ;;  %v5357_v4 = vld [vmem:[#allocation7 + $0x8c] sm:$0xf0]  ;;  %v4860_v6 = vor.u32 %v5457_v0, %v4859_v63  ;;  %1009 = vmatpush.bf16.msra.mxu1 %v4604_v1  ;;  %v157_v63 = vld [vmem:[%s8042_s0 + $0x28] sm:$0xff] }
  0x1d   :  { %102 = vst [vmem:[#allocation4 + $0xb8] sm:$0xff] %v101_v23  ;;  %v4587_v5 = vld [vmem:[#allocation7 + $0x180] sm:$0xf]  ;;  %v5389_v7 = vld [vmem:[#allocation7 + $0x18c] sm:$0xf0]  ;;  %v4460_v12 = vor.u32 %v5357_v4, %v4459_v3  ;;  %1038 = vmatpush.bf16.msra.mxu2 %v4732_v2 }
  0x1e   :  { %104 = vst [vmem:[#allocation4 + $0xc0] sm:$0xff] %v103_v24  ;;  %v4715_v8 = vld [vmem:[#allocation7 + $0x280] sm:$0xf]  ;;  %v5421_v9 = vld [vmem:[#allocation7 + $0x28c] sm:$0xf0]  ;;  %v4588_v13 = vor.u32 %v5389_v7, %v4587_v5  ;;  %1067 = vmatpush.bf16.msra.mxu3 %v4860_v6 }
  0x1f   :  { %106 = vst [vmem:[#allocation4 + $0xc8] sm:$0xff] %v105_v25  ;;  %v4843_v10 = vld [vmem:[#allocation7 + $0x380] sm:$0xf]  ;;  %v5453_v11 = vld [vmem:[#allocation7 + $0x38c] sm:$0xf0]  ;;  %v4716_v14 = vor.u32 %v5421_v9, %v4715_v8  ;;  %981 = vmatpush.bf16.msra.mxu0 %v4460_v12  ;;  %v155_v9 = vld [vmem:[%s8042_s0 + $0x18] sm:$0xff] }
  0x20   :  { %108 = vst [vmem:[#allocation4 + $0xd0] sm:$0xff] %v107_v26  ;;  %v4443_v15 = vld [vmem:[#allocation7 + $0x60] sm:$0xf]  ;;  %v5353_v16 = vld [vmem:[#allocation7 + $0x6c] sm:$0xf0]  ;;  %v4844_v18 = vor.u32 %v5453_v11, %v4843_v10  ;;  %1010 = vmatpush.bf16.msra.mxu1 %v4588_v13  ;;  %v159_v10 = vld [vmem:[%s8042_s0 + $0x38] sm:$0xff] }
  0x21   :  { %110 = vst [vmem:[#allocation4 + $0xd8] sm:$0xff] %v109_v27  ;;  %v4571_v17 = vld [vmem:[#allocation7 + $0x160] sm:$0xf]  ;;  %v5385_v19 = vld [vmem:[#allocation7 + $0x16c] sm:$0xf0]  ;;  %v4444_v24 = vor.u32 %v5353_v16, %v4443_v15  ;;  %1039 = vmatpush.bf16.msra.mxu2 %v4716_v14 }
  0x22   :  { %112 = vst [vmem:[#allocation4 + $0xe0] sm:$0xff] %v111_v28  ;;  %v4699_v20 = vld [vmem:[#allocation7 + $0x260] sm:$0xf]  ;;  %v5417_v21 = vld [vmem:[#allocation7 + $0x26c] sm:$0xf0]  ;;  %v4572_v25 = vor.u32 %v5385_v19, %v4571_v17  ;;  %1068 = vmatpush.bf16.msra.mxu3 %v4844_v18 }
  0x23   :  { %114 = vst [vmem:[#allocation4 + $0xe8] sm:$0xff] %v113_v29  ;;  %v4827_v22 = vld [vmem:[#allocation7 + $0x360] sm:$0xf]  ;;  %v5449_v23 = vld [vmem:[#allocation7 + $0x36c] sm:$0xf0]  ;;  %v4700_v26 = vor.u32 %v5417_v21, %v4699_v20  ;;  %982 = vmatpush.bf16.msra.mxu0 %v4444_v24  ;;  %v6064_v21 = vpack.c.bf16 %v157_v63, %v153_v62 }
  0x24   :  { %116 = vst [vmem:[#allocation4 + $0xf0] sm:$0xff] %v115_v30  ;;  %v4427_v27 = vld [vmem:[#allocation7 + $0x40] sm:$0xf]  ;;  %v5349_v28 = vld [vmem:[#allocation7 + $0x4c] sm:$0xf0]  ;;  %v4828_v30 = vor.u32 %v5449_v23, %v4827_v22  ;;  %1011 = vmatpush.bf16.msra.mxu1 %v4572_v25  ;;  %v6068_v25 = vpack.c.bf16 %v159_v10, %v155_v9 }
  0x25   :  { %118 = vst [vmem:[#allocation4 + $0xf8] sm:$0xff] %v117_v31  ;;  %v4555_v29 = vld [vmem:[#allocation7 + $0x140] sm:$0xf]  ;;  %v5381_v31 = vld [vmem:[#allocation7 + $0x14c] sm:$0xf0]  ;;  %v4428_v36 = vor.u32 %v5349_v28, %v4427_v27  ;;  %1040 = vmatpush.bf16.msra.mxu2 %v4700_v26 }
  0x26   :  { %v4683_v32 = vld [vmem:[#allocation7 + $0x240] sm:$0xf]  ;;  %v5413_v33 = vld [vmem:[#allocation7 + $0x24c] sm:$0xf0]  ;;  %v4556_v37 = vor.u32 %v5381_v31, %v4555_v29  ;;  %1069 = vmatpush.bf16.msra.mxu3 %v4828_v30  ;;  %v5367_v0 = vld [vmem:[#allocation7 + $0xe4] sm:$0xf] }
  0x27   :  { %v4811_v34 = vld [vmem:[#allocation7 + $0x340] sm:$0xf]  ;;  %v5445_v35 = vld [vmem:[#allocation7 + $0x34c] sm:$0xf0]  ;;  %v4684_v38 = vor.u32 %v5413_v33, %v4683_v32  ;;  %983 = vmatpush.bf16.msra.mxu0 %v4428_v36  ;;  %v4509_v1 = vld [vmem:[#allocation7 + $0xf0] sm:$0xf0] }
  0x28   :  { %v4411_v39 = vld [vmem:[#allocation7 + $0x20] sm:$0xf]  ;;  %v5345_v40 = vld [vmem:[#allocation7 + $0x2c] sm:$0xf0]  ;;  %v4812_v42 = vor.u32 %v5445_v35, %v4811_v34  ;;  %1012 = vmatpush.bf16.msra.mxu1 %v4556_v37  ;;  %v5399_v4 = vld [vmem:[#allocation7 + $0x1e4] sm:$0xf]  ;;  %v4512_v12 = vor.u32 %v5367_v0, %v4509_v1 }
  0x29   :  { %v4539_v41 = vld [vmem:[#allocation7 + $0x120] sm:$0xf]  ;;  %v5377_v43 = vld [vmem:[#allocation7 + $0x12c] sm:$0xf0]  ;;  %v4412_v49 = vor.u32 %v5345_v40, %v4411_v39  ;;  %1041 = vmatpush.bf16.msra.mxu2 %v4684_v38  ;;  %v4637_v5 = vld [vmem:[#allocation7 + $0x1f0] sm:$0xf0] }
  0x2a   :  { %v4667_v44 = vld [vmem:[#allocation7 + $0x220] sm:$0xf]  ;;  %v5409_v45 = vld [vmem:[#allocation7 + $0x22c] sm:$0xf0]  ;;  %v4540_v53 = vor.u32 %v5377_v43, %v4539_v41  ;;  %1070 = vmatpush.bf16.msra.mxu3 %v4812_v42  ;;  %v5431_v13 = vld [vmem:[#allocation7 + $0x2e4] sm:$0xf]  ;;  %v4640_v17 = vor.u32 %v5399_v4, %v4637_v5 }
  0x2b   :  { %v4795_v46 = vld [vmem:[#allocation7 + $0x320] sm:$0xf]  ;;  %v5441_v47 = vld [vmem:[#allocation7 + $0x32c] sm:$0xf0]  ;;  %v4668_v54 = vor.u32 %v5409_v45, %v4667_v44  ;;  %984 = vmatpush.bf16.msra.mxu0 %v4412_v49  ;;  %v4765_v14 = vld [vmem:[#allocation7 + $0x2f0] sm:$0xf0] }
  0x2c   :  { %v4395_v48 = vld [vmem:[#allocation7] sm:$0xf]  ;;  %v5341_v50 = vld [vmem:[#allocation7 + $0xc] sm:$0xf0]  ;;  %v4796_v58 = vor.u32 %v5441_v47, %v4795_v46  ;;  %1013 = vmatpush.bf16.msra.mxu1 %v4540_v53  ;;  %v5363_v15 = vld [vmem:[#allocation7 + $0xc4] sm:$0xf]  ;;  %v4768_v26 = vor.u32 %v5431_v13, %v4765_v14 }
  0x2d   :  { %v4523_v51 = vld [vmem:[#allocation7 + $0x100] sm:$0xf]  ;;  %v5373_v52 = vld [vmem:[#allocation7 + $0x10c] sm:$0xf0]  ;;  %v4396_v2 = vor.u32 %v5341_v50, %v4395_v48  ;;  %1042 = vmatpush.bf16.msra.mxu2 %v4668_v54  ;;  %v4493_v18 = vld [vmem:[#allocation7 + $0xd0] sm:$0xf0] }
  0x2e   :  { %v4651_v55 = vld [vmem:[#allocation7 + $0x200] sm:$0xf]  ;;  %v5405_v56 = vld [vmem:[#allocation7 + $0x20c] sm:$0xf0]  ;;  %v4524_v6 = vor.u32 %v5373_v52, %v4523_v51  ;;  %1071 = vmatpush.bf16.msra.mxu3 %v4796_v58  ;;  %v5463_v19 = vld [vmem:[#allocation7 + $0x3e4] sm:$0xf]  ;;  %v4496_v27 = vor.u32 %v5363_v15, %v4493_v18 }
  0x2f   :  { %v4779_v57 = vld [vmem:[#allocation7 + $0x300] sm:$0xf]  ;;  %v5437_v59 = vld [vmem:[#allocation7 + $0x30c] sm:$0xf0]  ;;  %v4652_v7 = vor.u32 %v5405_v56, %v4651_v55  ;;  %v4893_v20 = vld [vmem:[#allocation7 + $0x3f0] sm:$0xf0]  ;;  %985 = vmatpush.bf16.msra.mxu0 %v4396_v2 }
  0x30   :  { %v152_v60 = vld [vmem:[%s8042_s0] sm:$0xff]  ;;  %v154_v3 = vld [vmem:[%s8042_s0 + $0x10] sm:$0xff]  ;;  %v4780_v11 = vor.u32 %v5437_v59, %v4779_v57  ;;  %1014 = vmatpush.bf16.msra.mxu1 %v4524_v6  ;;  %v4896_v30 = vor.u32 %v5463_v19, %v4893_v20  ;;  %v161_v58 = vld [vmem:[%s8042_s0 + $0x48] sm:$0xff] }
  0x31   :  { %v156_v61 = vld [vmem:[%s8042_s0 + $0x20] sm:$0xff]  ;;  %v158_v8 = vld [vmem:[%s8042_s0 + $0x30] sm:$0xff]  ;;  %1043 = vmatpush.bf16.msra.mxu2 %v4652_v7  ;;  %v165_v59 = vld [vmem:[%s8042_s0 + $0x68] sm:$0xff] }
  0x32   :  { %v6062_v16 = vpack.c.bf16 %v156_v61, %v152_v60  ;;  %v6066_v22 = vpack.c.bf16 %v158_v8, %v154_v3  ;;  %v5395_v23 = vld [vmem:[#allocation7 + $0x1c4] sm:$0xf]  ;;  %v4621_v24 = vld [vmem:[#allocation7 + $0x1d0] sm:$0xf0]  ;;  %1072 = vmatpush.bf16.msra.mxu3 %v4780_v11  ;;  %v163_v4 = vld [vmem:[%s8042_s0 + $0x58] sm:$0xff] }
  0x33   :  { %1094 = vmatpush.bf16.msrb.mxu0 %v4512_v12  ;;  %v5427_v28 = vld [vmem:[#allocation7 + $0x2c4] sm:$0xf]  ;;  %v4749_v29 = vld [vmem:[#allocation7 + $0x2d0] sm:$0xf0]  ;;  %v4624_v32 = vor.u32 %v5395_v23, %v4621_v24  ;;  %1015 = vmatmul.bf16.vlgmr.msra.gmra.mxu1 %v6064_v21  ;;  %v167_v5 = vld [vmem:[%s8042_s0 + $0x78] sm:$0xff] }
  0x34   :  { %v5359_v31 = vld [vmem:[#allocation7 + $0xa4] sm:$0xf]  ;;  %986 = vmatmul.bf16.vlgmr.msra.gmra.mxu0 %v6062_v16  ;;  %1123 = vmatpush.bf16.msrb.mxu1 %v4640_v17  ;;  %v4477_v33 = vld [vmem:[#allocation7 + $0xb0] sm:$0xf0]  ;;  %v4752_v38 = vor.u32 %v5427_v28, %v4749_v29 }
  0x35   :  { %v5459_v34 = vld [vmem:[#allocation7 + $0x3c4] sm:$0xf]  ;;  %v4877_v35 = vld [vmem:[#allocation7 + $0x3d0] sm:$0xf0]  ;;  %1044 = vmatmul.bf16.vlgmr.msra.gmra.mxu2 %v6066_v22  ;;  %1073 = vmatmul.bf16.vlgmr.msra.gmra.mxu3 %v6068_v25  ;;  %v4480_v39 = vor.u32 %v5359_v31, %v4477_v33 }
  0x36   :  { %v5391_v36 = vld [vmem:[#allocation7 + $0x1a4] sm:$0xf]  ;;  %v4605_v37 = vld [vmem:[#allocation7 + $0x1b0] sm:$0xf0]  ;;  %1152 = vmatpush.bf16.msrb.mxu2 %v4768_v26  ;;  %1181 = vmatpush.bf16.msrb.mxu3 %v4896_v30  ;;  %v4880_v42 = vor.u32 %v5459_v34, %v4877_v35 }
  0x37   :  { %1095 = vmatpush.bf16.msrb.mxu0 %v4496_v27  ;;  %v5423_v40 = vld [vmem:[#allocation7 + $0x2a4] sm:$0xf]  ;;  %v4733_v41 = vld [vmem:[#allocation7 + $0x2b0] sm:$0xf0]  ;;  %v4608_v44 = vor.u32 %v5391_v36, %v4605_v37 }
  0x38   :  { %v5355_v43 = vld [vmem:[#allocation7 + $0x84] sm:$0xf]  ;;  %1124 = vmatpush.bf16.msrb.mxu1 %v4624_v32  ;;  %v4461_v45 = vld [vmem:[#allocation7 + $0x90] sm:$0xf0]  ;;  %v4736_v50 = vor.u32 %v5423_v40, %v4733_v41 }
  0x39   :  { %v5455_v46 = vld [vmem:[#allocation7 + $0x3a4] sm:$0xf]  ;;  %v4861_v47 = vld [vmem:[#allocation7 + $0x3b0] sm:$0xf0]  ;;  %v4464_v53 = vor.u32 %v5355_v43, %v4461_v45 }
  0x3a   :  { %v5387_v48 = vld [vmem:[#allocation7 + $0x184] sm:$0xf]  ;;  %v4589_v49 = vld [vmem:[#allocation7 + $0x190] sm:$0xf0]  ;;  %1153 = vmatpush.bf16.msrb.mxu2 %v4752_v38  ;;  %1182 = vmatpush.bf16.msrb.mxu3 %v4880_v42  ;;  %v4864_v56 = vor.u32 %v5455_v46, %v4861_v47 }
  0x3b   :  { %v160_v51 = vld [vmem:[%s8042_s0 + $0x40] sm:$0xff]  ;;  %1096 = vmatpush.bf16.msrb.mxu0 %v4480_v39  ;;  %v4717_v55 = vld [vmem:[#allocation7 + $0x290] sm:$0xf0]  ;;  %v4592_v61 = vor.u32 %v5387_v48, %v4589_v49 }
  0x3c   :  { %v164_v52 = vld [vmem:[%s8042_s0 + $0x60] sm:$0xff]  ;;  %v162_v60 = vld [vmem:[%s8042_s0 + $0x50] sm:$0xff]  ;;  %1125 = vmatpush.bf16.msrb.mxu1 %v4608_v44 }
  0x3d   :  { %v5419_v54 = vld [vmem:[#allocation7 + $0x284] sm:$0xf]  ;;  %v4445_v62 = vld [vmem:[#allocation7 + $0x70] sm:$0xf0] }
  0x3e   :  { %v5351_v57 = vld [vmem:[#allocation7 + $0x64] sm:$0xf]  ;;  %v4845_v0 = vld [vmem:[#allocation7 + $0x390] sm:$0xf0]  ;;  %1154 = vmatpush.bf16.msrb.mxu2 %v4736_v50  ;;  %v4720_v6 = vor.u32 %v5419_v54, %v4717_v55  ;;  %1183 = vmatpush.bf16.msrb.mxu3 %v4864_v56 }
  0x3f   :  { %v5451_v63 = vld [vmem:[#allocation7 + $0x384] sm:$0xf]  ;;  %v166_v1 = vld [vmem:[%s8042_s0 + $0x70] sm:$0xff]  ;;  %1097 = vmatpush.bf16.msrb.mxu0 %v4464_v53  ;;  %v4448_v8 = vor.u32 %v5351_v57, %v4445_v62 }
  0x40   :  { %v5383_v2 = vld [vmem:[#allocation7 + $0x164] sm:$0xf]  ;;  %v4573_v3 = vld [vmem:[#allocation7 + $0x170] sm:$0xf0]  ;;  %v4848_v10 = vor.u32 %v5451_v63, %v4845_v0 }
  0x41   :  { %v5415_v7 = vld [vmem:[#allocation7 + $0x264] sm:$0xf]  ;;  %v4701_v9 = vld [vmem:[#allocation7 + $0x270] sm:$0xf0] }
  0x42   :  { %v5347_v11 = vld [vmem:[#allocation7 + $0x44] sm:$0xf] }
  0x43   :  { %124 = vsyncadd [#allocation6], 4096  ;;  %v6098_v12 = vpack.c.bf16 %v164_v52, %v160_v51  ;;  %1126 = vmatpush.bf16.msrb.mxu1 %v4592_v61  ;;  %v4576_v13 = vor.u32 %v5383_v2, %v4573_v3  ;;  %v4429_v14 = vld [vmem:[#allocation7 + $0x50] sm:$0xf0]  ;;  %v5447_v15 = vld [vmem:[#allocation7 + $0x364] sm:$0xf]  ;;  %v6100_v18 = vpack.c.bf16 %v165_v59, %v161_v58  ;;  %v6102_v19 = vpack.c.bf16 %v166_v1, %v162_v60 }
  0x44   :  { %v4829_v17 = vld [vmem:[#allocation7 + $0x370] sm:$0xf0]  ;;  %v5379_v20 = vld [vmem:[#allocation7 + $0x144] sm:$0xf]  ;;  %v6104_v24 = vpack.c.bf16 %v167_v5, %v163_v4  ;;  %1155 = vmatpush.bf16.msrb.mxu2 %v4720_v6  ;;  %v4704_v26 = vor.u32 %v5415_v7, %v4701_v9  ;;  %1098 = vmatpush.bf16.msrb.mxu0 %v4448_v8  ;;  %v4432_v27 = vor.u32 %v5347_v11, %v4429_v14  ;;  %v169_v60 = vld [vmem:[%s8042_s0 + $0x88] sm:$0xff]  ;;  %s133_s19 = sshll.u32 %s8050_s8, 4  ;;  %s134_s19 = int_to_ptr.hbm [resolvable:$true] %s133_s19 }
  0x45   :  { %v4557_v23 = vld [vmem:[#allocation7 + $0x150] sm:$0xf0]  ;;  %1184 = vmatpush.bf16.msrb.mxu3 %v4848_v10  ;;  %v5411_v28 = vld [vmem:[#allocation7 + $0x244] sm:$0xf]  ;;  %v4832_v30 = vor.u32 %v5447_v15, %v4829_v17  ;;  %991 = vmatmul.bf16.gmra.mxu0 %v6098_v12  ;;  %v173_v61 = vld [vmem:[%s8042_s0 + $0xa8] sm:$0xff]  ;;  %s5888_s20 = smov [#allocation5]  }
  0x46   :  { %v4685_v29 = vld [vmem:[#allocation7 + $0x250] sm:$0xf0]  ;;  %v4560_v31 = vor.u32 %v5379_v20, %v4557_v23  ;;  %1020 = vmatmul.bf16.gmra.mxu1 %v6100_v18  ;;  %1049 = vmatmul.bf16.gmra.mxu2 %v6102_v19  ;;  %v5343_v33 = vld [vmem:[#allocation7 + $0x24] sm:$0xf]  ;;  %v171_v1 = vld [vmem:[%s8042_s0 + $0x98] sm:$0xff]  ;;  %v6136_v5 = vpack.c.bf16 %v173_v61, %v169_v60  ;;  %s135_s21 = sshll.u32 %s5888_s20, 4  ;;  %s136_s21 = int_to_ptr.vmem [resolvable:$true] %s135_s21 }
  0x47   :  { %1127 = vmatpush.bf16.msrb.mxu1 %v4576_v13  ;;  %1078 = vmatmul.bf16.gmra.mxu3 %v6104_v24  ;;  %v4688_v32 = vor.u32 %v5411_v28, %v4685_v29  ;;  %v4413_v34 = vld [vmem:[#allocation7 + $0x30] sm:$0xf0]  ;;  %v5375_v35 = vld [vmem:[#allocation7 + $0x124] sm:$0xf]  ;;  %v175_v2 = vld [vmem:[%s8042_s0 + $0xb8] sm:$0xff] }
  0x48   :  { %1156 = vmatpush.bf16.msrb.mxu2 %v4704_v26  ;;  %1099 = vmatpush.bf16.msrb.mxu0 %v4432_v27  ;;  %v4416_v36 = vor.u32 %v5343_v33, %v4413_v34  ;;  %v4541_v37 = vld [vmem:[#allocation7 + $0x130] sm:$0xf0]  ;;  %v5407_v38 = vld [vmem:[#allocation7 + $0x224] sm:$0xf]  ;;  %v6140_v7 = vpack.c.bf16 %v175_v2, %v171_v1  ;;  %v4515_v8 = vld [vmem:[#allocation7 + $0xe8] sm:$0xf] }
  0x49   :  { %1185 = vmatpush.bf16.msrb.mxu3 %v4832_v30  ;;  %v4669_v39 = vld [vmem:[#allocation7 + $0x230] sm:$0xf0]  ;;  %v4544_v40 = vor.u32 %v5375_v35, %v4541_v37  ;;  %v5443_v41 = vld [vmem:[#allocation7 + $0x344] sm:$0xf]  ;;  %v5370_v9 = vld [vmem:[#allocation7 + $0xf4] sm:$0xf0] }
  0x4a   :  { %v4813_v42 = vld [vmem:[#allocation7 + $0x350] sm:$0xf0]  ;;  %v5339_v43 = vld [vmem:[#allocation7 + $0x4] sm:$0xf]  ;;  %v4672_v48 = vor.u32 %v5407_v38, %v4669_v39  ;;  %v4643_v10 = vld [vmem:[#allocation7 + $0x1e8] sm:$0xf]  ;;  %v4516_v11 = vor.u32 %v5370_v9, %v4515_v8 }
  0x4b   :  { %1128 = vmatpush.bf16.msrb.mxu1 %v4560_v31  ;;  %v4816_v44 = vor.u32 %v5443_v41, %v4813_v42  ;;  %v4397_v45 = vld [vmem:[#allocation7 + $0x10] sm:$0xf0]  ;;  %v5371_v46 = vld [vmem:[#allocation7 + $0x104] sm:$0xf]  ;;  %v5402_v13 = vld [vmem:[#allocation7 + $0x1f4] sm:$0xf0] }
  0x4c   :  { %v4525_v47 = vld [vmem:[#allocation7 + $0x110] sm:$0xf0]  ;;  %1157 = vmatpush.bf16.msrb.mxu2 %v4688_v32  ;;  %v5439_v49 = vld [vmem:[#allocation7 + $0x324] sm:$0xf]  ;;  %1100 = vmatpush.bf16.msrb.mxu0 %v4416_v36  ;;  %v4400_v51 = vor.u32 %v5339_v43, %v4397_v45  ;;  %v4771_v14 = vld [vmem:[#allocation7 + $0x2e8] sm:$0xf]  ;;  %v4644_v17 = vor.u32 %v5402_v13, %v4643_v10 }
  0x4d   :  { %v4797_v50 = vld [vmem:[#allocation7 + $0x330] sm:$0xf0]  ;;  %1186 = vmatpush.bf16.msrb.mxu3 %v4816_v44  ;;  %v5403_v53 = vld [vmem:[#allocation7 + $0x204] sm:$0xf]  ;;  %v4528_v55 = vor.u32 %v5371_v46, %v4525_v47  ;;  %v5434_v15 = vld [vmem:[#allocation7 + $0x2f4] sm:$0xf0] }
  0x4e   :  { %v4800_v52 = vor.u32 %v5439_v49, %v4797_v50  ;;  %v4653_v54 = vld [vmem:[#allocation7 + $0x210] sm:$0xf0]  ;;  %v5435_v56 = vld [vmem:[#allocation7 + $0x304] sm:$0xf]  ;;  %v4772_v20 = vor.u32 %v5434_v15, %v4771_v14  ;;  %v4499_v23 = vld [vmem:[#allocation7 + $0xc8] sm:$0xf] }
  0x4f   :  { %1129 = vmatpush.bf16.msrb.mxu1 %v4544_v40  ;;  %v4781_v57 = vld [vmem:[#allocation7 + $0x310] sm:$0xf0]  ;;  %v168_v58 = vld [vmem:[%s8042_s0 + $0x80] sm:$0xff]  ;;  %v4656_v0 = vor.u32 %v5403_v53, %v4653_v54  ;;  %v5366_v26 = vld [vmem:[#allocation7 + $0xd4] sm:$0xf0] }
  0x50   :  { %v172_v59 = vld [vmem:[%s8042_s0 + $0xa0] sm:$0xff]  ;;  %v170_v62 = vld [vmem:[%s8042_s0 + $0x90] sm:$0xff]  ;;  %1158 = vmatpush.bf16.msrb.mxu2 %v4672_v48  ;;  %1101 = vmatpush.bf16.msrb.mxu0 %v4400_v51  ;;  %v4784_v3 = vor.u32 %v5435_v56, %v4781_v57  ;;  %v4627_v27 = vld [vmem:[#allocation7 + $0x1c8] sm:$0xf]  ;;  %v4500_v28 = vor.u32 %v5366_v26, %v4499_v23  ;;  %138 = dma.hbm_to_vmem [thread:$0]  %s134_s19, 4096, %s136_s21, [#allocation6 + $0x1] }
  0x51   :  { %v174_v63 = vld [vmem:[%s8042_s0 + $0xb0] sm:$0xff]  ;;  %1187 = vmatpush.bf16.msrb.mxu3 %v4800_v52  ;;  %v6134_v4 = vpack.c.bf16 %v172_v59, %v168_v58  ;;  %v5398_v29 = vld [vmem:[#allocation7 + $0x1d4] sm:$0xf0]  ;;  %v4755_v30 = vld [vmem:[#allocation7 + $0x2c8] sm:$0xf] }
  0x52   :  { %v6138_v6 = vpack.c.bf16 %v174_v63, %v170_v62  ;;  %v5430_v31 = vld [vmem:[#allocation7 + $0x2d4] sm:$0xf0]  ;;  %v4628_v32 = vor.u32 %v5398_v29, %v4627_v27  ;;  %v4899_v34 = vld [vmem:[#allocation7 + $0x3e8] sm:$0xf]  ;;  %v176_v37 = vld [vmem:[%s8042_s0 + $0xc0] sm:$0xff] }
  0x53   :  { %1130 = vmatpush.bf16.msrb.mxu1 %v4528_v55  ;;  %v4756_v33 = vor.u32 %v5430_v31, %v4755_v30  ;;  %v5466_v35 = vld [vmem:[#allocation7 + $0x3f4] sm:$0xf0]  ;;  %v180_v38 = vld [vmem:[%s8042_s0 + $0xe0] sm:$0xff]  ;;  %v177_v39 = vld [vmem:[%s8042_s0 + $0xc8] sm:$0xff] }
  0x54   :  { %1159 = vmatpush.bf16.msrb.mxu2 %v4656_v0  ;;  %1210 = vmatpush.bf16.msra.mxu0 %v4516_v11  ;;  %v4900_v36 = vor.u32 %v5466_v35, %v4899_v34  ;;  %v181_v40 = vld [vmem:[%s8042_s0 + $0xe8] sm:$0xff]  ;;  %v178_v41 = vld [vmem:[%s8042_s0 + $0xd0] sm:$0xff]  ;;  %v179_v43 = vld [vmem:[%s8042_s0 + $0xd8] sm:$0xff]  ;;  %v6170_v45 = vpack.c.bf16 %v180_v38, %v176_v37 }
  0x55   :  { %1188 = vmatpush.bf16.msrb.mxu3 %v4784_v3  ;;  %996 = vmatmul.bf16.gmra.mxu0 %v6134_v4  ;;  %v182_v42 = vld [vmem:[%s8042_s0 + $0xf0] sm:$0xff]  ;;  %v183_v44 = vld [vmem:[%s8042_s0 + $0xf8] sm:$0xff]  ;;  %v6172_v46 = vpack.c.bf16 %v181_v40, %v177_v39  ;;  %v4483_v49 = vld [vmem:[#allocation7 + $0xa8] sm:$0xf] }
  0x56   :  { %1025 = vmatmul.bf16.gmra.mxu1 %v6136_v5  ;;  %1054 = vmatmul.bf16.gmra.mxu2 %v6138_v6  ;;  %v6174_v47 = vpack.c.bf16 %v182_v42, %v178_v41  ;;  %v6176_v48 = vpack.c.bf16 %v183_v44, %v179_v43  ;;  %v5362_v50 = vld [vmem:[#allocation7 + $0xb4] sm:$0xf0]  ;;  %v4611_v51 = vld [vmem:[#allocation7 + $0x1a8] sm:$0xf] }
  0x57   :  { %1083 = vmatmul.bf16.gmra.mxu3 %v6140_v7  ;;  %1239 = vmatpush.bf16.msra.mxu1 %v4644_v17  ;;  %v4484_v52 = vor.u32 %v5362_v50, %v4483_v49  ;;  %v5394_v53 = vld [vmem:[#allocation7 + $0x1b4] sm:$0xf0]  ;;  %v4739_v54 = vld [vmem:[#allocation7 + $0x2a8] sm:$0xf] }
  0x58   :  { %1268 = vmatpush.bf16.msra.mxu2 %v4772_v20  ;;  %1211 = vmatpush.bf16.msra.mxu0 %v4500_v28  ;;  %v5426_v55 = vld [vmem:[#allocation7 + $0x2b4] sm:$0xf0]  ;;  %v4612_v56 = vor.u32 %v5394_v53, %v4611_v51  ;;  %v4883_v58 = vld [vmem:[#allocation7 + $0x3c8] sm:$0xf] }
  0x59   :  { %1297 = vmatpush.bf16.msra.mxu3 %v4900_v36  ;;  %v4740_v57 = vor.u32 %v5426_v55, %v4739_v54  ;;  %v5462_v59 = vld [vmem:[#allocation7 + $0x3d4] sm:$0xf0]  ;;  %v4467_v60 = vld [vmem:[#allocation7 + $0x88] sm:$0xf] }
  0x5a   :  { %v4884_v61 = vor.u32 %v5462_v59, %v4883_v58  ;;  %v5358_v62 = vld [vmem:[#allocation7 + $0x94] sm:$0xf0]  ;;  %v4595_v63 = vld [vmem:[#allocation7 + $0x188] sm:$0xf] }
  0x5b   :  { %1240 = vmatpush.bf16.msra.mxu1 %v4628_v32  ;;  %v5390_v0 = vld [vmem:[#allocation7 + $0x194] sm:$0xf0]  ;;  %v4468_v1 = vor.u32 %v5358_v62, %v4467_v60  ;;  %v4723_v3 = vld [vmem:[#allocation7 + $0x288] sm:$0xf] }
  0x5c   :  { %1269 = vmatpush.bf16.msra.mxu2 %v4756_v33  ;;  %1212 = vmatpush.bf16.msra.mxu0 %v4484_v52  ;;  %v4596_v2 = vor.u32 %v5390_v0, %v4595_v63  ;;  %v5422_v8 = vld [vmem:[#allocation7 + $0x294] sm:$0xf0]  ;;  %v4867_v9 = vld [vmem:[#allocation7 + $0x3a8] sm:$0xf] }
  0x5d   :  { %1298 = vmatpush.bf16.msra.mxu3 %v4884_v61  ;;  %v4724_v10 = vor.u32 %v5422_v8, %v4723_v3  ;;  %v5458_v11 = vld [vmem:[#allocation7 + $0x3b4] sm:$0xf0]  ;;  %v4451_v14 = vld [vmem:[#allocation7 + $0x68] sm:$0xf] }
  0x5e   :  { %v4868_v13 = vor.u32 %v5458_v11, %v4867_v9  ;;  %v5354_v15 = vld [vmem:[#allocation7 + $0x74] sm:$0xf0]  ;;  %v4579_v17 = vld [vmem:[#allocation7 + $0x168] sm:$0xf] }
  0x5f   :  { %1241 = vmatpush.bf16.msra.mxu1 %v4612_v56  ;;  %v4452_v20 = vor.u32 %v5354_v15, %v4451_v14  ;;  %v5386_v23 = vld [vmem:[#allocation7 + $0x174] sm:$0xf0]  ;;  %v4707_v26 = vld [vmem:[#allocation7 + $0x268] sm:$0xf] }
  0x60   :  { %1270 = vmatpush.bf16.msra.mxu2 %v4740_v57  ;;  %1213 = vmatpush.bf16.msra.mxu0 %v4468_v1  ;;  %v5418_v27 = vld [vmem:[#allocation7 + $0x274] sm:$0xf0]  ;;  %v4580_v28 = vor.u32 %v5386_v23, %v4579_v17  ;;  %v4851_v30 = vld [vmem:[#allocation7 + $0x388] sm:$0xf]  ;;  %v4517_v23 = vld [vmem:[#allocation7 + $0xf8] sm:$0xf0] }
  0x61   :  { %1299 = vmatpush.bf16.msra.mxu3 %v4868_v13  ;;  %v4708_v29 = vor.u32 %v5418_v27, %v4707_v26  ;;  %v5454_v31 = vld [vmem:[#allocation7 + $0x394] sm:$0xf0]  ;;  %v4435_v32 = vld [vmem:[#allocation7 + $0x48] sm:$0xf]  ;;  %v5400_v26 = vld [vmem:[#allocation7 + $0x1ec] sm:$0xf] }
  0x62   :  { %v4852_v33 = vor.u32 %v5454_v31, %v4851_v30  ;;  %v5350_v34 = vld [vmem:[#allocation7 + $0x54] sm:$0xf0]  ;;  %v4563_v35 = vld [vmem:[#allocation7 + $0x148] sm:$0xf]  ;;  %v5432_v30 = vld [vmem:[#allocation7 + $0x2ec] sm:$0xf] }
  0x63   :  { %1242 = vmatpush.bf16.msra.mxu1 %v4596_v2  ;;  %v5382_v36 = vld [vmem:[#allocation7 + $0x154] sm:$0xf0]  ;;  %v4436_v37 = vor.u32 %v5350_v34, %v4435_v32  ;;  %v4691_v39 = vld [vmem:[#allocation7 + $0x248] sm:$0xf]  ;;  %v4773_v31 = vld [vmem:[#allocation7 + $0x2f8] sm:$0xf0] }
  0x64   :  { %1271 = vmatpush.bf16.msra.mxu2 %v4724_v10  ;;  %1214 = vmatpush.bf16.msra.mxu0 %v4452_v20  ;;  %v4564_v38 = vor.u32 %v5382_v36, %v4563_v35  ;;  %v5414_v40 = vld [vmem:[#allocation7 + $0x254] sm:$0xf0]  ;;  %v4835_v41 = vld [vmem:[#allocation7 + $0x368] sm:$0xf]  ;;  %v5368_v20 = vld [vmem:[#allocation7 + $0xec] sm:$0xf] }
  0x65   :  { %1001 = vmatmul.bf16.gmra.mxu0 %v6170_v45  ;;  %1300 = vmatpush.bf16.msra.mxu3 %v4852_v33  ;;  %v4692_v42 = vor.u32 %v5414_v40, %v4691_v39  ;;  %v5450_v43 = vld [vmem:[#allocation7 + $0x374] sm:$0xf0]  ;;  %v4419_v49 = vld [vmem:[#allocation7 + $0x28] sm:$0xf]  ;;  %v4520_v27 = vor.u32 %v5368_v20, %v4517_v23  ;;  %v5364_v32 = vld [vmem:[#allocation7 + $0xcc] sm:$0xf]  ;;  %v4776_v33 = vor.u32 %v5432_v30, %v4773_v31 }
  0x66   :  { %1030 = vmatmul.bf16.gmra.mxu1 %v6172_v46  ;;  %1059 = vmatmul.bf16.gmra.mxu2 %v6174_v47  ;;  %v4836_v44 = vor.u32 %v5450_v43, %v4835_v41  ;;  %v5346_v50 = vld [vmem:[#allocation7 + $0x34] sm:$0xf0]  ;;  %v4547_v51 = vld [vmem:[#allocation7 + $0x128] sm:$0xf]  ;;  %v4501_v34 = vld [vmem:[#allocation7 + $0xd8] sm:$0xf0] }
  0x67   :  { %1088 = vmatmul.bf16.gmra.mxu3 %v6176_v48  ;;  %1243 = vmatpush.bf16.msra.mxu1 %v4580_v28  ;;  %v4420_v52 = vor.u32 %v5346_v50, %v4419_v49  ;;  %v5378_v53 = vld [vmem:[#allocation7 + $0x134] sm:$0xf0]  ;;  %v4675_v54 = vld [vmem:[#allocation7 + $0x228] sm:$0xf]  ;;  %v4645_v28 = vld [vmem:[#allocation7 + $0x1f8] sm:$0xf0] }
  0x68   :  { %1272 = vmatpush.bf16.msra.mxu2 %v4708_v29  ;;  %1215 = vmatpush.bf16.msra.mxu0 %v4436_v37  ;;  %v5410_v55 = vld [vmem:[#allocation7 + $0x234] sm:$0xf0]  ;;  %v4548_v56 = vor.u32 %v5378_v53, %v4547_v51  ;;  %v4819_v58 = vld [vmem:[#allocation7 + $0x348] sm:$0xf]  ;;  %v4648_v29 = vor.u32 %v5400_v26, %v4645_v28  ;;  %v5396_v35 = vld [vmem:[#allocation7 + $0x1cc] sm:$0xf]  ;;  %v4504_v37 = vor.u32 %v5364_v32, %v4501_v34 }
  0x69   :  { %1301 = vmatpush.bf16.msra.mxu3 %v4836_v44  ;;  %v4676_v57 = vor.u32 %v5410_v55, %v4675_v54  ;;  %v5446_v59 = vld [vmem:[#allocation7 + $0x354] sm:$0xf0]  ;;  %v4403_v60 = vld [vmem:[#allocation7 + $0x8] sm:$0xf]  ;;  %v4629_v36 = vld [vmem:[#allocation7 + $0x1d8] sm:$0xf0] }
  0x6a   :  { %v4820_v61 = vor.u32 %v5446_v59, %v4819_v58  ;;  %v5342_v62 = vld [vmem:[#allocation7 + $0x14] sm:$0xf0]  ;;  %v4531_v63 = vld [vmem:[#allocation7 + $0x108] sm:$0xf]  ;;  %v5428_v39 = vld [vmem:[#allocation7 + $0x2cc] sm:$0xf] }
  0x6b   :  { %1244 = vmatpush.bf16.msra.mxu1 %v4564_v38  ;;  %v5374_v0 = vld [vmem:[#allocation7 + $0x114] sm:$0xf0]  ;;  %v4404_v1 = vor.u32 %v5342_v62, %v4403_v60  ;;  %v4803_v3 = vld [vmem:[#allocation7 + $0x328] sm:$0xf]  ;;  %v4632_v38 = vor.u32 %v5396_v35, %v4629_v36  ;;  %v4757_v40 = vld [vmem:[#allocation7 + $0x2d8] sm:$0xf0] }
  0x6c   :  { %1273 = vmatpush.bf16.msra.mxu2 %v4692_v42  ;;  %1216 = vmatpush.bf16.msra.mxu0 %v4420_v52  ;;  %v4532_v2 = vor.u32 %v5374_v0, %v4531_v63  ;;  %v5442_v8 = vld [vmem:[#allocation7 + $0x334] sm:$0xf0]  ;;  %v4659_v10 = vld [vmem:[#allocation7 + $0x208] sm:$0xf]  ;;  %v5464_v41 = vld [vmem:[#allocation7 + $0x3ec] sm:$0xf]  ;;  %v4760_v42 = vor.u32 %v5428_v39, %v4757_v40 }
  0x6d   :  { %1302 = vmatpush.bf16.msra.mxu3 %v4820_v61  ;;  %v4804_v9 = vor.u32 %v5442_v8, %v4803_v3  ;;  %v5406_v11 = vld [vmem:[#allocation7 + $0x214] sm:$0xf0]  ;;  %v4787_v13 = vld [vmem:[#allocation7 + $0x308] sm:$0xf]  ;;  %v4901_v43 = vld [vmem:[#allocation7 + $0x3f8] sm:$0xf0] }
  0x6e   :  { %v4660_v14 = vor.u32 %v5406_v11, %v4659_v10  ;;  %v5438_v15 = vld [vmem:[#allocation7 + $0x314] sm:$0xf0]  ;;  %v4904_v44 = vor.u32 %v5464_v41, %v4901_v43  ;;  %v5360_v49 = vld [vmem:[#allocation7 + $0xac] sm:$0xf]  ;;  %v4485_v50 = vld [vmem:[#allocation7 + $0xb8] sm:$0xf0] }
  0x6f   :  { %1245 = vmatpush.bf16.msra.mxu1 %v4548_v56  ;;  %v4788_v17 = vor.u32 %v5438_v15, %v4787_v13  ;;  %v5392_v51 = vld [vmem:[#allocation7 + $0x1ac] sm:$0xf]  ;;  %v4488_v52 = vor.u32 %v5360_v49, %v4485_v50  ;;  %v4613_v53 = vld [vmem:[#allocation7 + $0x1b8] sm:$0xf0]  ;;  %v6201_v55 = vld [vmem:[%s8045_s3] sm:$0xf] }
  0x70   :  { %1274 = vmatpush.bf16.msra.mxu2 %v4676_v57  ;;  %1217 = vmatpush.bf16.msra.mxu0 %v4404_v1  ;;  %v4616_v54 = vor.u32 %v5392_v51, %v4613_v53  ;;  %v5424_v56 = vld [vmem:[#allocation7 + $0x2ac] sm:$0xf]  ;;  %v4741_v57 = vld [vmem:[#allocation7 + $0x2b8] sm:$0xf0]  ;;  %v6204_v63 = vperm.slane %v6201_v55, 0 }
  0x71   :  { %1303 = vmatpush.bf16.msra.mxu3 %v4804_v9  ;;  %v5460_v58 = vld [vmem:[#allocation7 + $0x3cc] sm:$0xf]  ;;  %v4744_v59 = vor.u32 %v5424_v56, %v4741_v57  ;;  %v4885_v60 = vld [vmem:[#allocation7 + $0x3d8] sm:$0xf0] }
  0x72   :  { %v5356_v61 = vld [vmem:[#allocation7 + $0x8c] sm:$0xf]  ;;  %v4469_v62 = vld [vmem:[#allocation7 + $0x98] sm:$0xf0]  ;;  %v4888_v0 = vor.u32 %v5460_v58, %v4885_v60 }
  0x73   :  { %1246 = vmatpush.bf16.msra.mxu1 %v4532_v2  ;;  %v4472_v1 = vor.u32 %v5356_v61, %v4469_v62  ;;  %v5388_v2 = vld [vmem:[#allocation7 + $0x18c] sm:$0xf]  ;;  %v4597_v3 = vld [vmem:[#allocation7 + $0x198] sm:$0xf0] }
  0x74   :  { %1275 = vmatpush.bf16.msra.mxu2 %v4660_v14  ;;  %v4600_v8 = vor.u32 %v5388_v2, %v4597_v3  ;;  %v5420_v14 = vld [vmem:[#allocation7 + $0x28c] sm:$0xf]  ;;  %v4725_v15 = vld [vmem:[#allocation7 + $0x298] sm:$0xf0] }
  0x75   :  { %1102 = vmatmul.bf16.vlgmr.msrb.gmra.mxu0 %v6062_v16  ;;  %1304 = vmatpush.bf16.msra.mxu3 %v4788_v17  ;;  %v5456_v17 = vld [vmem:[#allocation7 + $0x3ac] sm:$0xf]  ;;  %v4728_v20 = vor.u32 %v5420_v14, %v4725_v15  ;;  %v4869_v23 = vld [vmem:[#allocation7 + $0x3b8] sm:$0xf0] }
  0x76   :  { %1131 = vmatmul.bf16.vlgmr.msrb.gmra.mxu1 %v6064_v21  ;;  %1160 = vmatmul.bf16.vlgmr.msrb.gmra.mxu2 %v6066_v22  ;;  %v4872_v26 = vor.u32 %v5456_v17, %v4869_v23  ;;  %v4453_v28 = vld [vmem:[#allocation7 + $0x78] sm:$0xf0]  ;;  %v5416_v41 = vld [vmem:[#allocation7 + $0x26c] sm:$0xf] }
  0x77   :  { %1189 = vmatmul.bf16.vlgmr.msrb.gmra.mxu3 %v6068_v25  ;;  %1326 = vmatpush.bf16.msrb.mxu0 %v4520_v27  ;;  %v5352_v27 = vld [vmem:[#allocation7 + $0x6c] sm:$0xf]  ;;  %v4581_v31 = vld [vmem:[#allocation7 + $0x178] sm:$0xf0] }
  0x78   :  { %1355 = vmatpush.bf16.msrb.mxu1 %v4648_v29  ;;  %1384 = vmatpush.bf16.msrb.mxu2 %v4776_v33  ;;  %v5384_v29 = vld [vmem:[#allocation7 + $0x16c] sm:$0xf]  ;;  %v4456_v30 = vor.u32 %v5352_v27, %v4453_v28  ;;  %v4853_v49 = vld [vmem:[#allocation7 + $0x398] sm:$0xf0] }
  0x79   :  { %1413 = vmatpush.bf16.msrb.mxu3 %v4904_v44  ;;  %v4584_v33 = vor.u32 %v5384_v29, %v4581_v31  ;;  %v5452_v43 = vld [vmem:[#allocation7 + $0x38c] sm:$0xf]  ;;  %v4437_v51 = vld [vmem:[#allocation7 + $0x58] sm:$0xf0] }
  0x7a   :  { %v5348_v50 = vld [vmem:[#allocation7 + $0x4c] sm:$0xf]  ;;  %v4565_v56 = vld [vmem:[#allocation7 + $0x158] sm:$0xf0] }
  0x7b   :  { %1327 = vmatpush.bf16.msrb.mxu0 %v4504_v37  ;;  %v4440_v53 = vor.u32 %v5348_v50, %v4437_v51  ;;  %v5412_v3 = vld [vmem:[#allocation7 + $0x24c] sm:$0xf]  ;;  %v4421_v15 = vld [vmem:[#allocation7 + $0x38] sm:$0xf0]  ;;  %v139_v50 = vlaneseq }
  0x7c   :  { %1356 = vmatpush.bf16.msrb.mxu1 %v4632_v38  ;;  %1385 = vmatpush.bf16.msrb.mxu2 %v4760_v42  ;;  %v4709_v42 = vld [vmem:[#allocation7 + $0x278] sm:$0xf0]  ;;  %v5344_v14 = vld [vmem:[#allocation7 + $0x2c] sm:$0xf] }
  0x7d   :  { %1414 = vmatpush.bf16.msrb.mxu3 %v4888_v0  ;;  %v4712_v44 = vor.u32 %v5416_v41, %v4709_v42  ;;  %v5376_v17 = vld [vmem:[#allocation7 + $0x12c] sm:$0xf]  ;;  %v4549_v23 = vld [vmem:[#allocation7 + $0x138] sm:$0xf0] }
  0x7e   :  { %v4552_v27 = vor.u32 %v5376_v17, %v4549_v23  ;;  %v5444_v28 = vld [vmem:[#allocation7 + $0x34c] sm:$0xf]  ;;  %v4821_v29 = vld [vmem:[#allocation7 + $0x358] sm:$0xf0]  ;;  %v5019_v17 = vld [vmem:[%s8044_s2 + $0xe0] sm:$0xf] }
  0x7f   :  { %1328 = vmatpush.bf16.msrb.mxu0 %v4488_v52  ;;  %v4856_v52 = vor.u32 %v5452_v43, %v4853_v49  ;;  %v5340_v41 = vld [vmem:[#allocation7 + $0xc] sm:$0xf]  ;;  %v4405_v43 = vld [vmem:[#allocation7 + $0x18] sm:$0xf0]  ;;  %v5495_v23 = vld [vmem:[%s8044_s2 + $0xe4] sm:$0xf] }
  0x80   :  { %1357 = vmatpush.bf16.msrb.mxu1 %v4616_v54  ;;  %1386 = vmatpush.bf16.msrb.mxu2 %v4744_v59  ;;  %v5380_v54 = vld [vmem:[#allocation7 + $0x14c] sm:$0xf]  ;;  %v4533_v49 = vld [vmem:[#allocation7 + $0x118] sm:$0xf0]  ;;  %v4408_v51 = vor.u32 %v5340_v41, %v4405_v43  ;;  %v5498_v41 = vld [vmem:[%s8044_s2 + $0xf4] sm:$0xf0] }
  0x81   :  { %1415 = vmatpush.bf16.msrb.mxu3 %v4872_v26  ;;  %v4568_v57 = vor.u32 %v5380_v54, %v4565_v56  ;;  %v4805_v54 = vld [vmem:[#allocation7 + $0x338] sm:$0xf0] }
  0x83   :  { %1329 = vmatpush.bf16.msrb.mxu0 %v4472_v1 }
  0x84   :  { %1358 = vmatpush.bf16.msrb.mxu1 %v4600_v8  ;;  %1387 = vmatpush.bf16.msrb.mxu2 %v4728_v20  ;;  %v4693_v8 = vld [vmem:[#allocation7 + $0x258] sm:$0xf0]  ;;  %v4424_v20 = vor.u32 %v5344_v14, %v4421_v15 }
  0x85   :  { %1107 = vmatmul.bf16.gmra.mxu0 %v6098_v12  ;;  %1416 = vmatpush.bf16.msrb.mxu3 %v4856_v52 }
  0x86   :  { %1136 = vmatmul.bf16.gmra.mxu1 %v6100_v18  ;;  %1165 = vmatmul.bf16.gmra.mxu2 %v6102_v19 }
  0x87   :  { %1194 = vmatmul.bf16.gmra.mxu3 %v6104_v24  ;;  %1330 = vmatpush.bf16.msrb.mxu0 %v4456_v30 }
  0x88   :  { %1359 = vmatpush.bf16.msrb.mxu1 %v4584_v33  ;;  %1388 = vmatpush.bf16.msrb.mxu2 %v4712_v44  ;;  %v4824_v33 = vor.u32 %v5444_v28, %v4821_v29  ;;  %v5372_v44 = vld [vmem:[#allocation7 + $0x10c] sm:$0xf] }
  0x89   :  { %v4536_v52 = vor.u32 %v5372_v44, %v4533_v49  ;;  %v5493_v44 = vld [vmem:[%s8044_s2 + $0xcc] sm:$0xf0]  ;;  %v5491_v49 = vld [vmem:[%s8044_s2 + $0xc4] sm:$0xf] }
  0x8b   :  { %1331 = vmatpush.bf16.msrb.mxu0 %v4440_v53  ;;  %v5440_v53 = vld [vmem:[#allocation7 + $0x32c] sm:$0xf] }
  0x8c   :  { %1360 = vmatpush.bf16.msrb.mxu1 %v4568_v57  ;;  %v4808_v56 = vor.u32 %v5440_v53, %v4805_v54 }
  0x8f   :  { %1332 = vmatpush.bf16.msrb.mxu0 %v4424_v20  ;;  %v5497_v20 = vld [vmem:[%s8044_s2 + $0xec] sm:$0xf0] }
  0x90   :  { %1361 = vmatpush.bf16.msrb.mxu1 %v4552_v27  ;;  %v5021_v27 = vld [vmem:[%s8044_s2 + $0xf0] sm:$0xf0] }
  0x91   :  { %v6248_v29 = vor.u32 %v5495_v23, %v5021_v27  ;;  %v5489_v23 = vld [vmem:[%s8044_s2 + $0xac] sm:$0xf0]  ;;  %v5487_v27 = vld [vmem:[%s8044_s2 + $0xa4] sm:$0xf] }
  0x93   :  { %1333 = vmatpush.bf16.msrb.mxu0 %v4408_v51 }
  0x94   :  { %1362 = vmatpush.bf16.msrb.mxu1 %v4536_v52 }
  0x95   :  { %1112 = vmatmul.bf16.gmra.mxu0 %v6134_v4 }
  0x96   :  { %1141 = vmatmul.bf16.gmra.mxu1 %v6136_v5  ;;  %1170 = vmatmul.bf16.gmra.mxu2 %v6138_v6 }
  0x97   :  { %1199 = vmatmul.bf16.gmra.mxu3 %v6140_v7 }
  0xa5   :  { %1117 = vmatmul.bf16.gmra.mxu0 %v6170_v45 }
  0xa6   :  { %1146 = vmatmul.bf16.gmra.mxu1 %v6172_v46  ;;  %1175 = vmatmul.bf16.gmra.mxu2 %v6174_v47 }
  0xa7   :  { %1204 = vmatmul.bf16.gmra.mxu3 %v6176_v48 }
  0xb0   :  { %v1016_v11 = vpop.f32.mrf.mxu1 }
  0xb1   :  { %v987_v9 = vpop.f32.mrf.mxu0 }
  0xb2   :  { %v988_v10 = vadd.f32 %v987_v9, %v6204_v63  ;;  %v5448_v9 = vld [vmem:[#allocation7 + $0x36c] sm:$0xf] }
  0xb4   :  { %v1017_v13 = vadd.f32 %v1016_v11, %v988_v10  ;;  %v4696_v10 = vor.u32 %v5412_v3, %v4693_v8  ;;  %v4837_v11 = vld [vmem:[#allocation7 + $0x378] sm:$0xf0]  ;;  %v6224_v8 = vand.u32 127, %v139_v50  ;;  %v5005_v50 = vld [vmem:[%s8044_s2 + $0xd0] sm:$0xf0] }
  0xb5   :  { %1218 = vmatmul.bf16.vlgmr.msra.gmra.mxu0 %v6062_v16  ;;  %v4789_v3 = vld [vmem:[#allocation7 + $0x318] sm:$0xf0]  ;;  %v6289_v54 = vor.u32 %v5491_v49, %v5005_v50  ;;  %v4995_v49 = vld [vmem:[%s8044_s2 + $0xa8] sm:$0xf]  ;;  %v5490_v50 = vld [vmem:[%s8044_s2 + $0xb4] sm:$0xf0] }
  0xb6   :  { %1247 = vmatmul.bf16.vlgmr.msra.gmra.mxu1 %v6064_v21  ;;  %1276 = vmatmul.bf16.vlgmr.msra.gmra.mxu2 %v6066_v22  ;;  %v144_v15 = vand.u32 64, %v6224_v8 }
  0xb7   :  { %1305 = vmatmul.bf16.vlgmr.msra.gmra.mxu3 %v6068_v25  ;;  %1389 = vmatpush.bf16.msrb.mxu2 %v4696_v10 }
  0xb8   :  { %v1045_v32 = vpop.f32.mrf.mxu2  ;;  %v1074_v35 = vpop.f32.mrf.mxu3  ;;  %1722 = vmatpush.bf16.msra.mxu1 %v6248_v29  ;;  %vm6253_vm0 = vcmp.eq.s32.totalorder %v144_v15, 0  ;;  %v5474_v15 = vld [vmem:[%s8044_s2 + $0x34] sm:$0xf0] }
  0xb9   :  { %v1046_v34 = vadd.f32 %v1045_v32, %v1017_v13  ;;  %v989_v36 = vpop.f32.mrf.mxu0  ;;  %v1018_v38 = vpop.f32.mrf.mxu1  ;;  %v4840_v13 = vor.u32 %v5448_v9, %v4837_v11 }
  0xba   :  { %v990_v37 = vadd.f32 %v989_v36, %v6204_v63 }
  0xbb   :  { %v6212_v39 = vadd.f32 %v1074_v35, %v1046_v34  ;;  %1417 = vmatpush.bf16.msrb.mxu3 %v4840_v13 }
  0xbc   :  { %v1019_v40 = vadd.f32 %v1018_v38, %v990_v37  ;;  %v5408_v38 = vld [vmem:[#allocation7 + $0x22c] sm:$0xf]  ;;  %1723 = vmatpush.bf16.msra.mxu1 %v6289_v54 }
  0xbd   :  { %8170 = vst [vmem:[#allocation17_spill] sm:$0xff] %v6212_v39 }
  0xbf   :  { %1418 = vmatpush.bf16.msrb.mxu3 %v4824_v33 }
  0xc0   :  { %v1047_v58 = vpop.f32.mrf.mxu2  ;;  %v1076_v60 = vpop.f32.mrf.mxu3 }
  0xc1   :  { %v1048_v59 = vadd.f32 %v1047_v58, %v1019_v40  ;;  %v4677_v40 = vld [vmem:[#allocation7 + $0x238] sm:$0xf0]  ;;  %v5404_v58 = vld [vmem:[#allocation7 + $0x20c] sm:$0xf] }
  0xc2   :  { %v992_v61 = vpop.f32.mrf.mxu0  ;;  %v4680_v42 = vor.u32 %v5408_v38, %v4677_v40  ;;  %v5027_v40 = vld [vmem:[%s8044_s2 + $0xe8] sm:$0xf] }
  0xc3   :  { %v993_v62 = vadd.f32 %v992_v61, %v6204_v63  ;;  %v1021_v0 = vpop.f32.mrf.mxu1  ;;  %v6215_v1 = vadd.f32 %v1076_v60, %v1048_v59  ;;  %v4661_v59 = vld [vmem:[#allocation7 + $0x218] sm:$0xf0]  ;;  %v5436_v60 = vld [vmem:[#allocation7 + $0x30c] sm:$0xf]  ;;  %1419 = vmatpush.bf16.msrb.mxu3 %v4808_v56  ;;  %v6268_v43 = vor.u32 %v5498_v41, %v5027_v40 }
  0xc4   :  { %1390 = vmatpush.bf16.msrb.mxu2 %v4680_v42  ;;  %v4792_v13 = vor.u32 %v5436_v60, %v4789_v3  ;;  %v5003_v42 = vld [vmem:[%s8044_s2 + $0xc0] sm:$0xf]  ;;  %v5494_v3 = vld [vmem:[%s8044_s2 + $0xd4] sm:$0xf0] }
  0xc5   :  { %8171 = vst [vmem:[#allocation18_spill] sm:$0xff] %v6215_v1  ;;  %v1022_v2 = vadd.f32 %v1021_v0, %v993_v62  ;;  %1223 = vmatmul.bf16.gmra.mxu0 %v6098_v12  ;;  %v6287_v53 = vor.u32 %v5493_v44, %v5003_v42 }
  0xc6   :  { %1252 = vmatmul.bf16.gmra.mxu1 %v6100_v18  ;;  %1281 = vmatmul.bf16.gmra.mxu2 %v6102_v19 }
  0xc7   :  { %1310 = vmatmul.bf16.gmra.mxu3 %v6104_v24 }
  0xc8   :  { %1420 = vmatpush.bf16.msrb.mxu3 %v4792_v13  ;;  %v5029_v13 = vld [vmem:[%s8044_s2 + $0xf8] sm:$0xf0] }
  0xc9   :  { %v1050_v26 = vpop.f32.mrf.mxu2 }
  0xca   :  { %v1051_v30 = vadd.f32 %v1050_v26, %v1022_v2  ;;  %v1079_v31 = vpop.f32.mrf.mxu3  ;;  %v994_v32 = vpop.f32.mrf.mxu0  ;;  %v4664_v2 = vor.u32 %v5404_v58, %v4661_v59  ;;  %v6243_v26 = vor.u32 %v5497_v20, %v5019_v17  ;;  %v4987_v20 = vld [vmem:[%s8044_s2 + $0xa0] sm:$0xf] }
  0xcb   :  { %v995_v34 = vadd.f32 %v994_v32, %v6204_v63  ;;  %v1023_v35 = vpop.f32.mrf.mxu1 }
  0xcc   :  { %v6222_v36 = vadd.f32 %v1079_v31, %v1051_v30  ;;  %1391 = vmatpush.bf16.msrb.mxu2 %v4664_v2  ;;  %1709 = vmatpush.bf16.msra.mxu0 %v6243_v26  ;;  %v5011_v2 = vld [vmem:[%s8044_s2 + $0xc8] sm:$0xf] }
  0xcd   :  { %v1024_v37 = vadd.f32 %v1023_v35, %v995_v34 }
  0xce   :  { %8172 = vst [vmem:[#allocation19_spill] sm:$0xff] %v6222_v36 }
  0xd0   :  { %1735 = vmatpush.bf16.msra.mxu2 %v6268_v43  ;;  %1710 = vmatpush.bf16.msra.mxu0 %v6287_v53 }
  0xd1   :  { %v1052_v57 = vpop.f32.mrf.mxu2 }
  0xd2   :  { %v1053_v61 = vadd.f32 %v1052_v57, %v1024_v37  ;;  %v1081_v62 = vpop.f32.mrf.mxu3  ;;  %v997_v0 = vpop.f32.mrf.mxu0 }
  0xd3   :  { %v998_v9 = vadd.f32 %v997_v0, %v6204_v63  ;;  %v1026_v10 = vpop.f32.mrf.mxu1 }
  0xd4   :  { %v6227_v11 = vadd.f32 %v1081_v62, %v1053_v61 }
  0xd5   :  { %v1027_v14 = vadd.f32 %v1026_v10, %v998_v9  ;;  %1228 = vmatmul.bf16.gmra.mxu0 %v6134_v4  ;;  %v5496_v9 = vld [vmem:[%s8044_s2 + $0xec] sm:$0xf]  ;;  %v6309_v10 = vor.u32 %v5494_v3, %v5011_v2 }
  0xd6   :  { %8173 = vst [vmem:[#allocation20_spill] sm:$0xff] %v6227_v11  ;;  %1257 = vmatmul.bf16.gmra.mxu1 %v6136_v5  ;;  %1286 = vmatmul.bf16.gmra.mxu2 %v6138_v6  ;;  %v6323_v17 = vor.u32 %v5496_v9, %v5029_v13  ;;  %v5483_v9 = vld [vmem:[%s8044_s2 + $0x84] sm:$0xf]  ;;  %v4973_v13 = vld [vmem:[%s8044_s2 + $0x90] sm:$0xf0] }
  0xd7   :  { %1315 = vmatmul.bf16.gmra.mxu3 %v6140_v7  ;;  %1736 = vmatpush.bf16.msra.mxu2 %v6309_v10 }
  0xd8   :  { %1748 = vmatpush.bf16.msra.mxu3 %v6323_v17 }
  0xd9   :  { %v1055_v28 = vpop.f32.mrf.mxu2 }
  0xda   :  { %v1056_v30 = vadd.f32 %v1055_v28, %v1027_v14  ;;  %v1084_v31 = vpop.f32.mrf.mxu3  ;;  %v999_v32 = vpop.f32.mrf.mxu0  ;;  %v6335_v28 = vor.u32 %v5489_v23, %v4987_v20  ;;  %v6390_v20 = vor.u32 %v5483_v9, %v4973_v13 }
  0xdb   :  { %v1000_v33 = vadd.f32 %v999_v32, %v6204_v63  ;;  %v1028_v34 = vpop.f32.mrf.mxu1 }
  0xdc   :  { %v6257_v37 = vadd.f32 %v1084_v31, %v1056_v30  ;;  %v4989_v30 = vld [vmem:[%s8044_s2 + $0xb0] sm:$0xf0]  ;;  %1711 = vmatpush.bf16.msra.mxu0 %v6335_v28 }
  0xdd   :  { %v1029_v38 = vadd.f32 %v1028_v34, %v1000_v33  ;;  %v6341_v32 = vor.u32 %v5487_v27, %v4989_v30 }
  0xde   :  { %8176 = vst [vmem:[#allocation21_spill] sm:$0xff] %v6257_v37 }
  0xdf   :  { %1724 = vmatpush.bf16.msra.mxu1 %v6341_v32 }
  0xe1   :  { %v1057_v56 = vpop.f32.mrf.mxu2 }
  0xe2   :  { %v1058_v57 = vadd.f32 %v1057_v56, %v1029_v38  ;;  %v1086_v58 = vpop.f32.mrf.mxu3  ;;  %v1002_v59 = vpop.f32.mrf.mxu0  ;;  %v5492_v56 = vld [vmem:[%s8044_s2 + $0xcc] sm:$0xf] }
  0xe3   :  { %v1003_v60 = vadd.f32 %v1002_v59, %v6204_v63  ;;  %v1031_v61 = vpop.f32.mrf.mxu1  ;;  %v5485_v59 = vld [vmem:[%s8044_s2 + $0x8c] sm:$0xf0]  ;;  %1725 = vmatpush.bf16.msra.mxu1 %v6390_v20 }
  0xe4   :  { %v6295_v62 = vadd.f32 %v1086_v58, %v1058_v57  ;;  %v6357_v57 = vor.u32 %v5490_v50, %v4995_v49  ;;  %v4971_v58 = vld [vmem:[%s8044_s2 + $0x80] sm:$0xf]  ;;  %v5488_v49 = vld [vmem:[%s8044_s2 + $0xac] sm:$0xf] }
  0xe5   :  { %v1032_v0 = vadd.f32 %v1031_v61, %v1003_v60  ;;  %1233 = vmatmul.bf16.gmra.mxu0 %v6170_v45  ;;  %v6381_v3 = vor.u32 %v5485_v59, %v4971_v58  ;;  %v5481_v58 = vld [vmem:[%s8044_s2 + $0x6c] sm:$0xf0]  ;;  %v5479_v59 = vld [vmem:[%s8044_s2 + $0x64] sm:$0xf] }
  0xe6   :  { %8177 = vst [vmem:[#allocation22_spill] sm:$0xff] %v6295_v62  ;;  %1262 = vmatmul.bf16.gmra.mxu1 %v6172_v46  ;;  %1291 = vmatmul.bf16.gmra.mxu2 %v6174_v47  ;;  %v141_v62 = vadd.s32 128, %v6224_v8 }
  0xe7   :  { %1320 = vmatmul.bf16.gmra.mxu3 %v6176_v48  ;;  %1737 = vmatpush.bf16.msra.mxu2 %v6357_v57 }
  0xe8   :  { %1712 = vmatpush.bf16.msra.mxu0 %v6381_v3 }
  0xe9   :  { %v1060_v31 = vpop.f32.mrf.mxu2 }
  0xea   :  { %v1061_v33 = vadd.f32 %v1060_v31, %v1032_v0  ;;  %v1089_v34 = vpop.f32.mrf.mxu3  ;;  %v1004_v38 = vpop.f32.mrf.mxu0  ;;  %v6377_v0 = vperm.slane %v6201_v55, 1 }
  0xeb   :  { %v1005_v40 = vadd.f32 %v1004_v38, %v6204_v63  ;;  %v1033_v41 = vpop.f32.mrf.mxu1  ;;  %v5013_v63 = vld [vmem:[%s8044_s2 + $0xd8] sm:$0xf0] }
  0xec   :  { %v6346_v42 = vadd.f32 %v1089_v34, %v1061_v33  ;;  %v6379_v2 = vor.u32 %v5492_v56, %v5013_v63  ;;  %v4917_v56 = vld [vmem:[%s8044_s2 + $0x18] sm:$0xf0] }
  0xed   :  { %v1034_v44 = vadd.f32 %v1033_v41, %v1005_v40  ;;  %v4979_v41 = vld [vmem:[%s8044_s2 + $0x88] sm:$0xf] }
  0xee   :  { %8178 = vst [vmem:[#allocation23_spill] sm:$0xff] %v6346_v42  ;;  %1749 = vmatpush.bf16.msra.mxu3 %v6379_v2  ;;  %v8193_v42 = vmov 0 }
  0xf1   :  { %v1062_v23 = vpop.f32.mrf.mxu2 }
  0xf2   :  { %v1063_v27 = vadd.f32 %v1062_v23, %v1034_v44  ;;  %v1091_v30 = vpop.f32.mrf.mxu3  ;;  %v1103_v31 = vpop.f32.mrf.mxu0  ;;  %v5486_v44 = vld [vmem:[%s8044_s2 + $0x94] sm:$0xf0] }
  0xf3   :  { %v1104_v33 = vadd.f32 %v1103_v31, %v6377_v0  ;;  %v1132_v34 = vpop.f32.mrf.mxu1  ;;  %v6410_v50 = vor.u32 %v5486_v44, %v4979_v41 }
  0xf4   :  { %v6396_v38 = vadd.f32 %v1091_v30, %v1063_v27 }
  0xf5   :  { %v1133_v40 = vadd.f32 %v1132_v34, %v1104_v33  ;;  %1334 = vmatmul.bf16.vlgmr.msrb.gmra.mxu0 %v6062_v16  ;;  %v4997_v16 = vld [vmem:[%s8044_s2 + $0xb8] sm:$0xf0]  ;;  %1738 = vmatpush.bf16.msra.mxu2 %v6410_v50 }
  0xf6   :  { %8179 = vst [vmem:[#allocation24_spill] sm:$0xff] %v6396_v38  ;;  %1363 = vmatmul.bf16.vlgmr.msrb.gmra.mxu1 %v6064_v21  ;;  %1392 = vmatmul.bf16.vlgmr.msrb.gmra.mxu2 %v6066_v22  ;;  %v6424_v21 = vor.u32 %v5488_v49, %v4997_v16  ;;  %v4955_v22 = vld [vmem:[%s8044_s2 + $0x60] sm:$0xf]  ;;  %v4963_v49 = vld [vmem:[%s8044_s2 + $0x68] sm:$0xf] }
  0xf7   :  { %1421 = vmatmul.bf16.vlgmr.msrb.gmra.mxu3 %v6068_v25  ;;  %v6436_v9 = vor.u32 %v5481_v58, %v4955_v22  ;;  %v4957_v25 = vld [vmem:[%s8044_s2 + $0x70] sm:$0xf0]  ;;  %v5484_v16 = vld [vmem:[%s8044_s2 + $0x8c] sm:$0xf]  ;;  %v4981_v58 = vld [vmem:[%s8044_s2 + $0x98] sm:$0xf0] }
  0xf8   :  { %1750 = vmatpush.bf16.msra.mxu3 %v6424_v21  ;;  %v6442_v23 = vor.u32 %v5479_v59, %v4957_v25  ;;  %v4939_v59 = vld [vmem:[%s8044_s2 + $0x40] sm:$0xf]  ;;  %v5477_v25 = vld [vmem:[%s8044_s2 + $0x4c] sm:$0xf0] }
  0xf9   :  { %v1161_v13 = vpop.f32.mrf.mxu2  ;;  %1713 = vmatpush.bf16.msra.mxu0 %v6436_v9 }
  0xfa   :  { %v1162_v27 = vadd.f32 %v1161_v13, %v1133_v40  ;;  %v1190_v30 = vpop.f32.mrf.mxu3  ;;  %v1105_v31 = vpop.f32.mrf.mxu0  ;;  %1726 = vmatpush.bf16.msra.mxu1 %v6442_v23  ;;  %v5482_v40 = vld [vmem:[%s8044_s2 + $0x74] sm:$0xf0]  ;;  %v6469_v13 = vor.u32 %v5484_v16, %v4981_v58 }
  0xfb   :  { %v1106_v33 = vadd.f32 %v1105_v31, %v6377_v0  ;;  %v1134_v34 = vpop.f32.mrf.mxu1  ;;  %v6458_v22 = vor.u32 %v5482_v40, %v4963_v49  ;;  %v4941_v31 = vld [vmem:[%s8044_s2 + $0x50] sm:$0xf0] }
  0xfc   :  { %v6447_v41 = vadd.f32 %v1190_v30, %v1162_v27  ;;  %v6471_v27 = vor.u32 %v5477_v25, %v4939_v59  ;;  %v5475_v30 = vld [vmem:[%s8044_s2 + $0x44] sm:$0xf]  ;;  %1751 = vmatpush.bf16.msra.mxu3 %v6469_v13 }
  0xfd   :  { %v1135_v44 = vadd.f32 %v1134_v34, %v1106_v33  ;;  %1739 = vmatpush.bf16.msra.mxu2 %v6458_v22  ;;  %v6480_v33 = vor.u32 %v5475_v30, %v4941_v31  ;;  %v4947_v30 = vld [vmem:[%s8044_s2 + $0x48] sm:$0xf]  ;;  %v5480_v31 = vld [vmem:[%s8044_s2 + $0x6c] sm:$0xf] }
  0xfe   :  { %8180 = vst [vmem:[#allocation25_spill] sm:$0xff] %v6447_v41  ;;  %1714 = vmatpush.bf16.msra.mxu0 %v6471_v27 }
  0xff   :  { %1727 = vmatpush.bf16.msra.mxu1 %v6480_v33 }
 0x101   :  { %v1163_v34 = vpop.f32.mrf.mxu2 }
 0x102   :  { %v1164_v49 = vadd.f32 %v1163_v34, %v1135_v44  ;;  %v1192_v40 = vpop.f32.mrf.mxu3  ;;  %v1108_v16 = vpop.f32.mrf.mxu0  ;;  %v5478_v44 = vld [vmem:[%s8044_s2 + $0x54] sm:$0xf0] }
 0x103   :  { %v1109_v58 = vadd.f32 %v1108_v16, %v6377_v0  ;;  %v1137_v59 = vpop.f32.mrf.mxu1  ;;  %v6500_v34 = vor.u32 %v5478_v44, %v4947_v30  ;;  %v5476_v30 = vld [vmem:[%s8044_s2 + $0x4c] sm:$0xf]  ;;  %v4949_v44 = vld [vmem:[%s8044_s2 + $0x58] sm:$0xf0] }
 0x104   :  { %v6486_v25 = vadd.f32 %v1192_v40, %v1164_v49  ;;  %v4923_v40 = vld [vmem:[%s8044_s2 + $0x20] sm:$0xf] }
 0x105   :  { %v1138_v63 = vadd.f32 %v1137_v59, %v1109_v58  ;;  %1339 = vmatmul.bf16.gmra.mxu0 %v6098_v12  ;;  %v4965_v12 = vld [vmem:[%s8044_s2 + $0x78] sm:$0xf0]  ;;  %1740 = vmatpush.bf16.msra.mxu2 %v6500_v34 }
 0x106   :  { %8181 = vst [vmem:[#allocation26_spill] sm:$0xff] %v6486_v25  ;;  %1368 = vmatmul.bf16.gmra.mxu1 %v6100_v18  ;;  %1397 = vmatmul.bf16.gmra.mxu2 %v6102_v19  ;;  %v6506_v49 = vor.u32 %v5480_v31, %v4965_v12  ;;  %v5473_v18 = vld [vmem:[%s8044_s2 + $0x2c] sm:$0xf0]  ;;  %v5471_v19 = vld [vmem:[%s8044_s2 + $0x24] sm:$0xf] }
 0x107   :  { %1426 = vmatmul.bf16.gmra.mxu3 %v6104_v24  ;;  %v6518_v16 = vor.u32 %v5473_v18, %v4923_v40  ;;  %v4925_v24 = vld [vmem:[%s8044_s2 + $0x30] sm:$0xf0]  ;;  %v6533_v18 = vor.u32 %v5476_v30, %v4949_v44  ;;  %v5469_v30 = vld [vmem:[%s8044_s2 + $0xc] sm:$0xf0]  ;;  %v5467_v44 = vld [vmem:[%s8044_s2 + $0x4] sm:$0xf] }
 0x108   :  { %1752 = vmatpush.bf16.msra.mxu3 %v6506_v49  ;;  %v6524_v59 = vor.u32 %v5471_v19, %v4925_v24  ;;  %v4931_v24 = vld [vmem:[%s8044_s2 + $0x28] sm:$0xf] }
 0x109   :  { %v1166_v58 = vpop.f32.mrf.mxu2  ;;  %1715 = vmatpush.bf16.msra.mxu0 %v6518_v16 }
 0x10a   :  { %v1167_v31 = vadd.f32 %v1166_v58, %v1138_v63  ;;  %v1195_v12 = vpop.f32.mrf.mxu3  ;;  %v1110_v40 = vpop.f32.mrf.mxu0  ;;  %1728 = vmatpush.bf16.msra.mxu1 %v6524_v59  ;;  %v4907_v63 = vld [vmem:[%s8044_s2] sm:$0xf]  ;;  %v6548_v58 = vor.u32 %v5474_v15, %v4931_v24  ;;  %v5472_v15 = vld [vmem:[%s8044_s2 + $0x2c] sm:$0xf]  ;;  %v4933_v24 = vld [vmem:[%s8044_s2 + $0x38] sm:$0xf0] }
 0x10b   :  { %v1139_v61 = vpop.f32.mrf.mxu1  ;;  %v6570_v51 = vor.u32 %v5472_v15, %v4933_v24 }
 0x10c   :  { %v6536_v19 = vadd.f32 %v1195_v12, %v1167_v31  ;;  %1753 = vmatpush.bf16.msra.mxu3 %v6533_v18  ;;  %v4909_v31 = vld [vmem:[%s8044_s2 + $0x10] sm:$0xf0]  ;;  %v6559_v12 = vor.u32 %v5469_v30, %v4907_v63  ;;  %1741 = vmatpush.bf16.msra.mxu2 %v6548_v58  ;;  %v4915_v63 = vld [vmem:[%s8044_s2 + $0x8] sm:$0xf]  ;;  %v5470_v30 = vld [vmem:[%s8044_s2 + $0x14] sm:$0xf0] }
 0x10d   :  { %v6561_v52 = vor.u32 %v5467_v44, %v4909_v31  ;;  %v5468_v44 = vld [vmem:[%s8044_s2 + $0xc] sm:$0xf]  ;;  %v1111_v31 = vadd.f32 %v1110_v40, %v6377_v0  ;;  %v6585_v60 = vor.u32 %v5470_v30, %v4915_v63  ;;  %v145_v30 = vand.u32 64, %v141_v62 }
 0x10e   :  { %8182 = vst [vmem:[#allocation27_spill] sm:$0xff] %v6536_v19  ;;  %1716 = vmatpush.bf16.msra.mxu0 %v6559_v12  ;;  %v6595_v40 = vor.u32 %v5468_v44, %v4917_v56 }
 0x10f   :  { %8183 = vst [vmem:[#allocation28_spill] sm:$0xff] %v6561_v52  ;;  %1729 = vmatpush.bf16.msra.mxu1 %v6561_v52  ;;  %v1140_v63 = vadd.f32 %v1139_v61, %v1111_v31  ;;  %vm6607_vm1 = vcmp.eq.s32.totalorder %v145_v30, 0 }
 0x110   :  { %1754 = vmatpush.bf16.msra.mxu3 %v6570_v51  ;;  %1742 = vmatpush.bf16.msra.mxu2 %v6585_v60 }
 0x111   :  { %v1168_v14 = vpop.f32.mrf.mxu2 }
 0x112   :  { %v1197_v15 = vpop.f32.mrf.mxu3  ;;  %v1113_v24 = vpop.f32.mrf.mxu0  ;;  %1838 = vmatpush.bf16.msrb.mxu0 %v6243_v26 }
 0x113   :  { %v1114_v37 = vadd.f32 %v1113_v24, %v6377_v0  ;;  %v1142_v11 = vpop.f32.mrf.mxu1  ;;  %1851 = vmatpush.bf16.msrb.mxu1 %v6248_v29  ;;  %v1169_v24 = vadd.f32 %v1168_v14, %v1140_v63 }
 0x114   :  { %1864 = vmatpush.bf16.msrb.mxu2 %v6268_v43  ;;  %1755 = vmatpush.bf16.msra.mxu3 %v6595_v40 }
 0x115   :  { %v1143_v36 = vadd.f32 %v1142_v11, %v1114_v37  ;;  %1344 = vmatmul.bf16.gmra.mxu0 %v6134_v4 }
 0x116   :  { %1373 = vmatmul.bf16.gmra.mxu1 %v6136_v5  ;;  %1402 = vmatmul.bf16.gmra.mxu2 %v6138_v6 }
 0x117   :  { %1431 = vmatmul.bf16.gmra.mxu3 %v6140_v7  ;;  %1839 = vmatpush.bf16.msrb.mxu0 %v6287_v53  ;;  %v6612_v7 = vadd.f32 %v1197_v15, %v1169_v24 }
 0x118   :  { %1852 = vmatpush.bf16.msrb.mxu1 %v6289_v54  ;;  %1877 = vmatpush.bf16.msrb.mxu3 %v6323_v17 }
 0x119   :  { %v1171_v11 = vpop.f32.mrf.mxu2  ;;  %1865 = vmatpush.bf16.msrb.mxu2 %v6309_v10  ;;  %8186 = vst [vmem:[#allocation29_spill] sm:$0xff] %v6612_v7 }
 0x11a   :  { %v1172_v4 = vadd.f32 %v1171_v11, %v1143_v36  ;;  %v1200_v37 = vpop.f32.mrf.mxu3  ;;  %v1115_v5 = vpop.f32.mrf.mxu0 }
 0x11b   :  { %v1144_v61 = vpop.f32.mrf.mxu1  ;;  %1840 = vmatpush.bf16.msrb.mxu0 %v6335_v28  ;;  %v1116_v14 = vadd.f32 %v1115_v5, %v6377_v0  ;;  %v142_v5 = vadd.s32 256, %v6224_v8 }
 0x11c   :  { %v6614_v62 = vadd.f32 %v1200_v37, %v1172_v4  ;;  %1853 = vmatpush.bf16.msrb.mxu1 %v6341_v32  ;;  %1878 = vmatpush.bf16.msrb.mxu3 %v6379_v2 }
 0x11d   :  { %1866 = vmatpush.bf16.msrb.mxu2 %v6357_v57  ;;  %v1145_v44 = vadd.f32 %v1144_v61, %v1116_v14  ;;  %v146_v7 = vand.u32 64, %v142_v5 }
 0x11e   :  { %8187 = vst [vmem:[#allocation30_spill] sm:$0xff] %v6614_v62 }
 0x11f   :  { %1841 = vmatpush.bf16.msrb.mxu0 %v6381_v3  ;;  %vm6737_vm2 = vcmp.eq.s32.totalorder %v146_v7, 0 }
 0x120   :  { %1854 = vmatpush.bf16.msrb.mxu1 %v6390_v20  ;;  %1879 = vmatpush.bf16.msrb.mxu3 %v6424_v21  ;;  %v8194_v42 = vsel %vm6737_vm2, 4294967295, %v8193_v42 }
 0x121   :  { %v1173_v31 = vpop.f32.mrf.mxu2  ;;  %1867 = vmatpush.bf16.msrb.mxu2 %v6410_v50  ;;  %8195 = vst [vmem:[#allocation36_spill] sm:$0xff] %v8194_v42 }
 0x122   :  { %v1174_v15 = vadd.f32 %v1173_v31, %v1145_v44  ;;  %v1202_v63 = vpop.f32.mrf.mxu3  ;;  %v1118_v30 = vpop.f32.mrf.mxu0 }
 0x123   :  { %v1119_v24 = vadd.f32 %v1118_v30, %v6377_v0  ;;  %v1147_v11 = vpop.f32.mrf.mxu1  ;;  %1842 = vmatpush.bf16.msrb.mxu0 %v6436_v9  ;;  %v6670_v30 = vperm.slane %v6201_v55, 2 }
 0x124   :  { %v6634_v4 = vadd.f32 %v1202_v63, %v1174_v15  ;;  %1855 = vmatpush.bf16.msrb.mxu1 %v6442_v23  ;;  %1880 = vmatpush.bf16.msrb.mxu3 %v6469_v13  ;;  %v8060_v63 = vmov 0  }
 0x125   :  { %v1148_v37 = vadd.f32 %v1147_v11, %v1119_v24  ;;  %1349 = vmatmul.bf16.gmra.mxu0 %v6170_v45  ;;  %1868 = vmatpush.bf16.msrb.mxu2 %v6458_v22 }
 0x126   :  { %8188 = vst [vmem:[#allocation31_spill] sm:$0xff] %v6634_v4  ;;  %1378 = vmatmul.bf16.gmra.mxu1 %v6172_v46  ;;  %1407 = vmatmul.bf16.gmra.mxu2 %v6174_v47 }
 0x127   :  { %1436 = vmatmul.bf16.gmra.mxu3 %v6176_v48  ;;  %1843 = vmatpush.bf16.msrb.mxu0 %v6471_v27 }
 0x128   :  { %1856 = vmatpush.bf16.msrb.mxu1 %v6480_v33  ;;  %1881 = vmatpush.bf16.msrb.mxu3 %v6506_v49 }
 0x129   :  { %v1176_v45 = vpop.f32.mrf.mxu2  ;;  %1869 = vmatpush.bf16.msrb.mxu2 %v6500_v34 }
 0x12a   :  { %v1177_v46 = vadd.f32 %v1176_v45, %v1148_v37  ;;  %v1205_v47 = vpop.f32.mrf.mxu3  ;;  %v1120_v14 = vpop.f32.mrf.mxu0 }
 0x12b   :  { %v1149_v44 = vpop.f32.mrf.mxu1  ;;  %v1121_v15 = vadd.f32 %v1120_v14, %v6377_v0  ;;  %1844 = vmatpush.bf16.msrb.mxu0 %v6518_v16 }
 0x12c   :  { %v6655_v31 = vadd.f32 %v1205_v47, %v1177_v46  ;;  %1857 = vmatpush.bf16.msrb.mxu1 %v6524_v59  ;;  %1882 = vmatpush.bf16.msrb.mxu3 %v6533_v18 }
 0x12d   :  { %1870 = vmatpush.bf16.msrb.mxu2 %v6548_v58  ;;  %v1150_v0 = vadd.f32 %v1149_v44, %v1121_v15 }
 0x12e   :  { %8189 = vst [vmem:[#allocation32_spill] sm:$0xff] %v6655_v31 }
 0x12f   :  { %1845 = vmatpush.bf16.msrb.mxu0 %v6559_v12 }
 0x130   :  { %1858 = vmatpush.bf16.msrb.mxu1 %v6561_v52  ;;  %1883 = vmatpush.bf16.msrb.mxu3 %v6570_v51 }
 0x131   :  { %v1178_v24 = vpop.f32.mrf.mxu2  ;;  %1871 = vmatpush.bf16.msrb.mxu2 %v6585_v60 }
 0x132   :  { %v1179_v11 = vadd.f32 %v1178_v24, %v1150_v0  ;;  %v1207_v37 = vpop.f32.mrf.mxu3  ;;  %v1219_v45 = vpop.f32.mrf.mxu0 }
 0x133   :  { %v1220_v46 = vadd.f32 %v1219_v45, %v6670_v30  ;;  %v1248_v47 = vpop.f32.mrf.mxu1 }
 0x134   :  { %v6678_v55 = vadd.f32 %v1207_v37, %v1179_v11  ;;  %1884 = vmatpush.bf16.msrb.mxu3 %v6595_v40 }
 0x135   :  { %v1249_v14 = vadd.f32 %v1248_v47, %v1220_v46  ;;  %1717 = vmatmul.bf16.vlgmr.msra.gmra.mxu0 %v8060_v63 }
 0x136   :  { %8190 = vst [vmem:[#allocation33_spill] sm:$0xff] %v6678_v55  ;;  %1730 = vmatmul.bf16.vlgmr.msra.gmra.mxu1 %v8060_v63  ;;  %1743 = vmatmul.bf16.vlgmr.msra.gmra.mxu2 %v8060_v63 }
 0x137   :  { %1756 = vmatmul.bf16.vlgmr.msra.gmra.mxu3 %v8060_v63  ;;  %1966 = vmatpush.bf16.msra.mxu0 %v6243_v26 }
 0x138   :  { %1979 = vmatpush.bf16.msra.mxu1 %v6248_v29  ;;  %1992 = vmatpush.bf16.msra.mxu2 %v6268_v43 }
 0x139   :  { %v1277_v15 = vpop.f32.mrf.mxu2  ;;  %2005 = vmatpush.bf16.msra.mxu3 %v6323_v17 }
 0x13a   :  { %v1278_v0 = vadd.f32 %v1277_v15, %v1249_v14  ;;  %v1306_v24 = vpop.f32.mrf.mxu3  ;;  %v6693_v11 = vpop.f32.mrf.mxu0 }
 0x13b   :  { %v6695_v37 = vpop.f32.mrf.mxu1  ;;  %1967 = vmatpush.bf16.msra.mxu0 %v6287_v53 }
 0x13c   :  { %v6698_v45 = vadd.f32 %v1306_v24, %v1278_v0  ;;  %1980 = vmatpush.bf16.msra.mxu1 %v6289_v54  ;;  %1993 = vmatpush.bf16.msra.mxu2 %v6309_v10 }
 0x13d   :  { %2006 = vmatpush.bf16.msra.mxu3 %v6379_v2 }
 0x13e   :  { %8191 = vst [vmem:[#allocation34_spill] sm:$0xff] %v6698_v45 }
 0x13f   :  { %1968 = vmatpush.bf16.msra.mxu0 %v6335_v28 }
 0x140   :  { %1981 = vmatpush.bf16.msra.mxu1 %v6341_v32  ;;  %1994 = vmatpush.bf16.msra.mxu2 %v6357_v57 }
 0x141   :  { %v6706_v46 = vpop.f32.mrf.mxu2  ;;  %2007 = vmatpush.bf16.msra.mxu3 %v6424_v21 }
 0x142   :  { %v6709_v47 = vpop.f32.mrf.mxu3  ;;  %v1224_v14 = vpop.f32.mrf.mxu0 }
 0x143   :  { %v1225_v15 = vadd.f32 %v1224_v14, %v6670_v30  ;;  %v1253_v0 = vpop.f32.mrf.mxu1  ;;  %1969 = vmatpush.bf16.msra.mxu0 %v6381_v3 }
 0x144   :  { %1982 = vmatpush.bf16.msra.mxu1 %v6390_v20  ;;  %1995 = vmatpush.bf16.msra.mxu2 %v6410_v50 }
 0x145   :  { %v1254_v24 = vadd.f32 %v1253_v0, %v1225_v15  ;;  %2008 = vmatpush.bf16.msra.mxu3 %v6469_v13 }
 0x147   :  { %1970 = vmatpush.bf16.msra.mxu0 %v6436_v9 }
 0x148   :  { %1983 = vmatpush.bf16.msra.mxu1 %v6442_v23  ;;  %1996 = vmatpush.bf16.msra.mxu2 %v6458_v22 }
 0x149   :  { %v1282_v63 = vpop.f32.mrf.mxu2  ;;  %2009 = vmatpush.bf16.msra.mxu3 %v6506_v49 }
 0x14a   :  { %v1283_v14 = vadd.f32 %v1282_v63, %v1254_v24  ;;  %v1311_v44 = vpop.f32.mrf.mxu3  ;;  %v1226_v61 = vpop.f32.mrf.mxu0 }
 0x14b   :  { %v1255_v56 = vpop.f32.mrf.mxu1  ;;  %1971 = vmatpush.bf16.msra.mxu0 %v6471_v27  ;;  %v1227_v15 = vadd.f32 %v1226_v61, %v6670_v30 }
 0x14c   :  { %v6721_v36 = vadd.f32 %v1311_v44, %v1283_v14  ;;  %1984 = vmatpush.bf16.msra.mxu1 %v6480_v33  ;;  %1997 = vmatpush.bf16.msra.mxu2 %v6500_v34 }
 0x14d   :  { %2010 = vmatpush.bf16.msra.mxu3 %v6533_v18  ;;  %v1256_v62 = vadd.f32 %v1255_v56, %v1227_v15 }
 0x14e   :  { %8192 = vst [vmem:[#allocation35_spill] sm:$0xff] %v6721_v36 }
 0x14f   :  { %1972 = vmatpush.bf16.msra.mxu0 %v6518_v16 }
 0x150   :  { %1985 = vmatpush.bf16.msra.mxu1 %v6524_v59  ;;  %1998 = vmatpush.bf16.msra.mxu2 %v6548_v58 }
 0x151   :  { %v1284_v63 = vpop.f32.mrf.mxu2  ;;  %2011 = vmatpush.bf16.msra.mxu3 %v6570_v51 }
 0x152   :  { %v1313_v0 = vpop.f32.mrf.mxu3  ;;  %v1229_v44 = vpop.f32.mrf.mxu0  ;;  %v1285_v4 = vadd.f32 %v1284_v63, %v1256_v62 }
 0x153   :  { %v1230_v24 = vadd.f32 %v1229_v44, %v6670_v30  ;;  %v1258_v14 = vpop.f32.mrf.mxu1  ;;  %1973 = vmatpush.bf16.msra.mxu0 %v6559_v12 }
 0x154   :  { %1986 = vmatpush.bf16.msra.mxu1 %v6561_v52  ;;  %1999 = vmatpush.bf16.msra.mxu2 %v6585_v60  ;;  %v6741_v1 = vadd.f32 %v1313_v0, %v1285_v4  ;;  %v1222_v4 = vadd.f32 %v6693_v11, %v6670_v30 }
 0x155   :  { %v1259_v48 = vadd.f32 %v1258_v14, %v1230_v24  ;;  %2012 = vmatpush.bf16.msra.mxu3 %v6595_v40 }
 0x156   :  { %8196 = vst [vmem:[#allocation37_spill] sm:$0xff] %v6741_v1  ;;  %v1251_v14 = vadd.f32 %v6695_v37, %v1222_v4 }
 0x159   :  { %v1287_v61 = vpop.f32.mrf.mxu2 }
 0x15a   :  { %v1288_v19 = vadd.f32 %v1287_v61, %v1259_v48  ;;  %v1316_v31 = vpop.f32.mrf.mxu3  ;;  %v1231_v25 = vpop.f32.mrf.mxu0 }
 0x15b   :  { %v1260_v44 = vpop.f32.mrf.mxu1  ;;  %v1232_v24 = vadd.f32 %v1231_v25, %v6670_v30 }
 0x15c   :  { %v6743_v52 = vadd.f32 %v1316_v31, %v1288_v19 }
 0x15d   :  { %v1261_v7 = vadd.f32 %v1260_v44, %v1232_v24  ;;  %v1280_v44 = vadd.f32 %v6706_v46, %v1251_v14 }
 0x15e   :  { %8197 = vst [vmem:[#allocation38_spill] sm:$0xff] %v6743_v52 }
 0x161   :  { %v1289_v5 = vpop.f32.mrf.mxu2 }
 0x162   :  { %v1290_v48 = vadd.f32 %v1289_v5, %v1261_v7  ;;  %v1318_v19 = vpop.f32.mrf.mxu3  ;;  %v1234_v31 = vpop.f32.mrf.mxu0 }
 0x163   :  { %v1235_v25 = vadd.f32 %v1234_v31, %v6670_v30  ;;  %v1263_v63 = vpop.f32.mrf.mxu1  ;;  %v6770_v31 = vadd.f32 %v6709_v47, %v1280_v44 }
 0x164   :  { %v6757_v15 = vadd.f32 %v1318_v19, %v1290_v48 }
 0x165   :  { %v1264_v0 = vadd.f32 %v1263_v63, %v1235_v25  ;;  %8199 = vst [vmem:[#allocation40_spill] sm:$0xff] %v6770_v31  ;;  %v5696_v63 = vld [vmem:[%s8045_s3] sm:$0xf] }
 0x166   :  { %8198 = vst [vmem:[#allocation39_spill] sm:$0xff] %v6757_v15  ;;  %v6786_v47 = vperm.slane %v5696_v63, 3 }
 0x169   :  { %v1292_v24 = vpop.f32.mrf.mxu2 }
 0x16a   :  { %v1293_v7 = vadd.f32 %v1292_v24, %v1264_v0  ;;  %v1321_v5 = vpop.f32.mrf.mxu3  ;;  %v1236_v48 = vpop.f32.mrf.mxu0 }
 0x16b   :  { %v1265_v19 = vpop.f32.mrf.mxu1  ;;  %v1237_v4 = vadd.f32 %v1236_v48, %v6670_v30 }
 0x16c   :  { %v6772_v37 = vadd.f32 %v1321_v5, %v1293_v7 }
 0x16d   :  { %v1266_v0 = vadd.f32 %v1265_v19, %v1237_v4 }
 0x16e   :  { %8200 = vst [vmem:[#allocation41_spill] sm:$0xff] %v6772_v37 }
 0x171   :  { %v1294_v14 = vpop.f32.mrf.mxu2 }
 0x172   :  { %v1295_v44 = vadd.f32 %v1294_v14, %v1266_v0  ;;  %v1323_v30 = vpop.f32.mrf.mxu3  ;;  %v1335_v24 = vpop.f32.mrf.mxu0 }
 0x173   :  { %v1336_v7 = vadd.f32 %v1335_v24, %v6786_v47  ;;  %v1364_v5 = vpop.f32.mrf.mxu1 }
 0x174   :  { %v6789_v48 = vadd.f32 %v1323_v30, %v1295_v44 }
 0x175   :  { %v1365_v11 = vadd.f32 %v1364_v5, %v1336_v7 }
 0x176   :  { %8201 = vst [vmem:[#allocation42_spill] sm:$0xff] %v6789_v48 }
 0x179   :  { %v1393_v56 = vpop.f32.mrf.mxu2 }
 0x17a   :  { %v1394_v62 = vadd.f32 %v1393_v56, %v1365_v11  ;;  %v1422_v63 = vpop.f32.mrf.mxu3  ;;  %v1337_v61 = vpop.f32.mrf.mxu0 }
 0x17b   :  { %v1338_v19 = vadd.f32 %v1337_v61, %v6786_v47  ;;  %v1366_v4 = vpop.f32.mrf.mxu1 }
 0x17c   :  { %v6796_v0 = vadd.f32 %v1422_v63, %v1394_v62 }
 0x17d   :  { %v1367_v14 = vadd.f32 %v1366_v4, %v1338_v19 }
 0x17e   :  { %8202 = vst [vmem:[#allocation43_spill] sm:$0xff] %v6796_v0 }
 0x181   :  { %v1395_v24 = vpop.f32.mrf.mxu2 }
 0x182   :  { %v1396_v25 = vadd.f32 %v1395_v24, %v1367_v14  ;;  %v1424_v44 = vpop.f32.mrf.mxu3  ;;  %v1340_v30 = vpop.f32.mrf.mxu0 }
 0x183   :  { %v1341_v7 = vadd.f32 %v1340_v30, %v6786_v47  ;;  %v1369_v5 = vpop.f32.mrf.mxu1 }
 0x184   :  { %v6799_v52 = vadd.f32 %v1424_v44, %v1396_v25  ;;  %v143_v25 = vadd.s32 384, %v6224_v8 }
 0x185   :  { %v1370_v46 = vadd.f32 %v1369_v5, %v1341_v7 }
 0x186   :  { %8203 = vst [vmem:[#allocation44_spill] sm:$0xff] %v6799_v52 }
 0x189   :  { %v1398_v1 = vpop.f32.mrf.mxu2 }
 0x18a   :  { %v1399_v56 = vadd.f32 %v1398_v1, %v1370_v46  ;;  %v1427_v11 = vpop.f32.mrf.mxu3  ;;  %v1342_v15 = vpop.f32.mrf.mxu0  ;;  %v147_v46 = vand.u32 64, %v143_v25 }
 0x18b   :  { %v1343_v61 = vadd.f32 %v1342_v15, %v6786_v47  ;;  %v1371_v36 = vpop.f32.mrf.mxu1 }
 0x18c   :  { %v6802_v62 = vadd.f32 %v1427_v11, %v1399_v56  ;;  %vm6809_vm3 = vcmp.eq.s32.totalorder %v147_v46, 0  ;;  %v8206_v11 = vmov 0 }
 0x18d   :  { %v1372_v63 = vadd.f32 %v1371_v36, %v1343_v61  ;;  %v8207_v11 = vsel %vm6809_vm3, 4294967295, %v8206_v11 }
 0x18e   :  { %8204 = vst [vmem:[#allocation45_spill] sm:$0xff] %v6802_v62 }
 0x18f   :  { %8208 = vst [vmem:[#allocation47_spill] sm:$0xff] %v8207_v11 }
 0x191   :  { %v1400_v19 = vpop.f32.mrf.mxu2 }
 0x192   :  { %v1401_v4 = vadd.f32 %v1400_v19, %v1372_v63  ;;  %v1429_v14 = vpop.f32.mrf.mxu3  ;;  %v1345_v24 = vpop.f32.mrf.mxu0 }
 0x193   :  { %v1346_v30 = vadd.f32 %v1345_v24, %v6786_v47  ;;  %v1374_v37 = vpop.f32.mrf.mxu1 }
 0x194   :  { %v6806_v44 = vadd.f32 %v1429_v14, %v1401_v4 }
 0x195   :  { %v1375_v1 = vadd.f32 %v1374_v37, %v1346_v30 }
 0x196   :  { %8205 = vst [vmem:[#allocation46_spill] sm:$0xff] %v6806_v44 }
 0x199   :  { %v1403_v7 = vpop.f32.mrf.mxu2 }
 0x19a   :  { %v1404_v5 = vadd.f32 %v1403_v7, %v1375_v1  ;;  %v1432_v15 = vpop.f32.mrf.mxu3  ;;  %v1347_v31 = vpop.f32.mrf.mxu0 }
 0x19b   :  { %v1348_v56 = vadd.f32 %v1347_v31, %v6786_v47  ;;  %v1376_v36 = vpop.f32.mrf.mxu1 }
 0x19c   :  { %v6813_v61 = vadd.f32 %v1432_v15, %v1404_v5 }
 0x19d   :  { %v1377_v63 = vadd.f32 %v1376_v36, %v1348_v56 }
 0x19e   :  { %8209 = vst [vmem:[#allocation48_spill] sm:$0xff] %v6813_v61 }
 0x1a1   :  { %v1405_v19 = vpop.f32.mrf.mxu2 }
 0x1a2   :  { %v1406_v31 = vadd.f32 %v1405_v19, %v1377_v63  ;;  %v1434_v4 = vpop.f32.mrf.mxu3  ;;  %v1350_v14 = vpop.f32.mrf.mxu0 }
 0x1a3   :  { %v1351_v24 = vadd.f32 %v1350_v14, %v6786_v47  ;;  %v1379_v30 = vpop.f32.mrf.mxu1 }
 0x1a4   :  { %v6824_v25 = vadd.f32 %v1434_v4, %v1406_v31 }
 0x1a5   :  { %v1380_v1 = vadd.f32 %v1379_v30, %v1351_v24 }
 0x1a6   :  { %8210 = vst [vmem:[#allocation49_spill] sm:$0xff] %v6824_v25 }
 0x1a9   :  { %v1408_v5 = vpop.f32.mrf.mxu2 }
 0x1aa   :  { %v1409_v15 = vadd.f32 %v1408_v5, %v1380_v1  ;;  %v1437_v56 = vpop.f32.mrf.mxu3  ;;  %v1352_v36 = vpop.f32.mrf.mxu0 }
 0x1ab   :  { %v1381_v63 = vpop.f32.mrf.mxu1  ;;  %v1353_v31 = vadd.f32 %v1352_v36, %v6786_v47  ;;  %v8212_v47 = vsel %vm6253_vm0, %v6212_v39, %v6396_v38 }
 0x1ac   :  { %v6834_v19 = vadd.f32 %v1437_v56, %v1409_v15  ;;  %v1443_v56 = vsel %vm6607_vm1, %v6447_v41, %v6678_v55 }
 0x1ad   :  { %v1382_v24 = vadd.f32 %v1381_v63, %v1353_v31 }
 0x1ae   :  { %8211 = vst [vmem:[#allocation50_spill] sm:$0xff] %v6834_v19 }
 0x1b1   :  { %v1410_v30 = vpop.f32.mrf.mxu2 }
 0x1b2   :  { %v1411_v1 = vadd.f32 %v1410_v30, %v1382_v24  ;;  %v1439_v5 = vpop.f32.mrf.mxu3  ;;  %v1718_v7 = vpop.f32.mrf.mxu0 }
 0x1b3   :  { %v1761_v15 = vadd.f32 %v1718_v7, %v8212_v47  ;;  %v1731_v36 = vpop.f32.mrf.mxu1  ;;  %v1444_v7 = vsel %vm6737_vm2, %v6698_v45, %v6789_v48 }
 0x1b4   :  { %v6854_v37 = vadd.f32 %v1439_v5, %v1411_v1  ;;  %v1762_v14 = vadd.f32 %v1731_v36, %v1443_v56 }
 0x1b5   :  { %v5033_v63 = vmul.f32 -1.442695, %v1761_v15 }
 0x1b6   :  { %8213 = vst [vmem:[#allocation51_spill] sm:$0xff] %v6854_v37  ;;  %v5034_v31 = vmul.f32 -1.442695, %v1762_v14 }
 0x1b7   :  { %5568 = vpow2.f32 %v5033_v63 }
 0x1b8   :  { %5570 = vpow2.f32 %v5034_v31 }
 0x1b9   :  { %v1744_v30 = vpop.f32.mrf.mxu2 }
 0x1ba   :  { %v1763_v47 = vadd.f32 %v1744_v30, %v1444_v7  ;;  %v1757_v8 = vpop.f32.mrf.mxu3  ;;  %v1720_v1 = vpop.f32.mrf.mxu0  ;;  %v1445_v7 = vsel %vm6809_vm3, %v6796_v0, %v6854_v37 }
 0x1bb   :  { %v1733_v5 = vpop.f32.mrf.mxu1  ;;  %v1764_v1 = vadd.f32 %v1757_v8, %v1445_v7 }
 0x1bc   :  { %v5035_v56 = vmul.f32 -1.442695, %v1763_v47 }
 0x1bd   :  { %v5569_v15 = vpop.eup %5568 }
 0x1be   :  { %v5571_v14 = vpop.eup %5570  ;;  %v1774_v36 = vadd.f32 1.0, %v5569_v15  ;;  %5572 = vpow2.f32 %v5035_v56 }
 0x1bf   :  { %v1775_v46 = vadd.f32 1.0, %v5571_v14 }
 0x1c0   :  { %5574 = vrcp.f32 %v1774_v36  ;;  %v1788_v14 = vand.u32 2147483648, %v1774_v36  ;;  %vm1782_vm6 = vweird.f32 %v1774_v36 }
 0x1c1   :  { %5576 = vrcp.f32 %v1775_v46  ;;  %v1746_v63 = vpop.f32.mrf.mxu2  ;;  %v1803_v48 = vand.u32 2147483648, %v1775_v46  ;;  %v1801_v41 = vand.u32 2147483647, %v1775_v46  ;;  %vm1797_vm7 = vweird.f32 %v1775_v46 }
 0x1c2   :  { %v1759_v31 = vpop.f32.mrf.mxu3  ;;  %v1789_v7 = vor.u32 1.1754944e-38, %v1788_v14 }
 0x1c3   :  { %v1786_v31 = vand.u32 2147483647, %v1774_v36  ;;  %v1804_v37 = vor.u32 1.1754944e-38, %v1803_v48  ;;  %vm1802_vm11 = vcmp.eq.f32.partialorder %v1801_v41, 8.507059e+37 }
 0x1c4   :  { %v5573_v24 = vpop.eup %5572 }
 0x1c5   :  { %v1776_v4 = vadd.f32 1.0, %v5573_v24  ;;  %vm1787_vm9 = vcmp.eq.f32.partialorder %v1786_v31, 8.507059e+37  ;;  %v8218_v31 = vld [vmem:[#allocation26_spill] sm:$0xff] }
 0x1c6   :  { %v5575_v30 = vpop.eup %5574 }
 0x1c7   :  { %v5577_v5 = vpop.eup %5576  ;;  %v1778_v47 = vmul.f32 %v5575_v30, %v1774_v36  ;;  %5578 = vrcp.f32 %v1776_v4  ;;  %vm1783_vm4 = vweird.f32 %v5575_v30  ;;  %v1818_v36 = vand.u32 2147483648, %v1776_v4 }
 0x1c8   :  { %v1793_v45 = vmul.f32 %v5577_v5, %v1775_v46  ;;  %5580 = vtanh.f32 %v1764_v1  ;;  %vm1798_vm5 = vweird.f32 %v5577_v5  ;;  %vm1784_vm8 = vmor %vm1782_vm6, %vm1783_vm4  ;;  %vm1812_vm13 = vweird.f32 %v1776_v4 }
 0x1c9   :  { %v1779_v15 = vsub.f32 1.0, %v1778_v47  ;;  %vm1799_vm10 = vmor %vm1797_vm7, %vm1798_vm5  ;;  %vm1828_vm4 = vcmask 523264   ;;  %vm1831_vm5 = vcmask 1048064  }
 0x1ca   :  { %v1794_v56 = vsub.f32 1.0, %v1793_v45 }
 0x1cb   :  { %v1780_v63 = vmul.f32 %v5575_v30, %v1779_v15 }
 0x1cc   :  { %v1795_v24 = vmul.f32 %v5577_v5, %v1794_v56 }
 0x1cd   :  { %v5579_v55 = vpop.eup %5578  ;;  %v1781_v39 = vadd.f32 %v5575_v30, %v1780_v63 }
 0x1ce   :  { %v1808_v8 = vmul.f32 %v5579_v55, %v1776_v4  ;;  %v1796_v0 = vadd.f32 %v5577_v5, %v1795_v24  ;;  %v5581_v45 = vpop.eup %5580  ;;  %vm1813_vm12 = vweird.f32 %v5579_v55  ;;  %v8219_v24 = vld [vmem:[#allocation32_spill] sm:$0xff] }
 0x1cf   :  { %v1785_v47 = vsel %vm1784_vm8, %v5575_v30, %v1781_v39  ;;  %v1816_v39 = vand.u32 2147483647, %v1776_v4  ;;  %vm1814_vm14 = vmor %vm1812_vm13, %vm1813_vm12  ;;  %v1819_v30 = vor.u32 1.1754944e-38, %v1818_v36 }
 0x1d0   :  { %v1809_v1 = vsub.f32 1.0, %v1808_v8  ;;  %v1790_v15 = vsel %vm1787_vm9, %v1789_v7, %v1785_v47  ;;  %v1800_v38 = vsel %vm1799_vm10, %v5577_v5, %v1796_v0  ;;  %v8220_v8 = vsel %vm6607_vm1, %v8218_v31, %v8219_v24 }
 0x1d1   :  { %v1805_v56 = vsel %vm1802_vm11, %v1804_v37, %v1800_v38  ;;  %v1824_v61 = vmul.f32 %v5581_v45, %v1790_v15  ;;  %vm1817_vm15 = vcmp.eq.f32.partialorder %v1816_v39, 8.507059e+37  ;;  %v8215_v37 = vld [vmem:[#allocation18_spill] sm:$0xff] }
 0x1d2   :  { %v1810_v44 = vmul.f32 %v5579_v55, %v1809_v1  ;;  %v1823_v25 = vmul.f32 0.0, %v1805_v56  ;;  %v8221_v56 = vld [vmem:[#allocation40_spill] sm:$0xff] }
 0x1d4   :  { %v6868_v63 = vadd.f32 %v1824_v61, %v1823_v25  ;;  %v1811_v46 = vadd.f32 %v5579_v55, %v1810_v44  ;;  %v8216_v25 = vld [vmem:[#allocation23_spill] sm:$0xff] }
 0x1d5   :  { %v8217_v4 = vsel %vm6253_vm0, %v8215_v37, %v8216_v25 }
 0x1d6   :  { %5582 = vtanh.f32 %v6868_v63  ;;  %v1815_v48 = vsel %vm1814_vm14, %v5579_v55, %v1811_v46  ;;  %v8214_v55 = vld [vmem:[#allocation28_spill] sm:$0xff]  ;;  %v8222_v46 = vld [vmem:[#allocation41_spill] sm:$0xff] }
 0x1d7   :  { %v1820_v0 = vsel %vm1817_vm15, %v1819_v30, %v1815_v48  ;;  %v8223_v36 = vsel %vm6737_vm2, %v8221_v56, %v8222_v46 }
 0x1dc   :  { %v5583_v14 = vpop.eup %5582 }
 0x1dd   :  { %v1827_v38 = vmul.f32 %v5583_v14, %v1820_v0 }
 0x1df   :  { %1829 = vst.msk [vmem:[#allocation3] sm:$0xff] %vm1828_vm4, %v1827_v38  ;;  %v1837_v41 = vpack.c.bf16 %v1827_v38, %v1827_v38 }
 0x1e0   :  { %1832 = vst.msk [vmem:[#allocation3 + $0x38] sm:$0xff] %vm1831_vm5, %v1827_v38 }
 0x1e1   :  { %1846 = vmatmul.bf16.vlgmr.msrb.gmra.mxu0 %v1837_v41  ;;  %1859 = vmatmul.bf16.vlgmr.msrb.gmra.mxu1 %v1837_v41 }
 0x1e2   :  { %1872 = vmatmul.bf16.vlgmr.msrb.gmra.mxu2 %v1837_v41  ;;  %1885 = vmatmul.bf16.vlgmr.msrb.gmra.mxu3 %v1837_v41 }
 0x1e3   :  { %2094 = vmatpush.bf16.msrb.mxu0 %v6243_v26  ;;  %2107 = vmatpush.bf16.msrb.mxu1 %v6248_v29 }
 0x1e4   :  { %2120 = vmatpush.bf16.msrb.mxu2 %v6268_v43  ;;  %2133 = vmatpush.bf16.msrb.mxu3 %v6323_v17 }
 0x1e7   :  { %2095 = vmatpush.bf16.msrb.mxu0 %v6287_v53  ;;  %2108 = vmatpush.bf16.msrb.mxu1 %v6289_v54 }
 0x1e8   :  { %2121 = vmatpush.bf16.msrb.mxu2 %v6309_v10  ;;  %2134 = vmatpush.bf16.msrb.mxu3 %v6379_v2 }
 0x1eb   :  { %2096 = vmatpush.bf16.msrb.mxu0 %v6335_v28  ;;  %2109 = vmatpush.bf16.msrb.mxu1 %v6341_v32 }
 0x1ec   :  { %2122 = vmatpush.bf16.msrb.mxu2 %v6357_v57  ;;  %2135 = vmatpush.bf16.msrb.mxu3 %v6424_v21 }
 0x1ef   :  { %2097 = vmatpush.bf16.msrb.mxu0 %v6381_v3  ;;  %2110 = vmatpush.bf16.msrb.mxu1 %v6390_v20 }
 0x1f0   :  { %2123 = vmatpush.bf16.msrb.mxu2 %v6410_v50  ;;  %2136 = vmatpush.bf16.msrb.mxu3 %v6469_v13 }
 0x1f3   :  { %2098 = vmatpush.bf16.msrb.mxu0 %v6436_v9  ;;  %2111 = vmatpush.bf16.msrb.mxu1 %v6442_v23 }
 0x1f4   :  { %2124 = vmatpush.bf16.msrb.mxu2 %v6458_v22  ;;  %2137 = vmatpush.bf16.msrb.mxu3 %v6506_v49 }
 0x1f7   :  { %2099 = vmatpush.bf16.msrb.mxu0 %v6471_v27  ;;  %2112 = vmatpush.bf16.msrb.mxu1 %v6480_v33 }
 0x1f8   :  { %2125 = vmatpush.bf16.msrb.mxu2 %v6500_v34  ;;  %2138 = vmatpush.bf16.msrb.mxu3 %v6533_v18 }
 0x1fb   :  { %2100 = vmatpush.bf16.msrb.mxu0 %v6518_v16  ;;  %2113 = vmatpush.bf16.msrb.mxu1 %v6524_v59 }
 0x1fc   :  { %2126 = vmatpush.bf16.msrb.mxu2 %v6548_v58  ;;  %2139 = vmatpush.bf16.msrb.mxu3 %v6570_v51 }
 0x1ff   :  { %2101 = vmatpush.bf16.msrb.mxu0 %v6559_v12  ;;  %2114 = vmatpush.bf16.msrb.mxu1 %v8214_v55 }
 0x200   :  { %2127 = vmatpush.bf16.msrb.mxu2 %v6585_v60  ;;  %2140 = vmatpush.bf16.msrb.mxu3 %v6595_v40 }
 0x25e   :  { %v1847_v44 = vpop.f32.mrf.mxu0  ;;  %v1860_v61 = vpop.f32.mrf.mxu1 }
 0x25f   :  { %v1890_v5 = vadd.f32 %v1847_v44, %v8217_v4  ;;  %v1891_v7 = vadd.f32 %v1860_v61, %v8220_v8 }
 0x261   :  { %v5036_v47 = vmul.f32 -1.442695, %v1890_v5  ;;  %v5037_v45 = vmul.f32 -1.442695, %v1891_v7 }
 0x263   :  { %5584 = vpow2.f32 %v5036_v47  ;;  %v8224_v47 = vsel %vm6809_vm3, %v6799_v52, %v6834_v19 }
 0x264   :  { %5586 = vpow2.f32 %v5037_v45 }
 0x265   :  { %v1873_v1 = vpop.f32.mrf.mxu2  ;;  %v1886_v15 = vpop.f32.mrf.mxu3 }
 0x266   :  { %v1892_v39 = vadd.f32 %v1873_v1, %v8223_v36  ;;  %v1849_v48 = vpop.f32.mrf.mxu0  ;;  %v1862_v30 = vpop.f32.mrf.mxu1  ;;  %v1893_v45 = vadd.f32 %v1886_v15, %v8224_v47 }
 0x268   :  { %v5038_v14 = vmul.f32 -1.442695, %v1892_v39 }
 0x269   :  { %v5585_v0 = vpop.eup %5584 }
 0x26a   :  { %v5587_v38 = vpop.eup %5586  ;;  %v1903_v41 = vadd.f32 1.0, %v5585_v0  ;;  %5588 = vpow2.f32 %v5038_v14 }
 0x26b   :  { %v1904_v44 = vadd.f32 1.0, %v5587_v38 }
 0x26c   :  { %5590 = vrcp.f32 %v1903_v41  ;;  %v1917_v14 = vand.u32 2147483648, %v1903_v41  ;;  %vm1911_vm8 = vweird.f32 %v1903_v41 }
 0x26d   :  { %5592 = vrcp.f32 %v1904_v44  ;;  %v1875_v61 = vpop.f32.mrf.mxu2  ;;  %v1888_v4 = vpop.f32.mrf.mxu3  ;;  %v1932_v0 = vand.u32 2147483648, %v1904_v44  ;;  %vm1926_vm9 = vweird.f32 %v1904_v44 }
 0x26e   :  { %v1915_v61 = vand.u32 2147483647, %v1903_v41  ;;  %v1918_v47 = vor.u32 1.1754944e-38, %v1917_v14 }
 0x270   :  { %v5589_v5 = vpop.eup %5588  ;;  %vm1916_vm12 = vcmp.eq.f32.partialorder %v1915_v61, 8.507059e+37 }
 0x271   :  { %v1905_v8 = vadd.f32 1.0, %v5589_v5  ;;  %v1930_v5 = vand.u32 2147483647, %v1904_v44 }
 0x272   :  { %v5591_v7 = vpop.eup %5590 }
 0x273   :  { %v5593_v1 = vpop.eup %5592  ;;  %v1907_v36 = vmul.f32 %v5591_v7, %v1903_v41  ;;  %5594 = vrcp.f32 %v1905_v8  ;;  %vm1912_vm6 = vweird.f32 %v5591_v7  ;;  %vm1931_vm13 = vcmp.eq.f32.partialorder %v1930_v5, 8.507059e+37  ;;  %v8229_v5 = vld [vmem:[#allocation31_spill] sm:$0xff] }
 0x274   :  { %v1922_v39 = vmul.f32 %v5593_v1, %v1904_v44  ;;  %5596 = vtanh.f32 %v1893_v45  ;;  %vm1927_vm7 = vweird.f32 %v5593_v1  ;;  %vm1913_vm10 = vmor %vm1911_vm8, %vm1912_vm6  ;;  %v1947_v14 = vand.u32 2147483648, %v1905_v8 }
 0x275   :  { %v1908_v48 = vsub.f32 1.0, %v1907_v36  ;;  %vm1928_vm11 = vmor %vm1926_vm9, %vm1927_vm7  ;;  %v1933_v36 = vor.u32 1.1754944e-38, %v1932_v0  ;;  %vm1941_vm15 = vweird.f32 %v1905_v8 }
 0x276   :  { %v1923_v30 = vsub.f32 1.0, %v1922_v39  ;;  %v1948_v0 = vor.u32 1.1754944e-38, %v1947_v14 }
 0x277   :  { %v1909_v38 = vmul.f32 %v5591_v7, %v1908_v48 }
 0x278   :  { %v1924_v4 = vmul.f32 %v5593_v1, %v1923_v30 }
 0x279   :  { %v5595_v56 = vpop.eup %5594  ;;  %v1910_v46 = vadd.f32 %v5591_v7, %v1909_v38 }
 0x27a   :  { %v1937_v15 = vmul.f32 %v5595_v56, %v1905_v8  ;;  %v1925_v52 = vadd.f32 %v5593_v1, %v1924_v4  ;;  %v5597_v45 = vpop.eup %5596  ;;  %vm1942_vm14 = vweird.f32 %v5595_v56  ;;  %v8228_v4 = vld [vmem:[#allocation27_spill] sm:$0xff] }
 0x27b   :  { %v1914_v39 = vsel %vm1913_vm10, %v5591_v7, %v1910_v46  ;;  %v1945_v46 = vand.u32 2147483647, %v1905_v8  ;;  %vm1943_vm6 = vmor %vm1941_vm15, %vm1942_vm14 }
 0x27c   :  { %v1938_v19 = vsub.f32 1.0, %v1937_v15  ;;  %v1919_v48 = vsel %vm1916_vm12, %v1918_v47, %v1914_v39  ;;  %v1929_v31 = vsel %vm1928_vm11, %v5593_v1, %v1925_v52  ;;  %v8230_v15 = vsel %vm6607_vm1, %v8228_v4, %v8229_v5 }
 0x27d   :  { %v1934_v30 = vsel %vm1931_vm13, %v1933_v36, %v1929_v31  ;;  %v1953_v24 = vmul.f32 %v5597_v45, %v1919_v48  ;;  %vm1946_vm7 = vcmp.eq.f32.partialorder %v1945_v46, 8.507059e+37 }
 0x27e   :  { %v1939_v37 = vmul.f32 %v5595_v56, %v1938_v19  ;;  %v1952_v38 = vmul.f32 %v1934_v30, %v6868_v63  ;;  %v8231_v30 = vld [vmem:[#allocation35_spill] sm:$0xff] }
 0x280   :  { %v6926_v41 = vadd.f32 %v1953_v24, %v1952_v38  ;;  %v1940_v44 = vadd.f32 %v5595_v56, %v1939_v37  ;;  %v8225_v24 = vld [vmem:[#allocation19_spill] sm:$0xff] }
 0x281   :  { %v8232_v38 = vld [vmem:[#allocation39_spill] sm:$0xff] }
 0x282   :  { %5598 = vtanh.f32 %v6926_v41  ;;  %v1944_v7 = vsel %vm1943_vm6, %v5595_v56, %v1940_v44  ;;  %v8226_v56 = vld [vmem:[#allocation22_spill] sm:$0xff]  ;;  %v8233_v44 = vsel %vm6737_vm2, %v8231_v30, %v8232_v38 }
 0x283   :  { %v1949_v1 = vsel %vm1946_vm7, %v1948_v0, %v1944_v7  ;;  %v8227_v8 = vsel %vm6253_vm0, %v8225_v24, %v8226_v56 }
 0x288   :  { %v5599_v52 = vpop.eup %5598 }
 0x289   :  { %v1956_v31 = vmul.f32 %v5599_v52, %v1949_v1 }
 0x28b   :  { %1958 = vst.msk [vmem:[#allocation3 + $0x8] sm:$0xff] %vm1828_vm4, %v1956_v31  ;;  %v1965_v19 = vpack.c.bf16 %v1956_v31, %v1956_v31 }
 0x28c   :  { %1960 = vst.msk [vmem:[#allocation3 + $0x30] sm:$0xff] %vm1831_vm5, %v1956_v31 }
 0x28d   :  { %1974 = vmatmul.bf16.vlgmr.msra.gmra.mxu0 %v1965_v19  ;;  %1987 = vmatmul.bf16.vlgmr.msra.gmra.mxu1 %v1965_v19 }
 0x28e   :  { %2000 = vmatmul.bf16.vlgmr.msra.gmra.mxu2 %v1965_v19  ;;  %2013 = vmatmul.bf16.vlgmr.msra.gmra.mxu3 %v1965_v19 }
 0x28f   :  { %2222 = vmatpush.bf16.msra.mxu0 %v6243_v26  ;;  %2235 = vmatpush.bf16.msra.mxu1 %v6248_v29 }
 0x290   :  { %2248 = vmatpush.bf16.msra.mxu2 %v6268_v43  ;;  %2261 = vmatpush.bf16.msra.mxu3 %v6323_v17 }
 0x293   :  { %2223 = vmatpush.bf16.msra.mxu0 %v6287_v53  ;;  %2236 = vmatpush.bf16.msra.mxu1 %v6289_v54 }
 0x294   :  { %2249 = vmatpush.bf16.msra.mxu2 %v6309_v10  ;;  %2262 = vmatpush.bf16.msra.mxu3 %v6379_v2 }
 0x297   :  { %2224 = vmatpush.bf16.msra.mxu0 %v6335_v28  ;;  %2237 = vmatpush.bf16.msra.mxu1 %v6341_v32 }
 0x298   :  { %2250 = vmatpush.bf16.msra.mxu2 %v6357_v57  ;;  %2263 = vmatpush.bf16.msra.mxu3 %v6424_v21 }
 0x29b   :  { %2225 = vmatpush.bf16.msra.mxu0 %v6381_v3  ;;  %2238 = vmatpush.bf16.msra.mxu1 %v6390_v20 }
 0x29c   :  { %2251 = vmatpush.bf16.msra.mxu2 %v6410_v50  ;;  %2264 = vmatpush.bf16.msra.mxu3 %v6469_v13 }
 0x29f   :  { %2226 = vmatpush.bf16.msra.mxu0 %v6436_v9  ;;  %2239 = vmatpush.bf16.msra.mxu1 %v6442_v23 }
 0x2a0   :  { %2252 = vmatpush.bf16.msra.mxu2 %v6458_v22  ;;  %2265 = vmatpush.bf16.msra.mxu3 %v6506_v49 }
 0x2a3   :  { %2227 = vmatpush.bf16.msra.mxu0 %v6471_v27  ;;  %2240 = vmatpush.bf16.msra.mxu1 %v6480_v33 }
 0x2a4   :  { %2253 = vmatpush.bf16.msra.mxu2 %v6500_v34  ;;  %2266 = vmatpush.bf16.msra.mxu3 %v6533_v18 }
 0x2a7   :  { %2228 = vmatpush.bf16.msra.mxu0 %v6518_v16  ;;  %2241 = vmatpush.bf16.msra.mxu1 %v6524_v59 }
 0x2a8   :  { %2254 = vmatpush.bf16.msra.mxu2 %v6548_v58  ;;  %2267 = vmatpush.bf16.msra.mxu3 %v6570_v51 }
 0x2ab   :  { %2229 = vmatpush.bf16.msra.mxu0 %v6559_v12  ;;  %2242 = vmatpush.bf16.msra.mxu1 %v8214_v55 }
 0x2ac   :  { %2255 = vmatpush.bf16.msra.mxu2 %v6585_v60  ;;  %2268 = vmatpush.bf16.msra.mxu3 %v6595_v40 }
 0x30a   :  { %v1975_v63 = vpop.f32.mrf.mxu0  ;;  %v1988_v37 = vpop.f32.mrf.mxu1 }
 0x30b   :  { %v2018_v61 = vadd.f32 %v1975_v63, %v8227_v8  ;;  %v2019_v47 = vadd.f32 %v1988_v37, %v8230_v15 }
 0x30d   :  { %v5039_v36 = vmul.f32 -1.442695, %v2018_v61  ;;  %v5040_v39 = vmul.f32 -1.442695, %v2019_v47  ;;  %v8234_v47 = vld [vmem:[#allocation49_spill] sm:$0xff] }
 0x30f   :  { %5600 = vpow2.f32 %v5039_v36  ;;  %v8235_v36 = vsel %vm6809_vm3, %v6802_v62, %v8234_v47 }
 0x310   :  { %5602 = vpow2.f32 %v5040_v39 }
 0x311   :  { %v2001_v45 = vpop.f32.mrf.mxu2  ;;  %v2014_v48 = vpop.f32.mrf.mxu3 }
 0x312   :  { %v2020_v14 = vadd.f32 %v2001_v45, %v8233_v44  ;;  %v1977_v46 = vpop.f32.mrf.mxu0  ;;  %v1990_v7 = vpop.f32.mrf.mxu1  ;;  %v2021_v39 = vadd.f32 %v2014_v48, %v8235_v36 }
 0x314   :  { %v5041_v0 = vmul.f32 -1.442695, %v2020_v14 }
 0x315   :  { %v5601_v52 = vpop.eup %5600 }
 0x316   :  { %v5603_v1 = vpop.eup %5602  ;;  %v2031_v31 = vadd.f32 1.0, %v5601_v52  ;;  %5604 = vpow2.f32 %v5041_v0 }
 0x317   :  { %v2032_v19 = vadd.f32 1.0, %v5603_v1 }
 0x318   :  { %5606 = vrcp.f32 %v2031_v31  ;;  %v2045_v0 = vand.u32 2147483648, %v2031_v31  ;;  %vm2039_vm10 = vweird.f32 %v2031_v31 }
 0x319   :  { %5608 = vrcp.f32 %v2032_v19  ;;  %v2003_v63 = vpop.f32.mrf.mxu2  ;;  %v2016_v37 = vpop.f32.mrf.mxu3  ;;  %v2060_v52 = vand.u32 2147483648, %v2032_v19  ;;  %vm2054_vm11 = vweird.f32 %v2032_v19 }
 0x31a   :  { %v2043_v63 = vand.u32 2147483647, %v2031_v31  ;;  %v2046_v36 = vor.u32 1.1754944e-38, %v2045_v0 }
 0x31c   :  { %v5605_v8 = vpop.eup %5604  ;;  %vm2044_vm14 = vcmp.eq.f32.partialorder %v2043_v63, 8.507059e+37 }
 0x31d   :  { %v2033_v61 = vadd.f32 1.0, %v5605_v8  ;;  %v2058_v8 = vand.u32 2147483647, %v2032_v19 }
 0x31e   :  { %v5607_v15 = vpop.eup %5606 }
 0x31f   :  { %v5609_v45 = vpop.eup %5608  ;;  %v2035_v44 = vmul.f32 %v5607_v15, %v2031_v31  ;;  %5610 = vrcp.f32 %v2033_v61  ;;  %vm2040_vm8 = vweird.f32 %v5607_v15  ;;  %vm2059_vm15 = vcmp.eq.f32.partialorder %v2058_v8, 8.507059e+37  ;;  %v8240_v8 = vld [vmem:[#allocation30_spill] sm:$0xff] }
 0x320   :  { %v2050_v14 = vmul.f32 %v5609_v45, %v2032_v19  ;;  %5612 = vtanh.f32 %v2021_v39  ;;  %vm2055_vm9 = vweird.f32 %v5609_v45  ;;  %vm2041_vm12 = vmor %vm2039_vm10, %vm2040_vm8  ;;  %v2075_v0 = vand.u32 2147483648, %v2033_v61 }
 0x321   :  { %v2036_v46 = vsub.f32 1.0, %v2035_v44  ;;  %vm2056_vm13 = vmor %vm2054_vm11, %vm2055_vm9  ;;  %v2061_v44 = vor.u32 1.1754944e-38, %v2060_v52  ;;  %vm2069_vm7 = vweird.f32 %v2033_v61 }
 0x322   :  { %v2051_v7 = vsub.f32 1.0, %v2050_v14  ;;  %v2076_v52 = vor.u32 1.1754944e-38, %v2075_v0 }
 0x323   :  { %v2037_v1 = vmul.f32 %v5607_v15, %v2036_v46 }
 0x324   :  { %v2052_v37 = vmul.f32 %v5609_v45, %v2051_v7 }
 0x325   :  { %v5611_v25 = vpop.eup %5610  ;;  %v2038_v30 = vadd.f32 %v5607_v15, %v2037_v1 }
 0x326   :  { %v2065_v48 = vmul.f32 %v5611_v25, %v2033_v61  ;;  %v2053_v62 = vadd.f32 %v5609_v45, %v2052_v37  ;;  %v5613_v39 = vpop.eup %5612  ;;  %vm2070_vm6 = vweird.f32 %v5611_v25  ;;  %v8239_v37 = vld [vmem:[#allocation29_spill] sm:$0xff] }
 0x327   :  { %v2042_v14 = vsel %vm2041_vm12, %v5607_v15, %v2038_v30  ;;  %v2073_v30 = vand.u32 2147483647, %v2033_v61  ;;  %vm2071_vm8 = vmor %vm2069_vm7, %vm2070_vm6 }
 0x328   :  { %v2066_v47 = vsub.f32 1.0, %v2065_v48  ;;  %v2047_v46 = vsel %vm2044_vm14, %v2046_v36, %v2042_v14  ;;  %v2057_v38 = vsel %vm2056_vm13, %v5609_v45, %v2053_v62  ;;  %v8241_v48 = vsel %vm6607_vm1, %v8239_v37, %v8240_v8 }
 0x329   :  { %v2062_v7 = vsel %vm2059_vm15, %v2061_v44, %v2057_v38  ;;  %v2081_v4 = vmul.f32 %v5613_v39, %v2047_v46  ;;  %vm2074_vm9 = vcmp.eq.f32.partialorder %v2073_v30, 8.507059e+37 }
 0x32a   :  { %v2067_v5 = vmul.f32 %v5611_v25, %v2066_v47  ;;  %v2080_v1 = vmul.f32 %v2062_v7, %v6926_v41  ;;  %v8242_v7 = vld [vmem:[#allocation37_spill] sm:$0xff] }
 0x32c   :  { %v6984_v31 = vadd.f32 %v2081_v4, %v2080_v1  ;;  %v2068_v19 = vadd.f32 %v5611_v25, %v2067_v5  ;;  %v8236_v4 = vld [vmem:[#allocation20_spill] sm:$0xff]  ;;  %v8237_v5 = vld [vmem:[#allocation21_spill] sm:$0xff]  ;;  %v8243_v1 = vld [vmem:[#allocation38_spill] sm:$0xff] }
 0x32d   :  { %v8238_v61 = vsel %vm6253_vm0, %v8236_v4, %v8237_v5 }
 0x32e   :  { %5614 = vtanh.f32 %v6984_v31  ;;  %v2072_v15 = vsel %vm2071_vm8, %v5611_v25, %v2068_v19  ;;  %v8244_v19 = vsel %vm6737_vm2, %v8242_v7, %v8243_v1 }
 0x32f   :  { %v2077_v45 = vsel %vm2074_vm9, %v2076_v52, %v2072_v15 }
 0x334   :  { %v5615_v62 = vpop.eup %5614 }
 0x335   :  { %v2084_v38 = vmul.f32 %v5615_v62, %v2077_v45 }
 0x337   :  { %2086 = vst.msk [vmem:[#allocation3 + $0x10] sm:$0xff] %vm1828_vm4, %v2084_v38  ;;  %v2093_v47 = vpack.c.bf16 %v2084_v38, %v2084_v38 }
 0x338   :  { %2088 = vst.msk [vmem:[#allocation3 + $0x28] sm:$0xff] %vm1831_vm5, %v2084_v38 }
 0x339   :  { %2102 = vmatmul.bf16.vlgmr.msrb.gmra.mxu0 %v2093_v47  ;;  %2115 = vmatmul.bf16.vlgmr.msrb.gmra.mxu1 %v2093_v47 }
 0x33a   :  { %2128 = vmatmul.bf16.vlgmr.msrb.gmra.mxu2 %v2093_v47  ;;  %2141 = vmatmul.bf16.vlgmr.msrb.gmra.mxu3 %v2093_v47 }
 0x33b   :  { %2348 = vmatpush.bf16.msrb.mxu0 %v6243_v26  ;;  %2361 = vmatpush.bf16.msrb.mxu1 %v6248_v29 }
 0x33c   :  { %2374 = vmatpush.bf16.msrb.mxu2 %v6268_v43  ;;  %2387 = vmatpush.bf16.msrb.mxu3 %v6323_v17 }
 0x33f   :  { %2349 = vmatpush.bf16.msrb.mxu0 %v6287_v53  ;;  %2362 = vmatpush.bf16.msrb.mxu1 %v6289_v54 }
 0x340   :  { %2375 = vmatpush.bf16.msrb.mxu2 %v6309_v10  ;;  %2388 = vmatpush.bf16.msrb.mxu3 %v6379_v2 }
 0x343   :  { %2350 = vmatpush.bf16.msrb.mxu0 %v6335_v28  ;;  %2363 = vmatpush.bf16.msrb.mxu1 %v6341_v32 }
 0x344   :  { %2376 = vmatpush.bf16.msrb.mxu2 %v6357_v57  ;;  %2389 = vmatpush.bf16.msrb.mxu3 %v6424_v21 }
 0x347   :  { %2351 = vmatpush.bf16.msrb.mxu0 %v6381_v3  ;;  %2364 = vmatpush.bf16.msrb.mxu1 %v6390_v20 }
 0x348   :  { %2377 = vmatpush.bf16.msrb.mxu2 %v6410_v50  ;;  %2390 = vmatpush.bf16.msrb.mxu3 %v6469_v13 }
 0x34b   :  { %2352 = vmatpush.bf16.msrb.mxu0 %v6436_v9  ;;  %2365 = vmatpush.bf16.msrb.mxu1 %v6442_v23 }
 0x34c   :  { %2378 = vmatpush.bf16.msrb.mxu2 %v6458_v22  ;;  %2391 = vmatpush.bf16.msrb.mxu3 %v6506_v49 }
 0x34f   :  { %2353 = vmatpush.bf16.msrb.mxu0 %v6471_v27  ;;  %2366 = vmatpush.bf16.msrb.mxu1 %v6480_v33 }
 0x350   :  { %2379 = vmatpush.bf16.msrb.mxu2 %v6500_v34  ;;  %2392 = vmatpush.bf16.msrb.mxu3 %v6533_v18 }
 0x353   :  { %2354 = vmatpush.bf16.msrb.mxu0 %v6518_v16  ;;  %2367 = vmatpush.bf16.msrb.mxu1 %v6524_v59 }
 0x354   :  { %2380 = vmatpush.bf16.msrb.mxu2 %v6548_v58  ;;  %2393 = vmatpush.bf16.msrb.mxu3 %v6570_v51 }
 0x357   :  { %2355 = vmatpush.bf16.msrb.mxu0 %v6559_v12  ;;  %2368 = vmatpush.bf16.msrb.mxu1 %v8214_v55 }
 0x358   :  { %2381 = vmatpush.bf16.msrb.mxu2 %v6585_v60  ;;  %2394 = vmatpush.bf16.msrb.mxu3 %v6595_v40 }
 0x3b6   :  { %v2103_v25 = vpop.f32.mrf.mxu0  ;;  %v2116_v41 = vpop.f32.mrf.mxu1 }
 0x3b7   :  { %v2146_v63 = vadd.f32 %v2103_v25, %v8238_v61  ;;  %v2147_v36 = vadd.f32 %v2116_v41, %v8241_v48 }
 0x3b9   :  { %v5042_v44 = vmul.f32 -1.442695, %v2146_v63  ;;  %v5043_v14 = vmul.f32 -1.442695, %v2147_v36  ;;  %v8245_v36 = vld [vmem:[#allocation46_spill] sm:$0xff] }
 0x3bb   :  { %5616 = vpow2.f32 %v5042_v44  ;;  %v8246_v44 = vld [vmem:[#allocation48_spill] sm:$0xff] }
 0x3bc   :  { %5618 = vpow2.f32 %v5043_v14  ;;  %v8247_v14 = vsel %vm6809_vm3, %v8245_v36, %v8246_v44 }
 0x3bd   :  { %v2129_v39 = vpop.f32.mrf.mxu2  ;;  %v2142_v46 = vpop.f32.mrf.mxu3 }
 0x3be   :  { %v2148_v0 = vadd.f32 %v2129_v39, %v8244_v19  ;;  %v2105_v30 = vpop.f32.mrf.mxu0  ;;  %v2118_v15 = vpop.f32.mrf.mxu1  ;;  %v2149_v39 = vadd.f32 %v2142_v46, %v8247_v14 }
 0x3c0   :  { %v5044_v52 = vmul.f32 -1.442695, %v2148_v0 }
 0x3c1   :  { %v5617_v62 = vpop.eup %5616 }
 0x3c2   :  { %v5619_v45 = vpop.eup %5618  ;;  %v2159_v38 = vadd.f32 1.0, %v5617_v62  ;;  %5620 = vpow2.f32 %v5044_v52 }
 0x3c3   :  { %v2160_v47 = vadd.f32 1.0, %v5619_v45 }
 0x3c4   :  { %5622 = vrcp.f32 %v2159_v38  ;;  %v2173_v62 = vand.u32 2147483648, %v2159_v38  ;;  %vm2167_vm12 = vweird.f32 %v2159_v38 }
 0x3c5   :  { %5624 = vrcp.f32 %v2160_v47  ;;  %v2131_v25 = vpop.f32.mrf.mxu2  ;;  %v2144_v41 = vpop.f32.mrf.mxu3  ;;  %v2188_v45 = vand.u32 2147483648, %v2160_v47  ;;  %v2186_v24 = vand.u32 2147483647, %v2160_v47  ;;  %vm2182_vm13 = vweird.f32 %v2160_v47 }
 0x3c6   :  { %v2171_v41 = vand.u32 2147483647, %v2159_v38  ;;  %v2174_v14 = vor.u32 1.1754944e-38, %v2173_v62 }
 0x3c7   :  { %vm2187_vm7 = vcmp.eq.f32.partialorder %v2186_v24, 8.507059e+37 }
 0x3c8   :  { %v5621_v61 = vpop.eup %5620  ;;  %vm2172_vm6 = vcmp.eq.f32.partialorder %v2171_v41, 8.507059e+37 }
 0x3c9   :  { %v2161_v63 = vadd.f32 1.0, %v5621_v61 }
 0x3ca   :  { %v5623_v48 = vpop.eup %5622 }
 0x3cb   :  { %v5625_v19 = vpop.eup %5624  ;;  %v2163_v0 = vmul.f32 %v5623_v48, %v2159_v38  ;;  %5626 = vrcp.f32 %v2161_v63  ;;  %vm2168_vm10 = vweird.f32 %v5623_v48  ;;  %v2203_v62 = vand.u32 2147483648, %v2161_v63 }
 0x3cc   :  { %v2178_v30 = vmul.f32 %v5625_v19, %v2160_v47  ;;  %5628 = vtanh.f32 %v2149_v39  ;;  %vm2183_vm11 = vweird.f32 %v5625_v19  ;;  %vm2169_vm14 = vmor %vm2167_vm12, %vm2168_vm10  ;;  %vm2197_vm9 = vweird.f32 %v2161_v63 }
 0x3cd   :  { %v2164_v15 = vsub.f32 1.0, %v2163_v0  ;;  %vm2184_vm15 = vmor %vm2182_vm13, %vm2183_vm11  ;;  %v2189_v0 = vor.u32 1.1754944e-38, %v2188_v45  ;;  %v2204_v45 = vor.u32 1.1754944e-38, %v2203_v62 }
 0x3ce   :  { %v2179_v52 = vsub.f32 1.0, %v2178_v30 }
 0x3cf   :  { %v2165_v25 = vmul.f32 %v5623_v48, %v2164_v15 }
 0x3d0   :  { %v2180_v61 = vmul.f32 %v5625_v19, %v2179_v52 }
 0x3d1   :  { %v5627_v56 = vpop.eup %5626  ;;  %v2166_v11 = vadd.f32 %v5623_v48, %v2165_v25 }
 0x3d2   :  { %v2193_v46 = vmul.f32 %v5627_v56, %v2161_v63  ;;  %v2181_v36 = vadd.f32 %v5625_v19, %v2180_v61  ;;  %v5629_v39 = vpop.eup %5628  ;;  %vm2198_vm8 = vweird.f32 %v5627_v56 }
 0x3d3   :  { %v2170_v30 = vsel %vm2169_vm14, %v5623_v48, %v2166_v11  ;;  %v2201_v11 = vand.u32 2147483647, %v2161_v63  ;;  %vm2199_vm10 = vmor %vm2197_vm9, %vm2198_vm8  ;;  %v8249_v63 = vsel %vm6607_vm1, %v8240_v8, %v8239_v37 }
 0x3d4   :  { %v2194_v44 = vsub.f32 1.0, %v2193_v46  ;;  %v2175_v15 = vsel %vm2172_vm6, %v2174_v14, %v2170_v30  ;;  %v2185_v7 = vsel %vm2184_vm15, %v5625_v19, %v2181_v36  ;;  %v8251_v30 = vld [vmem:[#allocation38_spill] sm:$0xff] }
 0x3d5   :  { %v2190_v52 = vsel %vm2187_vm7, %v2189_v0, %v2185_v7  ;;  %v2209_v1 = vmul.f32 %v5629_v39, %v2175_v15  ;;  %vm2202_vm11 = vcmp.eq.f32.partialorder %v2201_v11, 8.507059e+37  ;;  %v8252_v39 = vld [vmem:[#allocation37_spill] sm:$0xff] }
 0x3d6   :  { %v2195_v42 = vmul.f32 %v5627_v56, %v2194_v44  ;;  %v2208_v25 = vmul.f32 %v2190_v52, %v6984_v31  ;;  %v8248_v31 = vsel %vm6253_vm0, %v8237_v5, %v8236_v4  ;;  %v8253_v15 = vsel %vm6737_vm2, %v8251_v30, %v8252_v39 }
 0x3d8   :  { %v7042_v38 = vadd.f32 %v2209_v1, %v2208_v25  ;;  %v2196_v47 = vadd.f32 %v5627_v56, %v2195_v42 }
 0x3da   :  { %5630 = vtanh.f32 %v7042_v38  ;;  %v2200_v48 = vsel %vm2199_vm10, %v5627_v56, %v2196_v47 }
 0x3db   :  { %v2205_v24 = vsel %vm2202_vm11, %v2204_v45, %v2200_v48 }
 0x3e0   :  { %v5631_v36 = vpop.eup %5630 }
 0x3e1   :  { %v2212_v7 = vmul.f32 %v5631_v36, %v2205_v24 }
 0x3e3   :  { %2214 = vst.msk [vmem:[#allocation3 + $0x18] sm:$0xff] %vm1828_vm4, %v2212_v7  ;;  %v2221_v44 = vpack.c.bf16 %v2212_v7, %v2212_v7 }
 0x3e4   :  { %2216 = vst.msk [vmem:[#allocation3 + $0x20] sm:$0xff] %vm1831_vm5, %v2212_v7 }
 0x3e5   :  { %2230 = vmatmul.bf16.vlgmr.msra.gmra.mxu0 %v2221_v44  ;;  %2243 = vmatmul.bf16.vlgmr.msra.gmra.mxu1 %v2221_v44 }
 0x3e6   :  { %2256 = vmatmul.bf16.vlgmr.msra.gmra.mxu2 %v2221_v44  ;;  %2269 = vmatmul.bf16.vlgmr.msra.gmra.mxu3 %v2221_v44  ;;  %v8255_v44 = vld [vmem:[#allocation48_spill] sm:$0xff] }
 0x3e7   :  { %2474 = vmatpush.bf16.msra.mxu0 %v6243_v26  ;;  %2487 = vmatpush.bf16.msra.mxu1 %v6248_v29 }
 0x3e8   :  { %2500 = vmatpush.bf16.msra.mxu2 %v6268_v43  ;;  %2513 = vmatpush.bf16.msra.mxu3 %v6323_v17 }
 0x3eb   :  { %2475 = vmatpush.bf16.msra.mxu0 %v6287_v53  ;;  %2488 = vmatpush.bf16.msra.mxu1 %v6289_v54 }
 0x3ec   :  { %2501 = vmatpush.bf16.msra.mxu2 %v6309_v10  ;;  %2514 = vmatpush.bf16.msra.mxu3 %v6379_v2 }
 0x3ef   :  { %2476 = vmatpush.bf16.msra.mxu0 %v6335_v28  ;;  %2489 = vmatpush.bf16.msra.mxu1 %v6341_v32 }
 0x3f0   :  { %2502 = vmatpush.bf16.msra.mxu2 %v6357_v57  ;;  %2515 = vmatpush.bf16.msra.mxu3 %v6424_v21 }
 0x3f3   :  { %2477 = vmatpush.bf16.msra.mxu0 %v6381_v3  ;;  %2490 = vmatpush.bf16.msra.mxu1 %v6390_v20 }
 0x3f4   :  { %2503 = vmatpush.bf16.msra.mxu2 %v6410_v50  ;;  %2516 = vmatpush.bf16.msra.mxu3 %v6469_v13 }
 0x3f7   :  { %2478 = vmatpush.bf16.msra.mxu0 %v6436_v9  ;;  %2491 = vmatpush.bf16.msra.mxu1 %v6442_v23 }
 0x3f8   :  { %2504 = vmatpush.bf16.msra.mxu2 %v6458_v22  ;;  %2517 = vmatpush.bf16.msra.mxu3 %v6506_v49 }
 0x3fb   :  { %2479 = vmatpush.bf16.msra.mxu0 %v6471_v27  ;;  %2492 = vmatpush.bf16.msra.mxu1 %v6480_v33 }
 0x3fc   :  { %2505 = vmatpush.bf16.msra.mxu2 %v6500_v34  ;;  %2518 = vmatpush.bf16.msra.mxu3 %v6533_v18 }
 0x3ff   :  { %2480 = vmatpush.bf16.msra.mxu0 %v6518_v16  ;;  %2493 = vmatpush.bf16.msra.mxu1 %v6524_v59 }
 0x400   :  { %2506 = vmatpush.bf16.msra.mxu2 %v6548_v58  ;;  %2519 = vmatpush.bf16.msra.mxu3 %v6570_v51 }
 0x403   :  { %2481 = vmatpush.bf16.msra.mxu0 %v6559_v12  ;;  %2494 = vmatpush.bf16.msra.mxu1 %v8214_v55 }
 0x404   :  { %2507 = vmatpush.bf16.msra.mxu2 %v6585_v60  ;;  %2520 = vmatpush.bf16.msra.mxu3 %v6595_v40 }
 0x462   :  { %v2231_v42 = vpop.f32.mrf.mxu0  ;;  %v2244_v56 = vpop.f32.mrf.mxu1 }
 0x463   :  { %v2274_v1 = vadd.f32 %v2231_v42, %v8248_v31  ;;  %v2275_v19 = vadd.f32 %v2244_v56, %v8249_v63  ;;  %v8256_v42 = vld [vmem:[#allocation46_spill] sm:$0xff] }
 0x464   :  { %v8257_v56 = vsel %vm6809_vm3, %v8255_v44, %v8256_v42 }
 0x465   :  { %v5045_v41 = vmul.f32 -1.442695, %v2274_v1  ;;  %v5046_v61 = vmul.f32 -1.442695, %v2275_v19 }
 0x467   :  { %5632 = vpow2.f32 %v5045_v41 }
 0x468   :  { %5634 = vpow2.f32 %v5046_v61 }
 0x469   :  { %v2257_v46 = vpop.f32.mrf.mxu2  ;;  %v2270_v14 = vpop.f32.mrf.mxu3 }
 0x46a   :  { %v2276_v52 = vadd.f32 %v2257_v46, %v8253_v15  ;;  %v2233_v4 = vpop.f32.mrf.mxu0  ;;  %v2246_v5 = vpop.f32.mrf.mxu1  ;;  %v2277_v31 = vadd.f32 %v2270_v14, %v8257_v56 }
 0x46c   :  { %v5047_v25 = vmul.f32 -1.442695, %v2276_v52 }
 0x46d   :  { %v5633_v47 = vpop.eup %5632 }
 0x46e   :  { %v5635_v62 = vpop.eup %5634  ;;  %v2287_v11 = vadd.f32 1.0, %v5633_v47  ;;  %5636 = vpow2.f32 %v5047_v25 }
 0x46f   :  { %v2288_v37 = vadd.f32 1.0, %v5635_v62 }
 0x470   :  { %5638 = vrcp.f32 %v2287_v11  ;;  %v2301_v46 = vand.u32 2147483648, %v2287_v11  ;;  %v2299_v15 = vand.u32 2147483647, %v2287_v11  ;;  %vm2295_vm14 = vweird.f32 %v2287_v11 }
 0x471   :  { %5640 = vrcp.f32 %v2288_v37  ;;  %v2259_v8 = vpop.f32.mrf.mxu2  ;;  %v2272_v48 = vpop.f32.mrf.mxu3  ;;  %v2316_v30 = vand.u32 2147483648, %v2288_v37  ;;  %v2314_v4 = vand.u32 2147483647, %v2288_v37  ;;  %vm2310_vm15 = vweird.f32 %v2288_v37 }
 0x472   :  { %v2302_v47 = vor.u32 1.1754944e-38, %v2301_v46  ;;  %vm2300_vm8 = vcmp.eq.f32.partialorder %v2299_v15, 8.507059e+37 }
 0x473   :  { %v2317_v8 = vor.u32 1.1754944e-38, %v2316_v30  ;;  %vm2315_vm9 = vcmp.eq.f32.partialorder %v2314_v4, 8.507059e+37 }
 0x474   :  { %v5637_v45 = vpop.eup %5636 }
 0x475   :  { %v2289_v36 = vadd.f32 1.0, %v5637_v45 }
 0x476   :  { %v5639_v24 = vpop.eup %5638 }
 0x477   :  { %v5641_v1 = vpop.eup %5640  ;;  %v2291_v63 = vmul.f32 %v5639_v24, %v2287_v11  ;;  %5642 = vrcp.f32 %v2289_v36  ;;  %vm2296_vm12 = vweird.f32 %v5639_v24  ;;  %vm2325_vm11 = vweird.f32 %v2289_v36 }
 0x478   :  { %v2306_v19 = vmul.f32 %v5641_v1, %v2288_v37  ;;  %5644 = vtanh.f32 %v2277_v31  ;;  %vm2311_vm13 = vweird.f32 %v5641_v1  ;;  %vm2297_vm6 = vmor %vm2295_vm14, %vm2296_vm12 }
 0x479   :  { %v2292_v41 = vsub.f32 1.0, %v2291_v63  ;;  %vm2312_vm7 = vmor %vm2310_vm15, %vm2311_vm13 }
 0x47a   :  { %v2307_v61 = vsub.f32 1.0, %v2306_v19 }
 0x47b   :  { %v2293_v39 = vmul.f32 %v5639_v24, %v2292_v41 }
 0x47c   :  { %v2308_v52 = vmul.f32 %v5641_v1, %v2307_v61  ;;  %v2331_v61 = vand.u32 2147483648, %v2289_v36 }
 0x47d   :  { %v5643_v5 = vpop.eup %5642  ;;  %v2294_v25 = vadd.f32 %v5639_v24, %v2293_v39 }
 0x47e   :  { %v2321_v14 = vmul.f32 %v5643_v5, %v2289_v36  ;;  %v2309_v62 = vadd.f32 %v5641_v1, %v2308_v52  ;;  %v5645_v45 = vpop.eup %5644  ;;  %vm2326_vm10 = vweird.f32 %v5643_v5  ;;  %v2332_v30 = vor.u32 1.1754944e-38, %v2331_v61 }
 0x47f   :  { %v2298_v48 = vsel %vm2297_vm6, %v5639_v24, %v2294_v25  ;;  %v2329_v24 = vand.u32 2147483647, %v2289_v36  ;;  %vm2327_vm12 = vmor %vm2325_vm11, %vm2326_vm10 }
 0x480   :  { %v2322_v44 = vsub.f32 1.0, %v2321_v14  ;;  %v2303_v42 = vsel %vm2300_vm8, %v2302_v47, %v2298_v48  ;;  %v2313_v56 = vsel %vm2312_vm7, %v5641_v1, %v2309_v62 }
 0x481   :  { %v2318_v31 = vsel %vm2315_vm9, %v2317_v8, %v2313_v56  ;;  %v2337_v63 = vmul.f32 %v5645_v45, %v2303_v42  ;;  %vm2330_vm13 = vcmp.eq.f32.partialorder %v2329_v24, 8.507059e+37 }
 0x482   :  { %v2323_v19 = vmul.f32 %v5643_v5, %v2322_v44  ;;  %v2336_v41 = vmul.f32 %v2318_v31, %v7042_v38 }
 0x484   :  { %v7100_v11 = vadd.f32 %v2337_v63, %v2336_v41  ;;  %v2324_v37 = vadd.f32 %v5643_v5, %v2323_v19 }
 0x486   :  { %5646 = vtanh.f32 %v7100_v11  ;;  %v2328_v46 = vsel %vm2327_vm12, %v5643_v5, %v2324_v37 }
 0x487   :  { %v2333_v39 = vsel %vm2330_vm13, %v2332_v30, %v2328_v46 }
 0x48c   :  { %v5647_v1 = vpop.eup %5646 }
 0x48d   :  { %v2340_v15 = vmul.f32 %v5647_v1, %v2333_v39 }
 0x48f   :  { %2341 = vst.msk [vmem:[#allocation3 + $0x20] sm:$0xff] %vm1828_vm4, %v2340_v15  ;;  %v2347_v52 = vpack.c.bf16 %v2340_v15, %v2340_v15 }
 0x490   :  { %2342 = vst.msk [vmem:[#allocation3 + $0x18] sm:$0xff] %vm1831_vm5, %v2340_v15 }
 0x491   :  { %2356 = vmatmul.bf16.vlgmr.msrb.gmra.mxu0 %v2347_v52  ;;  %2369 = vmatmul.bf16.vlgmr.msrb.gmra.mxu1 %v2347_v52 }
 0x492   :  { %2382 = vmatmul.bf16.vlgmr.msrb.gmra.mxu2 %v2347_v52  ;;  %2395 = vmatmul.bf16.vlgmr.msrb.gmra.mxu3 %v2347_v52 }
 0x493   :  { %2600 = vmatpush.bf16.msrb.mxu0 %v6243_v26  ;;  %2613 = vmatpush.bf16.msrb.mxu1 %v6248_v29 }
 0x494   :  { %2626 = vmatpush.bf16.msrb.mxu2 %v6268_v43  ;;  %2639 = vmatpush.bf16.msrb.mxu3 %v6323_v17  ;;  %v8258_v43 = vld [vmem:[#allocation22_spill] sm:$0xff]  ;;  %v8261_v17 = vld [vmem:[#allocation31_spill] sm:$0xff] }
 0x497   :  { %2601 = vmatpush.bf16.msrb.mxu0 %v6287_v53  ;;  %2614 = vmatpush.bf16.msrb.mxu1 %v6289_v54  ;;  %v8259_v53 = vld [vmem:[#allocation19_spill] sm:$0xff] }
 0x498   :  { %2627 = vmatpush.bf16.msrb.mxu2 %v6309_v10  ;;  %2640 = vmatpush.bf16.msrb.mxu3 %v6379_v2  ;;  %v8260_v54 = vsel %vm6253_vm0, %v8258_v43, %v8259_v53 }
 0x49b   :  { %2602 = vmatpush.bf16.msrb.mxu0 %v6335_v28  ;;  %2615 = vmatpush.bf16.msrb.mxu1 %v6341_v32 }
 0x49c   :  { %2628 = vmatpush.bf16.msrb.mxu2 %v6357_v57  ;;  %2641 = vmatpush.bf16.msrb.mxu3 %v6424_v21 }
 0x49f   :  { %2603 = vmatpush.bf16.msrb.mxu0 %v6381_v3  ;;  %2616 = vmatpush.bf16.msrb.mxu1 %v6390_v20  ;;  %v8264_v20 = vld [vmem:[#allocation39_spill] sm:$0xff] }
 0x4a0   :  { %2629 = vmatpush.bf16.msrb.mxu2 %v6410_v50  ;;  %2642 = vmatpush.bf16.msrb.mxu3 %v6469_v13  ;;  %v8265_v50 = vld [vmem:[#allocation35_spill] sm:$0xff] }
 0x4a1   :  { %v8266_v21 = vsel %vm6737_vm2, %v8264_v20, %v8265_v50 }
 0x4a3   :  { %2604 = vmatpush.bf16.msrb.mxu0 %v6436_v9  ;;  %2617 = vmatpush.bf16.msrb.mxu1 %v6442_v23 }
 0x4a4   :  { %2630 = vmatpush.bf16.msrb.mxu2 %v6458_v22  ;;  %2643 = vmatpush.bf16.msrb.mxu3 %v6506_v49 }
 0x4a7   :  { %2605 = vmatpush.bf16.msrb.mxu0 %v6471_v27  ;;  %2618 = vmatpush.bf16.msrb.mxu1 %v6480_v33 }
 0x4a8   :  { %2631 = vmatpush.bf16.msrb.mxu2 %v6500_v34  ;;  %2644 = vmatpush.bf16.msrb.mxu3 %v6533_v18 }
 0x4ab   :  { %2606 = vmatpush.bf16.msrb.mxu0 %v6518_v16  ;;  %2619 = vmatpush.bf16.msrb.mxu1 %v6524_v59 }
 0x4ac   :  { %2632 = vmatpush.bf16.msrb.mxu2 %v6548_v58  ;;  %2645 = vmatpush.bf16.msrb.mxu3 %v6570_v51  ;;  %v8262_v51 = vld [vmem:[#allocation27_spill] sm:$0xff] }
 0x4ad   :  { %v8263_v28 = vsel %vm6607_vm1, %v8261_v17, %v8262_v51 }
 0x4af   :  { %2607 = vmatpush.bf16.msrb.mxu0 %v6559_v12  ;;  %2620 = vmatpush.bf16.msrb.mxu1 %v8214_v55  ;;  %v8268_v55 = vld [vmem:[#allocation45_spill] sm:$0xff] }
 0x4b0   :  { %2633 = vmatpush.bf16.msrb.mxu2 %v6585_v60  ;;  %2646 = vmatpush.bf16.msrb.mxu3 %v6595_v40  ;;  %v8267_v40 = vld [vmem:[#allocation49_spill] sm:$0xff] }
 0x4b1   :  { %v8269_v38 = vsel %vm6809_vm3, %v8267_v40, %v8268_v55 }
 0x50e   :  { %v2357_v26 = vpop.f32.mrf.mxu0  ;;  %v2370_v29 = vpop.f32.mrf.mxu1 }
 0x50f   :  { %v2400_v10 = vadd.f32 %v2357_v26, %v8260_v54  ;;  %v2401_v32 = vadd.f32 %v2370_v29, %v8263_v28 }
 0x511   :  { %v5048_v57 = vmul.f32 -1.442695, %v2400_v10  ;;  %v5049_v2 = vmul.f32 -1.442695, %v2401_v32 }
 0x513   :  { %5648 = vpow2.f32 %v5048_v57 }
 0x514   :  { %5650 = vpow2.f32 %v5049_v2 }
 0x515   :  { %v2383_v60 = vpop.f32.mrf.mxu2  ;;  %v2396_v3 = vpop.f32.mrf.mxu3 }
 0x516   :  { %v2402_v9 = vadd.f32 %v2383_v60, %v8266_v21  ;;  %v2359_v23 = vpop.f32.mrf.mxu0  ;;  %v2372_v22 = vpop.f32.mrf.mxu1  ;;  %v2403_v36 = vadd.f32 %v2396_v3, %v8269_v38  ;;  %v8270_v60 = vld [vmem:[#allocation23_spill] sm:$0xff]  ;;  %v8271_v3 = vld [vmem:[#allocation18_spill] sm:$0xff]  ;;  %v8273_v21 = vld [vmem:[#allocation32_spill] sm:$0xff] }
 0x517   :  { %v8272_v20 = vsel %vm6253_vm0, %v8270_v60, %v8271_v3 }
 0x518   :  { %v5050_v13 = vmul.f32 -1.442695, %v2402_v9  ;;  %v8274_v9 = vld [vmem:[#allocation26_spill] sm:$0xff] }
 0x519   :  { %v5649_v27 = vpop.eup %5648  ;;  %v8275_v23 = vsel %vm6607_vm1, %v8273_v21, %v8274_v9 }
 0x51a   :  { %v5651_v33 = vpop.eup %5650  ;;  %v2413_v34 = vadd.f32 1.0, %v5649_v27  ;;  %5652 = vpow2.f32 %v5050_v13 }
 0x51b   :  { %v2414_v49 = vadd.f32 1.0, %v5651_v33 }
 0x51c   :  { %5654 = vrcp.f32 %v2413_v34  ;;  %v2427_v62 = vand.u32 2147483648, %v2413_v34  ;;  %v2425_v45 = vand.u32 2147483647, %v2413_v34  ;;  %vm2421_vm6 = vweird.f32 %v2413_v34 }
 0x51d   :  { %5656 = vrcp.f32 %v2414_v49  ;;  %v2385_v16 = vpop.f32.mrf.mxu2  ;;  %v2398_v59 = vpop.f32.mrf.mxu3  ;;  %v2442_v8 = vand.u32 2147483648, %v2414_v49  ;;  %v2440_v42 = vand.u32 2147483647, %v2414_v49  ;;  %vm2436_vm7 = vweird.f32 %v2414_v49 }
 0x51e   :  { %v2428_v19 = vor.u32 1.1754944e-38, %v2427_v62  ;;  %vm2426_vm10 = vcmp.eq.f32.partialorder %v2425_v45, 8.507059e+37  ;;  %v8277_v16 = vld [vmem:[#allocation40_spill] sm:$0xff] }
 0x51f   :  { %v2443_v37 = vor.u32 1.1754944e-38, %v2442_v8  ;;  %vm2441_vm11 = vcmp.eq.f32.partialorder %v2440_v42, 8.507059e+37  ;;  %v8279_v8 = vld [vmem:[#allocation50_spill] sm:$0xff] }
 0x520   :  { %v5653_v18 = vpop.eup %5652 }
 0x521   :  { %v2415_v58 = vadd.f32 1.0, %v5653_v18 }
 0x522   :  { %v5655_v12 = vpop.eup %5654 }
 0x523   :  { %v5657_v4 = vpop.eup %5656  ;;  %v2417_v5 = vmul.f32 %v5655_v12, %v2413_v34  ;;  %5658 = vrcp.f32 %v2415_v58  ;;  %vm2422_vm14 = vweird.f32 %v5655_v12  ;;  %v2457_v53 = vand.u32 2147483648, %v2415_v58 }
 0x524   :  { %v2432_v25 = vmul.f32 %v5657_v4, %v2414_v49  ;;  %5660 = vtanh.f32 %v2403_v36  ;;  %vm2437_vm15 = vweird.f32 %v5657_v4  ;;  %vm2423_vm8 = vmor %vm2421_vm6, %vm2422_vm14  ;;  %vm2451_vm13 = vweird.f32 %v2415_v58  ;;  %v8276_v49 = vld [vmem:[#allocation41_spill] sm:$0xff] }
 0x525   :  { %v2418_v14 = vsub.f32 1.0, %v2417_v5  ;;  %vm2438_vm9 = vmor %vm2436_vm7, %vm2437_vm15  ;;  %v2455_v54 = vand.u32 2147483647, %v2415_v58  ;;  %v2458_v17 = vor.u32 1.1754944e-38, %v2457_v53  ;;  %v8278_v59 = vsel %vm6737_vm2, %v8276_v49, %v8277_v16 }
 0x526   :  { %v2433_v47 = vsub.f32 1.0, %v2432_v25 }
 0x527   :  { %v2419_v48 = vmul.f32 %v5655_v12, %v2418_v14  ;;  %vm2456_vm15 = vcmp.eq.f32.partialorder %v2455_v54, 8.507059e+37 }
 0x528   :  { %v2434_v44 = vmul.f32 %v5657_v4, %v2433_v47 }
 0x529   :  { %v5659_v56 = vpop.eup %5658  ;;  %v2420_v31 = vadd.f32 %v5655_v12, %v2419_v48  ;;  %v8280_v48 = vld [vmem:[#allocation44_spill] sm:$0xff] }
 0x52a   :  { %v2447_v63 = vmul.f32 %v5659_v56, %v2415_v58  ;;  %v2435_v41 = vadd.f32 %v5657_v4, %v2434_v44  ;;  %v5661_v24 = vpop.eup %5660  ;;  %vm2452_vm12 = vweird.f32 %v5659_v56  ;;  %v8281_v45 = vsel %vm6809_vm3, %v8279_v8, %v8280_v48 }
 0x52b   :  { %v2424_v61 = vsel %vm2423_vm8, %v5655_v12, %v2420_v31  ;;  %vm2453_vm14 = vmor %vm2451_vm13, %vm2452_vm12 }
 0x52c   :  { %v2448_v46 = vsub.f32 1.0, %v2447_v63  ;;  %v2429_v30 = vsel %vm2426_vm10, %v2428_v19, %v2424_v61  ;;  %v2439_v1 = vsel %vm2438_vm9, %v5657_v4, %v2435_v41 }
 0x52d   :  { %v2444_v39 = vsel %vm2441_vm11, %v2443_v37, %v2439_v1  ;;  %v2463_v15 = vmul.f32 %v5661_v24, %v2429_v30 }
 0x52e   :  { %v2449_v52 = vmul.f32 %v5659_v56, %v2448_v46  ;;  %v2462_v26 = vmul.f32 %v2444_v39, %v7100_v11 }
 0x530   :  { %v7158_v29 = vadd.f32 %v2463_v15, %v2462_v26  ;;  %v2450_v43 = vadd.f32 %v5659_v56, %v2449_v52 }
 0x532   :  { %5662 = vtanh.f32 %v7158_v29  ;;  %v2454_v10 = vsel %vm2453_vm14, %v5659_v56, %v2450_v43 }
 0x533   :  { %v2459_v28 = vsel %vm2456_vm15, %v2458_v17, %v2454_v10 }
 0x538   :  { %v5663_v51 = vpop.eup %5662 }
 0x539   :  { %v2466_v32 = vmul.f32 %v5663_v51, %v2459_v28 }
 0x53b   :  { %2467 = vst.msk [vmem:[#allocation3 + $0x28] sm:$0xff] %vm1828_vm4, %v2466_v32  ;;  %v2473_v57 = vpack.c.bf16 %v2466_v32, %v2466_v32 }
 0x53c   :  { %2468 = vst.msk [vmem:[#allocation3 + $0x10] sm:$0xff] %vm1831_vm5, %v2466_v32 }
 0x53d   :  { %2482 = vmatmul.bf16.vlgmr.msra.gmra.mxu0 %v2473_v57  ;;  %2495 = vmatmul.bf16.vlgmr.msra.gmra.mxu1 %v2473_v57 }
 0x53e   :  { %2508 = vmatmul.bf16.vlgmr.msra.gmra.mxu2 %v2473_v57  ;;  %2521 = vmatmul.bf16.vlgmr.msra.gmra.mxu3 %v2473_v57 }
 0x5ba   :  { %v2483_v11 = vpop.f32.mrf.mxu0  ;;  %v2496_v2 = vpop.f32.mrf.mxu1 }
 0x5bb   :  { %v2526_v50 = vadd.f32 %v2483_v11, %v8272_v20  ;;  %v2527_v22 = vadd.f32 %v2496_v2, %v8275_v23 }
 0x5bd   :  { %v5051_v13 = vmul.f32 -1.442695, %v2526_v50  ;;  %v5052_v27 = vmul.f32 -1.442695, %v2527_v22 }
 0x5bf   :  { %5664 = vpow2.f32 %v5051_v13 }
 0x5c0   :  { %5666 = vpow2.f32 %v5052_v27 }
 0x5c1   :  { %v2509_v33 = vpop.f32.mrf.mxu2  ;;  %v2522_v34 = vpop.f32.mrf.mxu3 }
 0x5c2   :  { %v2528_v18 = vadd.f32 %v2509_v33, %v8278_v59  ;;  %v2485_v58 = vpop.f32.mrf.mxu0  ;;  %v2498_v12 = vpop.f32.mrf.mxu1  ;;  %v2529_v44 = vadd.f32 %v2522_v34, %v8281_v45  ;;  %v8282_v33 = vld [vmem:[#allocation24_spill] sm:$0xff]  ;;  %v8283_v34 = vld [vmem:[#allocation17_spill] sm:$0xff] }
 0x5c3   :  { %v8284_v49 = vsel %vm6253_vm0, %v8282_v33, %v8283_v34  ;;  %v8285_v59 = vld [vmem:[#allocation33_spill] sm:$0xff] }
 0x5c4   :  { %v5053_v40 = vmul.f32 -1.442695, %v2528_v18  ;;  %v8286_v18 = vld [vmem:[#allocation25_spill] sm:$0xff] }
 0x5c5   :  { %v5665_v55 = vpop.eup %5664  ;;  %v8287_v58 = vsel %vm6607_vm1, %v8285_v59, %v8286_v18 }
 0x5c6   :  { %v5667_v38 = vpop.eup %5666  ;;  %v2539_v36 = vadd.f32 1.0, %v5665_v55  ;;  %5668 = vpow2.f32 %v5053_v40 }
 0x5c7   :  { %v2540_v4 = vadd.f32 1.0, %v5667_v38 }
 0x5c8   :  { %5670 = vrcp.f32 %v2539_v36  ;;  %v2553_v41 = vand.u32 2147483648, %v2539_v36  ;;  %v2551_v24 = vand.u32 2147483647, %v2539_v36  ;;  %vm2547_vm8 = vweird.f32 %v2539_v36 }
 0x5c9   :  { %5672 = vrcp.f32 %v2540_v4  ;;  %v2511_v5 = vpop.f32.mrf.mxu2  ;;  %v2524_v25 = vpop.f32.mrf.mxu3  ;;  %v2568_v37 = vand.u32 2147483648, %v2540_v4  ;;  %v2566_v30 = vand.u32 2147483647, %v2540_v4  ;;  %vm2562_vm9 = vweird.f32 %v2540_v4 }
 0x5ca   :  { %v2554_v52 = vor.u32 1.1754944e-38, %v2553_v41  ;;  %vm2552_vm12 = vcmp.eq.f32.partialorder %v2551_v24, 8.507059e+37  ;;  %v8289_v5 = vld [vmem:[#allocation34_spill] sm:$0xff] }
 0x5cb   :  { %v2569_v43 = vor.u32 1.1754944e-38, %v2568_v37  ;;  %vm2567_vm13 = vcmp.eq.f32.partialorder %v2566_v30, 8.507059e+37  ;;  %v8291_v37 = vld [vmem:[#allocation51_spill] sm:$0xff] }
 0x5cc   :  { %v5669_v14 = vpop.eup %5668 }
 0x5cd   :  { %v2541_v47 = vadd.f32 1.0, %v5669_v14 }
 0x5ce   :  { %v5671_v62 = vpop.eup %5670 }
 0x5cf   :  { %v5673_v42 = vpop.eup %5672  ;;  %v2543_v56 = vmul.f32 %v5671_v62, %v2539_v36  ;;  %5674 = vrcp.f32 %v2541_v47  ;;  %vm2548_vm6 = vweird.f32 %v5671_v62  ;;  %v2583_v3 = vand.u32 2147483648, %v2541_v47 }
 0x5d0   :  { %v2558_v31 = vmul.f32 %v5673_v42, %v2540_v4  ;;  %5676 = vtanh.f32 %v2529_v44  ;;  %vm2563_vm7 = vweird.f32 %v5673_v42  ;;  %vm2549_vm10 = vmor %vm2547_vm8, %vm2548_vm6  ;;  %vm2577_vm15 = vweird.f32 %v2541_v47  ;;  %v8288_v4 = vld [vmem:[#allocation42_spill] sm:$0xff] }
 0x5d1   :  { %v2544_v63 = vsub.f32 1.0, %v2543_v56  ;;  %vm2564_vm11 = vmor %vm2562_vm9, %vm2563_vm7  ;;  %v2581_v20 = vand.u32 2147483647, %v2541_v47  ;;  %v2584_v21 = vor.u32 1.1754944e-38, %v2583_v3  ;;  %v8290_v25 = vsel %vm6737_vm2, %v8288_v4, %v8289_v5 }
 0x5d2   :  { %v2559_v19 = vsub.f32 1.0, %v2558_v31 }
 0x5d3   :  { %v2545_v61 = vmul.f32 %v5671_v62, %v2544_v63  ;;  %vm2582_vm7 = vcmp.eq.f32.partialorder %v2581_v20, 8.507059e+37 }
 0x5d4   :  { %v2560_v46 = vmul.f32 %v5673_v42, %v2559_v19 }
 0x5d5   :  { %v5675_v1 = vpop.eup %5674  ;;  %v2546_v39 = vadd.f32 %v5671_v62, %v2545_v61  ;;  %v8292_v61 = vld [vmem:[#allocation43_spill] sm:$0xff] }
 0x5d6   :  { %v2573_v15 = vmul.f32 %v5675_v1, %v2541_v47  ;;  %v2561_v26 = vadd.f32 %v5673_v42, %v2560_v46  ;;  %v5677_v54 = vpop.eup %5676  ;;  %vm2578_vm14 = vweird.f32 %v5675_v1  ;;  %v8293_v24 = vsel %vm6809_vm3, %v8291_v37, %v8292_v61 }
 0x5d7   :  { %v2550_v53 = vsel %vm2549_vm10, %v5671_v62, %v2546_v39  ;;  %vm2579_vm6 = vmor %vm2577_vm15, %vm2578_vm14 }
 0x5d8   :  { %v2574_v10 = vsub.f32 1.0, %v2573_v15  ;;  %v2555_v17 = vsel %vm2552_vm12, %v2554_v52, %v2550_v53  ;;  %v2565_v51 = vsel %vm2564_vm11, %v5673_v42, %v2561_v26 }
 0x5d9   :  { %v2570_v28 = vsel %vm2567_vm13, %v2569_v43, %v2565_v51  ;;  %v2589_v32 = vmul.f32 %v5677_v54, %v2555_v17 }
 0x5da   :  { %v2575_v57 = vmul.f32 %v5675_v1, %v2574_v10  ;;  %v2588_v11 = vmul.f32 %v2570_v28, %v7158_v29 }
 0x5dc   :  { %v7184_v2 = vadd.f32 %v2589_v32, %v2588_v11  ;;  %v2576_v60 = vadd.f32 %v5675_v1, %v2575_v57 }
 0x5de   :  { %5678 = vtanh.f32 %v7184_v2  ;;  %v2580_v50 = vsel %vm2579_vm6, %v5675_v1, %v2576_v60 }
 0x5df   :  { %v2585_v23 = vsel %vm2582_vm7, %v2584_v21, %v2580_v50 }
 0x5e4   :  { %v5679_v9 = vpop.eup %5678 }
 0x5e5   :  { %v2592_v22 = vmul.f32 %v5679_v9, %v2585_v23 }
 0x5e7   :  { %2593 = vst.msk [vmem:[#allocation3 + $0x30] sm:$0xff] %vm1828_vm4, %v2592_v22  ;;  %v2599_v13 = vpack.c.bf16 %v2592_v22, %v2592_v22 }
 0x5e8   :  { %2594 = vst.msk [vmem:[#allocation3 + $0x8] sm:$0xff] %vm1831_vm5, %v2592_v22 }
 0x5e9   :  { %2608 = vmatmul.bf16.vlgmr.msrb.gmra.mxu0 %v2599_v13  ;;  %2621 = vmatmul.bf16.vlgmr.msrb.gmra.mxu1 %v2599_v13 }
 0x5ea   :  { %2634 = vmatmul.bf16.vlgmr.msrb.gmra.mxu2 %v2599_v13  ;;  %2647 = vmatmul.bf16.vlgmr.msrb.gmra.mxu3 %v2599_v13 }
 0x666   :  { %v2609_v29 = vpop.f32.mrf.mxu0  ;;  %v2622_v27 = vpop.f32.mrf.mxu1 }
 0x667   :  { %v2652_v16 = vadd.f32 %v2609_v29, %v8284_v49  ;;  %v2653_v12 = vadd.f32 %v2622_v27, %v8287_v58 }
 0x669   :  { %v5054_v40 = vmul.f32 -1.442695, %v2652_v16  ;;  %v5055_v55 = vmul.f32 -1.442695, %v2653_v12 }
 0x66b   :  { %5680 = vpow2.f32 %v5054_v40 }
 0x66c   :  { %5682 = vpow2.f32 %v5055_v55 }
 0x66d   :  { %v2635_v38 = vpop.f32.mrf.mxu2  ;;  %v2648_v36 = vpop.f32.mrf.mxu3 }
 0x66e   :  { %v2654_v14 = vadd.f32 %v2635_v38, %v8290_v25  ;;  %v2611_v47 = vpop.f32.mrf.mxu0  ;;  %v2624_v62 = vpop.f32.mrf.mxu1  ;;  %v2655_v46 = vadd.f32 %v2648_v36, %v8293_v24 }
 0x670   :  { %v5056_v8 = vmul.f32 -1.442695, %v2654_v14 }
 0x671   :  { %v5681_v48 = vpop.eup %5680 }
 0x672   :  { %v5683_v45 = vpop.eup %5682  ;;  %v2665_v44 = vadd.f32 1.0, %v5681_v48  ;;  %5684 = vpow2.f32 %v5056_v8 }
 0x673   :  { %v2666_v42 = vadd.f32 1.0, %v5683_v45 }
 0x674   :  { %5686 = vrcp.f32 %v2665_v44  ;;  %v2679_v26 = vand.u32 2147483648, %v2665_v44  ;;  %v2677_v54 = vand.u32 2147483647, %v2665_v44  ;;  %vm2673_vm10 = vweird.f32 %v2665_v44 }
 0x675   :  { %5688 = vrcp.f32 %v2666_v42  ;;  %v2637_v56 = vpop.f32.mrf.mxu2  ;;  %v2650_v31 = vpop.f32.mrf.mxu3  ;;  %v2694_v43 = vand.u32 2147483648, %v2666_v42  ;;  %v2692_v17 = vand.u32 2147483647, %v2666_v42  ;;  %vm2688_vm11 = vweird.f32 %v2666_v42 }
 0x676   :  { %v2680_v57 = vor.u32 1.1754944e-38, %v2679_v26  ;;  %vm2678_vm14 = vcmp.eq.f32.partialorder %v2677_v54, 8.507059e+37 }
 0x677   :  { %v2695_v60 = vor.u32 1.1754944e-38, %v2694_v43  ;;  %vm2693_vm15 = vcmp.eq.f32.partialorder %v2692_v17, 8.507059e+37 }
 0x678   :  { %v5685_v63 = vpop.eup %5684 }
 0x679   :  { %v2667_v19 = vadd.f32 1.0, %v5685_v63 }
 0x67a   :  { %v5687_v41 = vpop.eup %5686 }
 0x67b   :  { %v5689_v30 = vpop.eup %5688  ;;  %v2669_v1 = vmul.f32 %v5687_v41, %v2665_v44  ;;  %5690 = vrcp.f32 %v2667_v19  ;;  %vm2674_vm8 = vweird.f32 %v5687_v41  ;;  %v2709_v34 = vand.u32 2147483648, %v2667_v19 }
 0x67c   :  { %v2684_v39 = vmul.f32 %v5689_v30, %v2666_v42  ;;  %5692 = vtanh.f32 %v2655_v46  ;;  %vm2689_vm9 = vweird.f32 %v5689_v30  ;;  %vm2675_vm12 = vmor %vm2673_vm10, %vm2674_vm8  ;;  %vm2703_vm7 = vweird.f32 %v2667_v19 }
 0x67d   :  { %v2670_v15 = vsub.f32 1.0, %v2669_v1  ;;  %vm2690_vm13 = vmor %vm2688_vm11, %vm2689_vm9  ;;  %v2707_v49 = vand.u32 2147483647, %v2667_v19  ;;  %v2710_v59 = vor.u32 1.1754944e-38, %v2709_v34 }
 0x67e   :  { %v2685_v52 = vsub.f32 1.0, %v2684_v39 }
 0x67f   :  { %v2671_v53 = vmul.f32 %v5687_v41, %v2670_v15  ;;  %vm2708_vm9 = vcmp.eq.f32.partialorder %v2707_v49, 8.507059e+37 }
 0x680   :  { %v2686_v10 = vmul.f32 %v5689_v30, %v2685_v52 }
 0x681   :  { %v5691_v51 = vpop.eup %5690  ;;  %v2672_v28 = vadd.f32 %v5687_v41, %v2671_v53 }
 0x682   :  { %v2699_v32 = vmul.f32 %v5691_v51, %v2667_v19  ;;  %v2687_v11 = vadd.f32 %v5689_v30, %v2686_v10  ;;  %v5693_v20 = vpop.eup %5692  ;;  %vm2704_vm6 = vweird.f32 %v5691_v51 }
 0x683   :  { %v2676_v3 = vsel %vm2675_vm12, %v5687_v41, %v2672_v28  ;;  %vm2705_vm8 = vmor %vm2703_vm7, %vm2704_vm6 }
 0x684   :  { %v2700_v50 = vsub.f32 1.0, %v2699_v32  ;;  %v2681_v21 = vsel %vm2678_vm14, %v2680_v57, %v2676_v3  ;;  %v2691_v9 = vsel %vm2690_vm13, %v5689_v30, %v2687_v11 }
 0x685   :  { %v2696_v23 = vsel %vm2693_vm15, %v2695_v60, %v2691_v9  ;;  %v2715_v22 = vmul.f32 %v5693_v20, %v2681_v21 }
 0x686   :  { %v2701_v13 = vmul.f32 %v5691_v51, %v2700_v50  ;;  %v2714_v29 = vmul.f32 %v2696_v23, %v7184_v2 }
 0x688   :  { %v2716_v27 = vadd.f32 %v2715_v22, %v2714_v29  ;;  %v2702_v33 = vadd.f32 %v5691_v51, %v2701_v13 }
 0x68a   :  { %5694 = vtanh.f32 %v2716_v27  ;;  %v2706_v16 = vsel %vm2705_vm8, %v5691_v51, %v2702_v33 }
 0x68b   :  { %v2711_v58 = vsel %vm2708_vm9, %v2710_v59, %v2706_v16 }
 0x690   :  { %v5695_v18 = vpop.eup %5694 }
 0x691   :  { %v7213_v12 = vmul.f32 %v5695_v18, %v2711_v58 }
 0x693   :  { %8294 = vst [vmem:[#allocation28_spill] sm:$0xff] %v7213_v12 }
 0x694   :  { %2719 = vst.msk [vmem:[#allocation3 + $0x38] sm:$0xff] %vm1828_vm4, %v7213_v12 }
 0x695   :  { %2720 = vst.msk [vmem:[#allocation3] sm:$0xff] %vm1831_vm5, %v7213_v12 }
 0x696   :  { %5880 = dma.done.wait [#allocation6], 4096 }
 0x697   :  { %5881 = vsyncadd [#allocation6], 4294963200  ;;  %v5171_v2 = vld [vmem:[#allocation4 + $0xe0] sm:$0xf]  ;;  %v5529_v40 = vld [vmem:[#allocation4 + $0xec] sm:$0xf0] }
 0x698   :  { %v5527_v55 = vld [vmem:[#allocation4 + $0xe4] sm:$0xf]  ;;  %v5172_v38 = vor.u32 %v5529_v40, %v5171_v2  ;;  %v5173_v36 = vld [vmem:[#allocation4 + $0xf0] sm:$0xf0]  ;;  %v5179_v4 = vld [vmem:[#allocation4 + $0xe8] sm:$0xf] }
 0x699   :  { %v5530_v5 = vld [vmem:[#allocation4 + $0xf4] sm:$0xf0]  ;;  %v5176_v25 = vor.u32 %v5527_v55, %v5173_v36  ;;  %v5528_v47 = vld [vmem:[#allocation4 + $0xec] sm:$0xf]  ;;  %v5181_v62 = vld [vmem:[#allocation4 + $0xf8] sm:$0xf0] }
 0x69a   :  { %v5180_v14 = vor.u32 %v5530_v5, %v5179_v4  ;;  %v5155_v8 = vld [vmem:[#allocation4 + $0xc0] sm:$0xf]  ;;  %2939 = vmatpush.bf16.msra.mxu0 %v5172_v38  ;;  %v5184_v48 = vor.u32 %v5528_v47, %v5181_v62  ;;  %v5525_v45 = vld [vmem:[#allocation4 + $0xcc] sm:$0xf0]  ;;  %v5523_v44 = vld [vmem:[#allocation4 + $0xc4] sm:$0xf] }
 0x69b   :  { %v5157_v42 = vld [vmem:[#allocation4 + $0xd0] sm:$0xf0]  ;;  %2968 = vmatpush.bf16.msra.mxu1 %v5176_v25  ;;  %v5156_v56 = vor.u32 %v5525_v45, %v5155_v8  ;;  %v5163_v63 = vld [vmem:[#allocation4 + $0xc8] sm:$0xf]  ;;  %v5526_v19 = vld [vmem:[#allocation4 + $0xd4] sm:$0xf0] }
 0x69c   :  { %2997 = vmatpush.bf16.msra.mxu2 %v5180_v14  ;;  %v5160_v31 = vor.u32 %v5523_v44, %v5157_v42  ;;  %v5524_v41 = vld [vmem:[#allocation4 + $0xcc] sm:$0xf]  ;;  %3026 = vmatpush.bf16.msra.mxu3 %v5184_v48  ;;  %v5164_v37 = vor.u32 %v5526_v19, %v5163_v63  ;;  %v5165_v61 = vld [vmem:[#allocation4 + $0xd8] sm:$0xf0]  ;;  %v5139_v24 = vld [vmem:[#allocation4 + $0xa0] sm:$0xf] }
 0x69d   :  { %v5521_v46 = vld [vmem:[#allocation4 + $0xac] sm:$0xf0]  ;;  %v5168_v30 = vor.u32 %v5524_v41, %v5165_v61  ;;  %v5519_v1 = vld [vmem:[#allocation4 + $0xa4] sm:$0xf]  ;;  %v5141_v39 = vld [vmem:[#allocation4 + $0xb0] sm:$0xf0] }
 0x69e   :  { %v5147_v15 = vld [vmem:[#allocation4 + $0xa8] sm:$0xf]  ;;  %2940 = vmatpush.bf16.msra.mxu0 %v5156_v56  ;;  %v5140_v52 = vor.u32 %v5521_v46, %v5139_v24  ;;  %v5522_v26 = vld [vmem:[#allocation4 + $0xb4] sm:$0xf0]  ;;  %v5520_v43 = vld [vmem:[#allocation4 + $0xac] sm:$0xf]  ;;  %v5144_v54 = vor.u32 %v5519_v1, %v5141_v39 }
 0x69f   :  { %v5149_v53 = vld [vmem:[#allocation4 + $0xb8] sm:$0xf0]  ;;  %2969 = vmatpush.bf16.msra.mxu1 %v5160_v31  ;;  %v5148_v10 = vor.u32 %v5522_v26, %v5147_v15  ;;  %v5123_v17 = vld [vmem:[#allocation4 + $0x80] sm:$0xf]  ;;  %v5517_v51 = vld [vmem:[#allocation4 + $0x8c] sm:$0xf0] }
 0x6a0   :  { %2998 = vmatpush.bf16.msra.mxu2 %v5164_v37  ;;  %v5515_v28 = vld [vmem:[#allocation4 + $0x84] sm:$0xf]  ;;  %3027 = vmatpush.bf16.msra.mxu3 %v5168_v30  ;;  %v5152_v32 = vor.u32 %v5520_v43, %v5149_v53  ;;  %v5125_v57 = vld [vmem:[#allocation4 + $0x90] sm:$0xf0]  ;;  %v5131_v11 = vld [vmem:[#allocation4 + $0x88] sm:$0xf]  ;;  %v5124_v50 = vor.u32 %v5517_v51, %v5123_v17 }
 0x6a1   :  { %v5518_v60 = vld [vmem:[#allocation4 + $0x94] sm:$0xf0]  ;;  %v5516_v3 = vld [vmem:[#allocation4 + $0x8c] sm:$0xf]  ;;  %v5133_v20 = vld [vmem:[#allocation4 + $0x98] sm:$0xf0]  ;;  %v5128_v21 = vor.u32 %v5515_v28, %v5125_v57 }
 0x6a2   :  { %2941 = vmatpush.bf16.msra.mxu0 %v5140_v52  ;;  %v5132_v9 = vor.u32 %v5518_v60, %v5131_v11  ;;  %v5107_v23 = vld [vmem:[#allocation4 + $0x60] sm:$0xf]  ;;  %v5513_v22 = vld [vmem:[#allocation4 + $0x6c] sm:$0xf0]  ;;  %v5511_v13 = vld [vmem:[#allocation4 + $0x64] sm:$0xf]  ;;  %v5136_v29 = vor.u32 %v5516_v3, %v5133_v20 }
 0x6a3   :  { %2970 = vmatpush.bf16.msra.mxu1 %v5144_v54  ;;  %v5109_v27 = vld [vmem:[#allocation4 + $0x70] sm:$0xf0]  ;;  %v5115_v33 = vld [vmem:[#allocation4 + $0x68] sm:$0xf]  ;;  %v5514_v34 = vld [vmem:[#allocation4 + $0x74] sm:$0xf0]  ;;  %v5108_v59 = vor.u32 %v5513_v22, %v5107_v23 }
 0x6a4   :  { %2999 = vmatpush.bf16.msra.mxu2 %v5148_v10  ;;  %3028 = vmatpush.bf16.msra.mxu3 %v5152_v32  ;;  %v5512_v49 = vld [vmem:[#allocation4 + $0x6c] sm:$0xf]  ;;  %v5117_v16 = vld [vmem:[#allocation4 + $0x78] sm:$0xf0]  ;;  %v5112_v18 = vor.u32 %v5511_v13, %v5109_v27  ;;  %v5116_v58 = vor.u32 %v5514_v34, %v5115_v33  ;;  %v5091_v2 = vld [vmem:[#allocation4 + $0x40] sm:$0xf] }
 0x6a5   :  { %v5509_v40 = vld [vmem:[#allocation4 + $0x4c] sm:$0xf0]  ;;  %v5507_v55 = vld [vmem:[#allocation4 + $0x44] sm:$0xf]  ;;  %v5120_v38 = vor.u32 %v5512_v49, %v5117_v16  ;;  %v5093_v36 = vld [vmem:[#allocation4 + $0x50] sm:$0xf0] }
 0x6a6   :  { %2942 = vmatpush.bf16.msra.mxu0 %v5124_v50  ;;  %v5099_v4 = vld [vmem:[#allocation4 + $0x48] sm:$0xf]  ;;  %v5510_v5 = vld [vmem:[#allocation4 + $0x54] sm:$0xf0]  ;;  %v5508_v25 = vld [vmem:[#allocation4 + $0x4c] sm:$0xf]  ;;  %v5092_v47 = vor.u32 %v5509_v40, %v5091_v2  ;;  %v5096_v62 = vor.u32 %v5507_v55, %v5093_v36 }
 0x6a7   :  { %2971 = vmatpush.bf16.msra.mxu1 %v5128_v21  ;;  %v5101_v14 = vld [vmem:[#allocation4 + $0x58] sm:$0xf0]  ;;  %v5100_v8 = vor.u32 %v5510_v5, %v5099_v4  ;;  %v5075_v48 = vld [vmem:[#allocation4 + $0x20] sm:$0xf]  ;;  %v5505_v45 = vld [vmem:[#allocation4 + $0x2c] sm:$0xf0] }
 0x6a8   :  { %3000 = vmatpush.bf16.msra.mxu2 %v5132_v9  ;;  %3029 = vmatpush.bf16.msra.mxu3 %v5136_v29  ;;  %v5503_v44 = vld [vmem:[#allocation4 + $0x24] sm:$0xf]  ;;  %v5104_v42 = vor.u32 %v5508_v25, %v5101_v14  ;;  %v5077_v56 = vld [vmem:[#allocation4 + $0x30] sm:$0xf0]  ;;  %v5083_v31 = vld [vmem:[#allocation4 + $0x28] sm:$0xf]  ;;  %v5076_v37 = vor.u32 %v5505_v45, %v5075_v48 }
 0x6a9   :  { %v5506_v63 = vld [vmem:[#allocation4 + $0x34] sm:$0xf0]  ;;  %v5504_v19 = vld [vmem:[#allocation4 + $0x2c] sm:$0xf]  ;;  %v5085_v41 = vld [vmem:[#allocation4 + $0x38] sm:$0xf0]  ;;  %v5080_v61 = vor.u32 %v5503_v44, %v5077_v56 }
 0x6aa   :  { %2943 = vmatpush.bf16.msra.mxu0 %v5108_v59  ;;  %v5084_v24 = vor.u32 %v5506_v63, %v5083_v31  ;;  %v5059_v46 = vld [vmem:[#allocation4] sm:$0xf]  ;;  %v5501_v30 = vld [vmem:[#allocation4 + $0xc] sm:$0xf0]  ;;  %v5499_v1 = vld [vmem:[#allocation4 + $0x4] sm:$0xf]  ;;  %v5088_v39 = vor.u32 %v5504_v19, %v5085_v41 }
 0x6ab   :  { %2972 = vmatpush.bf16.msra.mxu1 %v5112_v18  ;;  %v5061_v15 = vld [vmem:[#allocation4 + $0x10] sm:$0xf0]  ;;  %v5067_v52 = vld [vmem:[#allocation4 + $0x8] sm:$0xf]  ;;  %v5502_v26 = vld [vmem:[#allocation4 + $0x14] sm:$0xf0]  ;;  %v5060_v54 = vor.u32 %v5501_v30, %v5059_v46 }
 0x6ac   :  { %3001 = vmatpush.bf16.msra.mxu2 %v5116_v58  ;;  %3030 = vmatpush.bf16.msra.mxu3 %v5120_v38  ;;  %v5500_v43 = vld [vmem:[#allocation4 + $0xc] sm:$0xf]  ;;  %v5069_v53 = vld [vmem:[#allocation4 + $0x18] sm:$0xf0]  ;;  %v2725_v10 = vld [vmem:[#allocation3] sm:$0xff]  ;;  %v5064_v51 = vor.u32 %v5499_v1, %v5061_v15  ;;  %v5068_v28 = vor.u32 %v5502_v26, %v5067_v52 }
 0x6ad   :  { %v2726_v17 = vld [vmem:[#allocation3 + $0x8] sm:$0xff]  ;;  %v5072_v32 = vor.u32 %v5500_v43, %v5069_v53  ;;  %v2727_v11 = vld [vmem:[#allocation3 + $0x10] sm:$0xff]  ;;  %v2728_v60 = vld [vmem:[#allocation3 + $0x18] sm:$0xff] }
 0x6ae   :  { %2944 = vmatpush.bf16.msra.mxu0 %v5092_v47  ;;  %v2733_v57 = vpack.c.bf16 %v2726_v17, %v2725_v10  ;;  %v2734_v3 = vpack.c.bf16 %v2728_v60, %v2727_v11  ;;  %v2729_v20 = vld [vmem:[#allocation3 + $0x20] sm:$0xff]  ;;  %v2730_v50 = vld [vmem:[#allocation3 + $0x28] sm:$0xff]  ;;  %v2731_v9 = vld [vmem:[#allocation3 + $0x30] sm:$0xff] }
 0x6af   :  { %2973 = vmatpush.bf16.msra.mxu1 %v5096_v62  ;;  %v2735_v21 = vpack.c.bf16 %v2730_v50, %v2729_v20  ;;  %v2732_v23 = vld [vmem:[#allocation3 + $0x38] sm:$0xff]  ;;  %v2769_v36 = vld [vmem:[%s8046_s4] sm:$0xf] }
 0x6b0   :  { %3002 = vmatpush.bf16.msra.mxu2 %v5100_v8  ;;  %3031 = vmatpush.bf16.msra.mxu3 %v5104_v42  ;;  %v2736_v22 = vpack.c.bf16 %v2732_v23, %v2731_v9  ;;  %v7234_v4 = vperm.slane %v2769_v36, 0  ;;  %v7236_v25 = vperm.slane %v2769_v36, 1  ;;  %v7266_v19 = vperm.slane %v2769_v36, 2 }
 0x6b1   :  { %v7268_v41 = vperm.slane %v2769_v36, 3 }
 0x6b2   :  { %2945 = vmatpush.bf16.msra.mxu0 %v5076_v37 }
 0x6b3   :  { %2974 = vmatpush.bf16.msra.mxu1 %v5080_v61 }
 0x6b4   :  { %3003 = vmatpush.bf16.msra.mxu2 %v5084_v24  ;;  %3032 = vmatpush.bf16.msra.mxu3 %v5088_v39 }
 0x6b6   :  { %2946 = vmatpush.bf16.msra.mxu0 %v5060_v54 }
 0x6b7   :  { %2975 = vmatpush.bf16.msra.mxu1 %v5064_v51 }
 0x6b8   :  { %3004 = vmatpush.bf16.msra.mxu2 %v5068_v28  ;;  %3033 = vmatpush.bf16.msra.mxu3 %v5072_v32 }
 0x6b9   :  { %2947 = vmatmul.bf16.vlgmr.msra.gmra.mxu0 %v2733_v57 }
 0x6ba   :  { %2976 = vmatmul.bf16.vlgmr.msra.gmra.mxu1 %v2733_v57 }
 0x6bb   :  { %3005 = vmatmul.bf16.vlgmr.msra.gmra.mxu2 %v2733_v57  ;;  %3034 = vmatmul.bf16.vlgmr.msra.gmra.mxu3 %v2733_v57 }
 0x6c9   :  { %2952 = vmatmul.bf16.gmra.mxu0 %v2734_v3 }
 0x6ca   :  { %2981 = vmatmul.bf16.gmra.mxu1 %v2734_v3 }
 0x6cb   :  { %3010 = vmatmul.bf16.gmra.mxu2 %v2734_v3  ;;  %3039 = vmatmul.bf16.gmra.mxu3 %v2734_v3 }
 0x6d9   :  { %2957 = vmatmul.bf16.gmra.mxu0 %v2735_v21 }
 0x6da   :  { %2986 = vmatmul.bf16.gmra.mxu1 %v2735_v21 }
 0x6db   :  { %3015 = vmatmul.bf16.gmra.mxu2 %v2735_v21  ;;  %3044 = vmatmul.bf16.gmra.mxu3 %v2735_v21 }
 0x6e9   :  { %2962 = vmatmul.bf16.gmra.mxu0 %v2736_v22 }
 0x6ea   :  { %2991 = vmatmul.bf16.gmra.mxu1 %v2736_v22 }
 0x6eb   :  { %3020 = vmatmul.bf16.gmra.mxu2 %v2736_v22  ;;  %3049 = vmatmul.bf16.gmra.mxu3 %v2736_v22 }
 0x736   :  { %v7219_v13 = vpop.f32.mrf.mxu0 }
 0x737   :  { %v7221_v29 = vpop.f32.mrf.mxu1 }
 0x73e   :  { %v7223_v27 = vpop.f32.mrf.mxu2  ;;  %v7225_v33 = vpop.f32.mrf.mxu3 }
 0x73f   :  { %v2950_v34 = vpop.f32.mrf.mxu0  ;;  %v2979_v49 = vpop.f32.mrf.mxu1 }
 0x740   :  { %v7333_v9 = vadd.f32 %v2950_v34, %v7234_v4 }
 0x742   :  { %8309 = vst [vmem:[#allocation49_spill] sm:$0xff] %v7333_v9 }
 0x746   :  { %v7227_v16 = vpop.f32.mrf.mxu2  ;;  %v7229_v59 = vpop.f32.mrf.mxu3 }
 0x747   :  { %v2953_v18 = vpop.f32.mrf.mxu0  ;;  %v2982_v58 = vpop.f32.mrf.mxu1 }
 0x748   :  { %v7277_v1 = vadd.f32 %v2953_v18, %v7234_v4  ;;  %v7289_v43 = vadd.f32 %v2982_v58, %v7236_v25 }
 0x74a   :  { %8301 = vst [vmem:[#allocation48_spill] sm:$0xff] %v7277_v1 }
 0x74b   :  { %8305 = vst [vmem:[#allocation31_spill] sm:$0xff] %v7289_v43 }
 0x74e   :  { %v3011_v2 = vpop.f32.mrf.mxu2  ;;  %v3040_v40 = vpop.f32.mrf.mxu3 }
 0x74f   :  { %v2955_v55 = vpop.f32.mrf.mxu0  ;;  %v2984_v38 = vpop.f32.mrf.mxu1  ;;  %v7327_v3 = vadd.f32 %v3011_v2, %v7266_v19  ;;  %v7336_v23 = vadd.f32 %v3040_v40, %v7268_v41  ;;  %v7345_v2 = vadd.f32 %v2979_v49, %v7236_v25 }
 0x750   :  { %v7239_v62 = vadd.f32 %v2955_v55, %v7234_v4  ;;  %v7245_v45 = vadd.f32 %v2984_v38, %v7236_v25 }
 0x751   :  { %8307 = vst [vmem:[#allocation39_spill] sm:$0xff] %v7327_v3 }
 0x752   :  { %8295 = vst [vmem:[#allocation20_spill] sm:$0xff] %v7239_v62 }
 0x753   :  { %8297 = vst [vmem:[#allocation29_spill] sm:$0xff] %v7245_v45 }
 0x754   :  { %8310 = vst [vmem:[#allocation45_spill] sm:$0xff] %v7336_v23 }
 0x755   :  { %8313 = vst [vmem:[#allocation32_spill] sm:$0xff] %v7345_v2 }
 0x756   :  { %v3013_v5 = vpop.f32.mrf.mxu2  ;;  %v3042_v14 = vpop.f32.mrf.mxu3 }
 0x757   :  { %v2958_v47 = vpop.f32.mrf.mxu0  ;;  %v2987_v48 = vpop.f32.mrf.mxu1  ;;  %v7271_v61 = vadd.f32 %v3013_v5, %v7266_v19  ;;  %v7280_v39 = vadd.f32 %v3042_v14, %v7268_v41 }
 0x758   :  { %v7242_v8 = vadd.f32 %v2958_v47, %v7234_v4  ;;  %v7248_v44 = vadd.f32 %v2987_v48, %v7236_v25  ;;  %v7444_v47 = vadd.f32 %v7223_v27, %v7266_v19 }
 0x759   :  { %8299 = vst [vmem:[#allocation38_spill] sm:$0xff] %v7271_v61 }
 0x75a   :  { %8296 = vst [vmem:[#allocation21_spill] sm:$0xff] %v7242_v8 }
 0x75b   :  { %8298 = vst [vmem:[#allocation30_spill] sm:$0xff] %v7248_v44 }
 0x75c   :  { %8302 = vst [vmem:[#allocation46_spill] sm:$0xff] %v7280_v39 }
 0x75d   :  { %8323 = vst [vmem:[#allocation42_spill] sm:$0xff] %v7444_v47 }
 0x75e   :  { %v3016_v37 = vpop.f32.mrf.mxu2  ;;  %v3045_v46 = vpop.f32.mrf.mxu3 }
 0x75f   :  { %v7274_v24 = vadd.f32 %v3016_v37, %v7266_v19  ;;  %v2960_v30 = vpop.f32.mrf.mxu0  ;;  %v7283_v15 = vadd.f32 %v3045_v46, %v7268_v41  ;;  %v2989_v26 = vpop.f32.mrf.mxu1  ;;  %v7384_v37 = vadd.f32 %v7227_v16, %v7266_v19 }
 0x760   :  { %v7286_v52 = vadd.f32 %v2960_v30, %v7234_v4  ;;  %v7300_v10 = vadd.f32 %v2989_v26, %v7236_v25 }
 0x761   :  { %8300 = vst [vmem:[#allocation37_spill] sm:$0xff] %v7274_v24 }
 0x762   :  { %8303 = vst [vmem:[#allocation22_spill] sm:$0xff] %v7283_v15 }
 0x763   :  { %8304 = vst [vmem:[#allocation19_spill] sm:$0xff] %v7286_v52 }
 0x764   :  { %8306 = vst [vmem:[#allocation27_spill] sm:$0xff] %v7300_v10 }
 0x765   :  { %8315 = vst [vmem:[#allocation41_spill] sm:$0xff] %v7384_v37 }
 0x766   :  { %v3018_v60 = vpop.f32.mrf.mxu2  ;;  %v3047_v50 = vpop.f32.mrf.mxu3 }
 0x767   :  { %v7330_v20 = vadd.f32 %v3018_v60, %v7266_v19  ;;  %v2963_v21 = vpop.f32.mrf.mxu0  ;;  %v7339_v22 = vadd.f32 %v3047_v50, %v7268_v41  ;;  %v2992_v58 = vpop.f32.mrf.mxu1  ;;  %v7391_v60 = vadd.f32 %v7219_v13, %v7234_v4  ;;  %v7395_v50 = vadd.f32 %v7229_v59, %v7268_v41 }
 0x768   :  { %v7342_v18 = vadd.f32 %v2963_v21, %v7234_v4  ;;  %v7356_v40 = vadd.f32 %v2992_v58, %v7236_v25 }
 0x769   :  { %8308 = vst [vmem:[#allocation35_spill] sm:$0xff] %v7330_v20 }
 0x76a   :  { %8311 = vst [vmem:[#allocation23_spill] sm:$0xff] %v7339_v22 }
 0x76b   :  { %8312 = vst [vmem:[#allocation18_spill] sm:$0xff] %v7342_v18 }
 0x76c   :  { %8314 = vst [vmem:[#allocation26_spill] sm:$0xff] %v7356_v40 }
 0x76d   :  { %8317 = vst [vmem:[#allocation50_spill] sm:$0xff] %v7391_v60 }
 0x76e   :  { %v3021_v48 = vpop.f32.mrf.mxu2  ;;  %v3050_v30 = vpop.f32.mrf.mxu3  ;;  %8318 = vst [vmem:[#allocation44_spill] sm:$0xff] %v7395_v50 }
 0x76f   :  { %v7387_v46 = vadd.f32 %v3021_v48, %v7266_v19  ;;  %v2965_v26 = vpop.f32.mrf.mxu0  ;;  %v7398_v21 = vadd.f32 %v3050_v30, %v7268_v41  ;;  %v2994_v16 = vpop.f32.mrf.mxu1  ;;  %v7405_v48 = vadd.f32 %v7221_v29, %v7236_v25 }
 0x770   :  { %v7401_v58 = vadd.f32 %v2965_v26, %v7234_v4  ;;  %v7416_v30 = vadd.f32 %v2994_v16, %v7236_v25  ;;  %v7451_v25 = vadd.f32 %v7225_v33, %v7268_v41 }
 0x771   :  { %8316 = vst [vmem:[#allocation40_spill] sm:$0xff] %v7387_v46 }
 0x772   :  { %8319 = vst [vmem:[#allocation24_spill] sm:$0xff] %v7398_v21 }
 0x773   :  { %8320 = vst [vmem:[#allocation17_spill] sm:$0xff] %v7401_v58 }
 0x774   :  { %8321 = vst [vmem:[#allocation33_spill] sm:$0xff] %v7405_v48 }
 0x775   :  { %8322 = vst [vmem:[#allocation25_spill] sm:$0xff] %v7416_v30 }
 0x776   :  { %v3023_v59 = vpop.f32.mrf.mxu2  ;;  %v3052_v49 = vpop.f32.mrf.mxu3  ;;  %8325 = vst [vmem:[#allocation51_spill] sm:$0xff] %v7451_v25 }
 0x777   :  { %v7447_v5 = vadd.f32 %v3023_v59, %v7266_v19  ;;  %v7454_v34 = vadd.f32 %v3052_v49, %v7268_v41 }
 0x779   :  { %8324 = vst [vmem:[#allocation34_spill] sm:$0xff] %v7447_v5 }
 0x77a   :  { %8326 = vst [vmem:[#allocation43_spill] sm:$0xff] %v7454_v34 }
 0x77b   :  { %5882 = dma.done.wait [#allocation6 + $0x1], 4096 }
 0x77c   :  { %5883 = vsyncadd [#allocation6 + $0x1], 4294963200  ;;  %v5299_v41 = vld [vmem:[#allocation5 + $0xe0] sm:$0xf]  ;;  %v5561_v49 = vld [vmem:[#allocation5 + $0xec] sm:$0xf0] }
 0x77d   :  { %v5559_v59 = vld [vmem:[#allocation5 + $0xe4] sm:$0xf]  ;;  %v7472_v11 = vor.u32 %v5561_v49, %v5299_v41  ;;  %v5301_v32 = vld [vmem:[#allocation5 + $0xf0] sm:$0xf0]  ;;  %v5307_v51 = vld [vmem:[#allocation5 + $0xe8] sm:$0xf] }
 0x77e   :  { %v5562_v27 = vld [vmem:[#allocation5 + $0xf4] sm:$0xf0]  ;;  %v7474_v54 = vor.u32 %v5559_v59, %v5301_v32  ;;  %v5283_v56 = vld [vmem:[#allocation5 + $0xc0] sm:$0xf]  ;;  %v5557_v17 = vld [vmem:[#allocation5 + $0xcc] sm:$0xf0] }
 0x77f   :  { %v7476_v63 = vor.u32 %v5562_v27, %v5307_v51  ;;  %v5555_v53 = vld [vmem:[#allocation5 + $0xc4] sm:$0xf]  ;;  %3317 = vmatpush.bf16.msrb.mxu0 %v7472_v11  ;;  %v7479_v33 = vor.u32 %v5557_v17, %v5283_v56  ;;  %v5285_v31 = vld [vmem:[#allocation5 + $0xd0] sm:$0xf0]  ;;  %v5291_v42 = vld [vmem:[#allocation5 + $0xc8] sm:$0xf] }
 0x780   :  { %v5558_v38 = vld [vmem:[#allocation5 + $0xd4] sm:$0xf0]  ;;  %3330 = vmatpush.bf16.msrb.mxu1 %v7474_v54  ;;  %v7483_v41 = vor.u32 %v5555_v53, %v5285_v31  ;;  %v5560_v51 = vld [vmem:[#allocation5 + $0xec] sm:$0xf]  ;;  %v5309_v27 = vld [vmem:[#allocation5 + $0xf8] sm:$0xf0] }
 0x781   :  { %3343 = vmatpush.bf16.msrb.mxu2 %v7476_v63  ;;  %v7485_v32 = vor.u32 %v5558_v38, %v5291_v42  ;;  %v5267_v49 = vld [vmem:[#allocation5 + $0xa0] sm:$0xf]  ;;  %v7487_v59 = vor.u32 %v5560_v51, %v5309_v27  ;;  %v5553_v55 = vld [vmem:[#allocation5 + $0xac] sm:$0xf0]  ;;  %v5551_v57 = vld [vmem:[#allocation5 + $0xa4] sm:$0xf] }
 0x782   :  { %v5269_v56 = vld [vmem:[#allocation5 + $0xb0] sm:$0xf0]  ;;  %v5275_v17 = vld [vmem:[#allocation5 + $0xa8] sm:$0xf]  ;;  %v5554_v28 = vld [vmem:[#allocation5 + $0xb4] sm:$0xf0]  ;;  %v7491_v13 = vor.u32 %v5553_v55, %v5267_v49 }
 0x783   :  { %v5556_v4 = vld [vmem:[#allocation5 + $0xcc] sm:$0xf]  ;;  %3318 = vmatpush.bf16.msrb.mxu0 %v7479_v33  ;;  %3356 = vmatpush.bf16.msrb.mxu3 %v7487_v59  ;;  %v5293_v31 = vld [vmem:[#allocation5 + $0xd8] sm:$0xf0]  ;;  %v5251_v42 = vld [vmem:[#allocation5 + $0x80] sm:$0xf]  ;;  %v7495_v38 = vor.u32 %v5551_v57, %v5269_v56  ;;  %v7497_v51 = vor.u32 %v5554_v28, %v5275_v17 }
 0x784   :  { %v5549_v53 = vld [vmem:[#allocation5 + $0x8c] sm:$0xf0]  ;;  %3331 = vmatpush.bf16.msrb.mxu1 %v7483_v41  ;;  %v7499_v27 = vor.u32 %v5556_v4, %v5293_v31  ;;  %v5547_v14 = vld [vmem:[#allocation5 + $0x84] sm:$0xf]  ;;  %v5253_v36 = vld [vmem:[#allocation5 + $0x90] sm:$0xf0] }
 0x785   :  { %3344 = vmatpush.bf16.msrb.mxu2 %v7485_v32  ;;  %v5259_v19 = vld [vmem:[#allocation5 + $0x88] sm:$0xf]  ;;  %v5550_v29 = vld [vmem:[#allocation5 + $0x94] sm:$0xf0]  ;;  %v5552_v16 = vld [vmem:[#allocation5 + $0xac] sm:$0xf]  ;;  %v7503_v49 = vor.u32 %v5549_v53, %v5251_v42  ;;  %v7509_v28 = vor.u32 %v5547_v14, %v5253_v36 }
 0x786   :  { %v5277_v55 = vld [vmem:[#allocation5 + $0xb8] sm:$0xf0]  ;;  %v5235_v57 = vld [vmem:[#allocation5 + $0x60] sm:$0xf]  ;;  %v5545_v56 = vld [vmem:[#allocation5 + $0x6c] sm:$0xf0]  ;;  %v7511_v4 = vor.u32 %v5550_v29, %v5259_v19 }
 0x787   :  { %3319 = vmatpush.bf16.msrb.mxu0 %v7491_v13  ;;  %3357 = vmatpush.bf16.msrb.mxu3 %v7499_v27  ;;  %v7505_v26 = vor.u32 %v5552_v16, %v5277_v55  ;;  %v5543_v17 = vld [vmem:[#allocation5 + $0x64] sm:$0xf]  ;;  %v5548_v31 = vld [vmem:[#allocation5 + $0x8c] sm:$0xf]  ;;  %v5261_v12 = vld [vmem:[#allocation5 + $0x98] sm:$0xf0]  ;;  %v7515_v16 = vor.u32 %v5545_v56, %v5235_v57 }
 0x788   :  { %3332 = vmatpush.bf16.msrb.mxu1 %v7495_v38  ;;  %v5237_v15 = vld [vmem:[#allocation5 + $0x70] sm:$0xf0]  ;;  %v5243_v39 = vld [vmem:[#allocation5 + $0x68] sm:$0xf]  ;;  %v5546_v24 = vld [vmem:[#allocation5 + $0x74] sm:$0xf0]  ;;  %v7517_v42 = vor.u32 %v5548_v31, %v5261_v12 }
 0x789   :  { %3345 = vmatpush.bf16.msrb.mxu2 %v7497_v51  ;;  %v5219_v53 = vld [vmem:[#allocation5 + $0x40] sm:$0xf]  ;;  %v5541_v55 = vld [vmem:[#allocation5 + $0x4c] sm:$0xf0]  ;;  %v7521_v36 = vor.u32 %v5543_v17, %v5237_v15  ;;  %v7523_v14 = vor.u32 %v5546_v24, %v5243_v39  ;;  %v5539_v29 = vld [vmem:[#allocation5 + $0x44] sm:$0xf] }
 0x78a   :  { %v5544_v19 = vld [vmem:[#allocation5 + $0x6c] sm:$0xf]  ;;  %v5245_v61 = vld [vmem:[#allocation5 + $0x78] sm:$0xf0]  ;;  %v5221_v44 = vld [vmem:[#allocation5 + $0x50] sm:$0xf0]  ;;  %v7527_v12 = vor.u32 %v5541_v55, %v5219_v53 }
 0x78b   :  { %3320 = vmatpush.bf16.msrb.mxu0 %v7503_v49  ;;  %3358 = vmatpush.bf16.msrb.mxu3 %v7505_v26  ;;  %v5227_v45 = vld [vmem:[#allocation5 + $0x48] sm:$0xf]  ;;  %v5542_v8 = vld [vmem:[#allocation5 + $0x54] sm:$0xf0]  ;;  %v7529_v57 = vor.u32 %v5544_v19, %v5245_v61  ;;  %v5203_v56 = vld [vmem:[#allocation5 + $0x20] sm:$0xf]  ;;  %v7533_v24 = vor.u32 %v5539_v29, %v5221_v44 }
 0x78c   :  { %3333 = vmatpush.bf16.msrb.mxu1 %v7509_v28  ;;  %v5537_v31 = vld [vmem:[#allocation5 + $0x2c] sm:$0xf0]  ;;  %v5535_v15 = vld [vmem:[#allocation5 + $0x24] sm:$0xf]  ;;  %v7535_v39 = vor.u32 %v5542_v8, %v5227_v45  ;;  %v5205_v17 = vld [vmem:[#allocation5 + $0x30] sm:$0xf0] }
 0x78d   :  { %3346 = vmatpush.bf16.msrb.mxu2 %v7511_v4  ;;  %v5540_v62 = vld [vmem:[#allocation5 + $0x4c] sm:$0xf]  ;;  %v5229_v22 = vld [vmem:[#allocation5 + $0x58] sm:$0xf0]  ;;  %v5211_v23 = vld [vmem:[#allocation5 + $0x28] sm:$0xf]  ;;  %v7539_v61 = vor.u32 %v5537_v31, %v5203_v56  ;;  %v7545_v8 = vor.u32 %v5535_v15, %v5205_v17 }
 0x78e   :  { %v5538_v20 = vld [vmem:[#allocation5 + $0x34] sm:$0xf0]  ;;  %v7541_v53 = vor.u32 %v5540_v62, %v5229_v22  ;;  %v5187_v55 = vld [vmem:[#allocation5] sm:$0xf]  ;;  %v5533_v19 = vld [vmem:[#allocation5 + $0xc] sm:$0xf0] }
 0x78f   :  { %3321 = vmatpush.bf16.msrb.mxu0 %v7515_v16  ;;  %3359 = vmatpush.bf16.msrb.mxu3 %v7517_v42  ;;  %v7547_v45 = vor.u32 %v5538_v20, %v5211_v23  ;;  %v5531_v44 = vld [vmem:[#allocation5 + $0x4] sm:$0xf]  ;;  %v5536_v29 = vld [vmem:[#allocation5 + $0x2c] sm:$0xf]  ;;  %v5213_v3 = vld [vmem:[#allocation5 + $0x38] sm:$0xf0]  ;;  %v7551_v62 = vor.u32 %v5533_v19, %v5187_v55  ;;  %v8329_v55 = vsel %vm6607_vm1, %v7405_v48, %v7416_v30 }
 0x790   :  { %3334 = vmatpush.bf16.msrb.mxu1 %v7521_v36  ;;  %v5189_v10 = vld [vmem:[#allocation5 + $0x10] sm:$0xf0]  ;;  %v5195_v43 = vld [vmem:[#allocation5 + $0x8] sm:$0xf]  ;;  %v5534_v52 = vld [vmem:[#allocation5 + $0x14] sm:$0xf0]  ;;  %v7553_v22 = vor.u32 %v5536_v29, %v5213_v3 }
 0x791   :  { %3347 = vmatpush.bf16.msrb.mxu2 %v7523_v14  ;;  %v7557_v20 = vor.u32 %v5531_v44, %v5189_v10  ;;  %v7559_v23 = vor.u32 %v5534_v52, %v5195_v43  ;;  %v5532_v56 = vld [vmem:[#allocation5 + $0xc] sm:$0xf]  ;;  %v5197_v31 = vld [vmem:[#allocation5 + $0x18] sm:$0xf0]  ;;  %v8327_v10 = vmov 0   ;;  %v8328_v43 = vsel %vm6253_vm0, %v7391_v60, %v7401_v58  ;;  %v4309_v6 = vld [vmem:[%s8047_s5 + $0x20] sm:$0xff] }
 0x792   :  { %v7565_v3 = vor.u32 %v5532_v56, %v5197_v31  ;;  %v8330_v31 = vsel %vm6737_vm2, %v7444_v47, %v7447_v5  ;;  %v4310_v35 = vld [vmem:[%s8047_s5 + $0x28] sm:$0xff] }
 0x793   :  { %3322 = vmatpush.bf16.msrb.mxu0 %v7527_v12  ;;  %3360 = vmatpush.bf16.msrb.mxu3 %v7529_v57 }
 0x794   :  { %3335 = vmatpush.bf16.msrb.mxu1 %v7533_v24 }
 0x795   :  { %3348 = vmatpush.bf16.msrb.mxu2 %v7535_v39 }
 0x797   :  { %3323 = vmatpush.bf16.msrb.mxu0 %v7539_v61  ;;  %3361 = vmatpush.bf16.msrb.mxu3 %v7541_v53 }
 0x798   :  { %3336 = vmatpush.bf16.msrb.mxu1 %v7545_v8 }
 0x799   :  { %3349 = vmatpush.bf16.msrb.mxu2 %v7547_v45 }
 0x79b   :  { %3324 = vmatpush.bf16.msrb.mxu0 %v7551_v62  ;;  %3362 = vmatpush.bf16.msrb.mxu3 %v7553_v22 }
 0x79c   :  { %3337 = vmatpush.bf16.msrb.mxu1 %v7557_v20 }
 0x79d   :  { %3350 = vmatpush.bf16.msrb.mxu2 %v7559_v23 }
 0x79e   :  { %3325 = vmatmul.bf16.vlgmr.msrb.gmra.mxu0 %v8327_v10 }
 0x79f   :  { %3441 = vmatpush.bf16.msra.mxu0 %v7472_v11  ;;  %3338 = vmatmul.bf16.vlgmr.msrb.gmra.mxu1 %v8327_v10 }
 0x7a0   :  { %3454 = vmatpush.bf16.msra.mxu1 %v7474_v54  ;;  %3351 = vmatmul.bf16.vlgmr.msrb.gmra.mxu2 %v8327_v10 }
 0x7a1   :  { %3467 = vmatpush.bf16.msra.mxu2 %v7476_v63  ;;  %3363 = vmatpush.bf16.msrb.mxu3 %v7565_v3 }
 0x7a3   :  { %3442 = vmatpush.bf16.msra.mxu0 %v7479_v33 }
 0x7a4   :  { %3455 = vmatpush.bf16.msra.mxu1 %v7483_v41  ;;  %3364 = vmatmul.bf16.vlgmr.msrb.gmra.mxu3 %v8327_v10 }
 0x7a5   :  { %3480 = vmatpush.bf16.msra.mxu3 %v7487_v59  ;;  %3468 = vmatpush.bf16.msra.mxu2 %v7485_v32 }
 0x7a7   :  { %3443 = vmatpush.bf16.msra.mxu0 %v7491_v13 }
 0x7a8   :  { %3456 = vmatpush.bf16.msra.mxu1 %v7495_v38 }
 0x7a9   :  { %3481 = vmatpush.bf16.msra.mxu3 %v7499_v27  ;;  %3469 = vmatpush.bf16.msra.mxu2 %v7497_v51 }
 0x7ab   :  { %3444 = vmatpush.bf16.msra.mxu0 %v7503_v49 }
 0x7ac   :  { %3457 = vmatpush.bf16.msra.mxu1 %v7509_v28 }
 0x7ad   :  { %3482 = vmatpush.bf16.msra.mxu3 %v7505_v26  ;;  %3470 = vmatpush.bf16.msra.mxu2 %v7511_v4 }
 0x7af   :  { %3445 = vmatpush.bf16.msra.mxu0 %v7515_v16 }
 0x7b0   :  { %3458 = vmatpush.bf16.msra.mxu1 %v7521_v36 }
 0x7b1   :  { %3483 = vmatpush.bf16.msra.mxu3 %v7517_v42  ;;  %3471 = vmatpush.bf16.msra.mxu2 %v7523_v14 }
 0x7b3   :  { %3446 = vmatpush.bf16.msra.mxu0 %v7527_v12 }
 0x7b4   :  { %3459 = vmatpush.bf16.msra.mxu1 %v7533_v24 }
 0x7b5   :  { %3484 = vmatpush.bf16.msra.mxu3 %v7529_v57  ;;  %3472 = vmatpush.bf16.msra.mxu2 %v7535_v39 }
 0x7b7   :  { %3447 = vmatpush.bf16.msra.mxu0 %v7539_v61 }
 0x7b8   :  { %3460 = vmatpush.bf16.msra.mxu1 %v7545_v8 }
 0x7b9   :  { %3485 = vmatpush.bf16.msra.mxu3 %v7541_v53  ;;  %3473 = vmatpush.bf16.msra.mxu2 %v7547_v45 }
 0x7bb   :  { %3448 = vmatpush.bf16.msra.mxu0 %v7551_v62 }
 0x7bc   :  { %3461 = vmatpush.bf16.msra.mxu1 %v7557_v20 }
 0x7bd   :  { %3486 = vmatpush.bf16.msra.mxu3 %v7553_v22  ;;  %3474 = vmatpush.bf16.msra.mxu2 %v7559_v23 }
 0x7bf   :  { %3565 = vmatpush.bf16.msrb.mxu0 %v7472_v11 }
 0x7c0   :  { %3578 = vmatpush.bf16.msrb.mxu1 %v7474_v54 }
 0x7c1   :  { %3591 = vmatpush.bf16.msrb.mxu2 %v7476_v63  ;;  %3487 = vmatpush.bf16.msra.mxu3 %v7565_v3 }
 0x7c3   :  { %3566 = vmatpush.bf16.msrb.mxu0 %v7479_v33 }
 0x7c4   :  { %3579 = vmatpush.bf16.msrb.mxu1 %v7483_v41 }
 0x7c5   :  { %3604 = vmatpush.bf16.msrb.mxu3 %v7487_v59  ;;  %3592 = vmatpush.bf16.msrb.mxu2 %v7485_v32 }
 0x7c7   :  { %3567 = vmatpush.bf16.msrb.mxu0 %v7491_v13 }
 0x7c8   :  { %3580 = vmatpush.bf16.msrb.mxu1 %v7495_v38 }
 0x7c9   :  { %3605 = vmatpush.bf16.msrb.mxu3 %v7499_v27  ;;  %3593 = vmatpush.bf16.msrb.mxu2 %v7497_v51 }
 0x7cb   :  { %3568 = vmatpush.bf16.msrb.mxu0 %v7503_v49 }
 0x7cc   :  { %3581 = vmatpush.bf16.msrb.mxu1 %v7509_v28 }
 0x7cd   :  { %3606 = vmatpush.bf16.msrb.mxu3 %v7505_v26  ;;  %3594 = vmatpush.bf16.msrb.mxu2 %v7511_v4 }
 0x7cf   :  { %3569 = vmatpush.bf16.msrb.mxu0 %v7515_v16 }
 0x7d0   :  { %3582 = vmatpush.bf16.msrb.mxu1 %v7521_v36 }
 0x7d1   :  { %3607 = vmatpush.bf16.msrb.mxu3 %v7517_v42  ;;  %3595 = vmatpush.bf16.msrb.mxu2 %v7523_v14 }
 0x7d3   :  { %3570 = vmatpush.bf16.msrb.mxu0 %v7527_v12 }
 0x7d4   :  { %3583 = vmatpush.bf16.msrb.mxu1 %v7533_v24 }
 0x7d5   :  { %3608 = vmatpush.bf16.msrb.mxu3 %v7529_v57  ;;  %3596 = vmatpush.bf16.msrb.mxu2 %v7535_v39 }
 0x7d7   :  { %3571 = vmatpush.bf16.msrb.mxu0 %v7539_v61 }
 0x7d8   :  { %3584 = vmatpush.bf16.msrb.mxu1 %v7545_v8 }
 0x7d9   :  { %3609 = vmatpush.bf16.msrb.mxu3 %v7541_v53  ;;  %3597 = vmatpush.bf16.msrb.mxu2 %v7547_v45 }
 0x7db   :  { %3572 = vmatpush.bf16.msrb.mxu0 %v7551_v62 }
 0x7dc   :  { %3585 = vmatpush.bf16.msrb.mxu1 %v7557_v20 }
 0x7dd   :  { %3610 = vmatpush.bf16.msrb.mxu3 %v7553_v22  ;;  %3598 = vmatpush.bf16.msrb.mxu2 %v7559_v23 }
 0x7e1   :  { %3611 = vmatpush.bf16.msrb.mxu3 %v7565_v3 }
 0x81b   :  { %v3326_v52 = vpop.f32.mrf.mxu0 }
 0x81c   :  { %v3369_v15 = vadd.f32 %v3326_v52, %v8328_v43  ;;  %v3339_v17 = vpop.f32.mrf.mxu1 }
 0x81d   :  { %v3370_v19 = vadd.f32 %v3339_v17, %v8329_v55 }
 0x81e   :  { %v5313_v44 = vmul.f32 -1.442695, %v3369_v15 }
 0x81f   :  { %v5314_v29 = vmul.f32 -1.442695, %v3370_v19  ;;  %v8331_v19 = vsel %vm6809_vm3, %v7451_v25, %v7454_v34 }
 0x820   :  { %5698 = vpow2.f32 %v5313_v44 }
 0x821   :  { %5700 = vpow2.f32 %v5314_v29 }
 0x823   :  { %v3352_v56 = vpop.f32.mrf.mxu2  ;;  %v3328_v60 = vpop.f32.mrf.mxu0 }
 0x824   :  { %v3371_v10 = vadd.f32 %v3352_v56, %v8330_v31  ;;  %v3341_v52 = vpop.f32.mrf.mxu1 }
 0x826   :  { %v5315_v43 = vmul.f32 -1.442695, %v3371_v10  ;;  %v5699_v58 = vpop.eup %5698 }
 0x827   :  { %v3365_v1 = vpop.f32.mrf.mxu3  ;;  %v5701_v21 = vpop.eup %5700  ;;  %v3382_v50 = vadd.f32 1.0, %v5699_v58 }
 0x828   :  { %5702 = vpow2.f32 %v5315_v43  ;;  %v3383_v17 = vadd.f32 1.0, %v5701_v21  ;;  %v3372_v44 = vadd.f32 %v3365_v1, %v8331_v19 }
 0x829   :  { %5704 = vrcp.f32 %v3382_v50  ;;  %v3396_v43 = vand.u32 2147483648, %v3382_v50  ;;  %v3394_v5 = vand.u32 2147483647, %v3382_v50  ;;  %vm3390_vm10 = vweird.f32 %v3382_v50 }
 0x82a   :  { %5706 = vrcp.f32 %v3383_v17  ;;  %v3411_v47 = vand.u32 2147483648, %v3383_v17  ;;  %v3409_v30 = vand.u32 2147483647, %v3383_v17  ;;  %vm3405_vm11 = vweird.f32 %v3383_v17 }
 0x82b   :  { %v3354_v15 = vpop.f32.mrf.mxu2  ;;  %vm3395_vm13 = vcmp.eq.f32.partialorder %v3394_v5, 8.507059e+37 }
 0x82c   :  { %vm3410_vm15 = vcmp.eq.f32.partialorder %v3409_v30, 8.507059e+37 }
 0x82e   :  { %v5703_v55 = vpop.eup %5702 }
 0x82f   :  { %v3384_v29 = vadd.f32 1.0, %v5703_v55  ;;  %v3367_v60 = vpop.f32.mrf.mxu3  ;;  %v5705_v56 = vpop.eup %5704 }
 0x830   :  { %v5707_v31 = vpop.eup %5706  ;;  %v3386_v10 = vmul.f32 %v5705_v56, %v3382_v50  ;;  %vm3391_vm4 = vweird.f32 %v5705_v56  ;;  %v3397_v60 = vor.u32 1.1754944e-38, %v3396_v43 }
 0x831   :  { %5708 = vrcp.f32 %v3384_v29  ;;  %v3401_v52 = vmul.f32 %v5707_v31, %v3383_v17  ;;  %vm3406_vm5 = vweird.f32 %v5707_v31  ;;  %vm3392_vm12 = vmor %vm3390_vm10, %vm3391_vm4  ;;  %v3426_v17 = vand.u32 2147483648, %v3384_v29 }
 0x832   :  { %5710 = vtanh.f32 %v3372_v44  ;;  %v3387_v58 = vsub.f32 1.0, %v3386_v10  ;;  %v3412_v44 = vor.u32 1.1754944e-38, %v3411_v47  ;;  %vm3407_vm14 = vmor %vm3405_vm11, %vm3406_vm5  ;;  %vm3420_vm7 = vweird.f32 %v3384_v29 }
 0x833   :  { %v3402_v21 = vsub.f32 1.0, %v3401_v52  ;;  %v3424_v47 = vand.u32 2147483647, %v3384_v29 }
 0x834   :  { %v3388_v15 = vmul.f32 %v5705_v56, %v3387_v58 }
 0x835   :  { %v3403_v48 = vmul.f32 %v5707_v31, %v3402_v21  ;;  %vm3425_vm9 = vcmp.eq.f32.partialorder %v3424_v47, 8.507059e+37 }
 0x836   :  { %v3389_v1 = vadd.f32 %v5705_v56, %v3388_v15 }
 0x837   :  { %v5709_v25 = vpop.eup %5708  ;;  %v3404_v34 = vadd.f32 %v5707_v31, %v3403_v48  ;;  %v3427_v48 = vor.u32 1.1754944e-38, %v3426_v17 }
 0x838   :  { %v5711_v55 = vpop.eup %5710  ;;  %v3416_v19 = vmul.f32 %v5709_v25, %v3384_v29  ;;  %v3393_v10 = vsel %vm3392_vm12, %v5705_v56, %v3389_v1  ;;  %vm3421_vm6 = vweird.f32 %v5709_v25  ;;  %v8333_v29 = vsel %vm6607_vm1, %v7345_v2, %v7356_v40 }
 0x839   :  { %v3398_v58 = vsel %vm3395_vm13, %v3397_v60, %v3393_v10  ;;  %v3408_v7 = vsel %vm3407_vm14, %v5707_v31, %v3404_v34  ;;  %vm3422_vm8 = vmor %vm3420_vm7, %vm3421_vm6  ;;  %v8336_v10 = vld [vmem:[#allocation40_spill] sm:$0xff] }
 0x83a   :  { %v3417_v52 = vsub.f32 1.0, %v3416_v19  ;;  %v3413_v21 = vsel %vm3410_vm15, %v3412_v44, %v3408_v7  ;;  %v3432_v46 = vmul.f32 %v5711_v55, %v3398_v58  ;;  %v8335_v44 = vld [vmem:[#allocation41_spill] sm:$0xff] }
 0x83b   :  { %v3431_v37 = vmul.f32 0.0, %v3413_v21 }
 0x83c   :  { %v3418_v0 = vmul.f32 %v5709_v25, %v3417_v52  ;;  %v8337_v52 = vsel %vm6737_vm2, %v8335_v44, %v8336_v10 }
 0x83d   :  { %v7656_v15 = vadd.f32 %v3432_v46, %v3431_v37  ;;  %v8332_v46 = vsel %vm6253_vm0, %v7333_v9, %v7342_v18 }
 0x83e   :  { %v3419_v50 = vadd.f32 %v5709_v25, %v3418_v0 }
 0x83f   :  { %5712 = vtanh.f32 %v7656_v15 }
 0x840   :  { %v3423_v5 = vsel %vm3422_vm8, %v5709_v25, %v3419_v50 }
 0x841   :  { %v3428_v34 = vsel %vm3425_vm9, %v3427_v48, %v3423_v5 }
 0x845   :  { %v5713_v56 = vpop.eup %5712 }
 0x846   :  { %v3435_v30 = vmul.f32 %v5713_v56, %v3428_v34 }
 0x848   :  { %v3440_v7 = vpack.c.bf16 %v3435_v30, %v3435_v30 }
 0x84a   :  { %3449 = vmatmul.bf16.vlgmr.msra.gmra.mxu0 %v3440_v7  ;;  %3462 = vmatmul.bf16.vlgmr.msra.gmra.mxu1 %v3440_v7 }
 0x84b   :  { %3475 = vmatmul.bf16.vlgmr.msra.gmra.mxu2 %v3440_v7  ;;  %3488 = vmatmul.bf16.vlgmr.msra.gmra.mxu3 %v3440_v7 }
 0x84c   :  { %3689 = vmatpush.bf16.msra.mxu0 %v7472_v11  ;;  %3702 = vmatpush.bf16.msra.mxu1 %v7474_v54 }
 0x84d   :  { %3715 = vmatpush.bf16.msra.mxu2 %v7476_v63  ;;  %3728 = vmatpush.bf16.msra.mxu3 %v7487_v59 }
 0x850   :  { %3690 = vmatpush.bf16.msra.mxu0 %v7479_v33  ;;  %3703 = vmatpush.bf16.msra.mxu1 %v7483_v41 }
 0x851   :  { %3716 = vmatpush.bf16.msra.mxu2 %v7485_v32  ;;  %3729 = vmatpush.bf16.msra.mxu3 %v7499_v27 }
 0x854   :  { %3691 = vmatpush.bf16.msra.mxu0 %v7491_v13  ;;  %3704 = vmatpush.bf16.msra.mxu1 %v7495_v38 }
 0x855   :  { %3717 = vmatpush.bf16.msra.mxu2 %v7497_v51  ;;  %3730 = vmatpush.bf16.msra.mxu3 %v7505_v26 }
 0x858   :  { %3692 = vmatpush.bf16.msra.mxu0 %v7503_v49  ;;  %3705 = vmatpush.bf16.msra.mxu1 %v7509_v28 }
 0x859   :  { %3718 = vmatpush.bf16.msra.mxu2 %v7511_v4  ;;  %3731 = vmatpush.bf16.msra.mxu3 %v7517_v42 }
 0x85c   :  { %3693 = vmatpush.bf16.msra.mxu0 %v7515_v16  ;;  %3706 = vmatpush.bf16.msra.mxu1 %v7521_v36 }
 0x85d   :  { %3719 = vmatpush.bf16.msra.mxu2 %v7523_v14  ;;  %3732 = vmatpush.bf16.msra.mxu3 %v7529_v57 }
 0x860   :  { %3694 = vmatpush.bf16.msra.mxu0 %v7527_v12  ;;  %3707 = vmatpush.bf16.msra.mxu1 %v7533_v24 }
 0x861   :  { %3720 = vmatpush.bf16.msra.mxu2 %v7535_v39  ;;  %3733 = vmatpush.bf16.msra.mxu3 %v7541_v53 }
 0x864   :  { %3695 = vmatpush.bf16.msra.mxu0 %v7539_v61  ;;  %3708 = vmatpush.bf16.msra.mxu1 %v7545_v8 }
 0x865   :  { %3721 = vmatpush.bf16.msra.mxu2 %v7547_v45  ;;  %3734 = vmatpush.bf16.msra.mxu3 %v7553_v22 }
 0x868   :  { %3696 = vmatpush.bf16.msra.mxu0 %v7551_v62  ;;  %3709 = vmatpush.bf16.msra.mxu1 %v7557_v20 }
 0x869   :  { %3722 = vmatpush.bf16.msra.mxu2 %v7559_v23  ;;  %3735 = vmatpush.bf16.msra.mxu3 %v7565_v3 }
 0x8c7   :  { %v3450_v0 = vpop.f32.mrf.mxu0  ;;  %v3463_v37 = vpop.f32.mrf.mxu1 }
 0x8c8   :  { %v3493_v25 = vadd.f32 %v3450_v0, %v8332_v46  ;;  %v3494_v31 = vadd.f32 %v3463_v37, %v8333_v29  ;;  %v8340_v29 = vld [vmem:[#allocation24_spill] sm:$0xff] }
 0x8ca   :  { %v5316_v43 = vmul.f32 -1.442695, %v3493_v25  ;;  %v5317_v1 = vmul.f32 -1.442695, %v3494_v31  ;;  %v8339_v25 = vld [vmem:[#allocation44_spill] sm:$0xff] }
 0x8cb   :  { %v8341_v31 = vsel %vm6809_vm3, %v8339_v25, %v8340_v29 }
 0x8cc   :  { %5714 = vpow2.f32 %v5316_v43 }
 0x8cd   :  { %5716 = vpow2.f32 %v5317_v1 }
 0x8ce   :  { %v3476_v55 = vpop.f32.mrf.mxu2  ;;  %v3489_v19 = vpop.f32.mrf.mxu3 }
 0x8cf   :  { %v3495_v58 = vadd.f32 %v3476_v55, %v8337_v52  ;;  %v3452_v21 = vpop.f32.mrf.mxu0  ;;  %v3465_v50 = vpop.f32.mrf.mxu1  ;;  %v3496_v43 = vadd.f32 %v3489_v19, %v8341_v31 }
 0x8d1   :  { %v5318_v17 = vmul.f32 -1.442695, %v3495_v58 }
 0x8d2   :  { %v5715_v47 = vpop.eup %5714 }
 0x8d3   :  { %v5717_v5 = vpop.eup %5716  ;;  %v3506_v48 = vadd.f32 1.0, %v5715_v47  ;;  %5718 = vpow2.f32 %v5318_v17 }
 0x8d4   :  { %v3507_v56 = vadd.f32 1.0, %v5717_v5 }
 0x8d5   :  { %5720 = vrcp.f32 %v3506_v48  ;;  %v3520_v50 = vand.u32 2147483648, %v3506_v48  ;;  %v3518_v5 = vand.u32 2147483647, %v3506_v48  ;;  %vm3514_vm10 = vweird.f32 %v3506_v48 }
 0x8d6   :  { %5722 = vrcp.f32 %v3507_v56  ;;  %v3478_v34 = vpop.f32.mrf.mxu2  ;;  %v3491_v30 = vpop.f32.mrf.mxu3  ;;  %v3535_v17 = vand.u32 2147483648, %v3507_v56  ;;  %vm3529_vm11 = vweird.f32 %v3507_v56 }
 0x8d7   :  { %v3533_v30 = vand.u32 2147483647, %v3507_v56  ;;  %v3521_v31 = vor.u32 1.1754944e-38, %v3520_v50  ;;  %vm3519_vm14 = vcmp.eq.f32.partialorder %v3518_v5, 8.507059e+37 }
 0x8d9   :  { %v5719_v7 = vpop.eup %5718  ;;  %vm3534_vm15 = vcmp.eq.f32.partialorder %v3533_v30, 8.507059e+37  ;;  %v8345_v30 = vld [vmem:[#allocation31_spill] sm:$0xff] }
 0x8da   :  { %v3508_v0 = vadd.f32 1.0, %v5719_v7 }
 0x8db   :  { %v5721_v37 = vpop.eup %5720 }
 0x8dc   :  { %v5723_v1 = vpop.eup %5722  ;;  %v3510_v55 = vmul.f32 %v5721_v37, %v3506_v48  ;;  %5724 = vrcp.f32 %v3508_v0  ;;  %vm3515_vm4 = vweird.f32 %v5721_v37  ;;  %v3550_v50 = vand.u32 2147483648, %v3508_v0 }
 0x8dd   :  { %v3525_v52 = vmul.f32 %v5723_v1, %v3507_v56  ;;  %5726 = vtanh.f32 %v3496_v43  ;;  %vm3530_vm5 = vweird.f32 %v5723_v1  ;;  %vm3516_vm12 = vmor %vm3514_vm10, %vm3515_vm4  ;;  %vm3544_vm7 = vweird.f32 %v3508_v0 }
 0x8de   :  { %v3511_v58 = vsub.f32 1.0, %v3510_v55  ;;  %vm3531_vm13 = vmor %vm3529_vm11, %vm3530_vm5  ;;  %v3536_v55 = vor.u32 1.1754944e-38, %v3535_v17  ;;  %v3551_v17 = vor.u32 1.1754944e-38, %v3550_v50 }
 0x8df   :  { %v3526_v21 = vsub.f32 1.0, %v3525_v52 }
 0x8e0   :  { %v3512_v47 = vmul.f32 %v5721_v37, %v3511_v58 }
 0x8e1   :  { %v3527_v34 = vmul.f32 %v5723_v1, %v3526_v21 }
 0x8e2   :  { %v5725_v7 = vpop.eup %5724  ;;  %v3513_v44 = vadd.f32 %v5721_v37, %v3512_v47 }
 0x8e3   :  { %v3540_v19 = vmul.f32 %v5725_v7, %v3508_v0  ;;  %v3528_v25 = vadd.f32 %v5723_v1, %v3527_v34  ;;  %v5727_v43 = vpop.eup %5726  ;;  %vm3545_vm6 = vweird.f32 %v5725_v7 }
 0x8e4   :  { %v3517_v52 = vsel %vm3516_vm12, %v5721_v37, %v3513_v44  ;;  %v3548_v44 = vand.u32 2147483647, %v3508_v0  ;;  %vm3546_vm8 = vmor %vm3544_vm7, %vm3545_vm6  ;;  %v8343_v0 = vld [vmem:[#allocation19_spill] sm:$0xff] }
 0x8e5   :  { %v3541_v29 = vsub.f32 1.0, %v3540_v19  ;;  %v3522_v58 = vsel %vm3519_vm14, %v3521_v31, %v3517_v52  ;;  %v3532_v10 = vsel %vm3531_vm13, %v5723_v1, %v3528_v25 }
 0x8e6   :  { %v3537_v21 = vsel %vm3534_vm15, %v3536_v55, %v3532_v10  ;;  %v3556_v2 = vmul.f32 %v5727_v43, %v3522_v58  ;;  %vm3549_vm9 = vcmp.eq.f32.partialorder %v3548_v44, 8.507059e+37 }
 0x8e7   :  { %v3555_v40 = vmul.f32 %v3537_v21, %v7656_v15  ;;  %v3542_v47 = vmul.f32 %v5725_v7, %v3541_v29  ;;  %v8342_v15 = vld [vmem:[#allocation48_spill] sm:$0xff]  ;;  %v8348_v21 = vld [vmem:[#allocation39_spill] sm:$0xff] }
 0x8e8   :  { %v8344_v29 = vsel %vm6253_vm0, %v8342_v15, %v8343_v0 }
 0x8e9   :  { %v7712_v48 = vadd.f32 %v3556_v2, %v3555_v40  ;;  %v3543_v56 = vadd.f32 %v5725_v7, %v3542_v47  ;;  %v8349_v47 = vld [vmem:[#allocation35_spill] sm:$0xff] }
 0x8eb   :  { %5728 = vtanh.f32 %v7712_v48  ;;  %v3547_v37 = vsel %vm3546_vm8, %v5725_v7, %v3543_v56  ;;  %v8346_v7 = vld [vmem:[#allocation27_spill] sm:$0xff]  ;;  %v8350_v56 = vsel %vm6737_vm2, %v8348_v21, %v8349_v47 }
 0x8ec   :  { %v3552_v1 = vsel %vm3549_vm9, %v3551_v17, %v3547_v37  ;;  %v8347_v19 = vsel %vm6607_vm1, %v8345_v30, %v8346_v7 }
 0x8f1   :  { %v5729_v25 = vpop.eup %5728 }
 0x8f2   :  { %v3559_v10 = vmul.f32 %v5729_v25, %v3552_v1 }
 0x8f4   :  { %v3564_v5 = vpack.c.bf16 %v3559_v10, %v3559_v10 }
 0x8f6   :  { %3573 = vmatmul.bf16.vlgmr.msrb.gmra.mxu0 %v3564_v5  ;;  %3586 = vmatmul.bf16.vlgmr.msrb.gmra.mxu1 %v3564_v5 }
 0x8f7   :  { %3599 = vmatmul.bf16.vlgmr.msrb.gmra.mxu2 %v3564_v5  ;;  %3612 = vmatmul.bf16.vlgmr.msrb.gmra.mxu3 %v3564_v5 }
 0x8f8   :  { %3813 = vmatpush.bf16.msrb.mxu0 %v7472_v11  ;;  %3826 = vmatpush.bf16.msrb.mxu1 %v7474_v54 }
 0x8f9   :  { %3839 = vmatpush.bf16.msrb.mxu2 %v7476_v63  ;;  %3852 = vmatpush.bf16.msrb.mxu3 %v7487_v59 }
 0x8fc   :  { %3814 = vmatpush.bf16.msrb.mxu0 %v7479_v33  ;;  %3827 = vmatpush.bf16.msrb.mxu1 %v7483_v41 }
 0x8fd   :  { %3840 = vmatpush.bf16.msrb.mxu2 %v7485_v32  ;;  %3853 = vmatpush.bf16.msrb.mxu3 %v7499_v27 }
 0x900   :  { %3815 = vmatpush.bf16.msrb.mxu0 %v7491_v13  ;;  %3828 = vmatpush.bf16.msrb.mxu1 %v7495_v38 }
 0x901   :  { %3841 = vmatpush.bf16.msrb.mxu2 %v7497_v51  ;;  %3854 = vmatpush.bf16.msrb.mxu3 %v7505_v26 }
 0x904   :  { %3816 = vmatpush.bf16.msrb.mxu0 %v7503_v49  ;;  %3829 = vmatpush.bf16.msrb.mxu1 %v7509_v28 }
 0x905   :  { %3842 = vmatpush.bf16.msrb.mxu2 %v7511_v4  ;;  %3855 = vmatpush.bf16.msrb.mxu3 %v7517_v42 }
 0x908   :  { %3817 = vmatpush.bf16.msrb.mxu0 %v7515_v16  ;;  %3830 = vmatpush.bf16.msrb.mxu1 %v7521_v36 }
 0x909   :  { %3843 = vmatpush.bf16.msrb.mxu2 %v7523_v14  ;;  %3856 = vmatpush.bf16.msrb.mxu3 %v7529_v57 }
 0x90c   :  { %3818 = vmatpush.bf16.msrb.mxu0 %v7527_v12  ;;  %3831 = vmatpush.bf16.msrb.mxu1 %v7533_v24 }
 0x90d   :  { %3844 = vmatpush.bf16.msrb.mxu2 %v7535_v39  ;;  %3857 = vmatpush.bf16.msrb.mxu3 %v7541_v53 }
 0x910   :  { %3819 = vmatpush.bf16.msrb.mxu0 %v7539_v61  ;;  %3832 = vmatpush.bf16.msrb.mxu1 %v7545_v8 }
 0x911   :  { %3845 = vmatpush.bf16.msrb.mxu2 %v7547_v45  ;;  %3858 = vmatpush.bf16.msrb.mxu3 %v7553_v22 }
 0x914   :  { %3820 = vmatpush.bf16.msrb.mxu0 %v7551_v62  ;;  %3833 = vmatpush.bf16.msrb.mxu1 %v7557_v20 }
 0x915   :  { %3846 = vmatpush.bf16.msrb.mxu2 %v7559_v23  ;;  %3859 = vmatpush.bf16.msrb.mxu3 %v7565_v3 }
 0x973   :  { %v3574_v2 = vpop.f32.mrf.mxu0  ;;  %v3587_v40 = vpop.f32.mrf.mxu1 }
 0x974   :  { %v3617_v34 = vadd.f32 %v3574_v2, %v8344_v29  ;;  %v3618_v31 = vadd.f32 %v3587_v40, %v8347_v19 }
 0x976   :  { %v5319_v55 = vmul.f32 -1.442695, %v3617_v34  ;;  %v5320_v52 = vmul.f32 -1.442695, %v3618_v31  ;;  %v8351_v31 = vld [vmem:[#allocation45_spill] sm:$0xff] }
 0x978   :  { %5730 = vpow2.f32 %v5319_v55  ;;  %v8352_v55 = vld [vmem:[#allocation23_spill] sm:$0xff] }
 0x979   :  { %5732 = vpow2.f32 %v5320_v52  ;;  %v8353_v52 = vsel %vm6809_vm3, %v8351_v31, %v8352_v55 }
 0x97a   :  { %v3600_v43 = vpop.f32.mrf.mxu2  ;;  %v3613_v58 = vpop.f32.mrf.mxu3 }
 0x97b   :  { %v3619_v50 = vadd.f32 %v3600_v43, %v8350_v56  ;;  %v3576_v44 = vpop.f32.mrf.mxu0  ;;  %v3589_v37 = vpop.f32.mrf.mxu1  ;;  %v3620_v43 = vadd.f32 %v3613_v58, %v8353_v52 }
 0x97d   :  { %v5321_v17 = vmul.f32 -1.442695, %v3619_v50 }
 0x97e   :  { %v5731_v25 = vpop.eup %5730 }
 0x97f   :  { %v5733_v1 = vpop.eup %5732  ;;  %v3630_v10 = vadd.f32 1.0, %v5731_v25  ;;  %5734 = vpow2.f32 %v5321_v17 }
 0x980   :  { %v3631_v5 = vadd.f32 1.0, %v5733_v1 }
 0x981   :  { %5736 = vrcp.f32 %v3630_v10  ;;  %v3644_v25 = vand.u32 2147483648, %v3630_v10  ;;  %vm3638_vm10 = vweird.f32 %v3630_v10 }
 0x982   :  { %5738 = vrcp.f32 %v3631_v5  ;;  %v3602_v2 = vpop.f32.mrf.mxu2  ;;  %v3615_v40 = vpop.f32.mrf.mxu3  ;;  %v3659_v1 = vand.u32 2147483648, %v3631_v5  ;;  %v3657_v9 = vand.u32 2147483647, %v3631_v5  ;;  %vm3653_vm11 = vweird.f32 %v3631_v5 }
 0x983   :  { %v3642_v40 = vand.u32 2147483647, %v3630_v10  ;;  %v3645_v52 = vor.u32 1.1754944e-38, %v3644_v25 }
 0x984   :  { %vm3658_vm15 = vcmp.eq.f32.partialorder %v3657_v9, 8.507059e+37 }
 0x985   :  { %v5735_v29 = vpop.eup %5734  ;;  %vm3643_vm14 = vcmp.eq.f32.partialorder %v3642_v40, 8.507059e+37  ;;  %v8357_v40 = vld [vmem:[#allocation29_spill] sm:$0xff] }
 0x986   :  { %v3632_v34 = vadd.f32 1.0, %v5735_v29 }
 0x987   :  { %v5737_v19 = vpop.eup %5736 }
 0x988   :  { %v5739_v56 = vpop.eup %5738  ;;  %v3634_v50 = vmul.f32 %v5737_v19, %v3630_v10  ;;  %5740 = vrcp.f32 %v3632_v34  ;;  %vm3639_vm4 = vweird.f32 %v5737_v19  ;;  %v3674_v25 = vand.u32 2147483648, %v3632_v34 }
 0x989   :  { %v3649_v44 = vmul.f32 %v5739_v56, %v3631_v5  ;;  %5742 = vtanh.f32 %v3620_v43  ;;  %vm3654_vm5 = vweird.f32 %v5739_v56  ;;  %vm3640_vm12 = vmor %vm3638_vm10, %vm3639_vm4  ;;  %vm3668_vm7 = vweird.f32 %v3632_v34 }
 0x98a   :  { %v3635_v37 = vsub.f32 1.0, %v3634_v50  ;;  %vm3655_vm13 = vmor %vm3653_vm11, %vm3654_vm5  ;;  %v3660_v50 = vor.u32 1.1754944e-38, %v3659_v1  ;;  %v3675_v1 = vor.u32 1.1754944e-38, %v3674_v25 }
 0x98b   :  { %v3650_v17 = vsub.f32 1.0, %v3649_v44 }
 0x98c   :  { %v3636_v2 = vmul.f32 %v5737_v19, %v3635_v37 }
 0x98d   :  { %v3651_v29 = vmul.f32 %v5739_v56, %v3650_v17 }
 0x98e   :  { %v5741_v18 = vpop.eup %5740  ;;  %v3637_v21 = vadd.f32 %v5737_v19, %v3636_v2 }
 0x98f   :  { %v3664_v58 = vmul.f32 %v5741_v18, %v3632_v34  ;;  %v3652_v31 = vadd.f32 %v5739_v56, %v3651_v29  ;;  %v5743_v43 = vpop.eup %5742  ;;  %vm3669_vm6 = vweird.f32 %v5741_v18  ;;  %v8358_v29 = vld [vmem:[#allocation30_spill] sm:$0xff] }
 0x990   :  { %v3641_v44 = vsel %vm3640_vm12, %v5737_v19, %v3637_v21  ;;  %v3672_v21 = vand.u32 2147483647, %v3632_v34  ;;  %vm3670_vm8 = vmor %vm3668_vm7, %vm3669_vm6 }
 0x991   :  { %v3665_v55 = vsub.f32 1.0, %v3664_v58  ;;  %v3646_v37 = vsel %vm3643_vm14, %v3645_v52, %v3641_v44  ;;  %v3656_v47 = vsel %vm3655_vm13, %v5739_v56, %v3652_v31  ;;  %v8359_v58 = vsel %vm6607_vm1, %v8357_v40, %v8358_v29 }
 0x992   :  { %v3661_v17 = vsel %vm3658_vm15, %v3660_v50, %v3656_v47  ;;  %v3680_v30 = vmul.f32 %v5743_v43, %v3646_v37  ;;  %vm3673_vm9 = vcmp.eq.f32.partialorder %v3672_v21, 8.507059e+37 }
 0x993   :  { %v3679_v7 = vmul.f32 %v3661_v17, %v7712_v48  ;;  %v3666_v2 = vmul.f32 %v5741_v18, %v3665_v55  ;;  %v8360_v17 = vld [vmem:[#allocation38_spill] sm:$0xff] }
 0x995   :  { %v7768_v10 = vadd.f32 %v3680_v30, %v3679_v7  ;;  %v3667_v5 = vadd.f32 %v5741_v18, %v3666_v2  ;;  %v8354_v30 = vld [vmem:[#allocation20_spill] sm:$0xff]  ;;  %v8355_v7 = vld [vmem:[#allocation21_spill] sm:$0xff] }
 0x996   :  { %v8356_v34 = vsel %vm6253_vm0, %v8354_v30, %v8355_v7  ;;  %v8361_v2 = vld [vmem:[#allocation37_spill] sm:$0xff] }
 0x997   :  { %5744 = vtanh.f32 %v7768_v10  ;;  %v3671_v19 = vsel %vm3670_vm8, %v5741_v18, %v3667_v5  ;;  %v8362_v5 = vsel %vm6737_vm2, %v8360_v17, %v8361_v2 }
 0x998   :  { %v3676_v9 = vsel %vm3673_vm9, %v3675_v1, %v3671_v19 }
 0x99d   :  { %v5745_v31 = vpop.eup %5744 }
 0x99e   :  { %v3683_v47 = vmul.f32 %v5745_v31, %v3676_v9 }
 0x9a0   :  { %v3688_v56 = vpack.c.bf16 %v3683_v47, %v3683_v47 }
 0x9a2   :  { %3697 = vmatmul.bf16.vlgmr.msra.gmra.mxu0 %v3688_v56  ;;  %3710 = vmatmul.bf16.vlgmr.msra.gmra.mxu1 %v3688_v56 }
 0x9a3   :  { %3723 = vmatmul.bf16.vlgmr.msra.gmra.mxu2 %v3688_v56  ;;  %3736 = vmatmul.bf16.vlgmr.msra.gmra.mxu3 %v3688_v56 }
 0x9a4   :  { %3937 = vmatpush.bf16.msra.mxu0 %v7472_v11  ;;  %3950 = vmatpush.bf16.msra.mxu1 %v7474_v54 }
 0x9a5   :  { %3963 = vmatpush.bf16.msra.mxu2 %v7476_v63  ;;  %3976 = vmatpush.bf16.msra.mxu3 %v7487_v59 }
 0x9a8   :  { %3938 = vmatpush.bf16.msra.mxu0 %v7479_v33  ;;  %3951 = vmatpush.bf16.msra.mxu1 %v7483_v41 }
 0x9a9   :  { %3964 = vmatpush.bf16.msra.mxu2 %v7485_v32  ;;  %3977 = vmatpush.bf16.msra.mxu3 %v7499_v27 }
 0x9ac   :  { %3939 = vmatpush.bf16.msra.mxu0 %v7491_v13  ;;  %3952 = vmatpush.bf16.msra.mxu1 %v7495_v38 }
 0x9ad   :  { %3965 = vmatpush.bf16.msra.mxu2 %v7497_v51  ;;  %3978 = vmatpush.bf16.msra.mxu3 %v7505_v26 }
 0x9b0   :  { %3940 = vmatpush.bf16.msra.mxu0 %v7503_v49  ;;  %3953 = vmatpush.bf16.msra.mxu1 %v7509_v28 }
 0x9b1   :  { %3966 = vmatpush.bf16.msra.mxu2 %v7511_v4  ;;  %3979 = vmatpush.bf16.msra.mxu3 %v7517_v42 }
 0x9b4   :  { %3941 = vmatpush.bf16.msra.mxu0 %v7515_v16  ;;  %3954 = vmatpush.bf16.msra.mxu1 %v7521_v36 }
 0x9b5   :  { %3967 = vmatpush.bf16.msra.mxu2 %v7523_v14  ;;  %3980 = vmatpush.bf16.msra.mxu3 %v7529_v57 }
 0x9b8   :  { %3942 = vmatpush.bf16.msra.mxu0 %v7527_v12  ;;  %3955 = vmatpush.bf16.msra.mxu1 %v7533_v24 }
 0x9b9   :  { %3968 = vmatpush.bf16.msra.mxu2 %v7535_v39  ;;  %3981 = vmatpush.bf16.msra.mxu3 %v7541_v53 }
 0x9bc   :  { %3943 = vmatpush.bf16.msra.mxu0 %v7539_v61  ;;  %3956 = vmatpush.bf16.msra.mxu1 %v7545_v8 }
 0x9bd   :  { %3969 = vmatpush.bf16.msra.mxu2 %v7547_v45  ;;  %3982 = vmatpush.bf16.msra.mxu3 %v7553_v22 }
 0x9c0   :  { %3944 = vmatpush.bf16.msra.mxu0 %v7551_v62  ;;  %3957 = vmatpush.bf16.msra.mxu1 %v7557_v20 }
 0x9c1   :  { %3970 = vmatpush.bf16.msra.mxu2 %v7559_v23  ;;  %3983 = vmatpush.bf16.msra.mxu3 %v7565_v3 }
 0xa1f   :  { %v3698_v18 = vpop.f32.mrf.mxu0  ;;  %v3711_v48 = vpop.f32.mrf.mxu1 }
 0xa20   :  { %v3741_v55 = vadd.f32 %v3698_v18, %v8356_v34  ;;  %v3742_v52 = vadd.f32 %v3711_v48, %v8359_v58 }
 0xa22   :  { %v5322_v50 = vmul.f32 -1.442695, %v3741_v55  ;;  %v5323_v44 = vmul.f32 -1.442695, %v3742_v52  ;;  %v8363_v52 = vld [vmem:[#allocation46_spill] sm:$0xff] }
 0xa24   :  { %5746 = vpow2.f32 %v5322_v50  ;;  %v8364_v50 = vld [vmem:[#allocation22_spill] sm:$0xff] }
 0xa25   :  { %5748 = vpow2.f32 %v5323_v44  ;;  %v8365_v44 = vsel %vm6809_vm3, %v8363_v52, %v8364_v50 }
 0xa26   :  { %v3724_v43 = vpop.f32.mrf.mxu2  ;;  %v3737_v37 = vpop.f32.mrf.mxu3 }
 0xa27   :  { %v3743_v25 = vadd.f32 %v3724_v43, %v8362_v5  ;;  %v3700_v21 = vpop.f32.mrf.mxu0  ;;  %v3713_v19 = vpop.f32.mrf.mxu1  ;;  %v3744_v43 = vadd.f32 %v3737_v37, %v8365_v44 }
 0xa29   :  { %v5324_v1 = vmul.f32 -1.442695, %v3743_v25 }
 0xa2a   :  { %v5747_v31 = vpop.eup %5746 }
 0xa2b   :  { %v5749_v9 = vpop.eup %5748  ;;  %v3754_v47 = vadd.f32 1.0, %v5747_v31  ;;  %5750 = vpow2.f32 %v5324_v1 }
 0xa2c   :  { %v3755_v56 = vadd.f32 1.0, %v5749_v9 }
 0xa2d   :  { %5752 = vrcp.f32 %v3754_v47  ;;  %v3768_v31 = vand.u32 2147483648, %v3754_v47  ;;  %vm3762_vm10 = vweird.f32 %v3754_v47 }
 0xa2e   :  { %5754 = vrcp.f32 %v3755_v56  ;;  %v3726_v18 = vpop.f32.mrf.mxu2  ;;  %v3739_v48 = vpop.f32.mrf.mxu3  ;;  %v3783_v9 = vand.u32 2147483648, %v3755_v56  ;;  %v3781_v15 = vand.u32 2147483647, %v3755_v56  ;;  %vm3777_vm11 = vweird.f32 %v3755_v56 }
 0xa2f   :  { %v3766_v48 = vand.u32 2147483647, %v3754_v47  ;;  %v3769_v44 = vor.u32 1.1754944e-38, %v3768_v31 }
 0xa30   :  { %vm3782_vm15 = vcmp.eq.f32.partialorder %v3781_v15, 8.507059e+37 }
 0xa31   :  { %v5751_v34 = vpop.eup %5750  ;;  %vm3767_vm14 = vcmp.eq.f32.partialorder %v3766_v48, 8.507059e+37 }
 0xa32   :  { %v3756_v55 = vadd.f32 1.0, %v5751_v34 }
 0xa33   :  { %v5753_v58 = vpop.eup %5752 }
 0xa34   :  { %v5755_v5 = vpop.eup %5754  ;;  %v3758_v25 = vmul.f32 %v5753_v58, %v3754_v47  ;;  %5756 = vrcp.f32 %v3756_v55  ;;  %vm3763_vm4 = vweird.f32 %v5753_v58  ;;  %v3798_v31 = vand.u32 2147483648, %v3756_v55 }
 0xa35   :  { %v3773_v21 = vmul.f32 %v5755_v5, %v3755_v56  ;;  %5758 = vtanh.f32 %v3744_v43  ;;  %vm3778_vm5 = vweird.f32 %v5755_v5  ;;  %vm3764_vm12 = vmor %vm3762_vm10, %vm3763_vm4  ;;  %vm3792_vm7 = vweird.f32 %v3756_v55 }
 0xa36   :  { %v3759_v19 = vsub.f32 1.0, %v3758_v25  ;;  %vm3779_vm13 = vmor %vm3777_vm11, %vm3778_vm5  ;;  %v3784_v25 = vor.u32 1.1754944e-38, %v3783_v9  ;;  %v3799_v9 = vor.u32 1.1754944e-38, %v3798_v31 }
 0xa37   :  { %v3774_v1 = vsub.f32 1.0, %v3773_v21 }
 0xa38   :  { %v3760_v18 = vmul.f32 %v5753_v58, %v3759_v19 }
 0xa39   :  { %v3775_v34 = vmul.f32 %v5755_v5, %v3774_v1 }
 0xa3a   :  { %v5757_v0 = vpop.eup %5756  ;;  %v3761_v46 = vadd.f32 %v5753_v58, %v3760_v18 }
 0xa3b   :  { %v3788_v37 = vmul.f32 %v5757_v0, %v3756_v55  ;;  %v3776_v52 = vadd.f32 %v5755_v5, %v3775_v34  ;;  %v5759_v43 = vpop.eup %5758  ;;  %vm3793_vm6 = vweird.f32 %v5757_v0 }
 0xa3c   :  { %v3765_v21 = vsel %vm3764_vm12, %v5753_v58, %v3761_v46  ;;  %v3796_v46 = vand.u32 2147483647, %v3756_v55  ;;  %vm3794_vm8 = vmor %vm3792_vm7, %vm3793_vm6  ;;  %v8367_v55 = vsel %vm6607_vm1, %v8358_v29, %v8357_v40 }
 0xa3d   :  { %v3789_v50 = vsub.f32 1.0, %v3788_v37  ;;  %v3770_v19 = vsel %vm3767_vm14, %v3769_v44, %v3765_v21  ;;  %v3780_v17 = vsel %vm3779_vm13, %v5755_v5, %v3776_v52  ;;  %v8369_v21 = vld [vmem:[#allocation37_spill] sm:$0xff] }
 0xa3e   :  { %v3785_v1 = vsel %vm3782_vm15, %v3784_v25, %v3780_v17  ;;  %v3804_v2 = vmul.f32 %v5759_v43, %v3770_v19  ;;  %vm3797_vm9 = vcmp.eq.f32.partialorder %v3796_v46, 8.507059e+37  ;;  %v8370_v43 = vld [vmem:[#allocation38_spill] sm:$0xff] }
 0xa3f   :  { %v3803_v60 = vmul.f32 %v3785_v1, %v7768_v10  ;;  %v3790_v18 = vmul.f32 %v5757_v0, %v3789_v50  ;;  %v8366_v10 = vsel %vm6253_vm0, %v8355_v7, %v8354_v30  ;;  %v8371_v19 = vsel %vm6737_vm2, %v8369_v21, %v8370_v43 }
 0xa41   :  { %v7824_v47 = vadd.f32 %v3804_v2, %v3803_v60  ;;  %v3791_v56 = vadd.f32 %v5757_v0, %v3790_v18 }
 0xa43   :  { %5760 = vtanh.f32 %v7824_v47  ;;  %v3795_v58 = vsel %vm3794_vm8, %v5757_v0, %v3791_v56 }
 0xa44   :  { %v3800_v15 = vsel %vm3797_vm9, %v3799_v9, %v3795_v58 }
 0xa49   :  { %v5761_v52 = vpop.eup %5760 }
 0xa4a   :  { %v3807_v17 = vmul.f32 %v5761_v52, %v3800_v15 }
 0xa4c   :  { %v3812_v5 = vpack.c.bf16 %v3807_v17, %v3807_v17 }
 0xa4e   :  { %3821 = vmatmul.bf16.vlgmr.msrb.gmra.mxu0 %v3812_v5  ;;  %3834 = vmatmul.bf16.vlgmr.msrb.gmra.mxu1 %v3812_v5 }
 0xa4f   :  { %3847 = vmatmul.bf16.vlgmr.msrb.gmra.mxu2 %v3812_v5  ;;  %3860 = vmatmul.bf16.vlgmr.msrb.gmra.mxu3 %v3812_v5  ;;  %v8373_v5 = vld [vmem:[#allocation22_spill] sm:$0xff] }
 0xa50   :  { %4061 = vmatpush.bf16.msrb.mxu0 %v7472_v11  ;;  %4074 = vmatpush.bf16.msrb.mxu1 %v7474_v54 }
 0xa51   :  { %4087 = vmatpush.bf16.msrb.mxu2 %v7476_v63  ;;  %4100 = vmatpush.bf16.msrb.mxu3 %v7487_v59 }
 0xa54   :  { %4062 = vmatpush.bf16.msrb.mxu0 %v7479_v33  ;;  %4075 = vmatpush.bf16.msrb.mxu1 %v7483_v41 }
 0xa55   :  { %4088 = vmatpush.bf16.msrb.mxu2 %v7485_v32  ;;  %4101 = vmatpush.bf16.msrb.mxu3 %v7499_v27 }
 0xa58   :  { %4063 = vmatpush.bf16.msrb.mxu0 %v7491_v13  ;;  %4076 = vmatpush.bf16.msrb.mxu1 %v7495_v38 }
 0xa59   :  { %4089 = vmatpush.bf16.msrb.mxu2 %v7497_v51  ;;  %4102 = vmatpush.bf16.msrb.mxu3 %v7505_v26 }
 0xa5c   :  { %4064 = vmatpush.bf16.msrb.mxu0 %v7503_v49  ;;  %4077 = vmatpush.bf16.msrb.mxu1 %v7509_v28 }
 0xa5d   :  { %4090 = vmatpush.bf16.msrb.mxu2 %v7511_v4  ;;  %4103 = vmatpush.bf16.msrb.mxu3 %v7517_v42 }
 0xa60   :  { %4065 = vmatpush.bf16.msrb.mxu0 %v7515_v16  ;;  %4078 = vmatpush.bf16.msrb.mxu1 %v7521_v36 }
 0xa61   :  { %4091 = vmatpush.bf16.msrb.mxu2 %v7523_v14  ;;  %4104 = vmatpush.bf16.msrb.mxu3 %v7529_v57 }
 0xa64   :  { %4066 = vmatpush.bf16.msrb.mxu0 %v7527_v12  ;;  %4079 = vmatpush.bf16.msrb.mxu1 %v7533_v24 }
 0xa65   :  { %4092 = vmatpush.bf16.msrb.mxu2 %v7535_v39  ;;  %4105 = vmatpush.bf16.msrb.mxu3 %v7541_v53 }
 0xa68   :  { %4067 = vmatpush.bf16.msrb.mxu0 %v7539_v61  ;;  %4080 = vmatpush.bf16.msrb.mxu1 %v7545_v8 }
 0xa69   :  { %4093 = vmatpush.bf16.msrb.mxu2 %v7547_v45  ;;  %4106 = vmatpush.bf16.msrb.mxu3 %v7553_v22 }
 0xa6c   :  { %4068 = vmatpush.bf16.msrb.mxu0 %v7551_v62  ;;  %4081 = vmatpush.bf16.msrb.mxu1 %v7557_v20 }
 0xa6d   :  { %4094 = vmatpush.bf16.msrb.mxu2 %v7559_v23  ;;  %4107 = vmatpush.bf16.msrb.mxu3 %v7565_v3 }
 0xacb   :  { %v3822_v60 = vpop.f32.mrf.mxu0  ;;  %v3835_v0 = vpop.f32.mrf.mxu1 }
 0xacc   :  { %v3865_v2 = vadd.f32 %v3822_v60, %v8366_v10  ;;  %v3866_v50 = vadd.f32 %v3835_v0, %v8367_v55  ;;  %v8374_v60 = vld [vmem:[#allocation46_spill] sm:$0xff] }
 0xacd   :  { %v8375_v0 = vsel %vm6809_vm3, %v8373_v5, %v8374_v60 }
 0xace   :  { %v5325_v48 = vmul.f32 -1.442695, %v3865_v2  ;;  %v5326_v34 = vmul.f32 -1.442695, %v3866_v50 }
 0xad0   :  { %5762 = vpow2.f32 %v5325_v48 }
 0xad1   :  { %5764 = vpow2.f32 %v5326_v34 }
 0xad2   :  { %v3848_v37 = vpop.f32.mrf.mxu2  ;;  %v3861_v44 = vpop.f32.mrf.mxu3 }
 0xad3   :  { %v3867_v1 = vadd.f32 %v3848_v37, %v8371_v19  ;;  %v3824_v30 = vpop.f32.mrf.mxu0  ;;  %v3837_v7 = vpop.f32.mrf.mxu1  ;;  %v3868_v10 = vadd.f32 %v3861_v44, %v8375_v0 }
 0xad5   :  { %v5327_v18 = vmul.f32 -1.442695, %v3867_v1 }
 0xad6   :  { %v5763_v56 = vpop.eup %5762 }
 0xad7   :  { %v5765_v31 = vpop.eup %5764  ;;  %v3878_v46 = vadd.f32 1.0, %v5763_v56  ;;  %5766 = vpow2.f32 %v5327_v18 }
 0xad8   :  { %v3879_v40 = vadd.f32 1.0, %v5765_v31 }
 0xad9   :  { %5768 = vrcp.f32 %v3878_v46  ;;  %v3892_v37 = vand.u32 2147483648, %v3878_v46  ;;  %v3890_v19 = vand.u32 2147483647, %v3878_v46  ;;  %vm3886_vm10 = vweird.f32 %v3878_v46 }
 0xada   :  { %5770 = vrcp.f32 %v3879_v40  ;;  %v3850_v29 = vpop.f32.mrf.mxu2  ;;  %v3863_v58 = vpop.f32.mrf.mxu3  ;;  %v3907_v21 = vand.u32 2147483648, %v3879_v40  ;;  %v3905_v30 = vand.u32 2147483647, %v3879_v40  ;;  %vm3901_vm11 = vweird.f32 %v3879_v40 }
 0xadb   :  { %v3893_v56 = vor.u32 1.1754944e-38, %v3892_v37  ;;  %vm3891_vm14 = vcmp.eq.f32.partialorder %v3890_v19, 8.507059e+37 }
 0xadc   :  { %v3908_v29 = vor.u32 1.1754944e-38, %v3907_v21  ;;  %vm3906_vm15 = vcmp.eq.f32.partialorder %v3905_v30, 8.507059e+37 }
 0xadd   :  { %v5767_v9 = vpop.eup %5766 }
 0xade   :  { %v3880_v52 = vadd.f32 1.0, %v5767_v9 }
 0xadf   :  { %v5769_v15 = vpop.eup %5768 }
 0xae0   :  { %v5771_v2 = vpop.eup %5770  ;;  %v3882_v55 = vmul.f32 %v5769_v15, %v3878_v46  ;;  %5772 = vrcp.f32 %v3880_v52  ;;  %vm3887_vm4 = vweird.f32 %v5769_v15  ;;  %vm3916_vm7 = vweird.f32 %v3880_v52 }
 0xae1   :  { %v3897_v50 = vmul.f32 %v5771_v2, %v3879_v40  ;;  %5774 = vtanh.f32 %v3868_v10  ;;  %vm3902_vm5 = vweird.f32 %v5771_v2  ;;  %vm3888_vm12 = vmor %vm3886_vm10, %vm3887_vm4 }
 0xae2   :  { %v3883_v48 = vsub.f32 1.0, %v3882_v55  ;;  %vm3903_vm13 = vmor %vm3901_vm11, %vm3902_vm5 }
 0xae3   :  { %v3898_v34 = vsub.f32 1.0, %v3897_v50 }
 0xae4   :  { %v3884_v43 = vmul.f32 %v5769_v15, %v3883_v48 }
 0xae5   :  { %v3899_v1 = vmul.f32 %v5771_v2, %v3898_v34  ;;  %v3922_v34 = vand.u32 2147483648, %v3880_v52 }
 0xae6   :  { %v5773_v7 = vpop.eup %5772  ;;  %v3885_v18 = vadd.f32 %v5769_v15, %v3884_v43 }
 0xae7   :  { %v3912_v44 = vmul.f32 %v5773_v7, %v3880_v52  ;;  %v3900_v31 = vadd.f32 %v5771_v2, %v3899_v1  ;;  %v5775_v9 = vpop.eup %5774  ;;  %vm3917_vm6 = vweird.f32 %v5773_v7  ;;  %v3923_v21 = vor.u32 1.1754944e-38, %v3922_v34 }
 0xae8   :  { %v3889_v58 = vsel %vm3888_vm12, %v5769_v15, %v3885_v18  ;;  %v3920_v15 = vand.u32 2147483647, %v3880_v52  ;;  %vm3918_vm8 = vmor %vm3916_vm7, %vm3917_vm6 }
 0xae9   :  { %v3913_v5 = vsub.f32 1.0, %v3912_v44  ;;  %v3894_v60 = vsel %vm3891_vm14, %v3893_v56, %v3889_v58  ;;  %v3904_v0 = vsel %vm3903_vm13, %v5771_v2, %v3900_v31 }
 0xaea   :  { %v3909_v10 = vsel %vm3906_vm15, %v3908_v29, %v3904_v0  ;;  %v3928_v55 = vmul.f32 %v5775_v9, %v3894_v60  ;;  %vm3921_vm9 = vcmp.eq.f32.partialorder %v3920_v15, 8.507059e+37 }
 0xaeb   :  { %v3927_v50 = vmul.f32 %v3909_v10, %v7824_v47  ;;  %v3914_v48 = vmul.f32 %v5773_v7, %v3913_v5 }
 0xaed   :  { %v7880_v46 = vadd.f32 %v3928_v55, %v3927_v50  ;;  %v3915_v40 = vadd.f32 %v5773_v7, %v3914_v48 }
 0xaef   :  { %5776 = vtanh.f32 %v7880_v46  ;;  %v3919_v37 = vsel %vm3918_vm8, %v5773_v7, %v3915_v40 }
 0xaf0   :  { %v3924_v43 = vsel %vm3921_vm9, %v3923_v21, %v3919_v37 }
 0xaf5   :  { %v5777_v2 = vpop.eup %5776 }
 0xaf6   :  { %v3931_v19 = vmul.f32 %v5777_v2, %v3924_v43 }
 0xaf8   :  { %v3936_v1 = vpack.c.bf16 %v3931_v19, %v3931_v19 }
 0xafa   :  { %3945 = vmatmul.bf16.vlgmr.msra.gmra.mxu0 %v3936_v1  ;;  %3958 = vmatmul.bf16.vlgmr.msra.gmra.mxu1 %v3936_v1 }
 0xafb   :  { %3971 = vmatmul.bf16.vlgmr.msra.gmra.mxu2 %v3936_v1  ;;  %3984 = vmatmul.bf16.vlgmr.msra.gmra.mxu3 %v3936_v1 }
 0xafc   :  { %4185 = vmatpush.bf16.msra.mxu0 %v7472_v11  ;;  %4198 = vmatpush.bf16.msra.mxu1 %v7474_v54  ;;  %v8376_v11 = vld [vmem:[#allocation19_spill] sm:$0xff] }
 0xafd   :  { %4211 = vmatpush.bf16.msra.mxu2 %v7476_v63  ;;  %4224 = vmatpush.bf16.msra.mxu3 %v7487_v59 }
 0xb00   :  { %4186 = vmatpush.bf16.msra.mxu0 %v7479_v33  ;;  %4199 = vmatpush.bf16.msra.mxu1 %v7483_v41  ;;  %v8379_v41 = vld [vmem:[#allocation27_spill] sm:$0xff] }
 0xb01   :  { %4212 = vmatpush.bf16.msra.mxu2 %v7485_v32  ;;  %4225 = vmatpush.bf16.msra.mxu3 %v7499_v27  ;;  %v8380_v32 = vld [vmem:[#allocation31_spill] sm:$0xff] }
 0xb02   :  { %v8381_v59 = vsel %vm6607_vm1, %v8379_v41, %v8380_v32 }
 0xb04   :  { %4187 = vmatpush.bf16.msra.mxu0 %v7491_v13  ;;  %4200 = vmatpush.bf16.msra.mxu1 %v7495_v38  ;;  %v8377_v13 = vld [vmem:[#allocation48_spill] sm:$0xff] }
 0xb05   :  { %4213 = vmatpush.bf16.msra.mxu2 %v7497_v51  ;;  %4226 = vmatpush.bf16.msra.mxu3 %v7505_v26  ;;  %v8378_v26 = vsel %vm6253_vm0, %v8376_v11, %v8377_v13 }
 0xb08   :  { %4188 = vmatpush.bf16.msra.mxu0 %v7503_v49  ;;  %4201 = vmatpush.bf16.msra.mxu1 %v7509_v28 }
 0xb09   :  { %4214 = vmatpush.bf16.msra.mxu2 %v7511_v4  ;;  %4227 = vmatpush.bf16.msra.mxu3 %v7517_v42  ;;  %v8382_v4 = vld [vmem:[#allocation35_spill] sm:$0xff] }
 0xb0c   :  { %4189 = vmatpush.bf16.msra.mxu0 %v7515_v16  ;;  %4202 = vmatpush.bf16.msra.mxu1 %v7521_v36  ;;  %v8383_v16 = vld [vmem:[#allocation39_spill] sm:$0xff] }
 0xb0d   :  { %4215 = vmatpush.bf16.msra.mxu2 %v7523_v14  ;;  %4228 = vmatpush.bf16.msra.mxu3 %v7529_v57  ;;  %v8384_v42 = vsel %vm6737_vm2, %v8382_v4, %v8383_v16 }
 0xb10   :  { %4190 = vmatpush.bf16.msra.mxu0 %v7527_v12  ;;  %4203 = vmatpush.bf16.msra.mxu1 %v7533_v24 }
 0xb11   :  { %4216 = vmatpush.bf16.msra.mxu2 %v7535_v39  ;;  %4229 = vmatpush.bf16.msra.mxu3 %v7541_v53 }
 0xb14   :  { %4191 = vmatpush.bf16.msra.mxu0 %v7539_v61  ;;  %4204 = vmatpush.bf16.msra.mxu1 %v7545_v8 }
 0xb15   :  { %4217 = vmatpush.bf16.msra.mxu2 %v7547_v45  ;;  %4230 = vmatpush.bf16.msra.mxu3 %v7553_v22 }
 0xb18   :  { %4192 = vmatpush.bf16.msra.mxu0 %v7551_v62  ;;  %4205 = vmatpush.bf16.msra.mxu1 %v7557_v20 }
 0xb19   :  { %4218 = vmatpush.bf16.msra.mxu2 %v7559_v23  ;;  %4231 = vmatpush.bf16.msra.mxu3 %v7565_v3  ;;  %v8385_v23 = vld [vmem:[#allocation23_spill] sm:$0xff]  ;;  %v8386_v3 = vld [vmem:[#allocation45_spill] sm:$0xff] }
 0xb1a   :  { %v8387_v47 = vsel %vm6809_vm3, %v8385_v23, %v8386_v3 }
 0xb77   :  { %v3946_v63 = vpop.f32.mrf.mxu0  ;;  %v3959_v54 = vpop.f32.mrf.mxu1 }
 0xb78   :  { %v3989_v33 = vadd.f32 %v3946_v63, %v8378_v26  ;;  %v3990_v38 = vadd.f32 %v3959_v54, %v8381_v59 }
 0xb7a   :  { %v5328_v51 = vmul.f32 -1.442695, %v3989_v33  ;;  %v5329_v27 = vmul.f32 -1.442695, %v3990_v38 }
 0xb7c   :  { %5778 = vpow2.f32 %v5328_v51 }
 0xb7d   :  { %5780 = vpow2.f32 %v5329_v27 }
 0xb7e   :  { %v3972_v49 = vpop.f32.mrf.mxu2  ;;  %v3985_v28 = vpop.f32.mrf.mxu3 }
 0xb7f   :  { %v3991_v36 = vadd.f32 %v3972_v49, %v8384_v42  ;;  %v3948_v14 = vpop.f32.mrf.mxu0  ;;  %v3961_v12 = vpop.f32.mrf.mxu1  ;;  %v3992_v52 = vadd.f32 %v3985_v28, %v8387_v47  ;;  %v8388_v49 = vld [vmem:[#allocation18_spill] sm:$0xff]  ;;  %v8389_v28 = vld [vmem:[#allocation49_spill] sm:$0xff] }
 0xb80   :  { %v8390_v4 = vsel %vm6253_vm0, %v8388_v49, %v8389_v28  ;;  %v8391_v42 = vld [vmem:[#allocation26_spill] sm:$0xff] }
 0xb81   :  { %v5330_v57 = vmul.f32 -1.442695, %v3991_v36  ;;  %v8392_v36 = vld [vmem:[#allocation32_spill] sm:$0xff] }
 0xb82   :  { %v5779_v24 = vpop.eup %5778  ;;  %v8393_v14 = vsel %vm6607_vm1, %v8391_v42, %v8392_v36 }
 0xb83   :  { %v5781_v39 = vpop.eup %5780  ;;  %v4002_v61 = vadd.f32 1.0, %v5779_v24  ;;  %5782 = vpow2.f32 %v5330_v57 }
 0xb84   :  { %v4003_v53 = vadd.f32 1.0, %v5781_v39 }
 0xb85   :  { %5784 = vrcp.f32 %v4002_v61  ;;  %v4016_v31 = vand.u32 2147483648, %v4002_v61  ;;  %v4014_v9 = vand.u32 2147483647, %v4002_v61  ;;  %vm4010_vm10 = vweird.f32 %v4002_v61 }
 0xb86   :  { %5786 = vrcp.f32 %v4003_v53  ;;  %v3974_v8 = vpop.f32.mrf.mxu2  ;;  %v3987_v45 = vpop.f32.mrf.mxu3  ;;  %v4031_v29 = vand.u32 2147483648, %v4003_v53  ;;  %v4029_v60 = vand.u32 2147483647, %v4003_v53  ;;  %vm4025_vm11 = vweird.f32 %v4003_v53 }
 0xb87   :  { %v4017_v50 = vor.u32 1.1754944e-38, %v4016_v31  ;;  %vm4015_vm14 = vcmp.eq.f32.partialorder %v4014_v9, 8.507059e+37  ;;  %v8395_v8 = vld [vmem:[#allocation41_spill] sm:$0xff] }
 0xb88   :  { %v4032_v40 = vor.u32 1.1754944e-38, %v4031_v29  ;;  %vm4030_vm15 = vcmp.eq.f32.partialorder %v4029_v60, 8.507059e+37  ;;  %v8397_v29 = vld [vmem:[#allocation24_spill] sm:$0xff] }
 0xb89   :  { %v5783_v62 = vpop.eup %5782 }
 0xb8a   :  { %v4004_v22 = vadd.f32 1.0, %v5783_v62 }
 0xb8b   :  { %v5785_v20 = vpop.eup %5784 }
 0xb8c   :  { %v5787_v30 = vpop.eup %5786  ;;  %v4006_v7 = vmul.f32 %v5785_v20, %v4002_v61  ;;  %5788 = vrcp.f32 %v4004_v22  ;;  %vm4011_vm4 = vweird.f32 %v5785_v20  ;;  %v4046_v13 = vand.u32 2147483648, %v4004_v22 }
 0xb8d   :  { %v4021_v18 = vmul.f32 %v5787_v30, %v4003_v53  ;;  %5790 = vtanh.f32 %v3992_v52  ;;  %vm4026_vm5 = vweird.f32 %v5787_v30  ;;  %vm4012_vm12 = vmor %vm4010_vm10, %vm4011_vm4  ;;  %vm4040_vm7 = vweird.f32 %v4004_v22  ;;  %v8394_v53 = vld [vmem:[#allocation40_spill] sm:$0xff] }
 0xb8e   :  { %v4007_v44 = vsub.f32 1.0, %v4006_v7  ;;  %vm4027_vm13 = vmor %vm4025_vm11, %vm4026_vm5  ;;  %v4044_v26 = vand.u32 2147483647, %v4004_v22  ;;  %v4047_v41 = vor.u32 1.1754944e-38, %v4046_v13  ;;  %v8396_v45 = vsel %vm6737_vm2, %v8394_v53, %v8395_v8  ;;  %v4316_v53 = vld [vmem:[%s8047_s5 + $0x58] sm:$0xff]  ;;  %v4315_v8 = vld [vmem:[%s8047_s5 + $0x50] sm:$0xff] }
 0xb8f   :  { %v4022_v56 = vsub.f32 1.0, %v4021_v18 }
 0xb90   :  { %v4008_v58 = vmul.f32 %v5785_v20, %v4007_v44  ;;  %vm4045_vm9 = vcmp.eq.f32.partialorder %v4044_v26, 8.507059e+37 }
 0xb91   :  { %v4023_v5 = vmul.f32 %v5787_v30, %v4022_v56 }
 0xb92   :  { %v5789_v0 = vpop.eup %5788  ;;  %v4009_v10 = vadd.f32 %v5785_v20, %v4008_v58  ;;  %v8398_v58 = vld [vmem:[#allocation44_spill] sm:$0xff] }
 0xb93   :  { %v4036_v55 = vmul.f32 %v5789_v0, %v4004_v22  ;;  %v4024_v48 = vadd.f32 %v5787_v30, %v4023_v5  ;;  %v5791_v15 = vpop.eup %5790  ;;  %vm4041_vm6 = vweird.f32 %v5789_v0  ;;  %v8399_v9 = vsel %vm6809_vm3, %v8397_v29, %v8398_v58 }
 0xb94   :  { %v4013_v34 = vsel %vm4012_vm12, %v5785_v20, %v4009_v10  ;;  %vm4042_vm8 = vmor %vm4040_vm7, %vm4041_vm6 }
 0xb95   :  { %v4037_v37 = vsub.f32 1.0, %v4036_v55  ;;  %v4018_v21 = vsel %vm4015_vm14, %v4017_v50, %v4013_v34  ;;  %v4028_v2 = vsel %vm4027_vm13, %v5787_v30, %v4024_v48 }
 0xb96   :  { %v4033_v43 = vsel %vm4030_vm15, %v4032_v40, %v4028_v2  ;;  %v4052_v19 = vmul.f32 %v5791_v15, %v4018_v21 }
 0xb97   :  { %v4051_v1 = vmul.f32 %v4033_v43, %v7880_v46  ;;  %v4038_v63 = vmul.f32 %v5789_v0, %v4037_v37 }
 0xb99   :  { %v7936_v54 = vadd.f32 %v4052_v19, %v4051_v1  ;;  %v4039_v11 = vadd.f32 %v5789_v0, %v4038_v63 }
 0xb9b   :  { %5792 = vtanh.f32 %v7936_v54  ;;  %v4043_v33 = vsel %vm4042_vm8, %v5789_v0, %v4039_v11 }
 0xb9c   :  { %v4048_v59 = vsel %vm4045_vm9, %v4047_v41, %v4043_v33 }
 0xba1   :  { %v5793_v32 = vpop.eup %5792 }
 0xba2   :  { %v4055_v38 = vmul.f32 %v5793_v32, %v4048_v59 }
 0xba4   :  { %v4060_v51 = vpack.c.bf16 %v4055_v38, %v4055_v38 }
 0xba6   :  { %4069 = vmatmul.bf16.vlgmr.msrb.gmra.mxu0 %v4060_v51  ;;  %4082 = vmatmul.bf16.vlgmr.msrb.gmra.mxu1 %v4060_v51 }
 0xba7   :  { %4095 = vmatmul.bf16.vlgmr.msrb.gmra.mxu2 %v4060_v51  ;;  %4108 = vmatmul.bf16.vlgmr.msrb.gmra.mxu3 %v4060_v51 }
 0xc23   :  { %v4070_v46 = vpop.f32.mrf.mxu0  ;;  %v4083_v27 = vpop.f32.mrf.mxu1 }
 0xc24   :  { %v4113_v16 = vadd.f32 %v4070_v46, %v8390_v4  ;;  %v4114_v12 = vadd.f32 %v4083_v27, %v8393_v14 }
 0xc26   :  { %v5331_v57 = vmul.f32 -1.442695, %v4113_v16  ;;  %v5332_v24 = vmul.f32 -1.442695, %v4114_v12 }
 0xc28   :  { %5794 = vpow2.f32 %v5331_v57 }
 0xc29   :  { %5796 = vpow2.f32 %v5332_v24  ;;  %v4319_v24 = vld [vmem:[%s8047_s5 + $0x70] sm:$0xff] }
 0xc2a   :  { %v4096_v39 = vpop.f32.mrf.mxu2  ;;  %v4109_v61 = vpop.f32.mrf.mxu3 }
 0xc2b   :  { %v4115_v62 = vadd.f32 %v4096_v39, %v8396_v45  ;;  %v4072_v22 = vpop.f32.mrf.mxu0  ;;  %v4085_v20 = vpop.f32.mrf.mxu1  ;;  %v4116_v5 = vadd.f32 %v4109_v61, %v8399_v9  ;;  %v4318_v39 = vld [vmem:[%s8047_s5 + $0x68] sm:$0xff]  ;;  %v4317_v61 = vld [vmem:[%s8047_s5 + $0x60] sm:$0xff]  ;;  %v4308_v9 = vld [vmem:[%s8047_s5 + $0x18] sm:$0xff] }
 0xc2c   :  { %v4314_v45 = vld [vmem:[%s8047_s5 + $0x48] sm:$0xff]  ;;  %v4312_v22 = vld [vmem:[%s8047_s5 + $0x38] sm:$0xff] }
 0xc2d   :  { %v5333_v23 = vmul.f32 -1.442695, %v4115_v62  ;;  %v4313_v62 = vld [vmem:[%s8047_s5 + $0x40] sm:$0xff] }
 0xc2e   :  { %v5795_v3 = vpop.eup %5794 }
 0xc2f   :  { %v5797_v47 = vpop.eup %5796  ;;  %v4126_v52 = vadd.f32 1.0, %v5795_v3  ;;  %5798 = vpow2.f32 %v5333_v23  ;;  %v8400_v3 = vld [vmem:[#allocation17_spill] sm:$0xff] }
 0xc30   :  { %v4127_v30 = vadd.f32 1.0, %v5797_v47  ;;  %v8401_v47 = vld [vmem:[#allocation50_spill] sm:$0xff] }
 0xc31   :  { %5800 = vrcp.f32 %v4126_v52  ;;  %v4140_v48 = vand.u32 2147483648, %v4126_v52  ;;  %v4138_v15 = vand.u32 2147483647, %v4126_v52  ;;  %vm4134_vm10 = vweird.f32 %v4126_v52 }
 0xc32   :  { %5802 = vrcp.f32 %v4127_v30  ;;  %v4098_v7 = vpop.f32.mrf.mxu2  ;;  %v4111_v18 = vpop.f32.mrf.mxu3  ;;  %v4155_v40 = vand.u32 2147483648, %v4127_v30  ;;  %v4153_v21 = vand.u32 2147483647, %v4127_v30  ;;  %vm4149_vm11 = vweird.f32 %v4127_v30 }
 0xc33   :  { %v4141_v1 = vor.u32 1.1754944e-38, %v4140_v48  ;;  %vm4139_vm14 = vcmp.eq.f32.partialorder %v4138_v15, 8.507059e+37  ;;  %v8403_v7 = vld [vmem:[#allocation25_spill] sm:$0xff]  ;;  %v4306_v15 = vld [vmem:[%s8047_s5 + $0x8] sm:$0xff] }
 0xc34   :  { %v4156_v11 = vor.u32 1.1754944e-38, %v4155_v40  ;;  %vm4154_vm15 = vcmp.eq.f32.partialorder %v4153_v21, 8.507059e+37  ;;  %v8404_v18 = vld [vmem:[#allocation33_spill] sm:$0xff] }
 0xc35   :  { %v5799_v44 = vpop.eup %5798 }
 0xc36   :  { %v4128_v56 = vadd.f32 1.0, %v5799_v44  ;;  %v8405_v44 = vsel %vm6607_vm1, %v8403_v7, %v8404_v18 }
 0xc37   :  { %v5801_v31 = vpop.eup %5800 }
 0xc38   :  { %v5803_v60 = vpop.eup %5802  ;;  %v4130_v0 = vmul.f32 %v5801_v31, %v4126_v52  ;;  %5804 = vrcp.f32 %v4128_v56  ;;  %vm4135_vm4 = vweird.f32 %v5801_v31  ;;  %v4170_v28 = vand.u32 2147483648, %v4128_v56 }
 0xc39   :  { %v4145_v10 = vmul.f32 %v5803_v60, %v4127_v30  ;;  %5806 = vtanh.f32 %v4116_v5  ;;  %vm4150_vm5 = vweird.f32 %v5803_v60  ;;  %vm4136_vm12 = vmor %vm4134_vm10, %vm4135_vm4  ;;  %vm4164_vm7 = vweird.f32 %v4128_v56 }
 0xc3a   :  { %v4131_v55 = vsub.f32 1.0, %v4130_v0  ;;  %vm4151_vm13 = vmor %vm4149_vm11, %vm4150_vm5  ;;  %v4168_v4 = vand.u32 2147483647, %v4128_v56  ;;  %v4171_v42 = vor.u32 1.1754944e-38, %v4170_v28  ;;  %v8402_v52 = vsel %vm6253_vm0, %v8400_v3, %v8401_v47  ;;  %v4307_v0 = vld [vmem:[%s8047_s5 + $0x10] sm:$0xff] }
 0xc3b   :  { %v4146_v50 = vsub.f32 1.0, %v4145_v10  ;;  %v8406_v10 = vld [vmem:[#allocation34_spill] sm:$0xff] }
 0xc3c   :  { %v4132_v34 = vmul.f32 %v5801_v31, %v4131_v55  ;;  %vm4169_vm9 = vcmp.eq.f32.partialorder %v4168_v4, 8.507059e+37  ;;  %v8407_v55 = vld [vmem:[#allocation42_spill] sm:$0xff] }
 0xc3d   :  { %v4147_v37 = vmul.f32 %v5803_v60, %v4146_v50  ;;  %v8408_v50 = vsel %vm6737_vm2, %v8406_v10, %v8407_v55 }
 0xc3e   :  { %v5805_v2 = vpop.eup %5804  ;;  %v4133_v43 = vadd.f32 %v5801_v31, %v4132_v34 }
 0xc3f   :  { %v4160_v19 = vmul.f32 %v5805_v2, %v4128_v56  ;;  %v4148_v63 = vadd.f32 %v5803_v60, %v4147_v37  ;;  %v5807_v26 = vpop.eup %5806  ;;  %vm4165_vm6 = vweird.f32 %v5805_v2 }
 0xc40   :  { %v4137_v13 = vsel %vm4136_vm12, %v5801_v31, %v4133_v43  ;;  %vm4166_vm8 = vmor %vm4164_vm7, %vm4165_vm6  ;;  %v4311_v31 = vld [vmem:[%s8047_s5 + $0x30] sm:$0xff]  ;;  %vm4345_vm6 = vcmask 113664  }
 0xc41   :  { %v4161_v33 = vsub.f32 1.0, %v4160_v19  ;;  %v4142_v41 = vsel %vm4139_vm14, %v4141_v1, %v4137_v13  ;;  %v4152_v32 = vsel %vm4151_vm13, %v5803_v60, %v4148_v63 }
 0xc42   :  { %v4157_v59 = vsel %vm4154_vm15, %v4156_v11, %v4152_v32  ;;  %v4176_v38 = vmul.f32 %v5807_v26, %v4142_v41  ;;  %v8410_v41 = vld [vmem:[#allocation51_spill] sm:$0xff] }
 0xc43   :  { %v4175_v51 = vmul.f32 %v4157_v59, %v7936_v54  ;;  %v4162_v46 = vmul.f32 %v5805_v2, %v4161_v33  ;;  %v4320_v54 = vld [vmem:[%s8047_s5 + $0x78] sm:$0xff]  ;;  %v8409_v33 = vld [vmem:[#allocation43_spill] sm:$0xff] }
 0xc44   :  { %4325 = vmatpush.msrb.mxu0 %v4320_v54  ;;  %v8411_v32 = vsel %vm6809_vm3, %v8409_v33, %v8410_v41 }
 0xc45   :  { %v7960_v27 = vadd.f32 %v4176_v38, %v4175_v51  ;;  %v4163_v49 = vadd.f32 %v5805_v2, %v4162_v46 }
 0xc46   :  { %4326 = vmatpush.msrb.mxu0 %v4319_v24 }
 0xc47   :  { %5808 = vtanh.f32 %v7960_v27  ;;  %v4167_v16 = vsel %vm4166_vm8, %v5805_v2, %v4163_v49  ;;  %v4305_v2 = vld [vmem:[%s8047_s5] sm:$0xff] }
 0xc48   :  { %v4172_v14 = vsel %vm4169_vm9, %v4171_v42, %v4167_v16  ;;  %4327 = vmatpush.msrb.mxu0 %v4318_v39 }
 0xc4a   :  { %4328 = vmatpush.msrb.mxu0 %v4317_v61 }
 0xc4c   :  { %4329 = vmatpush.msrb.mxu0 %v4316_v53 }
 0xc4d   :  { %v5809_v36 = vpop.eup %5808 }
 0xc4e   :  { %v4179_v12 = vmul.f32 %v5809_v36, %v4172_v14  ;;  %4330 = vmatpush.msrb.mxu0 %v4315_v8 }
 0xc50   :  { %v4184_v57 = vpack.c.bf16 %v4179_v12, %v4179_v12  ;;  %4331 = vmatpush.msrb.mxu0 %v4314_v45 }
 0xc52   :  { %4193 = vmatmul.bf16.vlgmr.msra.gmra.mxu0 %v4184_v57  ;;  %4206 = vmatmul.bf16.vlgmr.msra.gmra.mxu1 %v4184_v57 }
 0xc53   :  { %4219 = vmatmul.bf16.vlgmr.msra.gmra.mxu2 %v4184_v57  ;;  %4232 = vmatmul.bf16.vlgmr.msra.gmra.mxu3 %v4184_v57 }
 0xc54   :  { %4332 = vmatpush.msrb.mxu0 %v4313_v62 }
 0xc56   :  { %4333 = vmatpush.msrb.mxu0 %v4312_v22 }
 0xc58   :  { %4334 = vmatpush.msrb.mxu0 %v4311_v31 }
 0xc5a   :  { %4335 = vmatpush.msrb.mxu0 %v4310_v35  ;;  %v8412_v35 = vld [vmem:[#allocation28_spill] sm:$0xff] }
 0xc5c   :  { %4336 = vmatpush.msrb.mxu0 %v4309_v6 }
 0xc5e   :  { %4337 = vmatpush.msrb.mxu0 %v4308_v9 }
 0xc60   :  { %4338 = vmatpush.msrb.mxu0 %v4307_v0 }
 0xc62   :  { %4339 = vmatpush.msrb.mxu0 %v4306_v15 }
 0xc64   :  { %4340 = vmatpush.msrb.mxu0 %v4305_v2 }
 0xccf   :  { %v4194_v20 = vpop.f32.mrf.mxu0  ;;  %v4207_v23 = vpop.f32.mrf.mxu1 }
 0xcd0   :  { %v4237_v30 = vadd.f32 %v4194_v20, %v8402_v52  ;;  %v4238_v56 = vadd.f32 %v4207_v23, %v8405_v44 }
 0xcd2   :  { %v5334_v29 = vmul.f32 -1.442695, %v4237_v30  ;;  %v5335_v58 = vmul.f32 -1.442695, %v4238_v56 }
 0xcd4   :  { %5810 = vpow2.f32 %v5334_v29 }
 0xcd5   :  { %5812 = vpow2.f32 %v5335_v58 }
 0xcd6   :  { %v4220_v5 = vpop.f32.mrf.mxu2  ;;  %v4233_v60 = vpop.f32.mrf.mxu3 }
 0xcd7   :  { %v4239_v48 = vadd.f32 %v4220_v5, %v8408_v50  ;;  %v4196_v40 = vpop.f32.mrf.mxu0  ;;  %v4209_v34 = vpop.f32.mrf.mxu1  ;;  %v4240_v59 = vadd.f32 %v4233_v60, %v8411_v32 }
 0xcd9   :  { %v5336_v37 = vmul.f32 -1.442695, %v4239_v48 }
 0xcda   :  { %v5811_v21 = vpop.eup %5810 }
 0xcdb   :  { %v5813_v43 = vpop.eup %5812  ;;  %v4250_v25 = vadd.f32 1.0, %v5811_v21  ;;  %5814 = vpow2.f32 %v5336_v37 }
 0xcdc   :  { %v4251_v19 = vadd.f32 1.0, %v5813_v43 }
 0xcdd   :  { %5816 = vrcp.f32 %v4250_v25  ;;  %v4264_v4 = vand.u32 2147483648, %v4250_v25  ;;  %v4262_v36 = vand.u32 2147483647, %v4250_v25  ;;  %vm4258_vm2 = vweird.f32 %v4250_v25 }
 0xcde   :  { %5818 = vrcp.f32 %v4251_v19  ;;  %v4222_v1 = vpop.f32.mrf.mxu2  ;;  %v4235_v63 = vpop.f32.mrf.mxu3  ;;  %v4279_v16 = vand.u32 2147483648, %v4251_v19  ;;  %v4277_v12 = vand.u32 2147483647, %v4251_v19  ;;  %vm4273_vm3 = vweird.f32 %v4251_v19 }
 0xcdf   :  { %v4265_v24 = vor.u32 1.1754944e-38, %v4264_v4  ;;  %vm4263_vm10 = vcmp.eq.f32.partialorder %v4262_v36, 8.507059e+37 }
 0xce0   :  { %v4280_v61 = vor.u32 1.1754944e-38, %v4279_v16  ;;  %vm4278_vm11 = vcmp.eq.f32.partialorder %v4277_v12, 8.507059e+37 }
 0xce1   :  { %v5815_v11 = vpop.eup %5814 }
 0xce2   :  { %v4252_v13 = vadd.f32 1.0, %v5815_v11 }
 0xce3   :  { %v5817_v26 = vpop.eup %5816 }
 0xce4   :  { %v5819_v38 = vpop.eup %5818  ;;  %v4254_v51 = vmul.f32 %v5817_v26, %v4250_v25  ;;  %5820 = vrcp.f32 %v4252_v13  ;;  %vm4259_vm0 = vweird.f32 %v5817_v26  ;;  %v4294_v7 = vand.u32 2147483648, %v4252_v13 }
 0xce5   :  { %v4269_v46 = vmul.f32 %v5819_v38, %v4251_v19  ;;  %5822 = vtanh.f32 %v4240_v59  ;;  %vm4274_vm1 = vweird.f32 %v5819_v38  ;;  %vm4260_vm4 = vmor %vm4258_vm2, %vm4259_vm0  ;;  %vm4288_vm13 = vweird.f32 %v4252_v13 }
 0xce6   :  { %v4255_v49 = vsub.f32 1.0, %v4254_v51  ;;  %vm4275_vm5 = vmor %vm4273_vm3, %vm4274_vm1  ;;  %v4292_v18 = vand.u32 2147483647, %v4252_v13  ;;  %v4295_v56 = vor.u32 1.1754944e-38, %v4294_v7 }
 0xce7   :  { %v4270_v28 = vsub.f32 1.0, %v4269_v46 }
 0xce8   :  { %v4256_v42 = vmul.f32 %v5817_v26, %v4255_v49  ;;  %vm4293_vm15 = vcmp.eq.f32.partialorder %v4292_v18, 8.507059e+37 }
 0xce9   :  { %v4271_v14 = vmul.f32 %v5819_v38, %v4270_v28 }
 0xcea   :  { %v5821_v17 = vpop.eup %5820  ;;  %v4257_v57 = vadd.f32 %v5817_v26, %v4256_v42 }
 0xceb   :  { %v4284_v54 = vmul.f32 %v5821_v17, %v4252_v13  ;;  %v4272_v39 = vadd.f32 %v5819_v38, %v4271_v14  ;;  %v5823_v8 = vpop.eup %5822  ;;  %vm4289_vm12 = vweird.f32 %v5821_v17 }
 0xcec   :  { %v4261_v53 = vsel %vm4260_vm4, %v5817_v26, %v4257_v57  ;;  %vm4290_vm14 = vmor %vm4288_vm13, %vm4289_vm12 }
 0xced   :  { %v4285_v45 = vsub.f32 1.0, %v4284_v54  ;;  %v4266_v62 = vsel %vm4263_vm10, %v4265_v24, %v4261_v53  ;;  %v4276_v22 = vsel %vm4275_vm5, %v5819_v38, %v4272_v39 }
 0xcee   :  { %v4281_v20 = vsel %vm4278_vm11, %v4280_v61, %v4276_v22  ;;  %v4300_v23 = vmul.f32 %v5823_v8, %v4266_v62 }
 0xcef   :  { %v4299_v3 = vmul.f32 %v4281_v20, %v7960_v27  ;;  %v4286_v47 = vmul.f32 %v5821_v17, %v4285_v45  ;;  %v5697_v27 = vld [vmem:[%s8048_s6] ss:$0 sm:$0xff] }
 0xcf1   :  { %v4301_v52 = vadd.f32 %v4300_v23, %v4299_v3  ;;  %v4287_v30 = vadd.f32 %v5821_v17, %v4286_v47 }
 0xcf3   :  { %5824 = vtanh.f32 %v4301_v52  ;;  %v4291_v44 = vsel %vm4290_vm14, %v5821_v17, %v4287_v30 }
 0xcf4   :  { %v4296_v29 = vsel %vm4293_vm15, %v4295_v56, %v4291_v44 }
 0xcf9   :  { %v5825_v31 = vpop.eup %5824 }
 0xcfa   :  { %v4303_v58 = vmul.f32 %v5825_v31, %v4296_v29 }
 0xcfc   :  { %v4304_v6 = vadd.f32 %v4303_v58, %v8412_v35 }
 0xcfe   :  { %4341 = vmatmul.f32.vlgmr.msrb.gmra.mxu0 %v4304_v6 }
 0xd7b   :  { %v4342_v9 = vpop.f32.mrf.mxu0 }
 0xd7c   :  { %v4343_v5 = vadd.f32 %v5697_v27, %v4342_v9 }
 0xd7e   :  { %v4346_v60 = vsel %vm4345_vm6, %v4343_v5, -inf }
 0xd7f   :  { %4347 = vmax.xlane.f32.xlu0 %v4346_v60 }
 0xdf2   :  { %v4348_v0 = vpop.xlane.xlu0 %4347 }
 0xdf3   :  { %v4349_v10 = vsub.f32 %v4343_v5, %v4348_v0 }
 0xdf5   :  { %v4350_v55 = vmul.f32 1.442695, %v4349_v10 }
 0xdf7   :  { %5826 = vpow2.f32 %v4350_v55 }
 0xdfd   :  { %v5827_v50 = vpop.eup %5826 }
 0xdfe   :  { %v4352_v48 = vsel %vm4345_vm6, %v5827_v50, 0.0 }
 0xdff   :  { %4353 = vadd.xlane.f32.xlu0 %v4352_v48 }
 0xe72   :  { %v4354_v40 = vpop.xlane.xlu0 %4353 }
 0xe73   :  { %5828 = vrcp.f32 %v4354_v40  ;;  %v4366_v21 = vand.u32 2147483648, %v4354_v40  ;;  %v4364_v43 = vand.u32 2147483647, %v4354_v40  ;;  %vm4360_vm8 = vweird.f32 %v4354_v40 }
 0xe75   :  { %v4367_v19 = vor.u32 1.1754944e-38, %v4366_v21  ;;  %vm4365_vm0 = vcmp.eq.f32.partialorder %v4364_v43, 8.507059e+37 }
 0xe79   :  { %v5829_v34 = vpop.eup %5828 }
 0xe7a   :  { %v4356_v15 = vmul.f32 %v5829_v34, %v4354_v40  ;;  %vm4361_vm7 = vweird.f32 %v5829_v34 }
 0xe7b   :  { %vm4362_vm9 = vmor %vm4360_vm8, %vm4361_vm7 }
 0xe7c   :  { %v4357_v37 = vsub.f32 1.0, %v4356_v15 }
 0xe7e   :  { %v4358_v2 = vmul.f32 %v5829_v34, %v4357_v37 }
 0xe80   :  { %v4359_v25 = vadd.f32 %v5829_v34, %v4358_v2 }
 0xe82   :  { %v4363_v1 = vsel %vm4362_vm9, %v5829_v34, %v4359_v25 }
 0xe83   :  { %v4368_v63 = vsel %vm4365_vm0, %v4367_v19, %v4363_v1 }
 0xe84   :  { %v4369_v11 = vmul.f32 %v5827_v50, %v4368_v63 }
 0xe86   :  { %4370 = vst.msk [vmem:[%s8051_s9] sm:$0xff] %vm4345_vm6, %v4369_v11 }
 0xe87   :  { %4375 = vsyncpa [#allocation8], 1 }
 0xe88   :  { %4376 = vsyncmov [#allocation6] }
 0xe8b   :  { %s4377_s27 = vpop.sfrf %4376 }
 0xe8c   :  { %p5337_p0 = scmp.ne.s32.totalorder %s4377_s27, 0 }
 0xe8e   :  { %4381 = shalt.err (%p5337_p0)  }
 0xe8f   :  { %4383 = vsyncmov [#allocation6 + $0x1] }
 0xe92   :  { %s4384_s28 = vpop.sfrf %4383 }
 0xe93   :  { %p5338_p1 = scmp.ne.s32.totalorder %s4384_s28, 0 }
 0xe95   :  { %4388 = shalt.err (%p5338_p1)  }

</bundles_post_ra>
